<compile_context>
chip_gen: v7x
topology: tpu7x:2x2x1
jax: 0.10.0
libtpu: 0.0.40
codegen_flags: <defaults>
</compile_context>

<pallas_src>
import functools
import math

import jax
import jax.numpy as jnp
import numpy as np
from jax.experimental import pallas as pl
from jax.experimental.pallas import tpu as pltpu

EPS = 1e-6


# --------------------------------------------------------------------------
# Kernel 1: attention sub-block.  grid = (B,).  Heads looped in-kernel.
# --------------------------------------------------------------------------
def attn_kernel(
    # inputs
    x_ref, cos_ref, sinr_ref, mask_ref, pk_ref, pv_ref,
    ln1_ref, wqkv_ref, bqkv_ref, wo_ref,
    # outputs
    h1_ref, nk_ref, nv_ref,
    # scratch
    ctx_ref, kall_ref, vall_ref,
    *, num_heads, head_dim, past_len,
):
    N, D, P = num_heads, head_dim, past_len
    S = x_ref.shape[1]
    T = P + S
    d2 = D // 2
    scale = 1.0 / math.sqrt(D)
    bf16 = jnp.bfloat16

    x = x_ref[0]                        # (S, H) f32
    cos = cos_ref[0]                    # (S, D) f32
    sin_r = sinr_ref[0]                 # (S, D) f32 (rotate-half sign folded in)
    mask = mask_ref[0]                  # (S, T) f32 additive

    # RMSNorm (f32 stats) -> bf16 activations for the MXU.
    var = jnp.mean(x * x, axis=-1, keepdims=True)
    hn = (x * jax.lax.rsqrt(var + EPS) * ln1_ref[...]).astype(bf16)

    # Fused QKV projection: ONE (S,H)@(H,3*N*D) matmul, f32 accumulation.
    qkv = jnp.dot(hn, wqkv_ref[...],
                  preferred_element_type=jnp.float32) + bqkv_ref[...]

    # RoPE: rotate-half == lane roll by D/2 (XLU) times the sign-folded sin.
    def rope(t):
        return t * cos + pltpu.roll(t, d2, axis=1) * sin_r

    for h in range(N):                  # static unroll; lane-aligned slices
        q = qkv[:, h * D:(h + 1) * D]
        k = qkv[:, (N + h) * D:(N + h + 1) * D]
        v = qkv[:, (2 * N + h) * D:(2 * N + h + 1) * D]

        q = rope(q) * scale             # fold 1/sqrt(D) into q
        k = rope(k)

        # Only the S new cache rows are written back (past cache untouched).
        nk_ref[0, h] = k
        nv_ref[0, h] = v

        # Assemble [past | new] K/V in a VMEM buffer -> single-chunk softmax.
        kall_ref[0:P, :] = pk_ref[0, h]
        kall_ref[P:T, :] = k.astype(bf16)
        vall_ref[0:P, :] = pv_ref[0, h]
        vall_ref[P:T, :] = v.astype(bf16)

        s = jax.lax.dot_general(q.astype(bf16), kall_ref[...],
                                (((1,), (1,)), ((), ())),
                                preferred_element_type=jnp.float32) + mask
        m = jnp.max(s, axis=-1, keepdims=True)
        p = jnp.exp(s - m)
        inv = pl.reciprocal(jnp.sum(p, axis=-1, keepdims=True))   # exact
        ctx = jnp.dot(p.astype(bf16), vall_ref[...],
                      preferred_element_type=jnp.float32) * inv   # (S, D)

        # Stash this head's context; o_proj is done once with full K = H.
        ctx_ref[:, h * D:(h + 1) * D] = ctx.astype(bf16)

    attn = jnp.dot(ctx_ref[...], wo_ref[...], preferred_element_type=jnp.float32)
    h1_ref[0] = x + attn                # residual; MLP runs in its own call


# --------------------------------------------------------------------------
# Kernel 2: SwiGLU MLP.  grid = (B, I // tile_i); I axis is an accumulated
# reduction so wg/wu/wd are streamed in chunks (needed at real Qwen sizes).
# --------------------------------------------------------------------------
def mlp_kernel(h1_ref, ln2_ref, wg_ref, wu_ref, wd_ref, out_ref, hn_ref, acc_ref):
    ic = pl.program_id(1)

    @pl.when(ic == 0)
    def _init():
        h1 = h1_ref[0]
        var = jnp.mean(h1 * h1, axis=-1, keepdims=True)
        hn_ref[...] = (h1 * jax.lax.rsqrt(var + EPS) * ln2_ref[...]).astype(jnp.bfloat16)
        acc_ref[...] = jnp.zeros_like(acc_ref)

    h2 = hn_ref[...]
    g = jnp.dot(h2, wg_ref[...], preferred_element_type=jnp.float32)
    u = jnp.dot(h2, wu_ref[...], preferred_element_type=jnp.float32)
    act = (g * jax.nn.sigmoid(g) * u).astype(jnp.bfloat16)
    acc_ref[...] += jnp.dot(act, wd_ref[...], preferred_element_type=jnp.float32)

    @pl.when(ic == pl.num_programs(1) - 1)
    def _fin():
        out_ref[0] = h1_ref[0] + acc_ref[...]


# --------------------------------------------------------------------------
# Wrapper: RoPE tables, fused-QKV weight packing, bf16 casts, BlockSpecs.
# --------------------------------------------------------------------------
@jax.jit
def qwen_block_cache(hidden_states, position_ids, attention_mask,
                     past_k, past_v, params):
    B, S, H = hidden_states.shape
    _, N, P, D = past_k.shape
    T = P + S
    I = params["wg"].shape[1]
    d2 = D // 2
    bf16 = jnp.bfloat16

    # RoPE tables from position_ids (parameter-free glue).
    inv_freq = 1.0 / (10000.0 ** (jnp.arange(0, D, 2, dtype=jnp.float32) / D))
    freqs = position_ids.astype(jnp.float32)[..., None] * inv_freq[None, None, :]
    emb = jnp.concatenate([freqs, freqs], axis=-1)            # (B, S, D)
    cos = jnp.cos(emb)
    sin = jnp.sin(emb)
    # fold the rotate-half sign into sin so the kernel only needs one roll
    sin_signed = jnp.concatenate([-sin[..., :d2], sin[..., d2:]], axis=-1)

    mask = attention_mask[:, 0]                               # (B, S, T) merged

    # bf16 kernel-side copies (halves KV DMA); the f32 cache API is preserved.
    pk_bf = past_k.astype(bf16)
    pv_bf = past_v.astype(bf16)

    # fused QKV weights / biases; matmul weights in bf16, biases/norms f32
    wqkv = jnp.concatenate([params["wq"], params["wk"], params["wv"]],
                           axis=1).astype(bf16)               # (H, 3*N*D)
    bqkv = jnp.concatenate([params["bq"], params["bk"], params["bv"]], axis=1)
    wo = params["wo"].astype(bf16)
    wg = params["wg"].astype(bf16)
    wu = params["wu"].astype(bf16)
    wd = params["wd"].astype(bf16)

    # ---- attention call: grid over batch only (megacore-parallel) ----
    attn_fn = functools.partial(attn_kernel, num_heads=N, head_dim=D, past_len=P)
    h1, new_k, new_v = pl.pallas_call(
        attn_fn,
        grid=(B,),
        in_specs=[
            pl.BlockSpec((1, S, H), lambda b: (b, 0, 0)),        # hidden_states
            pl.BlockSpec((1, S, D), lambda b: (b, 0, 0)),        # cos
            pl.BlockSpec((1, S, D), lambda b: (b, 0, 0)),        # sin (signed)
            pl.BlockSpec((1, S, T), lambda b: (b, 0, 0)),        # additive mask
            pl.BlockSpec((1, N, P, D), lambda b: (b, 0, 0, 0)),  # past_k (bf16)
            pl.BlockSpec((1, N, P, D), lambda b: (b, 0, 0, 0)),  # past_v (bf16)
            pl.BlockSpec((1, H), lambda b: (0, 0)),              # ln1
            pl.BlockSpec((H, 3 * N * D), lambda b: (0, 0)),      # wqkv fused
            pl.BlockSpec((1, 3 * N * D), lambda b: (0, 0)),      # bqkv fused
            pl.BlockSpec((H, H), lambda b: (0, 0)),              # wo
        ],
        out_specs=(
            pl.BlockSpec((1, S, H), lambda b: (b, 0, 0)),        # h1 (resid+attn)
            pl.BlockSpec((1, N, S, D), lambda b: (b, 0, 0, 0)),  # new_k
            pl.BlockSpec((1, N, S, D), lambda b: (b, 0, 0, 0)),  # new_v
        ),
        out_shape=(
            jax.ShapeDtypeStruct((B, S, H), jnp.float32),
            jax.ShapeDtypeStruct((B, N, S, D), jnp.float32),
            jax.ShapeDtypeStruct((B, N, S, D), jnp.float32),
        ),
        scratch_shapes=[
            pltpu.VMEM((S, H), bf16),        # per-head contexts -> one o_proj
            pltpu.VMEM((T, D), bf16),        # [past | new] K buffer
            pltpu.VMEM((T, D), bf16),        # [past | new] V buffer
        ],
        compiler_params=pltpu.CompilerParams(
            dimension_semantics=("parallel",),
            vmem_limit_bytes=32 * 1024 * 1024,
        ),
    )(hidden_states, cos, sin_signed, mask, pk_bf, pv_bf,
      params["ln1"], wqkv, bqkv, wo)

    # ---- MLP call: I-chunked reduction axis, accumulated down-projection ----
    ti = min(I, 512)
    assert I % ti == 0
    out = pl.pallas_call(
        mlp_kernel,
        grid=(B, I // ti),
        in_specs=[
            pl.BlockSpec((1, S, H), lambda b, ic: (b, 0, 0)),    # h1
            pl.BlockSpec((1, H), lambda b, ic: (0, 0)),          # ln2
            pl.BlockSpec((H, ti), lambda b, ic: (0, ic)),        # wg chunk
            pl.BlockSpec((H, ti), lambda b, ic: (0, ic)),        # wu chunk
            pl.BlockSpec((ti, H), lambda b, ic: (ic, 0)),        # wd chunk
        ],
        out_specs=pl.BlockSpec((1, S, H), lambda b, ic: (b, 0, 0)),
        out_shape=jax.ShapeDtypeStruct((B, S, H), jnp.float32),
        scratch_shapes=[
            pltpu.VMEM((S, H), bf16),        # RMSNorm'd activations
            pltpu.VMEM((S, H), jnp.float32), # down-proj accumulator over I
        ],
        compiler_params=pltpu.CompilerParams(
            dimension_semantics=("parallel", "arbitrary"),
            vmem_limit_bytes=32 * 1024 * 1024,
        ),
    )(h1, params["ln2"], wg, wu, wd)

    # present cache = [past | new]; one HBM-level concat outside the kernel.
    present_k = jnp.concatenate([past_k, new_k], axis=2)
    present_v = jnp.concatenate([past_v, new_v], axis=2)
    return out, present_k, present_v


# --------------------------------------------------------------------------
# Pure-JAX reference (same math, mirrors the bf16 matmul casts) for checking.
# --------------------------------------------------------------------------
def reference_forward(x, position_ids, attention_mask, past_k, past_v, p):
    B, S, H = x.shape
    _, N, P, D = past_k.shape
    bf16 = jnp.bfloat16
    scale = 1.0 / math.sqrt(D)

    inv_freq = 1.0 / (10000.0 ** (jnp.arange(0, D, 2, dtype=jnp.float32) / D))
    freqs = position_ids.astype(jnp.float32)[..., None] * inv_freq[None, None, :]
    emb = jnp.concatenate([freqs, freqs], axis=-1)
    cos, sin = jnp.cos(emb), jnp.sin(emb)                      # (B, S, D)

    def rmsnorm(h, w):
        var = jnp.mean(h * h, axis=-1, keepdims=True)
        return h * jax.lax.rsqrt(var + EPS) * w

    def rope(t):                                               # (B, N, S, D)
        d2 = D // 2
        rot = jnp.concatenate([-t[..., d2:], t[..., :d2]], axis=-1)
        return t * cos[:, None] + rot * sin[:, None]

    hn = rmsnorm(x, p["ln1"]).astype(bf16)

    def proj(w, b):
        y = jnp.dot(hn, w.astype(bf16), preferred_element_type=jnp.float32) + b
        return y.reshape(B, S, N, D).transpose(0, 2, 1, 3)

    q = rope(proj(p["wq"], p["bq"])) * scale
    k = rope(proj(p["wk"], p["bk"]))
    v = proj(p["wv"], p["bv"])

    k_all = jnp.concatenate([past_k, k], axis=2)               # (B, N, T, D)
    v_all = jnp.concatenate([past_v, v], axis=2)

    s = jnp.einsum("bnsd,bntd->bnst", q.astype(bf16), k_all.astype(bf16),
                   preferred_element_type=jnp.float32) + attention_mask
    probs = jax.nn.softmax(s, axis=-1)
    ctx = jnp.einsum("bnst,bntd->bnsd", probs.astype(bf16), v_all.astype(bf16),
                     preferred_element_type=jnp.float32)
    ctx = ctx.transpose(0, 2, 1, 3).reshape(B, S, N * D)

    attn = jnp.dot(ctx.astype(bf16), p["wo"].astype(bf16),
                   preferred_element_type=jnp.float32)
    h1 = x + attn
    h2 = rmsnorm(h1, p["ln2"]).astype(bf16)
    g = jnp.dot(h2, p["wg"].astype(bf16), preferred_element_type=jnp.float32)
    u = jnp.dot(h2, p["wu"].astype(bf16), preferred_element_type=jnp.float32)
    act = (g * jax.nn.sigmoid(g) * u).astype(bf16)
    out = h1 + jnp.dot(act, p["wd"].astype(bf16),
                       preferred_element_type=jnp.float32)
    return out, k_all, v_all


# --------------------------------------------------------------------------
if __name__ == "__main__":
    # Small Qwen-like config (head_dim kept at 128 as in the real model so the
    # per-head slices stay lane-tile aligned).
    B, S, P = 2, 8, 16         # batch, new tokens, cached tokens
    N, D = 4, 128              # heads, head_dim
    H = N * D                  # hidden = 512
    I = 1024                   # MLP intermediate
    T = P + S

    key = jax.random.PRNGKey(0)
    ks = jax.random.split(key, 16)
    init = lambda k, shape: (0.02 * jax.random.normal(k, shape)).astype(jnp.float32)

    params = {
        "ln1": jnp.ones((1, H), jnp.float32),
        "wq": init(ks[0], (H, N * D)), "bq": init(ks[1], (1, N * D)),
        "wk": init(ks[2], (H, N * D)), "bk": init(ks[3], (1, N * D)),
        "wv": init(ks[4], (H, N * D)), "bv": init(ks[5], (1, N * D)),
        "wo": init(ks[6], (N * D, H)),
        "ln2": jnp.ones((1, H), jnp.float32),
        "wg": init(ks[7], (H, I)),
        "wu": init(ks[8], (H, I)),
        "wd": init(ks[9], (I, H)),
    }

    hidden_states = jax.random.normal(ks[10], (B, S, H), jnp.float32)
    past_k = jax.random.normal(ks[11], (B, N, P, D), jnp.float32)
    past_v = jax.random.normal(ks[12], (B, N, P, D), jnp.float32)
    position_ids = jnp.broadcast_to(P + jnp.arange(S, dtype=jnp.int32), (B, S))

    # Additive causal mask over [past | new]: new token i sees keys 0..P+i.
    key_pos = jnp.arange(T)[None, :]
    qry_pos = (P + jnp.arange(S))[:, None]
    attention_mask = jnp.where(key_pos <= qry_pos, 0.0, -1e9).astype(jnp.float32)
    attention_mask = jnp.broadcast_to(attention_mask[None, None], (B, 1, S, T))

    out, pres_k, pres_v = qwen_block_cache(
        hidden_states, position_ids, attention_mask, past_k, past_v, params)
    jax.block_until_ready((out, pres_k, pres_v))

    ref_out, ref_k, ref_v = reference_forward(
        hidden_states, position_ids, attention_mask, past_k, past_v, params)

    assert out.shape == (B, S, H)
    assert pres_k.shape == (B, N, T, D) and pres_v.shape == (B, N, T, D)
    np.testing.assert_allclose(np.asarray(out), np.asarray(ref_out),
                               rtol=2e-2, atol=2e-2)
    np.testing.assert_allclose(np.asarray(pres_k), np.asarray(ref_k),
                               rtol=2e-2, atol=2e-2)
    np.testing.assert_allclose(np.asarray(pres_v), np.asarray(ref_v),
                               rtol=2e-2, atol=2e-2)

    print("KERNEL_OK")
</pallas_src>

<mosaic_0001>
module attributes {stable_mosaic.version = 11 : i64} {
  func.func @attn_kernel(%arg0: i32, %arg1: memref<1x8x512xf32, #tpu.memory_space<vmem>>, %arg2: memref<1x8x128xf32, #tpu.memory_space<vmem>>, %arg3: memref<1x8x128xf32, #tpu.memory_space<vmem>>, %arg4: memref<1x8x24xf32, #tpu.memory_space<vmem>>, %arg5: memref<1x4x16x128xbf16, #tpu.memory_space<vmem>>, %arg6: memref<1x4x16x128xbf16, #tpu.memory_space<vmem>>, %arg7: memref<1x512xf32, #tpu.memory_space<vmem>>, %arg8: memref<512x1536xbf16, #tpu.memory_space<vmem>>, %arg9: memref<1x1536xf32, #tpu.memory_space<vmem>>, %arg10: memref<512x512xbf16, #tpu.memory_space<vmem>>, %arg11: memref<1x8x512xf32, #tpu.memory_space<vmem>>, %arg12: memref<1x4x8x128xf32, #tpu.memory_space<vmem>>, %arg13: memref<1x4x8x128xf32, #tpu.memory_space<vmem>>, %arg14: memref<8x512xbf16, #tpu.memory_space<vmem>>, %arg15: memref<24x128xbf16, #tpu.memory_space<vmem>>, %arg16: memref<24x128xbf16, #tpu.memory_space<vmem>>) attributes {dimension_semantics = [#tpu.dimension_semantics<parallel>], iteration_bounds = array<i64: 2>, scalar_prefetch = 0 : i64, scratch_operands = 3 : i64, tpu.core_type = #tpu.core_type<tc>, window_params = [{transform_indices = @transform_0, window_bounds = array<i64: 1, 8, 512>}, {transform_indices = @transform_1, window_bounds = array<i64: 1, 8, 128>}, {transform_indices = @transform_2, window_bounds = array<i64: 1, 8, 128>}, {transform_indices = @transform_3, window_bounds = array<i64: 1, 8, 24>}, {transform_indices = @transform_4, window_bounds = array<i64: 1, 4, 16, 128>}, {transform_indices = @transform_5, window_bounds = array<i64: 1, 4, 16, 128>}, {pipeline_mode = #tpu.pipeline_mode<synchronous>, transform_indices = @transform_6, window_bounds = array<i64: 1, 512>}, {pipeline_mode = #tpu.pipeline_mode<synchronous>, transform_indices = @transform_7, window_bounds = array<i64: 512, 1536>}, {pipeline_mode = #tpu.pipeline_mode<synchronous>, transform_indices = @transform_8, window_bounds = array<i64: 1, 1536>}, {pipeline_mode = #tpu.pipeline_mode<synchronous>, transform_indices = @transform_9, window_bounds = array<i64: 512, 512>}, {transform_indices = @transform_10, window_bounds = array<i64: 1, 8, 512>}, {transform_indices = @transform_11, window_bounds = array<i64: 1, 4, 8, 128>}, {transform_indices = @transform_12, window_bounds = array<i64: 1, 4, 8, 128>}]} {
    %c0 = arith.constant 0 : index
    %c0_0 = arith.constant 0 : index
    %c0_1 = arith.constant 0 : index
    %0 = vector.load %arg1[%c0, %c0_0, %c0_1] : memref<1x8x512xf32, #tpu.memory_space<vmem>>, vector<1x8x512xf32>
    %1 = vector.shape_cast %0 : vector<1x8x512xf32> to vector<8x512xf32>
    %c0_2 = arith.constant 0 : index
    %c0_3 = arith.constant 0 : index
    %c0_4 = arith.constant 0 : index
    %2 = vector.load %arg2[%c0_2, %c0_3, %c0_4] : memref<1x8x128xf32, #tpu.memory_space<vmem>>, vector<1x8x128xf32>
    %3 = vector.shape_cast %2 : vector<1x8x128xf32> to vector<8x128xf32>
    %c0_5 = arith.constant 0 : index
    %c0_6 = arith.constant 0 : index
    %c0_7 = arith.constant 0 : index
    %4 = vector.load %arg3[%c0_5, %c0_6, %c0_7] : memref<1x8x128xf32, #tpu.memory_space<vmem>>, vector<1x8x128xf32>
    %5 = vector.shape_cast %4 : vector<1x8x128xf32> to vector<8x128xf32>
    %c0_8 = arith.constant 0 : index
    %c0_9 = arith.constant 0 : index
    %c0_10 = arith.constant 0 : index
    %6 = vector.load %arg4[%c0_8, %c0_9, %c0_10] : memref<1x8x24xf32, #tpu.memory_space<vmem>>, vector<1x8x24xf32>
    %7 = vector.shape_cast %6 : vector<1x8x24xf32> to vector<8x24xf32>
    %8 = arith.mulf %1, %1 : vector<8x512xf32>
    %cst = arith.constant dense<0.000000e+00> : vector<8xf32>
    %9 = vector.multi_reduction <add>, %8, %cst [1] : vector<8x512xf32> to vector<8xf32>
    %10 = vector.shape_cast %9 : vector<8xf32> to vector<8x1xf32>
    %cst_11 = arith.constant 5.120000e+02 : f32
    %11 = vector.broadcast %cst_11 : f32 to vector<8x1xf32>
    %12 = arith.divf %10, %11 : vector<8x1xf32>
    %cst_12 = arith.constant 9.99999997E-7 : f32
    %13 = vector.broadcast %cst_12 : f32 to vector<8x1xf32>
    %14 = arith.addf %12, %13 : vector<8x1xf32>
    %15 = math.rsqrt %14 : vector<8x1xf32>
    %16 = vector.broadcast %15 : vector<8x1xf32> to vector<8x512xf32>
    %17 = arith.mulf %1, %16 : vector<8x512xf32>
    %c0_13 = arith.constant 0 : index
    %c0_14 = arith.constant 0 : index
    %18 = vector.load %arg7[%c0_13, %c0_14] : memref<1x512xf32, #tpu.memory_space<vmem>>, vector<1x512xf32>
    %19 = vector.broadcast %18 : vector<1x512xf32> to vector<8x512xf32>
    %20 = arith.mulf %17, %19 : vector<8x512xf32>
    %21 = arith.truncf %20 : vector<8x512xf32> to vector<8x512xbf16>
    %c0_15 = arith.constant 0 : index
    %c0_16 = arith.constant 0 : index
    %22 = vector.load %arg8[%c0_15, %c0_16] : memref<512x1536xbf16, #tpu.memory_space<vmem>>, vector<512x1536xbf16>
    %cst_17 = arith.constant dense<0.000000e+00> : vector<8x1536xf32>
    %23 = tpu.matmul %21, %22, %cst_17 {dimension_numbers = #tpu.dot_dimension_numbers<[1], [0], [0], [1], [0, 0, 1, 1], [], []>} : vector<8x512xbf16>, vector<512x1536xbf16>, vector<8x1536xf32> -> vector<8x1536xf32>
    %c0_18 = arith.constant 0 : index
    %c0_19 = arith.constant 0 : index
    %24 = vector.load %arg9[%c0_18, %c0_19] : memref<1x1536xf32, #tpu.memory_space<vmem>>, vector<1x1536xf32>
    %25 = vector.broadcast %24 : vector<1x1536xf32> to vector<8x1536xf32>
    %26 = arith.addf %23, %25 : vector<8x1536xf32>
    %27 = vector.extract_strided_slice %26 {offsets = [0, 0], sizes = [8, 128], strides = [1, 1]} : vector<8x1536xf32> to vector<8x128xf32>
    %28 = vector.extract_strided_slice %26 {offsets = [0, 512], sizes = [8, 128], strides = [1, 1]} : vector<8x1536xf32> to vector<8x128xf32>
    %29 = vector.extract_strided_slice %26 {offsets = [0, 1024], sizes = [8, 128], strides = [1, 1]} : vector<8x1536xf32> to vector<8x128xf32>
    %30 = arith.mulf %27, %3 : vector<8x128xf32>
    %c64_i32 = arith.constant 64 : i32
    %31 = tpu.dynamic_rotate %27 by %c64_i32 dim 1 : vector<8x128xf32>, i32 -> vector<8x128xf32>
    %32 = arith.mulf %31, %5 : vector<8x128xf32>
    %33 = arith.addf %30, %32 : vector<8x128xf32>
    %cst_20 = arith.constant 0.0883883461 : f32
    %34 = vector.broadcast %cst_20 : f32 to vector<8x128xf32>
    %35 = arith.mulf %33, %34 : vector<8x128xf32>
    %36 = arith.mulf %28, %3 : vector<8x128xf32>
    %c64_i32_21 = arith.constant 64 : i32
    %37 = tpu.dynamic_rotate %28 by %c64_i32_21 dim 1 : vector<8x128xf32>, i32 -> vector<8x128xf32>
    %38 = arith.mulf %37, %5 : vector<8x128xf32>
    %39 = arith.addf %36, %38 : vector<8x128xf32>
    %c0_22 = arith.constant 0 : index
    %c0_23 = arith.constant 0 : index
    %c0_24 = arith.constant 0 : index
    %c0_25 = arith.constant 0 : index
    %40 = vector.load %arg12[%c0_22, %c0_23, %c0_24, %c0_25] : memref<1x4x8x128xf32, #tpu.memory_space<vmem>>, vector<1x1x8x128xf32>
    %41 = vector.shape_cast %40 : vector<1x1x8x128xf32> to vector<8x128xf32>
    %42 = vector.shape_cast %39 : vector<8x128xf32> to vector<1x1x8x128xf32>
    tpu.vector_store %arg12[%c0_22, %c0_23, %c0_24, %c0_25], %42 {strides = array<i32>} : memref<1x4x8x128xf32, #tpu.memory_space<vmem>>, vector<1x1x8x128xf32>,
    %c0_26 = arith.constant 0 : index
    %c0_27 = arith.constant 0 : index
    %c0_28 = arith.constant 0 : index
    %c0_29 = arith.constant 0 : index
    %43 = vector.load %arg13[%c0_26, %c0_27, %c0_28, %c0_29] : memref<1x4x8x128xf32, #tpu.memory_space<vmem>>, vector<1x1x8x128xf32>
    %44 = vector.shape_cast %43 : vector<1x1x8x128xf32> to vector<8x128xf32>
    %45 = vector.shape_cast %29 : vector<8x128xf32> to vector<1x1x8x128xf32>
    tpu.vector_store %arg13[%c0_26, %c0_27, %c0_28, %c0_29], %45 {strides = array<i32>} : memref<1x4x8x128xf32, #tpu.memory_space<vmem>>, vector<1x1x8x128xf32>,
    %c0_30 = arith.constant 0 : index
    %c0_31 = arith.constant 0 : index
    %c0_32 = arith.constant 0 : index
    %c0_33 = arith.constant 0 : index
    %46 = vector.load %arg5[%c0_30, %c0_31, %c0_32, %c0_33] : memref<1x4x16x128xbf16, #tpu.memory_space<vmem>>, vector<1x1x16x128xbf16>
    %47 = vector.shape_cast %46 : vector<1x1x16x128xbf16> to vector<16x128xbf16>
    %c0_34 = arith.constant 0 : index
    %c0_35 = arith.constant 0 : index
    %48 = vector.load %arg15[%c0_34, %c0_35] : memref<24x128xbf16, #tpu.memory_space<vmem>>, vector<16x128xbf16>
    tpu.vector_store %arg15[%c0_34, %c0_35], %47 {strides = array<i32>} : memref<24x128xbf16, #tpu.memory_space<vmem>>, vector<16x128xbf16>,
    %49 = arith.truncf %39 : vector<8x128xf32> to vector<8x128xbf16>
    %c16 = arith.constant 16 : index
    %c0_36 = arith.constant 0 : index
    %50 = vector.load %arg15[%c16, %c0_36] : memref<24x128xbf16, #tpu.memory_space<vmem>>, vector<8x128xbf16>
    tpu.vector_store %arg15[%c16, %c0_36], %49 {strides = array<i32>} : memref<24x128xbf16, #tpu.memory_space<vmem>>, vector<8x128xbf16>,
    %c0_37 = arith.constant 0 : index
    %c0_38 = arith.constant 0 : index
    %c0_39 = arith.constant 0 : index
    %c0_40 = arith.constant 0 : index
    %51 = vector.load %arg6[%c0_37, %c0_38, %c0_39, %c0_40] : memref<1x4x16x128xbf16, #tpu.memory_space<vmem>>, vector<1x1x16x128xbf16>
    %52 = vector.shape_cast %51 : vector<1x1x16x128xbf16> to vector<16x128xbf16>
    %c0_41 = arith.constant 0 : index
    %c0_42 = arith.constant 0 : index
    %53 = vector.load %arg16[%c0_41, %c0_42] : memref<24x128xbf16, #tpu.memory_space<vmem>>, vector<16x128xbf16>
    tpu.vector_store %arg16[%c0_41, %c0_42], %52 {strides = array<i32>} : memref<24x128xbf16, #tpu.memory_space<vmem>>, vector<16x128xbf16>,
    %54 = arith.truncf %29 : vector<8x128xf32> to vector<8x128xbf16>
    %c16_43 = arith.constant 16 : index
    %c0_44 = arith.constant 0 : index
    %55 = vector.load %arg16[%c16_43, %c0_44] : memref<24x128xbf16, #tpu.memory_space<vmem>>, vector<8x128xbf16>
    tpu.vector_store %arg16[%c16_43, %c0_44], %54 {strides = array<i32>} : memref<24x128xbf16, #tpu.memory_space<vmem>>, vector<8x128xbf16>,
    %56 = arith.truncf %35 : vector<8x128xf32> to vector<8x128xbf16>
    %c0_45 = arith.constant 0 : index
    %c0_46 = arith.constant 0 : index
    %57 = vector.load %arg15[%c0_45, %c0_46] : memref<24x128xbf16, #tpu.memory_space<vmem>>, vector<24x128xbf16>
    %cst_47 = arith.constant dense<0.000000e+00> : vector<8x24xf32>
    %58 = tpu.matmul %56, %57, %cst_47 {dimension_numbers = #tpu.dot_dimension_numbers<[1], [1], [0], [0], [0, 0, 1, 0], [], []>} : vector<8x128xbf16>, vector<24x128xbf16>, vector<8x24xf32> -> vector<8x24xf32>
    %59 = arith.addf %58, %7 : vector<8x24xf32>
    %cst_48 = arith.constant dense<0xFF800000> : vector<8xf32>
    %60 = vector.multi_reduction <maximumf>, %59, %cst_48 [1] : vector<8x24xf32> to vector<8xf32>
    %61 = vector.shape_cast %60 : vector<8xf32> to vector<8x1xf32>
    %62 = vector.broadcast %61 : vector<8x1xf32> to vector<8x24xf32>
    %63 = arith.subf %59, %62 : vector<8x24xf32>
    %64 = math.exp %63 : vector<8x24xf32>
    %cst_49 = arith.constant dense<0.000000e+00> : vector<8xf32>
    %65 = vector.multi_reduction <add>, %64, %cst_49 [1] : vector<8x24xf32> to vector<8xf32>
    %66 = vector.shape_cast %65 : vector<8xf32> to vector<8x1xf32>
    %67 = tpu.reciprocal %66 : vector<8x1xf32> -> vector<8x1xf32>
    %68 = arith.truncf %64 : vector<8x24xf32> to vector<8x24xbf16>
    %c0_50 = arith.constant 0 : index
    %c0_51 = arith.constant 0 : index
    %69 = vector.load %arg16[%c0_50, %c0_51] : memref<24x128xbf16, #tpu.memory_space<vmem>>, vector<24x128xbf16>
    %cst_52 = arith.constant dense<0.000000e+00> : vector<8x128xf32>
    %70 = tpu.matmul %68, %69, %cst_52 {dimension_numbers = #tpu.dot_dimension_numbers<[1], [0], [0], [1], [0, 0, 1, 1], [], []>} : vector<8x24xbf16>, vector<24x128xbf16>, vector<8x128xf32> -> vector<8x128xf32>
    %71 = vector.broadcast %67 : vector<8x1xf32> to vector<8x128xf32>
    %72 = arith.mulf %70, %71 : vector<8x128xf32>
    %73 = arith.truncf %72 : vector<8x128xf32> to vector<8x128xbf16>
    %c0_53 = arith.constant 0 : index
    %c0_54 = arith.constant 0 : index
    %74 = vector.load %arg14[%c0_53, %c0_54] : memref<8x512xbf16, #tpu.memory_space<vmem>>, vector<8x128xbf16>
    tpu.vector_store %arg14[%c0_53, %c0_54], %73 {strides = array<i32>} : memref<8x512xbf16, #tpu.memory_space<vmem>>, vector<8x128xbf16>,
    %75 = vector.extract_strided_slice %26 {offsets = [0, 128], sizes = [8, 128], strides = [1, 1]} : vector<8x1536xf32> to vector<8x128xf32>
    %76 = vector.extract_strided_slice %26 {offsets = [0, 640], sizes = [8, 128], strides = [1, 1]} : vector<8x1536xf32> to vector<8x128xf32>
    %77 = vector.extract_strided_slice %26 {offsets = [0, 1152], sizes = [8, 128], strides = [1, 1]} : vector<8x1536xf32> to vector<8x128xf32>
    %78 = arith.mulf %75, %3 : vector<8x128xf32>
    %c64_i32_55 = arith.constant 64 : i32
    %79 = tpu.dynamic_rotate %75 by %c64_i32_55 dim 1 : vector<8x128xf32>, i32 -> vector<8x128xf32>
    %80 = arith.mulf %79, %5 : vector<8x128xf32>
    %81 = arith.addf %78, %80 : vector<8x128xf32>
    %cst_56 = arith.constant 0.0883883461 : f32
    %82 = vector.broadcast %cst_56 : f32 to vector<8x128xf32>
    %83 = arith.mulf %81, %82 : vector<8x128xf32>
    %84 = arith.mulf %76, %3 : vector<8x128xf32>
    %c64_i32_57 = arith.constant 64 : i32
    %85 = tpu.dynamic_rotate %76 by %c64_i32_57 dim 1 : vector<8x128xf32>, i32 -> vector<8x128xf32>
    %86 = arith.mulf %85, %5 : vector<8x128xf32>
    %87 = arith.addf %84, %86 : vector<8x128xf32>
    %c0_58 = arith.constant 0 : index
    %c1 = arith.constant 1 : index
    %c0_59 = arith.constant 0 : index
    %c0_60 = arith.constant 0 : index
    %88 = vector.load %arg12[%c0_58, %c1, %c0_59, %c0_60] : memref<1x4x8x128xf32, #tpu.memory_space<vmem>>, vector<1x1x8x128xf32>
    %89 = vector.shape_cast %88 : vector<1x1x8x128xf32> to vector<8x128xf32>
    %90 = vector.shape_cast %87 : vector<8x128xf32> to vector<1x1x8x128xf32>
    tpu.vector_store %arg12[%c0_58, %c1, %c0_59, %c0_60], %90 {strides = array<i32>} : memref<1x4x8x128xf32, #tpu.memory_space<vmem>>, vector<1x1x8x128xf32>,
    %c0_61 = arith.constant 0 : index
    %c1_62 = arith.constant 1 : index
    %c0_63 = arith.constant 0 : index
    %c0_64 = arith.constant 0 : index
    %91 = vector.load %arg13[%c0_61, %c1_62, %c0_63, %c0_64] : memref<1x4x8x128xf32, #tpu.memory_space<vmem>>, vector<1x1x8x128xf32>
    %92 = vector.shape_cast %91 : vector<1x1x8x128xf32> to vector<8x128xf32>
    %93 = vector.shape_cast %77 : vector<8x128xf32> to vector<1x1x8x128xf32>
    tpu.vector_store %arg13[%c0_61, %c1_62, %c0_63, %c0_64], %93 {strides = array<i32>} : memref<1x4x8x128xf32, #tpu.memory_space<vmem>>, vector<1x1x8x128xf32>,
    %c0_65 = arith.constant 0 : index
    %c1_66 = arith.constant 1 : index
    %c0_67 = arith.constant 0 : index
    %c0_68 = arith.constant 0 : index
    %94 = vector.load %arg5[%c0_65, %c1_66, %c0_67, %c0_68] : memref<1x4x16x128xbf16, #tpu.memory_space<vmem>>, vector<1x1x16x128xbf16>
    %95 = vector.shape_cast %94 : vector<1x1x16x128xbf16> to vector<16x128xbf16>
    %c0_69 = arith.constant 0 : index
    %c0_70 = arith.constant 0 : index
    %96 = vector.load %arg15[%c0_69, %c0_70] : memref<24x128xbf16, #tpu.memory_space<vmem>>, vector<16x128xbf16>
    tpu.vector_store %arg15[%c0_69, %c0_70], %95 {strides = array<i32>} : memref<24x128xbf16, #tpu.memory_space<vmem>>, vector<16x128xbf16>,
    %97 = arith.truncf %87 : vector<8x128xf32> to vector<8x128xbf16>
    %c16_71 = arith.constant 16 : index
    %c0_72 = arith.constant 0 : index
    %98 = vector.load %arg15[%c16_71, %c0_72] : memref<24x128xbf16, #tpu.memory_space<vmem>>, vector<8x128xbf16>
    tpu.vector_store %arg15[%c16_71, %c0_72], %97 {strides = array<i32>} : memref<24x128xbf16, #tpu.memory_space<vmem>>, vector<8x128xbf16>,
    %c0_73 = arith.constant 0 : index
    %c1_74 = arith.constant 1 : index
    %c0_75 = arith.constant 0 : index
    %c0_76 = arith.constant 0 : index
    %99 = vector.load %arg6[%c0_73, %c1_74, %c0_75, %c0_76] : memref<1x4x16x128xbf16, #tpu.memory_space<vmem>>, vector<1x1x16x128xbf16>
    %100 = vector.shape_cast %99 : vector<1x1x16x128xbf16> to vector<16x128xbf16>
    %c0_77 = arith.constant 0 : index
    %c0_78 = arith.constant 0 : index
    %101 = vector.load %arg16[%c0_77, %c0_78] : memref<24x128xbf16, #tpu.memory_space<vmem>>, vector<16x128xbf16>
    tpu.vector_store %arg16[%c0_77, %c0_78], %100 {strides = array<i32>} : memref<24x128xbf16, #tpu.memory_space<vmem>>, vector<16x128xbf16>,
    %102 = arith.truncf %77 : vector<8x128xf32> to vector<8x128xbf16>
    %c16_79 = arith.constant 16 : index
    %c0_80 = arith.constant 0 : index
    %103 = vector.load %arg16[%c16_79, %c0_80] : memref<24x128xbf16, #tpu.memory_space<vmem>>, vector<8x128xbf16>
    tpu.vector_store %arg16[%c16_79, %c0_80], %102 {strides = array<i32>} : memref<24x128xbf16, #tpu.memory_space<vmem>>, vector<8x128xbf16>,
    %104 = arith.truncf %83 : vector<8x128xf32> to vector<8x128xbf16>
    %c0_81 = arith.constant 0 : index
    %c0_82 = arith.constant 0 : index
    %105 = vector.load %arg15[%c0_81, %c0_82] : memref<24x128xbf16, #tpu.memory_space<vmem>>, vector<24x128xbf16>
    %cst_83 = arith.constant dense<0.000000e+00> : vector<8x24xf32>
    %106 = tpu.matmul %104, %105, %cst_83 {dimension_numbers = #tpu.dot_dimension_numbers<[1], [1], [0], [0], [0, 0, 1, 0], [], []>} : vector<8x128xbf16>, vector<24x128xbf16>, vector<8x24xf32> -> vector<8x24xf32>
    %107 = arith.addf %106, %7 : vector<8x24xf32>
    %cst_84 = arith.constant dense<0xFF800000> : vector<8xf32>
    %108 = vector.multi_reduction <maximumf>, %107, %cst_84 [1] : vector<8x24xf32> to vector<8xf32>
    %109 = vector.shape_cast %108 : vector<8xf32> to vector<8x1xf32>
    %110 = vector.broadcast %109 : vector<8x1xf32> to vector<8x24xf32>
    %111 = arith.subf %107, %110 : vector<8x24xf32>
    %112 = math.exp %111 : vector<8x24xf32>
    %cst_85 = arith.constant dense<0.000000e+00> : vector<8xf32>
    %113 = vector.multi_reduction <add>, %112, %cst_85 [1] : vector<8x24xf32> to vector<8xf32>
    %114 = vector.shape_cast %113 : vector<8xf32> to vector<8x1xf32>
    %115 = tpu.reciprocal %114 : vector<8x1xf32> -> vector<8x1xf32>
    %116 = arith.truncf %112 : vector<8x24xf32> to vector<8x24xbf16>
    %c0_86 = arith.constant 0 : index
    %c0_87 = arith.constant 0 : index
    %117 = vector.load %arg16[%c0_86, %c0_87] : memref<24x128xbf16, #tpu.memory_space<vmem>>, vector<24x128xbf16>
    %cst_88 = arith.constant dense<0.000000e+00> : vector<8x128xf32>
    %118 = tpu.matmul %116, %117, %cst_88 {dimension_numbers = #tpu.dot_dimension_numbers<[1], [0], [0], [1], [0, 0, 1, 1], [], []>} : vector<8x24xbf16>, vector<24x128xbf16>, vector<8x128xf32> -> vector<8x128xf32>
    %119 = vector.broadcast %115 : vector<8x1xf32> to vector<8x128xf32>
    %120 = arith.mulf %118, %119 : vector<8x128xf32>
    %121 = arith.truncf %120 : vector<8x128xf32> to vector<8x128xbf16>
    %c0_89 = arith.constant 0 : index
    %c128 = arith.constant 128 : index
    %122 = vector.load %arg14[%c0_89, %c128] : memref<8x512xbf16, #tpu.memory_space<vmem>>, vector<8x128xbf16>
    tpu.vector_store %arg14[%c0_89, %c128], %121 {strides = array<i32>} : memref<8x512xbf16, #tpu.memory_space<vmem>>, vector<8x128xbf16>,
    %123 = vector.extract_strided_slice %26 {offsets = [0, 256], sizes = [8, 128], strides = [1, 1]} : vector<8x1536xf32> to vector<8x128xf32>
    %124 = vector.extract_strided_slice %26 {offsets = [0, 768], sizes = [8, 128], strides = [1, 1]} : vector<8x1536xf32> to vector<8x128xf32>
    %125 = vector.extract_strided_slice %26 {offsets = [0, 1280], sizes = [8, 128], strides = [1, 1]} : vector<8x1536xf32> to vector<8x128xf32>
    %126 = arith.mulf %123, %3 : vector<8x128xf32>
    %c64_i32_90 = arith.constant 64 : i32
    %127 = tpu.dynamic_rotate %123 by %c64_i32_90 dim 1 : vector<8x128xf32>, i32 -> vector<8x128xf32>
    %128 = arith.mulf %127, %5 : vector<8x128xf32>
    %129 = arith.addf %126, %128 : vector<8x128xf32>
    %cst_91 = arith.constant 0.0883883461 : f32
    %130 = vector.broadcast %cst_91 : f32 to vector<8x128xf32>
    %131 = arith.mulf %129, %130 : vector<8x128xf32>
    %132 = arith.mulf %124, %3 : vector<8x128xf32>
    %c64_i32_92 = arith.constant 64 : i32
    %133 = tpu.dynamic_rotate %124 by %c64_i32_92 dim 1 : vector<8x128xf32>, i32 -> vector<8x128xf32>
    %134 = arith.mulf %133, %5 : vector<8x128xf32>
    %135 = arith.addf %132, %134 : vector<8x128xf32>
    %c0_93 = arith.constant 0 : index
    %c2 = arith.constant 2 : index
    %c0_94 = arith.constant 0 : index
    %c0_95 = arith.constant 0 : index
    %136 = vector.load %arg12[%c0_93, %c2, %c0_94, %c0_95] : memref<1x4x8x128xf32, #tpu.memory_space<vmem>>, vector<1x1x8x128xf32>
    %137 = vector.shape_cast %136 : vector<1x1x8x128xf32> to vector<8x128xf32>
    %138 = vector.shape_cast %135 : vector<8x128xf32> to vector<1x1x8x128xf32>
    tpu.vector_store %arg12[%c0_93, %c2, %c0_94, %c0_95], %138 {strides = array<i32>} : memref<1x4x8x128xf32, #tpu.memory_space<vmem>>, vector<1x1x8x128xf32>,
    %c0_96 = arith.constant 0 : index
    %c2_97 = arith.constant 2 : index
    %c0_98 = arith.constant 0 : index
    %c0_99 = arith.constant 0 : index
    %139 = vector.load %arg13[%c0_96, %c2_97, %c0_98, %c0_99] : memref<1x4x8x128xf32, #tpu.memory_space<vmem>>, vector<1x1x8x128xf32>
    %140 = vector.shape_cast %139 : vector<1x1x8x128xf32> to vector<8x128xf32>
    %141 = vector.shape_cast %125 : vector<8x128xf32> to vector<1x1x8x128xf32>
    tpu.vector_store %arg13[%c0_96, %c2_97, %c0_98, %c0_99], %141 {strides = array<i32>} : memref<1x4x8x128xf32, #tpu.memory_space<vmem>>, vector<1x1x8x128xf32>,
    %c0_100 = arith.constant 0 : index
    %c2_101 = arith.constant 2 : index
    %c0_102 = arith.constant 0 : index
    %c0_103 = arith.constant 0 : index
    %142 = vector.load %arg5[%c0_100, %c2_101, %c0_102, %c0_103] : memref<1x4x16x128xbf16, #tpu.memory_space<vmem>>, vector<1x1x16x128xbf16>
    %143 = vector.shape_cast %142 : vector<1x1x16x128xbf16> to vector<16x128xbf16>
    %c0_104 = arith.constant 0 : index
    %c0_105 = arith.constant 0 : index
    %144 = vector.load %arg15[%c0_104, %c0_105] : memref<24x128xbf16, #tpu.memory_space<vmem>>, vector<16x128xbf16>
    tpu.vector_store %arg15[%c0_104, %c0_105], %143 {strides = array<i32>} : memref<24x128xbf16, #tpu.memory_space<vmem>>, vector<16x128xbf16>,
    %145 = arith.truncf %135 : vector<8x128xf32> to vector<8x128xbf16>
    %c16_106 = arith.constant 16 : index
    %c0_107 = arith.constant 0 : index
    %146 = vector.load %arg15[%c16_106, %c0_107] : memref<24x128xbf16, #tpu.memory_space<vmem>>, vector<8x128xbf16>
    tpu.vector_store %arg15[%c16_106, %c0_107], %145 {strides = array<i32>} : memref<24x128xbf16, #tpu.memory_space<vmem>>, vector<8x128xbf16>,
    %c0_108 = arith.constant 0 : index
    %c2_109 = arith.constant 2 : index
    %c0_110 = arith.constant 0 : index
    %c0_111 = arith.constant 0 : index
    %147 = vector.load %arg6[%c0_108, %c2_109, %c0_110, %c0_111] : memref<1x4x16x128xbf16, #tpu.memory_space<vmem>>, vector<1x1x16x128xbf16>
    %148 = vector.shape_cast %147 : vector<1x1x16x128xbf16> to vector<16x128xbf16>
    %c0_112 = arith.constant 0 : index
    %c0_113 = arith.constant 0 : index
    %149 = vector.load %arg16[%c0_112, %c0_113] : memref<24x128xbf16, #tpu.memory_space<vmem>>, vector<16x128xbf16>
    tpu.vector_store %arg16[%c0_112, %c0_113], %148 {strides = array<i32>} : memref<24x128xbf16, #tpu.memory_space<vmem>>, vector<16x128xbf16>,
    %150 = arith.truncf %125 : vector<8x128xf32> to vector<8x128xbf16>
    %c16_114 = arith.constant 16 : index
    %c0_115 = arith.constant 0 : index
    %151 = vector.load %arg16[%c16_114, %c0_115] : memref<24x128xbf16, #tpu.memory_space<vmem>>, vector<8x128xbf16>
    tpu.vector_store %arg16[%c16_114, %c0_115], %150 {strides = array<i32>} : memref<24x128xbf16, #tpu.memory_space<vmem>>, vector<8x128xbf16>,
    %152 = arith.truncf %131 : vector<8x128xf32> to vector<8x128xbf16>
    %c0_116 = arith.constant 0 : index
    %c0_117 = arith.constant 0 : index
    %153 = vector.load %arg15[%c0_116, %c0_117] : memref<24x128xbf16, #tpu.memory_space<vmem>>, vector<24x128xbf16>
    %cst_118 = arith.constant dense<0.000000e+00> : vector<8x24xf32>
    %154 = tpu.matmul %152, %153, %cst_118 {dimension_numbers = #tpu.dot_dimension_numbers<[1], [1], [0], [0], [0, 0, 1, 0], [], []>} : vector<8x128xbf16>, vector<24x128xbf16>, vector<8x24xf32> -> vector<8x24xf32>
    %155 = arith.addf %154, %7 : vector<8x24xf32>
    %cst_119 = arith.constant dense<0xFF800000> : vector<8xf32>
    %156 = vector.multi_reduction <maximumf>, %155, %cst_119 [1] : vector<8x24xf32> to vector<8xf32>
    %157 = vector.shape_cast %156 : vector<8xf32> to vector<8x1xf32>
    %158 = vector.broadcast %157 : vector<8x1xf32> to vector<8x24xf32>
    %159 = arith.subf %155, %158 : vector<8x24xf32>
    %160 = math.exp %159 : vector<8x24xf32>
    %cst_120 = arith.constant dense<0.000000e+00> : vector<8xf32>
    %161 = vector.multi_reduction <add>, %160, %cst_120 [1] : vector<8x24xf32> to vector<8xf32>
    %162 = vector.shape_cast %161 : vector<8xf32> to vector<8x1xf32>
    %163 = tpu.reciprocal %162 : vector<8x1xf32> -> vector<8x1xf32>
    %164 = arith.truncf %160 : vector<8x24xf32> to vector<8x24xbf16>
    %c0_121 = arith.constant 0 : index
    %c0_122 = arith.constant 0 : index
    %165 = vector.load %arg16[%c0_121, %c0_122] : memref<24x128xbf16, #tpu.memory_space<vmem>>, vector<24x128xbf16>
    %cst_123 = arith.constant dense<0.000000e+00> : vector<8x128xf32>
    %166 = tpu.matmul %164, %165, %cst_123 {dimension_numbers = #tpu.dot_dimension_numbers<[1], [0], [0], [1], [0, 0, 1, 1], [], []>} : vector<8x24xbf16>, vector<24x128xbf16>, vector<8x128xf32> -> vector<8x128xf32>
    %167 = vector.broadcast %163 : vector<8x1xf32> to vector<8x128xf32>
    %168 = arith.mulf %166, %167 : vector<8x128xf32>
    %169 = arith.truncf %168 : vector<8x128xf32> to vector<8x128xbf16>
    %c0_124 = arith.constant 0 : index
    %c256 = arith.constant 256 : index
    %170 = vector.load %arg14[%c0_124, %c256] : memref<8x512xbf16, #tpu.memory_space<vmem>>, vector<8x128xbf16>
    tpu.vector_store %arg14[%c0_124, %c256], %169 {strides = array<i32>} : memref<8x512xbf16, #tpu.memory_space<vmem>>, vector<8x128xbf16>,
    %171 = vector.extract_strided_slice %26 {offsets = [0, 384], sizes = [8, 128], strides = [1, 1]} : vector<8x1536xf32> to vector<8x128xf32>
    %172 = vector.extract_strided_slice %26 {offsets = [0, 896], sizes = [8, 128], strides = [1, 1]} : vector<8x1536xf32> to vector<8x128xf32>
    %173 = vector.extract_strided_slice %26 {offsets = [0, 1408], sizes = [8, 128], strides = [1, 1]} : vector<8x1536xf32> to vector<8x128xf32>
    %174 = arith.mulf %171, %3 : vector<8x128xf32>
    %c64_i32_125 = arith.constant 64 : i32
    %175 = tpu.dynamic_rotate %171 by %c64_i32_125 dim 1 : vector<8x128xf32>, i32 -> vector<8x128xf32>
    %176 = arith.mulf %175, %5 : vector<8x128xf32>
    %177 = arith.addf %174, %176 : vector<8x128xf32>
    %cst_126 = arith.constant 0.0883883461 : f32
    %178 = vector.broadcast %cst_126 : f32 to vector<8x128xf32>
    %179 = arith.mulf %177, %178 : vector<8x128xf32>
    %180 = arith.mulf %172, %3 : vector<8x128xf32>
    %c64_i32_127 = arith.constant 64 : i32
    %181 = tpu.dynamic_rotate %172 by %c64_i32_127 dim 1 : vector<8x128xf32>, i32 -> vector<8x128xf32>
    %182 = arith.mulf %181, %5 : vector<8x128xf32>
    %183 = arith.addf %180, %182 : vector<8x128xf32>
    %c0_128 = arith.constant 0 : index
    %c3 = arith.constant 3 : index
    %c0_129 = arith.constant 0 : index
    %c0_130 = arith.constant 0 : index
    %184 = vector.load %arg12[%c0_128, %c3, %c0_129, %c0_130] : memref<1x4x8x128xf32, #tpu.memory_space<vmem>>, vector<1x1x8x128xf32>
    %185 = vector.shape_cast %184 : vector<1x1x8x128xf32> to vector<8x128xf32>
    %186 = vector.shape_cast %183 : vector<8x128xf32> to vector<1x1x8x128xf32>
    tpu.vector_store %arg12[%c0_128, %c3, %c0_129, %c0_130], %186 {strides = array<i32>} : memref<1x4x8x128xf32, #tpu.memory_space<vmem>>, vector<1x1x8x128xf32>,
    %c0_131 = arith.constant 0 : index
    %c3_132 = arith.constant 3 : index
    %c0_133 = arith.constant 0 : index
    %c0_134 = arith.constant 0 : index
    %187 = vector.load %arg13[%c0_131, %c3_132, %c0_133, %c0_134] : memref<1x4x8x128xf32, #tpu.memory_space<vmem>>, vector<1x1x8x128xf32>
    %188 = vector.shape_cast %187 : vector<1x1x8x128xf32> to vector<8x128xf32>
    %189 = vector.shape_cast %173 : vector<8x128xf32> to vector<1x1x8x128xf32>
    tpu.vector_store %arg13[%c0_131, %c3_132, %c0_133, %c0_134], %189 {strides = array<i32>} : memref<1x4x8x128xf32, #tpu.memory_space<vmem>>, vector<1x1x8x128xf32>,
    %c0_135 = arith.constant 0 : index
    %c3_136 = arith.constant 3 : index
    %c0_137 = arith.constant 0 : index
    %c0_138 = arith.constant 0 : index
    %190 = vector.load %arg5[%c0_135, %c3_136, %c0_137, %c0_138] : memref<1x4x16x128xbf16, #tpu.memory_space<vmem>>, vector<1x1x16x128xbf16>
    %191 = vector.shape_cast %190 : vector<1x1x16x128xbf16> to vector<16x128xbf16>
    %c0_139 = arith.constant 0 : index
    %c0_140 = arith.constant 0 : index
    %192 = vector.load %arg15[%c0_139, %c0_140] : memref<24x128xbf16, #tpu.memory_space<vmem>>, vector<16x128xbf16>
    tpu.vector_store %arg15[%c0_139, %c0_140], %191 {strides = array<i32>} : memref<24x128xbf16, #tpu.memory_space<vmem>>, vector<16x128xbf16>,
    %193 = arith.truncf %183 : vector<8x128xf32> to vector<8x128xbf16>
    %c16_141 = arith.constant 16 : index
    %c0_142 = arith.constant 0 : index
    %194 = vector.load %arg15[%c16_141, %c0_142] : memref<24x128xbf16, #tpu.memory_space<vmem>>, vector<8x128xbf16>
    tpu.vector_store %arg15[%c16_141, %c0_142], %193 {strides = array<i32>} : memref<24x128xbf16, #tpu.memory_space<vmem>>, vector<8x128xbf16>,
    %c0_143 = arith.constant 0 : index
    %c3_144 = arith.constant 3 : index
    %c0_145 = arith.constant 0 : index
    %c0_146 = arith.constant 0 : index
    %195 = vector.load %arg6[%c0_143, %c3_144, %c0_145, %c0_146] : memref<1x4x16x128xbf16, #tpu.memory_space<vmem>>, vector<1x1x16x128xbf16>
    %196 = vector.shape_cast %195 : vector<1x1x16x128xbf16> to vector<16x128xbf16>
    %c0_147 = arith.constant 0 : index
    %c0_148 = arith.constant 0 : index
    %197 = vector.load %arg16[%c0_147, %c0_148] : memref<24x128xbf16, #tpu.memory_space<vmem>>, vector<16x128xbf16>
    tpu.vector_store %arg16[%c0_147, %c0_148], %196 {strides = array<i32>} : memref<24x128xbf16, #tpu.memory_space<vmem>>, vector<16x128xbf16>,
    %198 = arith.truncf %173 : vector<8x128xf32> to vector<8x128xbf16>
    %c16_149 = arith.constant 16 : index
    %c0_150 = arith.constant 0 : index
    %199 = vector.load %arg16[%c16_149, %c0_150] : memref<24x128xbf16, #tpu.memory_space<vmem>>, vector<8x128xbf16>
    tpu.vector_store %arg16[%c16_149, %c0_150], %198 {strides = array<i32>} : memref<24x128xbf16, #tpu.memory_space<vmem>>, vector<8x128xbf16>,
    %200 = arith.truncf %179 : vector<8x128xf32> to vector<8x128xbf16>
    %c0_151 = arith.constant 0 : index
    %c0_152 = arith.constant 0 : index
    %201 = vector.load %arg15[%c0_151, %c0_152] : memref<24x128xbf16, #tpu.memory_space<vmem>>, vector<24x128xbf16>
    %cst_153 = arith.constant dense<0.000000e+00> : vector<8x24xf32>
    %202 = tpu.matmul %200, %201, %cst_153 {dimension_numbers = #tpu.dot_dimension_numbers<[1], [1], [0], [0], [0, 0, 1, 0], [], []>} : vector<8x128xbf16>, vector<24x128xbf16>, vector<8x24xf32> -> vector<8x24xf32>
    %203 = arith.addf %202, %7 : vector<8x24xf32>
    %cst_154 = arith.constant dense<0xFF800000> : vector<8xf32>
    %204 = vector.multi_reduction <maximumf>, %203, %cst_154 [1] : vector<8x24xf32> to vector<8xf32>
    %205 = vector.shape_cast %204 : vector<8xf32> to vector<8x1xf32>
    %206 = vector.broadcast %205 : vector<8x1xf32> to vector<8x24xf32>
    %207 = arith.subf %203, %206 : vector<8x24xf32>
    %208 = math.exp %207 : vector<8x24xf32>
    %cst_155 = arith.constant dense<0.000000e+00> : vector<8xf32>
    %209 = vector.multi_reduction <add>, %208, %cst_155 [1] : vector<8x24xf32> to vector<8xf32>
    %210 = vector.shape_cast %209 : vector<8xf32> to vector<8x1xf32>
    %211 = tpu.reciprocal %210 : vector<8x1xf32> -> vector<8x1xf32>
    %212 = arith.truncf %208 : vector<8x24xf32> to vector<8x24xbf16>
    %c0_156 = arith.constant 0 : index
    %c0_157 = arith.constant 0 : index
    %213 = vector.load %arg16[%c0_156, %c0_157] : memref<24x128xbf16, #tpu.memory_space<vmem>>, vector<24x128xbf16>
    %cst_158 = arith.constant dense<0.000000e+00> : vector<8x128xf32>
    %214 = tpu.matmul %212, %213, %cst_158 {dimension_numbers = #tpu.dot_dimension_numbers<[1], [0], [0], [1], [0, 0, 1, 1], [], []>} : vector<8x24xbf16>, vector<24x128xbf16>, vector<8x128xf32> -> vector<8x128xf32>
    %215 = vector.broadcast %211 : vector<8x1xf32> to vector<8x128xf32>
    %216 = arith.mulf %214, %215 : vector<8x128xf32>
    %217 = arith.truncf %216 : vector<8x128xf32> to vector<8x128xbf16>
    %c0_159 = arith.constant 0 : index
    %c384 = arith.constant 384 : index
    %218 = vector.load %arg14[%c0_159, %c384] : memref<8x512xbf16, #tpu.memory_space<vmem>>, vector<8x128xbf16>
    tpu.vector_store %arg14[%c0_159, %c384], %217 {strides = array<i32>} : memref<8x512xbf16, #tpu.memory_space<vmem>>, vector<8x128xbf16>,
    %c0_160 = arith.constant 0 : index
    %c0_161 = arith.constant 0 : index
    %219 = vector.load %arg14[%c0_160, %c0_161] : memref<8x512xbf16, #tpu.memory_space<vmem>>, vector<8x512xbf16>
    %c0_162 = arith.constant 0 : index
    %c0_163 = arith.constant 0 : index
    %220 = vector.load %arg10[%c0_162, %c0_163] : memref<512x512xbf16, #tpu.memory_space<vmem>>, vector<512x512xbf16>
    %cst_164 = arith.constant dense<0.000000e+00> : vector<8x512xf32>
    %221 = tpu.matmul %219, %220, %cst_164 {dimension_numbers = #tpu.dot_dimension_numbers<[1], [0], [0], [1], [0, 0, 1, 1], [], []>} : vector<8x512xbf16>, vector<512x512xbf16>, vector<8x512xf32> -> vector<8x512xf32>
    %222 = arith.addf %1, %221 : vector<8x512xf32>
    %c0_165 = arith.constant 0 : index
    %c0_166 = arith.constant 0 : index
    %c0_167 = arith.constant 0 : index
    %223 = vector.load %arg11[%c0_165, %c0_166, %c0_167] : memref<1x8x512xf32, #tpu.memory_space<vmem>>, vector<1x8x512xf32>
    %224 = vector.shape_cast %223 : vector<1x8x512xf32> to vector<8x512xf32>
    %225 = vector.shape_cast %222 : vector<8x512xf32> to vector<1x8x512xf32>
    tpu.vector_store %arg11[%c0_165, %c0_166, %c0_167], %225 {strides = array<i32>} : memref<1x8x512xf32, #tpu.memory_space<vmem>>, vector<1x8x512xf32>,
    return
  }
  func.func @transform_0(%arg0: i32) -> (i32, i32, i32) {
    %c0_i32 = arith.constant 0 : i32
    %c0_i32_0 = arith.constant 0 : i32
    %c0_i32_1 = arith.constant 0 : i32
    return %arg0, %c0_i32, %c0_i32_0 : i32, i32, i32
  }
  func.func @transform_1(%arg0: i32) -> (i32, i32, i32) {
    %c0_i32 = arith.constant 0 : i32
    %c0_i32_0 = arith.constant 0 : i32
    %c0_i32_1 = arith.constant 0 : i32
    return %arg0, %c0_i32, %c0_i32_0 : i32, i32, i32
  }
  func.func @transform_2(%arg0: i32) -> (i32, i32, i32) {
    %c0_i32 = arith.constant 0 : i32
    %c0_i32_0 = arith.constant 0 : i32
    %c0_i32_1 = arith.constant 0 : i32
    return %arg0, %c0_i32, %c0_i32_0 : i32, i32, i32
  }
  func.func @transform_3(%arg0: i32) -> (i32, i32, i32) {
    %c0_i32 = arith.constant 0 : i32
    %c0_i32_0 = arith.constant 0 : i32
    %c0_i32_1 = arith.constant 0 : i32
    return %arg0, %c0_i32, %c0_i32_0 : i32, i32, i32
  }
  func.func @transform_4(%arg0: i32) -> (i32, i32, i32, i32) {
    %c0_i32 = arith.constant 0 : i32
    %c0_i32_0 = arith.constant 0 : i32
    %c0_i32_1 = arith.constant 0 : i32
    %c0_i32_2 = arith.constant 0 : i32
    return %arg0, %c0_i32, %c0_i32_0, %c0_i32_1 : i32, i32, i32, i32
  }
  func.func @transform_5(%arg0: i32) -> (i32, i32, i32, i32) {
    %c0_i32 = arith.constant 0 : i32
    %c0_i32_0 = arith.constant 0 : i32
    %c0_i32_1 = arith.constant 0 : i32
    %c0_i32_2 = arith.constant 0 : i32
    return %arg0, %c0_i32, %c0_i32_0, %c0_i32_1 : i32, i32, i32, i32
  }
  func.func @transform_6(%arg0: i32) -> (i32, i32) {
    %c0_i32 = arith.constant 0 : i32
    %c0_i32_0 = arith.constant 0 : i32
    %c0_i32_1 = arith.constant 0 : i32
    return %c0_i32, %c0_i32_0 : i32, i32
  }
  func.func @transform_7(%arg0: i32) -> (i32, i32) {
    %c0_i32 = arith.constant 0 : i32
    %c0_i32_0 = arith.constant 0 : i32
    %c0_i32_1 = arith.constant 0 : i32
    return %c0_i32, %c0_i32_0 : i32, i32
  }
  func.func @transform_8(%arg0: i32) -> (i32, i32) {
    %c0_i32 = arith.constant 0 : i32
    %c0_i32_0 = arith.constant 0 : i32
    %c0_i32_1 = arith.constant 0 : i32
    return %c0_i32, %c0_i32_0 : i32, i32
  }
  func.func @transform_9(%arg0: i32) -> (i32, i32) {
    %c0_i32 = arith.constant 0 : i32
    %c0_i32_0 = arith.constant 0 : i32
    %c0_i32_1 = arith.constant 0 : i32
    return %c0_i32, %c0_i32_0 : i32, i32
  }
  func.func @transform_10(%arg0: i32) -> (i32, i32, i32) {
    %c0_i32 = arith.constant 0 : i32
    %c0_i32_0 = arith.constant 0 : i32
    %c0_i32_1 = arith.constant 0 : i32
    return %arg0, %c0_i32, %c0_i32_0 : i32, i32, i32
  }
  func.func @transform_11(%arg0: i32) -> (i32, i32, i32, i32) {
    %c0_i32 = arith.constant 0 : i32
    %c0_i32_0 = arith.constant 0 : i32
    %c0_i32_1 = arith.constant 0 : i32
    %c0_i32_2 = arith.constant 0 : i32
    return %arg0, %c0_i32, %c0_i32_0, %c0_i32_1 : i32, i32, i32, i32
  }
  func.func @transform_12(%arg0: i32) -> (i32, i32, i32, i32) {
    %c0_i32 = arith.constant 0 : i32
    %c0_i32_0 = arith.constant 0 : i32
    %c0_i32_1 = arith.constant 0 : i32
    %c0_i32_2 = arith.constant 0 : i32
    return %arg0, %c0_i32, %c0_i32_0, %c0_i32_1 : i32, i32, i32, i32
  }
}

module attributes {stable_mosaic.version = 11 : i64} {
  func.func @mlp_kernel(%arg0: i32, %arg1: i32, %arg2: memref<1x8x512xf32, #tpu.memory_space<vmem>>, %arg3: memref<1x512xf32, #tpu.memory_space<vmem>>, %arg4: memref<512x512xbf16, #tpu.memory_space<vmem>>, %arg5: memref<512x512xbf16, #tpu.memory_space<vmem>>, %arg6: memref<512x512xbf16, #tpu.memory_space<vmem>>, %arg7: memref<1x8x512xf32, #tpu.memory_space<vmem>>, %arg8: memref<8x512xbf16, #tpu.memory_space<vmem>>, %arg9: memref<8x512xf32, #tpu.memory_space<vmem>>) attributes {dimension_semantics = [#tpu.dimension_semantics<parallel>, #tpu.dimension_semantics<arbitrary>], iteration_bounds = array<i64: 2, 2>, scalar_prefetch = 0 : i64, scratch_operands = 2 : i64, tpu.core_type = #tpu.core_type<tc>, window_params = [{transform_indices = @transform_0, window_bounds = array<i64: 1, 8, 512>}, {pipeline_mode = #tpu.pipeline_mode<synchronous>, transform_indices = @transform_1, window_bounds = array<i64: 1, 512>}, {transform_indices = @transform_2, window_bounds = array<i64: 512, 512>}, {transform_indices = @transform_3, window_bounds = array<i64: 512, 512>}, {transform_indices = @transform_4, window_bounds = array<i64: 512, 512>}, {transform_indices = @transform_5, window_bounds = array<i64: 1, 8, 512>}]} {
    %c0_i32 = arith.constant 0 : i32
    %0 = arith.cmpi eq, %arg1, %c0_i32 : i32
    %1 = arith.extui %0 : i1 to i32
    %c0_i32_0 = arith.constant 0 : i32
    %2 = arith.cmpi ne, %1, %c0_i32_0 : i32
    scf.if %2 {
      %c0_16 = arith.constant 0 : index
      %c0_17 = arith.constant 0 : index
      %c0_18 = arith.constant 0 : index
      %24 = vector.load %arg2[%c0_16, %c0_17, %c0_18] : memref<1x8x512xf32, #tpu.memory_space<vmem>>, vector<1x8x512xf32>
      %25 = vector.shape_cast %24 : vector<1x8x512xf32> to vector<8x512xf32>
      %26 = arith.mulf %25, %25 : vector<8x512xf32>
      %cst_19 = arith.constant dense<0.000000e+00> : vector<8xf32>
      %27 = vector.multi_reduction <add>, %26, %cst_19 [1] : vector<8x512xf32> to vector<8xf32>
      %28 = vector.shape_cast %27 : vector<8xf32> to vector<8x1xf32>
      %cst_20 = arith.constant 5.120000e+02 : f32
      %29 = vector.broadcast %cst_20 : f32 to vector<8x1xf32>
      %30 = arith.divf %28, %29 : vector<8x1xf32>
      %cst_21 = arith.constant 9.99999997E-7 : f32
      %31 = vector.broadcast %cst_21 : f32 to vector<8x1xf32>
      %32 = arith.addf %30, %31 : vector<8x1xf32>
      %33 = math.rsqrt %32 : vector<8x1xf32>
      %34 = vector.broadcast %33 : vector<8x1xf32> to vector<8x512xf32>
      %35 = arith.mulf %25, %34 : vector<8x512xf32>
      %c0_22 = arith.constant 0 : index
      %c0_23 = arith.constant 0 : index
      %36 = vector.load %arg3[%c0_22, %c0_23] : memref<1x512xf32, #tpu.memory_space<vmem>>, vector<1x512xf32>
      %37 = vector.broadcast %36 : vector<1x512xf32> to vector<8x512xf32>
      %38 = arith.mulf %35, %37 : vector<8x512xf32>
      %39 = arith.truncf %38 : vector<8x512xf32> to vector<8x512xbf16>
      %c0_24 = arith.constant 0 : index
      %c0_25 = arith.constant 0 : index
      %40 = vector.load %arg8[%c0_24, %c0_25] : memref<8x512xbf16, #tpu.memory_space<vmem>>, vector<8x512xbf16>
      tpu.vector_store %arg8[%c0_24, %c0_25], %39 {strides = array<i32>} : memref<8x512xbf16, #tpu.memory_space<vmem>>, vector<8x512xbf16>,
      %cst_26 = arith.constant 0.000000e+00 : f32
      %41 = vector.broadcast %cst_26 : f32 to vector<8x512xf32>
      %c0_27 = arith.constant 0 : index
      %c0_28 = arith.constant 0 : index
      %42 = vector.load %arg9[%c0_27, %c0_28] : memref<8x512xf32, #tpu.memory_space<vmem>>, vector<8x512xf32>
      tpu.vector_store %arg9[%c0_27, %c0_28], %41 {strides = array<i32>} : memref<8x512xf32, #tpu.memory_space<vmem>>, vector<8x512xf32>,
    } else {
    }
    %c0 = arith.constant 0 : index
    %c0_1 = arith.constant 0 : index
    %3 = vector.load %arg8[%c0, %c0_1] : memref<8x512xbf16, #tpu.memory_space<vmem>>, vector<8x512xbf16>
    %c0_2 = arith.constant 0 : index
    %c0_3 = arith.constant 0 : index
    %4 = vector.load %arg4[%c0_2, %c0_3] : memref<512x512xbf16, #tpu.memory_space<vmem>>, vector<512x512xbf16>
    %cst = arith.constant dense<0.000000e+00> : vector<8x512xf32>
    %5 = tpu.matmul %3, %4, %cst {dimension_numbers = #tpu.dot_dimension_numbers<[1], [0], [0], [1], [0, 0, 1, 1], [], []>} : vector<8x512xbf16>, vector<512x512xbf16>, vector<8x512xf32> -> vector<8x512xf32>
    %c0_4 = arith.constant 0 : index
    %c0_5 = arith.constant 0 : index
    %6 = vector.load %arg5[%c0_4, %c0_5] : memref<512x512xbf16, #tpu.memory_space<vmem>>, vector<512x512xbf16>
    %cst_6 = arith.constant dense<0.000000e+00> : vector<8x512xf32>
    %7 = tpu.matmul %3, %6, %cst_6 {dimension_numbers = #tpu.dot_dimension_numbers<[1], [0], [0], [1], [0, 0, 1, 1], [], []>} : vector<8x512xbf16>, vector<512x512xbf16>, vector<8x512xf32> -> vector<8x512xf32>
    %8 = arith.negf %5 : vector<8x512xf32>
    %9 = math.exp %8 : vector<8x512xf32>
    %cst_7 = arith.constant 1.000000e+00 : f32
    %10 = vector.broadcast %cst_7 : f32 to vector<8x512xf32>
    %11 = arith.addf %10, %9 : vector<8x512xf32>
    %12 = arith.divf %10, %11 : vector<8x512xf32>
    %13 = arith.mulf %5, %12 : vector<8x512xf32>
    %14 = arith.mulf %13, %7 : vector<8x512xf32>
    %15 = arith.truncf %14 : vector<8x512xf32> to vector<8x512xbf16>
    %c0_8 = arith.constant 0 : index
    %c0_9 = arith.constant 0 : index
    %16 = vector.load %arg9[%c0_8, %c0_9] : memref<8x512xf32, #tpu.memory_space<vmem>>, vector<8x512xf32>
    %c0_10 = arith.constant 0 : index
    %c0_11 = arith.constant 0 : index
    %17 = vector.load %arg6[%c0_10, %c0_11] : memref<512x512xbf16, #tpu.memory_space<vmem>>, vector<512x512xbf16>
    %cst_12 = arith.constant dense<0.000000e+00> : vector<8x512xf32>
    %18 = tpu.matmul %15, %17, %cst_12 {dimension_numbers = #tpu.dot_dimension_numbers<[1], [0], [0], [1], [0, 0, 1, 1], [], []>} : vector<8x512xbf16>, vector<512x512xbf16>, vector<8x512xf32> -> vector<8x512xf32>
    %19 = arith.addf %16, %18 : vector<8x512xf32>
    %c0_13 = arith.constant 0 : index
    %c0_14 = arith.constant 0 : index
    %20 = vector.load %arg9[%c0_13, %c0_14] : memref<8x512xf32, #tpu.memory_space<vmem>>, vector<8x512xf32>
    tpu.vector_store %arg9[%c0_13, %c0_14], %19 {strides = array<i32>} : memref<8x512xf32, #tpu.memory_space<vmem>>, vector<8x512xf32>,
    %c1_i32 = arith.constant 1 : i32
    %21 = arith.cmpi eq, %arg1, %c1_i32 : i32
    %22 = arith.extui %21 : i1 to i32
    %c0_i32_15 = arith.constant 0 : i32
    %23 = arith.cmpi ne, %22, %c0_i32_15 : i32
    scf.if %23 {
      %c0_16 = arith.constant 0 : index
      %c0_17 = arith.constant 0 : index
      %c0_18 = arith.constant 0 : index
      %24 = vector.load %arg2[%c0_16, %c0_17, %c0_18] : memref<1x8x512xf32, #tpu.memory_space<vmem>>, vector<1x8x512xf32>
      %25 = vector.shape_cast %24 : vector<1x8x512xf32> to vector<8x512xf32>
      %c0_19 = arith.constant 0 : index
      %c0_20 = arith.constant 0 : index
      %26 = vector.load %arg9[%c0_19, %c0_20] : memref<8x512xf32, #tpu.memory_space<vmem>>, vector<8x512xf32>
      %27 = arith.addf %25, %26 : vector<8x512xf32>
      %c0_21 = arith.constant 0 : index
      %c0_22 = arith.constant 0 : index
      %c0_23 = arith.constant 0 : index
      %28 = vector.load %arg7[%c0_21, %c0_22, %c0_23] : memref<1x8x512xf32, #tpu.memory_space<vmem>>, vector<1x8x512xf32>
      %29 = vector.shape_cast %28 : vector<1x8x512xf32> to vector<8x512xf32>
      %30 = vector.shape_cast %27 : vector<8x512xf32> to vector<1x8x512xf32>
      tpu.vector_store %arg7[%c0_21, %c0_22, %c0_23], %30 {strides = array<i32>} : memref<1x8x512xf32, #tpu.memory_space<vmem>>, vector<1x8x512xf32>,
    } else {
    }
    return
  }
  func.func @transform_0(%arg0: i32, %arg1: i32) -> (i32, i32, i32) {
    %c0_i32 = arith.constant 0 : i32
    %c0_i32_0 = arith.constant 0 : i32
    %c0_i32_1 = arith.constant 0 : i32
    return %arg0, %c0_i32, %c0_i32_0 : i32, i32, i32
  }
  func.func @transform_1(%arg0: i32, %arg1: i32) -> (i32, i32) {
    %c0_i32 = arith.constant 0 : i32
    %c0_i32_0 = arith.constant 0 : i32
    %c0_i32_1 = arith.constant 0 : i32
    return %c0_i32, %c0_i32_0 : i32, i32
  }
  func.func @transform_2(%arg0: i32, %arg1: i32) -> (i32, i32) {
    %c0_i32 = arith.constant 0 : i32
    %c0_i32_0 = arith.constant 0 : i32
    return %c0_i32, %arg1 : i32, i32
  }
  func.func @transform_3(%arg0: i32, %arg1: i32) -> (i32, i32) {
    %c0_i32 = arith.constant 0 : i32
    %c0_i32_0 = arith.constant 0 : i32
    return %c0_i32, %arg1 : i32, i32
  }
  func.func @transform_4(%arg0: i32, %arg1: i32) -> (i32, i32) {
    %c0_i32 = arith.constant 0 : i32
    %c0_i32_0 = arith.constant 0 : i32
    return %arg1, %c0_i32 : i32, i32
  }
  func.func @transform_5(%arg0: i32, %arg1: i32) -> (i32, i32, i32) {
    %c0_i32 = arith.constant 0 : i32
    %c0_i32_0 = arith.constant 0 : i32
    %c0_i32_1 = arith.constant 0 : i32
    return %arg0, %c0_i32, %c0_i32_0 : i32, i32, i32
  }
}

</mosaic_0001>

<bundles_post_ra>
// kernel: qwen_block_cache.2
= control target key start
LH: loop header
LB: loop body
LE: loop exit
PB: predicated region body
PF: predicated region fallthrough
CT: control target
= control target key end

     0   :  { %s6801_s21 = smov 0   ;;  %s8664_s0 = inlined_call_operand.vmem [shape: f32[2,8,512], index: 0, kind: input, shape index: {}]   ;;  %s8665_s1 = inlined_call_operand.vmem [shape: f32[2,8,128], index: 1, kind: input, shape index: {}]   ;;  %s8666_s2 = inlined_call_operand.vmem [shape: f32[2,8,128], index: 2, kind: input, shape index: {}]   ;;  %s8667_s3 = inlined_call_operand.vmem [shape: f32[2,8,24], index: 3, kind: input, shape index: {}]   ;;  %s8668_s4 = inlined_call_operand.vmem [shape: bf16[2,4,16,128], index: 4, kind: input, shape index: {}]   ;;  %s8669_s5 = inlined_call_operand.vmem [shape: bf16[2,4,16,128], index: 5, kind: input, shape index: {}]   ;;  %s8670_s6 = inlined_call_operand.vmem [shape: f32[1,512], index: 6, kind: input, shape index: {}]   ;;  %s8671_s7 = inlined_call_operand.vmem [shape: bf16[512,1536], index: 7, kind: input, shape index: {}]   ;;  %s8672_s8 = inlined_call_operand.vmem [shape: f32[1,1536], index: 8, kind: input, shape index: {}]   ;;  %s8673_s9 = inlined_call_operand.vmem [shape: bf16[512,512], index: 9, kind: input, shape index: {}]   ;;  %s8674_s10 = inlined_call_operand.vmem [shape: f32[2,8,512], index: 10, kind: output, shape index: {0}]   ;;  %s8675_s11 = inlined_call_operand.vmem [shape: f32[2,4,8,128], index: 11, kind: output, shape index: {1}]   ;;  %s8676_s12 = inlined_call_operand.vmem [shape: f32[2,4,8,128], index: 12, kind: output, shape index: {2}]  }
   0x1 LB: > { %s5200_s22 = sadd.s32 4294967295, %s6731_s21   ;;  %p5204_p0 = scmp.ge.s32.totalorder %s6731_s21, 1  ;;  %s6731_s21 = sphi %s6801_s21, %s23_s21  }
   0x2   : > { %p414_p1 = scmp.lt.s32.totalorder %s6731_s21, 3 }
   0x4   : > { %p415_p2 = pnand %p5204_p0, %p414_p1 }
   0x5   : > { %p488_p3 = scmp.lt.s32.totalorder (!%p415_p2), %s5200_s22, 1  ;;  %v5917_v0 = vld [vmem:[%s8671_s7 + $0x4] ss:$48 sps:$4 sm:$0xff] (!%p415_p2)   ;;  %v5919_v1 = vld [vmem:[%s8671_s7 + $0xc] ss:$48 sps:$4 sm:$0xff] (!%p415_p2)   ;;  %s6733_s20 = smov (!%p415_p2), 64  }
   0x6   : > { %418 = sbr.rel (%p415_p2) target bundleno = 2786 (0xae2), region = 60  ;;  %2953 = vmatprep.subr.bf16.mxu0 (!%p415_p2), %v5917_v0  ;;  %v5921_v2 = vld [vmem:[%s8671_s7] ss:$48 sps:$4 sm:$0xff] (!%p415_p2)   ;;  %v5922_v3 = vld [vmem:[%s8671_s7 + $0x8] ss:$48 sps:$4 sm:$0xff] (!%p415_p2)   ;;  %3035 = vmatprep.subr.bf16.mxu1 (!%p415_p2), %v5919_v1  ;;  %vm6735_vm0 = vmmov (!%p415_p2), 0  }
   0x7   : > { %v5923_v4 = vld [vmem:[%s8671_s7 + $0x64] ss:$48 sps:$4 sm:$0xff] (!%p415_p2)   ;;  %2954 = vmatpush1.bf16.msra.mxu0 (!%p415_p2), %v5921_v2  ;;  %3036 = vmatpush1.bf16.msra.mxu1 (!%p415_p2), %v5922_v3  ;;  %v5925_v5 = vld [vmem:[%s8671_s7 + $0x6c] ss:$48 sps:$4 sm:$0xff] (!%p415_p2)   ;;  %v5927_v6 = vld [vmem:[%s8671_s7 + $0x60] ss:$48 sps:$4 sm:$0xff] (!%p415_p2)  }
   0x8   : > { %2955 = vmatprep.subr.bf16.mxu0 (!%p415_p2), %v5923_v4  ;;  %v5928_v7 = vld [vmem:[%s8671_s7 + $0x68] ss:$48 sps:$4 sm:$0xff] (!%p415_p2)   ;;  %3037 = vmatprep.subr.bf16.mxu1 (!%p415_p2), %v5925_v5  ;;  %v5929_v15 = vld [vmem:[%s8671_s7 + $0xc4] ss:$48 sps:$4 sm:$0xff] (!%p415_p2)   ;;  %v5931_v16 = vld [vmem:[%s8671_s7 + $0xcc] ss:$48 sps:$4 sm:$0xff] (!%p415_p2)  }
   0x9   : > { %v5933_v17 = vld [vmem:[%s8671_s7 + $0xc0] ss:$48 sps:$4 sm:$0xff] (!%p415_p2)   ;;  %v5934_v20 = vld [vmem:[%s8671_s7 + $0xc8] ss:$48 sps:$4 sm:$0xff] (!%p415_p2)   ;;  %v5935_v21 = vld [vmem:[%s8671_s7 + $0x124] ss:$48 sps:$4 sm:$0xff] (!%p415_p2)  }
   0xa   : > { %v5937_v23 = vld [vmem:[%s8671_s7 + $0x12c] ss:$48 sps:$4 sm:$0xff] (!%p415_p2)   ;;  %v5939_v24 = vld [vmem:[%s8671_s7 + $0x120] ss:$48 sps:$4 sm:$0xff] (!%p415_p2)   ;;  %v5940_v25 = vld [vmem:[%s8671_s7 + $0x128] ss:$48 sps:$4 sm:$0xff] (!%p415_p2)  }
   0xb   : > { %2956 = vmatpush1.bf16.msra.mxu0 (!%p415_p2), %v5927_v6  ;;  %3038 = vmatpush1.bf16.msra.mxu1 (!%p415_p2), %v5928_v7  ;;  %v5941_v26 = vld [vmem:[%s8671_s7 + $0x184] ss:$48 sps:$4 sm:$0xff] (!%p415_p2)   ;;  %v5943_v28 = vld [vmem:[%s8671_s7 + $0x18c] ss:$48 sps:$4 sm:$0xff] (!%p415_p2)   ;;  %v5945_v29 = vld [vmem:[%s8671_s7 + $0x180] ss:$48 sps:$4 sm:$0xff] (!%p415_p2)  }
   0xc   : > { %2957 = vmatprep.subr.bf16.mxu0 (!%p415_p2), %v5929_v15  ;;  %3039 = vmatprep.subr.bf16.mxu1 (!%p415_p2), %v5931_v16  ;;  %v5946_v30 = vld [vmem:[%s8671_s7 + $0x188] ss:$48 sps:$4 sm:$0xff] (!%p415_p2)   ;;  %v5947_v31 = vld [vmem:[%s8671_s7 + $0x1e4] ss:$48 sps:$4 sm:$0xff] (!%p415_p2)   ;;  %v5949_v32 = vld [vmem:[%s8671_s7 + $0x1ec] ss:$48 sps:$4 sm:$0xff] (!%p415_p2)  }
   0xd   : > { %s8678_s22 = smov (!%p488_p3, %s5200_s22), 1  ;;  %v5951_v33 = vld [vmem:[%s8671_s7 + $0x1e0] ss:$48 sps:$4 sm:$0xff]   ;;  %v5952_v34 = vld [vmem:[%s8671_s7 + $0x1e8] ss:$48 sps:$4 sm:$0xff]   ;;  %vm3551_vm1 = vcmask 1043456  }
   0xe   : > { %s6827_s15 = sshll.u32 %s8678_s22, 5  ;;  %v5953_v35 = vld [vmem:[%s8671_s7 + $0x244] ss:$48 sps:$4 sm:$0xff]   ;;  %v5955_v36 = vld [vmem:[%s8671_s7 + $0x24c] ss:$48 sps:$4 sm:$0xff]   ;;  %s8113_s26 = sshll.u32 %s8678_s22, 3 }
   0xf   : > { %s6839_s24 = scalar_lea.vmem %s8664_s0, %s6827_s15  ;;  %2958 = vmatpush1.bf16.msra.mxu0 %v5933_v17  ;;  %3040 = vmatpush1.bf16.msra.mxu1 %v5934_v20  ;;  %v5957_v37 = vld [vmem:[%s8671_s7 + $0x240] ss:$48 sps:$4 sm:$0xff]   ;;  %v5958_v38 = vld [vmem:[%s8671_s7 + $0x248] ss:$48 sps:$4 sm:$0xff]   ;;  %v5959_v39 = vld [vmem:[%s8671_s7 + $0x2a4] ss:$48 sps:$4 sm:$0xff]   ;;  %s8074_s18 = scalar_lea.vmem %s8668_s4, %s6827_s15 }
  0x10   : > { %v6845_v8 = vld [vmem:[%s6839_s24] sm:$0xff]  ;;  %v6848_v9 = vld [vmem:[%s6839_s24 + $0x8] sm:$0xff]  ;;  %v6851_v10 = vld [vmem:[%s6839_s24 + $0x10] sm:$0xff]  ;;  %2959 = vmatprep.subr.bf16.mxu0 %v5935_v21  ;;  %3041 = vmatprep.subr.bf16.mxu1 %v5937_v23  ;;  %s8086_s25 = scalar_lea.vmem %s8669_s5, %s6827_s15  ;;  %s496_s29 = scalar_lea.vmem %s8665_s1, %s8113_s26  ;;  %vm3524_vm2 = vcmask 195584  }
  0x11   : > { %v6854_v11 = vld [vmem:[%s6839_s24 + $0x18] sm:$0xff]  ;;  %v538_v12 = vmul.f32 %v6845_v8, %v6845_v8  ;;  %v539_v13 = vmul.f32 %v6848_v9, %v6848_v9  ;;  %v540_v14 = vmul.f32 %v6851_v10, %v6851_v10  ;;  %v5963_v41 = vld [vmem:[%s8671_s7 + $0x2a0] ss:$48 sps:$4 sm:$0xff]   ;;  %v5965_v43 = vld [vmem:[%s8671_s7 + $0x304] ss:$48 sps:$4 sm:$0xff]   ;;  %s500_s14 = scalar_lea.vmem %s8666_s2, %s8113_s26  ;;  %s8133_s17 = scalar_lea.vmem %s8675_s11, %s6827_s15 }
  0x12   : > { %v541_v18 = vmul.f32 %v6854_v11, %v6854_v11  ;;  %v5961_v40 = vld [vmem:[%s8671_s7 + $0x2ac] ss:$48 sps:$4 sm:$0xff]   ;;  %v5964_v42 = vld [vmem:[%s8671_s7 + $0x2a8] ss:$48 sps:$4 sm:$0xff]   ;;  %v5969_v45 = vld [vmem:[%s8671_s7 + $0x300] ss:$48 sps:$4 sm:$0xff]  }
  0x13   : > { %v542_v19 = vadd.f32 %v539_v13, %v538_v12  ;;  %2960 = vmatpush1.bf16.msra.mxu0 %v5939_v24  ;;  %3042 = vmatpush1.bf16.msra.mxu1 %v5940_v25  ;;  %v5967_v44 = vld [vmem:[%s8671_s7 + $0x30c] ss:$48 sps:$4 sm:$0xff]   ;;  %v5970_v46 = vld [vmem:[%s8671_s7 + $0x308] ss:$48 sps:$4 sm:$0xff]   ;;  %v5971_v47 = vld [vmem:[%s8671_s7 + $0x364] ss:$48 sps:$4 sm:$0xff]  }
  0x14   : > { %2961 = vmatprep.subr.bf16.mxu0 %v5941_v26  ;;  %3043 = vmatprep.subr.bf16.mxu1 %v5943_v28  ;;  %v5973_v48 = vld [vmem:[%s8671_s7 + $0x36c] ss:$48 sps:$4 sm:$0xff]   ;;  %v5975_v49 = vld [vmem:[%s8671_s7 + $0x360] ss:$48 sps:$4 sm:$0xff]   ;;  %v5976_v50 = vld [vmem:[%s8671_s7 + $0x368] ss:$48 sps:$4 sm:$0xff]  }
  0x15   : > { %v543_v22 = vadd.f32 %v542_v19, %v540_v14  ;;  %v5977_v51 = vld [vmem:[%s8671_s7 + $0x3c4] ss:$48 sps:$4 sm:$0xff]   ;;  %v5979_v52 = vld [vmem:[%s8671_s7 + $0x3cc] ss:$48 sps:$4 sm:$0xff]   ;;  %v5981_v53 = vld [vmem:[%s8671_s7 + $0x3c0] ss:$48 sps:$4 sm:$0xff]   ;;  %v557_v19 = vlaneseq }
  0x16   : > { %v5982_v54 = vld [vmem:[%s8671_s7 + $0x3c8] ss:$48 sps:$4 sm:$0xff]   ;;  %v5983_v55 = vld [vmem:[%s8671_s7 + $0x424] ss:$48 sps:$4 sm:$0xff]   ;;  %v5985_v56 = vld [vmem:[%s8671_s7 + $0x42c] ss:$48 sps:$4 sm:$0xff]  }
  0x17   : > { %v544_v27 = vadd.f32 %v543_v22, %v541_v18  ;;  %2962 = vmatpush1.bf16.msra.mxu0 %v5945_v29  ;;  %3044 = vmatpush1.bf16.msra.mxu1 %v5946_v30  ;;  %v5987_v57 = vld [vmem:[%s8671_s7 + $0x420] ss:$48 sps:$4 sm:$0xff]   ;;  %v5988_v58 = vld [vmem:[%s8671_s7 + $0x428] ss:$48 sps:$4 sm:$0xff]   ;;  %v5989_v59 = vld [vmem:[%s8671_s7 + $0x484] ss:$48 sps:$4 sm:$0xff]  }
  0x18   : > { %2963 = vmatprep.subr.bf16.mxu0 %v5947_v31  ;;  %3045 = vmatprep.subr.bf16.mxu1 %v5949_v32  ;;  %v5991_v60 = vld [vmem:[%s8671_s7 + $0x48c] ss:$48 sps:$4 sm:$0xff]   ;;  %v5993_v61 = vld [vmem:[%s8671_s7 + $0x480] ss:$48 sps:$4 sm:$0xff]   ;;  %v5994_v62 = vld [vmem:[%s8671_s7 + $0x488] ss:$48 sps:$4 sm:$0xff]  }
  0x19   : > { %545 = vadd.xlane.f32.xlu0 %v544_v27  ;;  %v5995_v63 = vld [vmem:[%s8671_s7 + $0x4e4] ss:$48 sps:$4 sm:$0xff]   ;;  %v5997_v0 = vld [vmem:[%s8671_s7 + $0x4ec] ss:$48 sps:$4 sm:$0xff]   ;;  %v5999_v1 = vld [vmem:[%s8671_s7 + $0x4e0] ss:$48 sps:$4 sm:$0xff]  }
  0x1a   : > { %v6000_v2 = vld [vmem:[%s8671_s7 + $0x4e8] ss:$48 sps:$4 sm:$0xff]   ;;  %v6001_v3 = vld [vmem:[%s8671_s7 + $0x544] ss:$48 sps:$4 sm:$0xff]   ;;  %v6003_v4 = vld [vmem:[%s8671_s7 + $0x54c] ss:$48 sps:$4 sm:$0xff]  }
  0x1b   : > { %2964 = vmatpush1.bf16.msra.mxu0 %v5951_v33  ;;  %3046 = vmatpush1.bf16.msra.mxu1 %v5952_v34  ;;  %v6005_v5 = vld [vmem:[%s8671_s7 + $0x540] ss:$48 sps:$4 sm:$0xff]   ;;  %v6006_v6 = vld [vmem:[%s8671_s7 + $0x548] ss:$48 sps:$4 sm:$0xff]   ;;  %v6007_v7 = vld [vmem:[%s8671_s7 + $0x5a4] ss:$48 sps:$4 sm:$0xff]  }
  0x1c   : > { %2965 = vmatprep.subr.bf16.mxu0 %v5953_v35  ;;  %3047 = vmatprep.subr.bf16.mxu1 %v5955_v36  ;;  %v6009_v12 = vld [vmem:[%s8671_s7 + $0x5ac] ss:$48 sps:$4 sm:$0xff]   ;;  %v6011_v13 = vld [vmem:[%s8671_s7 + $0x5a0] ss:$48 sps:$4 sm:$0xff]   ;;  %v6012_v14 = vld [vmem:[%s8671_s7 + $0x5a8] ss:$48 sps:$4 sm:$0xff]  }
  0x1d   : > { %v6015_v15 = vld [vmem:[%s8671_s7 + $0x604] ss:$48 sps:$4 sm:$0xff]   ;;  %v6018_v16 = vld [vmem:[%s8671_s7 + $0x60c] ss:$48 sps:$4 sm:$0xff]   ;;  %v7038_v21 = vshrl.u32 %v557_v19, 7 }
  0x1e   : > { %v555_v23 = vld [vmem:[%s8670_s6] sm:$0xf] }
  0x1f   : > { %2966 = vmatpush1.bf16.msra.mxu0 %v5957_v37  ;;  %3048 = vmatpush1.bf16.msra.mxu1 %v5958_v38  ;;  %v7041_v22 = vsub.s32 1, %v7038_v21  ;;  %v7047_v24 = vsub.s32 0, %v7038_v21  ;;  %v7050_v25 = vsub.s32 2, %v7038_v21  ;;  %v7053_v26 = vsub.s32 3, %v7038_v21  ;;  %v6013_v37 = vld [vmem:[%s8671_s7 + $0x600] ss:$48 sps:$4 sm:$0xff]  }
  0x20   : > { %2967 = vmatprep.subr.bf16.mxu0 %v5959_v39  ;;  %3049 = vmatprep.subr.bf16.mxu1 %v5961_v40  ;;  %v6016_v38 = vld [vmem:[%s8671_s7 + $0x608] ss:$48 sps:$4 sm:$0xff]   ;;  %v6073_v19 = vld [vmem:[%s8671_s7 + $0x9c0] ss:$48 sps:$4 sm:$0xff]  }
  0x21   : > { %v564_v27 = vrot.slane %v555_v23, %v7041_v22  ;;  %v560_v28 = vrot.slane %v555_v23, %v7047_v24  ;;  %v568_v29 = vrot.slane %v555_v23, %v7050_v25  ;;  %v572_v31 = vrot.slane %v555_v23, %v7053_v26  ;;  %v6081_v23 = vld [vmem:[%s8671_s7 + $0xa24] ss:$48 sps:$4 sm:$0xff]  }
  0x23   : > { %2968 = vmatpush1.bf16.msra.mxu0 %v5963_v41  ;;  %3050 = vmatpush1.bf16.msra.mxu1 %v5964_v42  ;;  %v6022_v42 = vld [vmem:[%s8671_s7 + $0x668] ss:$48 sps:$4 sm:$0xff]  }
  0x24   : > { %2969 = vmatprep.subr.bf16.mxu0 %v5965_v43  ;;  %3051 = vmatprep.subr.bf16.mxu1 %v5967_v44  ;;  %v6024_v43 = vld [vmem:[%s8671_s7 + $0x66c] ss:$48 sps:$4 sm:$0xff]  }
  0x27   : > { %2970 = vmatpush1.bf16.msra.mxu0 %v5969_v45  ;;  %3052 = vmatpush1.bf16.msra.mxu1 %v5970_v46  ;;  %v6027_v45 = vld [vmem:[%s8671_s7 + $0x6c4] ss:$48 sps:$4 sm:$0xff]   ;;  %v6030_v46 = vld [vmem:[%s8671_s7 + $0x6cc] ss:$48 sps:$4 sm:$0xff]  }
  0x28   : > { %2971 = vmatprep.subr.bf16.mxu0 %v5971_v47  ;;  %3053 = vmatprep.subr.bf16.mxu1 %v5973_v48  ;;  %v6025_v47 = vld [vmem:[%s8671_s7 + $0x6c0] ss:$48 sps:$4 sm:$0xff]   ;;  %v6028_v48 = vld [vmem:[%s8671_s7 + $0x6c8] ss:$48 sps:$4 sm:$0xff]  }
  0x2b   : > { %2972 = vmatpush1.bf16.msra.mxu0 %v5975_v49  ;;  %3054 = vmatpush1.bf16.msra.mxu1 %v5976_v50  ;;  %v6033_v49 = vld [vmem:[%s8671_s7 + $0x724] ss:$48 sps:$4 sm:$0xff]   ;;  %v6036_v50 = vld [vmem:[%s8671_s7 + $0x72c] ss:$48 sps:$4 sm:$0xff]  }
  0x2c   : > { %2973 = vmatprep.subr.bf16.mxu0 %v5977_v51  ;;  %3055 = vmatprep.subr.bf16.mxu1 %v5979_v52  ;;  %v6031_v51 = vld [vmem:[%s8671_s7 + $0x720] ss:$48 sps:$4 sm:$0xff]   ;;  %v6034_v52 = vld [vmem:[%s8671_s7 + $0x728] ss:$48 sps:$4 sm:$0xff]  }
  0x2f   : > { %2974 = vmatpush1.bf16.msra.mxu0 %v5981_v53  ;;  %3056 = vmatpush1.bf16.msra.mxu1 %v5982_v54  ;;  %v6039_v53 = vld [vmem:[%s8671_s7 + $0x784] ss:$48 sps:$4 sm:$0xff]   ;;  %v6042_v54 = vld [vmem:[%s8671_s7 + $0x78c] ss:$48 sps:$4 sm:$0xff]  }
  0x30   : > { %2975 = vmatprep.subr.bf16.mxu0 %v5983_v55  ;;  %3057 = vmatprep.subr.bf16.mxu1 %v5985_v56  ;;  %v6037_v55 = vld [vmem:[%s8671_s7 + $0x780] ss:$48 sps:$4 sm:$0xff]   ;;  %v6040_v56 = vld [vmem:[%s8671_s7 + $0x788] ss:$48 sps:$4 sm:$0xff]  }
  0x33   : > { %2976 = vmatpush1.bf16.msra.mxu0 %v5987_v57  ;;  %3058 = vmatpush1.bf16.msra.mxu1 %v5988_v58  ;;  %v6045_v57 = vld [vmem:[%s8671_s7 + $0x7e4] ss:$48 sps:$4 sm:$0xff]   ;;  %v6048_v58 = vld [vmem:[%s8671_s7 + $0x7ec] ss:$48 sps:$4 sm:$0xff]  }
  0x34   : > { %2977 = vmatprep.subr.bf16.mxu0 %v5989_v59  ;;  %3059 = vmatprep.subr.bf16.mxu1 %v5991_v60  ;;  %v6043_v59 = vld [vmem:[%s8671_s7 + $0x7e0] ss:$48 sps:$4 sm:$0xff]   ;;  %v6046_v60 = vld [vmem:[%s8671_s7 + $0x7e8] ss:$48 sps:$4 sm:$0xff]  }
  0x37   : > { %2978 = vmatpush1.bf16.msra.mxu0 %v5993_v61  ;;  %3060 = vmatpush1.bf16.msra.mxu1 %v5994_v62  ;;  %v6051_v61 = vld [vmem:[%s8671_s7 + $0x844] ss:$48 sps:$4 sm:$0xff]   ;;  %v6054_v62 = vld [vmem:[%s8671_s7 + $0x84c] ss:$48 sps:$4 sm:$0xff]  }
  0x38   : > { %2979 = vmatprep.subr.bf16.mxu0 %v5995_v63  ;;  %3061 = vmatprep.subr.bf16.mxu1 %v5997_v0  ;;  %v6049_v63 = vld [vmem:[%s8671_s7 + $0x840] ss:$48 sps:$4 sm:$0xff]   ;;  %v6052_v0 = vld [vmem:[%s8671_s7 + $0x848] ss:$48 sps:$4 sm:$0xff]  }
  0x3b   : > { %2980 = vmatpush1.bf16.msra.mxu0 %v5999_v1  ;;  %3062 = vmatpush1.bf16.msra.mxu1 %v6000_v2  ;;  %v6057_v1 = vld [vmem:[%s8671_s7 + $0x8a4] ss:$48 sps:$4 sm:$0xff]   ;;  %v6060_v2 = vld [vmem:[%s8671_s7 + $0x8ac] ss:$48 sps:$4 sm:$0xff]  }
  0x3c   : > { %2981 = vmatprep.subr.bf16.mxu0 %v6001_v3  ;;  %3063 = vmatprep.subr.bf16.mxu1 %v6003_v4  ;;  %v6055_v3 = vld [vmem:[%s8671_s7 + $0x8a0] ss:$48 sps:$4 sm:$0xff]   ;;  %v6058_v4 = vld [vmem:[%s8671_s7 + $0x8a8] ss:$48 sps:$4 sm:$0xff]  }
  0x3f   : > { %2982 = vmatpush1.bf16.msra.mxu0 %v6005_v5  ;;  %3064 = vmatpush1.bf16.msra.mxu1 %v6006_v6  ;;  %v6063_v5 = vld [vmem:[%s8671_s7 + $0x904] ss:$48 sps:$4 sm:$0xff]   ;;  %v6066_v6 = vld [vmem:[%s8671_s7 + $0x90c] ss:$48 sps:$4 sm:$0xff]  }
  0x40   : > { %2983 = vmatprep.subr.bf16.mxu0 %v6007_v7  ;;  %3065 = vmatprep.subr.bf16.mxu1 %v6009_v12  ;;  %v6061_v7 = vld [vmem:[%s8671_s7 + $0x900] ss:$48 sps:$4 sm:$0xff]   ;;  %v6064_v12 = vld [vmem:[%s8671_s7 + $0x908] ss:$48 sps:$4 sm:$0xff]  }
  0x43   : > { %2984 = vmatpush1.bf16.msra.mxu0 %v6011_v13  ;;  %3066 = vmatpush1.bf16.msra.mxu1 %v6012_v14  ;;  %v6069_v13 = vld [vmem:[%s8671_s7 + $0x964] ss:$48 sps:$4 sm:$0xff]   ;;  %v6072_v14 = vld [vmem:[%s8671_s7 + $0x96c] ss:$48 sps:$4 sm:$0xff]  }
  0x44   : > { %2994 = vmatprep.subr.bf16.mxu0 %v6015_v15  ;;  %3076 = vmatprep.subr.bf16.mxu1 %v6018_v16  ;;  %v6067_v15 = vld [vmem:[%s8671_s7 + $0x960] ss:$48 sps:$4 sm:$0xff]   ;;  %v6070_v16 = vld [vmem:[%s8671_s7 + $0x968] ss:$48 sps:$4 sm:$0xff]  }
  0xa6   : > { %v546_v17 = vpop.xlane.xlu0 %545 }
  0xa7   : > { %v548_v18 = vmul.f32 0.001953125, %v546_v17  ;;  %v6075_v17 = vld [vmem:[%s8671_s7 + $0x9c4] ss:$48 sps:$4 sm:$0xff]  }
  0xa9   : > { %v549_v20 = vadd.f32 1e-06, %v548_v18  ;;  %v6078_v18 = vld [vmem:[%s8671_s7 + $0x9cc] ss:$48 sps:$4 sm:$0xff]  }
  0xab   : > { %6703 = vrsqrt.f32 %v549_v20  ;;  %v6076_v20 = vld [vmem:[%s8671_s7 + $0x9c8] ss:$48 sps:$4 sm:$0xff]  }
  0xb5   : > { %v6704_v30 = vpop.eup %6703 }
  0xb6   : > { %v552_v32 = vmul.f32 %v6704_v30, %v6848_v9  ;;  %v551_v33 = vmul.f32 %v6704_v30, %v6845_v8  ;;  %v554_v34 = vmul.f32 %v6704_v30, %v6854_v11  ;;  %v553_v35 = vmul.f32 %v6704_v30, %v6851_v10  ;;  %v6021_v10 = vld [vmem:[%s8671_s7 + $0x664] ss:$48 sps:$4 sm:$0xff]   ;;  %v6019_v11 = vld [vmem:[%s8671_s7 + $0x660] ss:$48 sps:$4 sm:$0xff]  }
  0xb7   : > { %v6087_v30 = vld [vmem:[%s8671_s7 + $0xa84] ss:$48 sps:$4 sm:$0xff]  }
  0xb8   : > { %v578_v36 = vmul.f32 %v564_v27, %v552_v32  ;;  %v577_v39 = vmul.f32 %v560_v28, %v551_v33  ;;  %v7069_v40 = vmul.f32 %v568_v29, %v553_v35  ;;  %v580_v41 = vmul.f32 %v572_v31, %v554_v34  ;;  %v6084_v27 = vld [vmem:[%s8671_s7 + $0xa2c] ss:$48 sps:$4 sm:$0xff]   ;;  %v6079_v28 = vld [vmem:[%s8671_s7 + $0xa20] ss:$48 sps:$4 sm:$0xff]   ;;  %v6082_v29 = vld [vmem:[%s8671_s7 + $0xa28] ss:$48 sps:$4 sm:$0xff]  }
  0xb9   : > { %v6090_v31 = vld [vmem:[%s8671_s7 + $0xa8c] ss:$48 sps:$4 sm:$0xff]   ;;  %v6085_v32 = vld [vmem:[%s8671_s7 + $0xa80] ss:$48 sps:$4 sm:$0xff]   ;;  %v6088_v33 = vld [vmem:[%s8671_s7 + $0xa88] ss:$48 sps:$4 sm:$0xff]  }
  0xba   : > { %v7071_v9 = vpack.c.bf16 %v578_v36, %v578_v36  ;;  %v7073_v8 = vpack.c.bf16 %v577_v39, %v577_v39  ;;  %v7091_v44 = vpack.c.bf16 %v580_v41, %v580_v41  ;;  %v6093_v34 = vld [vmem:[%s8671_s7 + $0xae4] ss:$48 sps:$4 sm:$0xff]   ;;  %v6096_v35 = vld [vmem:[%s8671_s7 + $0xaec] ss:$48 sps:$4 sm:$0xff]   ;;  %v6091_v36 = vld [vmem:[%s8671_s7 + $0xae0] ss:$48 sps:$4 sm:$0xff]  }
  0xbb   : > { %v6102_v39 = vld [vmem:[%s8671_s7 + $0xb4c] ss:$48 sps:$4 sm:$0xff]   ;;  %v6097_v41 = vld [vmem:[%s8671_s7 + $0xb40] ss:$48 sps:$4 sm:$0xff]  }
  0xbc   : > { %2985 = vmatprep.mubr.bf16.mxu0 %v7071_v9  ;;  %3067 = vmatprep.mubr.bf16.mxu1 %v7071_v9 }
  0xbd   : > { %2986 = vmatmul.mubr.bf16.vlgmr.msra.gmra.mrb[0].mxu0 %v7073_v8  ;;  %3068 = vmatmul.mubr.bf16.vlgmr.msra.gmra.mrb[0].mxu1 %v7073_v8 }
  0xbe   : > { %2995 = vmatpush1.bf16.msra.mxu0 %v6013_v37  ;;  %3077 = vmatpush1.bf16.msra.mxu1 %v6016_v38  ;;  %v6094_v37 = vld [vmem:[%s8671_s7 + $0xae8] ss:$48 sps:$4 sm:$0xff]   ;;  %v6099_v38 = vld [vmem:[%s8671_s7 + $0xb44] ss:$48 sps:$4 sm:$0xff]  }
  0xbf   : > { %3026 = vmatprep.mubr.bf16.mxu0 %v7091_v44  ;;  %3108 = vmatprep.mubr.bf16.mxu1 %v7091_v44 }
  0xc0   : > { %2996 = vmatprep.subr.bf16.mxu0 %v6021_v10  ;;  %3078 = vmatprep.subr.bf16.mxu1 %v6024_v43  ;;  %v6100_v10 = vld [vmem:[%s8671_s7 + $0xb48] ss:$48 sps:$4 sm:$0xff]   ;;  %v6103_v43 = vld [vmem:[%s8671_s7 + $0xba0] ss:$48 sps:$4 sm:$0xff]  }
  0xc2   : > { %2997 = vmatpush1.bf16.msra.mxu0 %v6019_v11  ;;  %3079 = vmatpush1.bf16.msra.mxu1 %v6022_v42  ;;  %v6105_v11 = vld [vmem:[%s8671_s7 + $0xba4] ss:$48 sps:$4 sm:$0xff]   ;;  %v6108_v42 = vld [vmem:[%s8671_s7 + $0xbac] ss:$48 sps:$4 sm:$0xff]  }
  0xc3   : > { %2998 = vmatprep.subr.bf16.mxu0 %v6027_v45  ;;  %3080 = vmatprep.subr.bf16.mxu1 %v6030_v46  ;;  %v6106_v45 = vld [vmem:[%s8671_s7 + $0xba8] ss:$48 sps:$4 sm:$0xff]   ;;  %v6111_v46 = vld [vmem:[%s8671_s7 + $0x14] ss:$48 sps:$4 sm:$0xff]  }
  0xc6   : > { %2999 = vmatpush1.bf16.msra.mxu0 %v6025_v47  ;;  %3081 = vmatpush1.bf16.msra.mxu1 %v6028_v48  ;;  %v6114_v47 = vld [vmem:[%s8671_s7 + $0x1c] ss:$48 sps:$4 sm:$0xff]   ;;  %v6109_v48 = vld [vmem:[%s8671_s7 + $0x10] ss:$48 sps:$4 sm:$0xff]  }
  0xc7   : > { %3000 = vmatprep.subr.bf16.mxu0 %v6033_v49  ;;  %3082 = vmatprep.subr.bf16.mxu1 %v6036_v50  ;;  %v6112_v49 = vld [vmem:[%s8671_s7 + $0x18] ss:$48 sps:$4 sm:$0xff]   ;;  %v6117_v50 = vld [vmem:[%s8671_s7 + $0x74] ss:$48 sps:$4 sm:$0xff]  }
  0xca   : > { %3001 = vmatpush1.bf16.msra.mxu0 %v6031_v51  ;;  %3083 = vmatpush1.bf16.msra.mxu1 %v6034_v52  ;;  %v6120_v51 = vld [vmem:[%s8671_s7 + $0x7c] ss:$48 sps:$4 sm:$0xff]   ;;  %v7283_v52 = vpack.c.bf16 %v7069_v40, %v7069_v40  ;;  %v6123_v40 = vld [vmem:[%s8671_s7 + $0xd4] ss:$48 sps:$4 sm:$0xff]  }
  0xcb   : > { %3002 = vmatprep.subr.bf16.mxu0 %v6039_v53  ;;  %3084 = vmatprep.subr.bf16.mxu1 %v6042_v54  ;;  %v6115_v53 = vld [vmem:[%s8671_s7 + $0x70] ss:$48 sps:$4 sm:$0xff]   ;;  %v6118_v54 = vld [vmem:[%s8671_s7 + $0x78] ss:$48 sps:$4 sm:$0xff]  }
  0xce   : > { %3003 = vmatpush1.bf16.msra.mxu0 %v6037_v55  ;;  %3085 = vmatpush1.bf16.msra.mxu1 %v6040_v56  ;;  %v6126_v55 = vld [vmem:[%s8671_s7 + $0xdc] ss:$48 sps:$4 sm:$0xff]   ;;  %v6121_v56 = vld [vmem:[%s8671_s7 + $0xd0] ss:$48 sps:$4 sm:$0xff]  }
  0xcf   : > { %3004 = vmatprep.subr.bf16.mxu0 %v6045_v57  ;;  %3086 = vmatprep.subr.bf16.mxu1 %v6048_v58  ;;  %v6124_v57 = vld [vmem:[%s8671_s7 + $0xd8] ss:$48 sps:$4 sm:$0xff]   ;;  %v6129_v58 = vld [vmem:[%s8671_s7 + $0x134] ss:$48 sps:$4 sm:$0xff]  }
  0xd2   : > { %3005 = vmatpush1.bf16.msra.mxu0 %v6043_v59  ;;  %3087 = vmatpush1.bf16.msra.mxu1 %v6046_v60  ;;  %v6127_v59 = vld [vmem:[%s8671_s7 + $0x130] ss:$48 sps:$4 sm:$0xff]   ;;  %v6132_v60 = vld [vmem:[%s8671_s7 + $0x13c] ss:$48 sps:$4 sm:$0xff]  }
  0xd3   : > { %3006 = vmatprep.subr.bf16.mxu0 %v6051_v61  ;;  %3088 = vmatprep.subr.bf16.mxu1 %v6054_v62  ;;  %v6130_v61 = vld [vmem:[%s8671_s7 + $0x138] ss:$48 sps:$4 sm:$0xff]   ;;  %v6135_v62 = vld [vmem:[%s8671_s7 + $0x194] ss:$48 sps:$4 sm:$0xff]  }
  0xd6   : > { %3007 = vmatpush1.bf16.msra.mxu0 %v6049_v63  ;;  %3089 = vmatpush1.bf16.msra.mxu1 %v6052_v0  ;;  %v6133_v63 = vld [vmem:[%s8671_s7 + $0x190] ss:$48 sps:$4 sm:$0xff]   ;;  %v6138_v0 = vld [vmem:[%s8671_s7 + $0x19c] ss:$48 sps:$4 sm:$0xff]  }
  0xd7   : > { %3008 = vmatprep.subr.bf16.mxu0 %v6057_v1  ;;  %3090 = vmatprep.subr.bf16.mxu1 %v6060_v2  ;;  %v6136_v1 = vld [vmem:[%s8671_s7 + $0x198] ss:$48 sps:$4 sm:$0xff]   ;;  %v6141_v2 = vld [vmem:[%s8671_s7 + $0x1f4] ss:$48 sps:$4 sm:$0xff]  }
  0xda   : > { %3009 = vmatpush1.bf16.msra.mxu0 %v6055_v3  ;;  %3091 = vmatpush1.bf16.msra.mxu1 %v6058_v4  ;;  %v6139_v3 = vld [vmem:[%s8671_s7 + $0x1f0] ss:$48 sps:$4 sm:$0xff]   ;;  %v6144_v4 = vld [vmem:[%s8671_s7 + $0x1fc] ss:$48 sps:$4 sm:$0xff]  }
  0xdb   : > { %3010 = vmatprep.subr.bf16.mxu0 %v6063_v5  ;;  %3092 = vmatprep.subr.bf16.mxu1 %v6066_v6  ;;  %v6142_v5 = vld [vmem:[%s8671_s7 + $0x1f8] ss:$48 sps:$4 sm:$0xff]   ;;  %v6147_v6 = vld [vmem:[%s8671_s7 + $0x254] ss:$48 sps:$4 sm:$0xff]  }
  0xde   : > { %3011 = vmatpush1.bf16.msra.mxu0 %v6061_v7  ;;  %3093 = vmatpush1.bf16.msra.mxu1 %v6064_v12  ;;  %v6145_v7 = vld [vmem:[%s8671_s7 + $0x250] ss:$48 sps:$4 sm:$0xff]   ;;  %v6150_v12 = vld [vmem:[%s8671_s7 + $0x25c] ss:$48 sps:$4 sm:$0xff]  }
  0xdf   : > { %3012 = vmatprep.subr.bf16.mxu0 %v6069_v13  ;;  %3094 = vmatprep.subr.bf16.mxu1 %v6072_v14  ;;  %v6148_v13 = vld [vmem:[%s8671_s7 + $0x258] ss:$48 sps:$4 sm:$0xff]   ;;  %v6153_v14 = vld [vmem:[%s8671_s7 + $0x2b4] ss:$48 sps:$4 sm:$0xff]  }
  0xe2   : > { %3013 = vmatpush1.bf16.msra.mxu0 %v6067_v15  ;;  %3095 = vmatpush1.bf16.msra.mxu1 %v6070_v16  ;;  %v6156_v15 = vld [vmem:[%s8671_s7 + $0x2bc] ss:$48 sps:$4 sm:$0xff]   ;;  %v6151_v16 = vld [vmem:[%s8671_s7 + $0x2b0] ss:$48 sps:$4 sm:$0xff]  }
  0xe3   : > { %3014 = vmatprep.subr.bf16.mxu0 %v6075_v17  ;;  %3096 = vmatprep.subr.bf16.mxu1 %v6078_v18  ;;  %v6154_v17 = vld [vmem:[%s8671_s7 + $0x2b8] ss:$48 sps:$4 sm:$0xff]   ;;  %v6159_v18 = vld [vmem:[%s8671_s7 + $0x314] ss:$48 sps:$4 sm:$0xff]  }
  0xe6   : > { %3015 = vmatpush1.bf16.msra.mxu0 %v6073_v19  ;;  %3097 = vmatpush1.bf16.msra.mxu1 %v6076_v20  ;;  %v6162_v19 = vld [vmem:[%s8671_s7 + $0x31c] ss:$48 sps:$4 sm:$0xff]   ;;  %v6157_v20 = vld [vmem:[%s8671_s7 + $0x310] ss:$48 sps:$4 sm:$0xff]  }
  0xe7   : > { %3016 = vmatprep.subr.bf16.mxu0 %v6081_v23  ;;  %3098 = vmatprep.subr.bf16.mxu1 %v6084_v27  ;;  %v6160_v23 = vld [vmem:[%s8671_s7 + $0x318] ss:$48 sps:$4 sm:$0xff]   ;;  %v6165_v27 = vld [vmem:[%s8671_s7 + $0x374] ss:$48 sps:$4 sm:$0xff]  }
  0xea   : > { %3017 = vmatpush1.bf16.msra.mxu0 %v6079_v28  ;;  %3099 = vmatpush1.bf16.msra.mxu1 %v6082_v29  ;;  %v6168_v28 = vld [vmem:[%s8671_s7 + $0x37c] ss:$48 sps:$4 sm:$0xff]   ;;  %v6163_v29 = vld [vmem:[%s8671_s7 + $0x370] ss:$48 sps:$4 sm:$0xff]  }
  0xeb   : > { %3018 = vmatprep.subr.bf16.mxu0 %v6087_v30  ;;  %3100 = vmatprep.subr.bf16.mxu1 %v6090_v31  ;;  %v6166_v30 = vld [vmem:[%s8671_s7 + $0x378] ss:$48 sps:$4 sm:$0xff]   ;;  %v6171_v31 = vld [vmem:[%s8671_s7 + $0x3d4] ss:$48 sps:$4 sm:$0xff]  }
  0xee   : > { %3019 = vmatpush1.bf16.msra.mxu0 %v6085_v32  ;;  %3101 = vmatpush1.bf16.msra.mxu1 %v6088_v33  ;;  %v6174_v32 = vld [vmem:[%s8671_s7 + $0x3dc] ss:$48 sps:$4 sm:$0xff]   ;;  %v6169_v33 = vld [vmem:[%s8671_s7 + $0x3d0] ss:$48 sps:$4 sm:$0xff]  }
  0xef   : > { %3020 = vmatprep.subr.bf16.mxu0 %v6093_v34  ;;  %3102 = vmatprep.subr.bf16.mxu1 %v6096_v35  ;;  %v6172_v34 = vld [vmem:[%s8671_s7 + $0x3d8] ss:$48 sps:$4 sm:$0xff]   ;;  %v6177_v35 = vld [vmem:[%s8671_s7 + $0x434] ss:$48 sps:$4 sm:$0xff]  }
  0xf2   : > { %3021 = vmatpush1.bf16.msra.mxu0 %v6091_v36  ;;  %3103 = vmatpush1.bf16.msra.mxu1 %v6094_v37  ;;  %v6180_v36 = vld [vmem:[%s8671_s7 + $0x43c] ss:$48 sps:$4 sm:$0xff]   ;;  %v6175_v37 = vld [vmem:[%s8671_s7 + $0x430] ss:$48 sps:$4 sm:$0xff]  }
  0xf3   : > { %3022 = vmatprep.subr.bf16.mxu0 %v6099_v38  ;;  %3104 = vmatprep.subr.bf16.mxu1 %v6102_v39  ;;  %v6178_v38 = vld [vmem:[%s8671_s7 + $0x438] ss:$48 sps:$4 sm:$0xff]   ;;  %v6183_v39 = vld [vmem:[%s8671_s7 + $0x494] ss:$48 sps:$4 sm:$0xff]  }
  0xf6   : > { %3023 = vmatpush1.bf16.msra.mxu0 %v6097_v41  ;;  %3105 = vmatpush1.bf16.msra.mxu1 %v6100_v10  ;;  %v6186_v41 = vld [vmem:[%s8671_s7 + $0x49c] ss:$48 sps:$4 sm:$0xff]   ;;  %v6181_v10 = vld [vmem:[%s8671_s7 + $0x490] ss:$48 sps:$4 sm:$0xff]  }
  0xf7   : > { %3024 = vmatprep.subr.bf16.mxu0 %v6105_v11  ;;  %3106 = vmatprep.subr.bf16.mxu1 %v6108_v42  ;;  %v6184_v11 = vld [vmem:[%s8671_s7 + $0x498] ss:$48 sps:$4 sm:$0xff]   ;;  %v6189_v42 = vld [vmem:[%s8671_s7 + $0x4f4] ss:$48 sps:$4 sm:$0xff]  }
  0xfa   : > { %3025 = vmatpush1.bf16.msra.mxu0 %v6103_v43  ;;  %3107 = vmatpush1.bf16.msra.mxu1 %v6106_v45  ;;  %v6192_v43 = vld [vmem:[%s8671_s7 + $0x4fc] ss:$48 sps:$4 sm:$0xff]   ;;  %v6187_v45 = vld [vmem:[%s8671_s7 + $0x4f0] ss:$48 sps:$4 sm:$0xff]  }
  0xfb   : > { %3117 = vmatprep.subr.bf16.mxu0 %v6111_v46  ;;  %3199 = vmatprep.subr.bf16.mxu1 %v6114_v47  ;;  %v6190_v46 = vld [vmem:[%s8671_s7 + $0x4f8] ss:$48 sps:$4 sm:$0xff]   ;;  %v6195_v47 = vld [vmem:[%s8671_s7 + $0x554] ss:$48 sps:$4 sm:$0xff]  }
  0xfd   : > { %3027 = vmatmul.mubr.bf16.vlgmr.msra.gmra.mrb[0].mxu0 %v7283_v52  ;;  %3109 = vmatmul.mubr.bf16.vlgmr.msra.gmra.mrb[0].mxu1 %v7283_v52 }
  0xfe   : > { %3118 = vmatpush1.bf16.msra.mxu0 %v6109_v48  ;;  %3149 = vmatprep.mubr.bf16.mxu0 %v7071_v9  ;;  %v6198_v48 = vld [vmem:[%s8671_s7 + $0x55c] ss:$48 sps:$4 sm:$0xff]  }
  0xff   : > { %3200 = vmatpush1.bf16.msra.mxu1 %v6112_v49  ;;  %3231 = vmatprep.mubr.bf16.mxu1 %v7071_v9  ;;  %v6193_v49 = vld [vmem:[%s8671_s7 + $0x550] ss:$48 sps:$4 sm:$0xff]  }
 0x100   : > { %3119 = vmatprep.subr.bf16.mxu0 %v6117_v50  ;;  %3201 = vmatprep.subr.bf16.mxu1 %v6120_v51  ;;  %v6196_v50 = vld [vmem:[%s8671_s7 + $0x558] ss:$48 sps:$4 sm:$0xff]   ;;  %v6201_v51 = vld [vmem:[%s8671_s7 + $0x5b4] ss:$48 sps:$4 sm:$0xff]  }
 0x102   : > { %3120 = vmatpush1.bf16.msra.mxu0 %v6115_v53  ;;  %v6204_v53 = vld [vmem:[%s8671_s7 + $0x5bc] ss:$48 sps:$4 sm:$0xff]  }
 0x103   : > { %3202 = vmatpush1.bf16.msra.mxu1 %v6118_v54  ;;  %3121 = vmatprep.subr.bf16.mxu0 %v6123_v40  ;;  %v6199_v54 = vld [vmem:[%s8671_s7 + $0x5b0] ss:$48 sps:$4 sm:$0xff]   ;;  %v6202_v40 = vld [vmem:[%s8671_s7 + $0x5b8] ss:$48 sps:$4 sm:$0xff]  }
 0x104   : > { %3203 = vmatprep.subr.bf16.mxu1 %v6126_v55  ;;  %v6207_v55 = vld [vmem:[%s8671_s7 + $0x614] ss:$48 sps:$4 sm:$0xff]  }
 0x106   : > { %3122 = vmatpush1.bf16.msra.mxu0 %v6121_v56  ;;  %v6210_v56 = vld [vmem:[%s8671_s7 + $0x61c] ss:$48 sps:$4 sm:$0xff]  }
 0x107   : > { %3204 = vmatpush1.bf16.msra.mxu1 %v6124_v57  ;;  %3123 = vmatprep.subr.bf16.mxu0 %v6129_v58  ;;  %v6205_v57 = vld [vmem:[%s8671_s7 + $0x610] ss:$48 sps:$4 sm:$0xff]   ;;  %v6208_v58 = vld [vmem:[%s8671_s7 + $0x618] ss:$48 sps:$4 sm:$0xff]  }
 0x108   : > { %3205 = vmatprep.subr.bf16.mxu1 %v6132_v60  ;;  %v6216_v60 = vld [vmem:[%s8671_s7 + $0x67c] ss:$48 sps:$4 sm:$0xff]  }
 0x10a   : > { %3124 = vmatpush1.bf16.msra.mxu0 %v6127_v59  ;;  %v6213_v59 = vld [vmem:[%s8671_s7 + $0x674] ss:$48 sps:$4 sm:$0xff]  }
 0x10b   : > { %3206 = vmatpush1.bf16.msra.mxu1 %v6130_v61  ;;  %3125 = vmatprep.subr.bf16.mxu0 %v6135_v62  ;;  %v6211_v61 = vld [vmem:[%s8671_s7 + $0x670] ss:$48 sps:$4 sm:$0xff]   ;;  %v6214_v62 = vld [vmem:[%s8671_s7 + $0x678] ss:$48 sps:$4 sm:$0xff]  }
 0x10c   : > { %3207 = vmatprep.subr.bf16.mxu1 %v6138_v0  ;;  %v6222_v0 = vld [vmem:[%s8671_s7 + $0x6dc] ss:$48 sps:$4 sm:$0xff]  }
 0x10e   : > { %3126 = vmatpush1.bf16.msra.mxu0 %v6133_v63  ;;  %v6219_v63 = vld [vmem:[%s8671_s7 + $0x6d4] ss:$48 sps:$4 sm:$0xff]  }
 0x10f   : > { %3208 = vmatpush1.bf16.msra.mxu1 %v6136_v1  ;;  %3127 = vmatprep.subr.bf16.mxu0 %v6141_v2  ;;  %v6217_v1 = vld [vmem:[%s8671_s7 + $0x6d0] ss:$48 sps:$4 sm:$0xff]   ;;  %v6220_v2 = vld [vmem:[%s8671_s7 + $0x6d8] ss:$48 sps:$4 sm:$0xff]  }
 0x110   : > { %3209 = vmatprep.subr.bf16.mxu1 %v6144_v4  ;;  %v6228_v4 = vld [vmem:[%s8671_s7 + $0x73c] ss:$48 sps:$4 sm:$0xff]  }
 0x112   : > { %3128 = vmatpush1.bf16.msra.mxu0 %v6139_v3  ;;  %v6225_v3 = vld [vmem:[%s8671_s7 + $0x734] ss:$48 sps:$4 sm:$0xff]  }
 0x113   : > { %3210 = vmatpush1.bf16.msra.mxu1 %v6142_v5  ;;  %3129 = vmatprep.subr.bf16.mxu0 %v6147_v6  ;;  %v6223_v5 = vld [vmem:[%s8671_s7 + $0x730] ss:$48 sps:$4 sm:$0xff]   ;;  %v6226_v6 = vld [vmem:[%s8671_s7 + $0x738] ss:$48 sps:$4 sm:$0xff]  }
 0x114   : > { %3211 = vmatprep.subr.bf16.mxu1 %v6150_v12  ;;  %v6234_v12 = vld [vmem:[%s8671_s7 + $0x79c] ss:$48 sps:$4 sm:$0xff]  }
 0x116   : > { %3130 = vmatpush1.bf16.msra.mxu0 %v6145_v7  ;;  %v6231_v7 = vld [vmem:[%s8671_s7 + $0x794] ss:$48 sps:$4 sm:$0xff]  }
 0x117   : > { %3212 = vmatpush1.bf16.msra.mxu1 %v6148_v13  ;;  %3131 = vmatprep.subr.bf16.mxu0 %v6153_v14  ;;  %v6229_v13 = vld [vmem:[%s8671_s7 + $0x790] ss:$48 sps:$4 sm:$0xff]   ;;  %v6232_v14 = vld [vmem:[%s8671_s7 + $0x798] ss:$48 sps:$4 sm:$0xff]  }
 0x118   : > { %3213 = vmatprep.subr.bf16.mxu1 %v6156_v15  ;;  %v6237_v15 = vld [vmem:[%s8671_s7 + $0x7f4] ss:$48 sps:$4 sm:$0xff]  }
 0x11a   : > { %3132 = vmatpush1.bf16.msra.mxu0 %v6151_v16  ;;  %v6240_v16 = vld [vmem:[%s8671_s7 + $0x7fc] ss:$48 sps:$4 sm:$0xff]  }
 0x11b   : > { %3214 = vmatpush1.bf16.msra.mxu1 %v6154_v17  ;;  %3133 = vmatprep.subr.bf16.mxu0 %v6159_v18  ;;  %v6235_v17 = vld [vmem:[%s8671_s7 + $0x7f0] ss:$48 sps:$4 sm:$0xff]   ;;  %v6238_v18 = vld [vmem:[%s8671_s7 + $0x7f8] ss:$48 sps:$4 sm:$0xff]  }
 0x11c   : > { %3215 = vmatprep.subr.bf16.mxu1 %v6162_v19  ;;  %v6243_v19 = vld [vmem:[%s8671_s7 + $0x854] ss:$48 sps:$4 sm:$0xff]  }
 0x11e   : > { %3134 = vmatpush1.bf16.msra.mxu0 %v6157_v20  ;;  %v6246_v20 = vld [vmem:[%s8671_s7 + $0x85c] ss:$48 sps:$4 sm:$0xff]  }
 0x11f   : > { %3216 = vmatpush1.bf16.msra.mxu1 %v6160_v23  ;;  %3135 = vmatprep.subr.bf16.mxu0 %v6165_v27  ;;  %v6241_v23 = vld [vmem:[%s8671_s7 + $0x850] ss:$48 sps:$4 sm:$0xff]   ;;  %v6244_v27 = vld [vmem:[%s8671_s7 + $0x858] ss:$48 sps:$4 sm:$0xff]  }
 0x120   : > { %3217 = vmatprep.subr.bf16.mxu1 %v6168_v28  ;;  %v6249_v28 = vld [vmem:[%s8671_s7 + $0x8b4] ss:$48 sps:$4 sm:$0xff]  }
 0x122   : > { %3136 = vmatpush1.bf16.msra.mxu0 %v6163_v29  ;;  %v6252_v29 = vld [vmem:[%s8671_s7 + $0x8bc] ss:$48 sps:$4 sm:$0xff]  }
 0x123   : > { %3218 = vmatpush1.bf16.msra.mxu1 %v6166_v30  ;;  %3137 = vmatprep.subr.bf16.mxu0 %v6171_v31  ;;  %v6247_v30 = vld [vmem:[%s8671_s7 + $0x8b0] ss:$48 sps:$4 sm:$0xff]   ;;  %v6250_v31 = vld [vmem:[%s8671_s7 + $0x8b8] ss:$48 sps:$4 sm:$0xff]  }
 0x124   : > { %3219 = vmatprep.subr.bf16.mxu1 %v6174_v32  ;;  %v6255_v32 = vld [vmem:[%s8671_s7 + $0x914] ss:$48 sps:$4 sm:$0xff]  }
 0x126   : > { %3138 = vmatpush1.bf16.msra.mxu0 %v6169_v33  ;;  %v6258_v33 = vld [vmem:[%s8671_s7 + $0x91c] ss:$48 sps:$4 sm:$0xff]  }
 0x127   : > { %3220 = vmatpush1.bf16.msra.mxu1 %v6172_v34  ;;  %3139 = vmatprep.subr.bf16.mxu0 %v6177_v35  ;;  %v6253_v34 = vld [vmem:[%s8671_s7 + $0x910] ss:$48 sps:$4 sm:$0xff]   ;;  %v6256_v35 = vld [vmem:[%s8671_s7 + $0x918] ss:$48 sps:$4 sm:$0xff]  }
 0x128   : > { %3221 = vmatprep.subr.bf16.mxu1 %v6180_v36  ;;  %v6261_v36 = vld [vmem:[%s8671_s7 + $0x974] ss:$48 sps:$4 sm:$0xff]  }
 0x12a   : > { %3140 = vmatpush1.bf16.msra.mxu0 %v6175_v37  ;;  %v6264_v37 = vld [vmem:[%s8671_s7 + $0x97c] ss:$48 sps:$4 sm:$0xff]  }
 0x12b   : > { %3222 = vmatpush1.bf16.msra.mxu1 %v6178_v38  ;;  %3141 = vmatprep.subr.bf16.mxu0 %v6183_v39  ;;  %v6259_v38 = vld [vmem:[%s8671_s7 + $0x970] ss:$48 sps:$4 sm:$0xff]   ;;  %v6262_v39 = vld [vmem:[%s8671_s7 + $0x978] ss:$48 sps:$4 sm:$0xff]  }
 0x12c   : > { %3223 = vmatprep.subr.bf16.mxu1 %v6186_v41  ;;  %v6267_v41 = vld [vmem:[%s8671_s7 + $0x9d4] ss:$48 sps:$4 sm:$0xff]  }
 0x12e   : > { %3142 = vmatpush1.bf16.msra.mxu0 %v6181_v10  ;;  %v6270_v10 = vld [vmem:[%s8671_s7 + $0x9dc] ss:$48 sps:$4 sm:$0xff]  }
 0x12f   : > { %3224 = vmatpush1.bf16.msra.mxu1 %v6184_v11  ;;  %3143 = vmatprep.subr.bf16.mxu0 %v6189_v42  ;;  %v6265_v11 = vld [vmem:[%s8671_s7 + $0x9d0] ss:$48 sps:$4 sm:$0xff]   ;;  %v6268_v42 = vld [vmem:[%s8671_s7 + $0x9d8] ss:$48 sps:$4 sm:$0xff]  }
 0x130   : > { %3225 = vmatprep.subr.bf16.mxu1 %v6192_v43  ;;  %v6273_v43 = vld [vmem:[%s8671_s7 + $0xa34] ss:$48 sps:$4 sm:$0xff]  }
 0x132   : > { %3144 = vmatpush1.bf16.msra.mxu0 %v6187_v45  ;;  %v6276_v45 = vld [vmem:[%s8671_s7 + $0xa3c] ss:$48 sps:$4 sm:$0xff]  }
 0x133   : > { %3226 = vmatpush1.bf16.msra.mxu1 %v6190_v46  ;;  %3145 = vmatprep.subr.bf16.mxu0 %v6195_v47  ;;  %v6271_v46 = vld [vmem:[%s8671_s7 + $0xa30] ss:$48 sps:$4 sm:$0xff]   ;;  %v6274_v47 = vld [vmem:[%s8671_s7 + $0xa38] ss:$48 sps:$4 sm:$0xff]  }
 0x134   : > { %3227 = vmatprep.subr.bf16.mxu1 %v6198_v48  ;;  %v6279_v48 = vld [vmem:[%s8671_s7 + $0xa94] ss:$48 sps:$4 sm:$0xff]  }
 0x136   : > { %3146 = vmatpush1.bf16.msra.mxu0 %v6193_v49  ;;  %v6282_v49 = vld [vmem:[%s8671_s7 + $0xa9c] ss:$48 sps:$4 sm:$0xff]  }
 0x137   : > { %3228 = vmatpush1.bf16.msra.mxu1 %v6196_v50  ;;  %3147 = vmatprep.subr.bf16.mxu0 %v6201_v51  ;;  %v6277_v50 = vld [vmem:[%s8671_s7 + $0xa90] ss:$48 sps:$4 sm:$0xff]   ;;  %v6280_v51 = vld [vmem:[%s8671_s7 + $0xa98] ss:$48 sps:$4 sm:$0xff]  }
 0x138   : > { %3229 = vmatprep.subr.bf16.mxu1 %v6204_v53  ;;  %v6285_v53 = vld [vmem:[%s8671_s7 + $0xaf4] ss:$48 sps:$4 sm:$0xff]  }
 0x13a   : > { %3148 = vmatpush1.bf16.msra.mxu0 %v6199_v54  ;;  %v6288_v54 = vld [vmem:[%s8671_s7 + $0xafc] ss:$48 sps:$4 sm:$0xff]  }
 0x13b   : > { %3230 = vmatpush1.bf16.msra.mxu1 %v6202_v40  ;;  %3158 = vmatprep.subr.bf16.mxu0 %v6207_v55  ;;  %v6283_v40 = vld [vmem:[%s8671_s7 + $0xaf0] ss:$48 sps:$4 sm:$0xff]   ;;  %v6286_v55 = vld [vmem:[%s8671_s7 + $0xaf8] ss:$48 sps:$4 sm:$0xff]  }
 0x13c   : > { %3240 = vmatprep.subr.bf16.mxu1 %v6210_v56  ;;  %v6291_v56 = vld [vmem:[%s8671_s7 + $0xb54] ss:$48 sps:$4 sm:$0xff]  }
 0x13d   : > { %3150 = vmatmul.mubr.bf16.vlgmr.msra.gmra.mrb[4].mxu0 %v7073_v8 }
 0x13e   : > { %3232 = vmatmul.mubr.bf16.vlgmr.msra.gmra.mrb[4].mxu1 %v7073_v8  ;;  %3159 = vmatpush1.bf16.msra.mxu0 %v6205_v57  ;;  %v6294_v57 = vld [vmem:[%s8671_s7 + $0xb5c] ss:$48 sps:$4 sm:$0xff]  }
 0x13f   : > { %3190 = vmatprep.mubr.bf16.mxu0 %v7091_v44  ;;  %3241 = vmatpush1.bf16.msra.mxu1 %v6208_v58  ;;  %v6289_v58 = vld [vmem:[%s8671_s7 + $0xb50] ss:$48 sps:$4 sm:$0xff]  }
 0x140   : > { %3272 = vmatprep.mubr.bf16.mxu1 %v7091_v44  ;;  %3160 = vmatprep.subr.bf16.mxu0 %v6213_v59  ;;  %v6292_v59 = vld [vmem:[%s8671_s7 + $0xb58] ss:$48 sps:$4 sm:$0xff]  }
 0x141   : > { %3242 = vmatprep.subr.bf16.mxu1 %v6216_v60  ;;  %v6297_v60 = vld [vmem:[%s8671_s7 + $0xbb4] ss:$48 sps:$4 sm:$0xff]  }
 0x142   : > { %3161 = vmatpush1.bf16.msra.mxu0 %v6211_v61  ;;  %v6300_v61 = vld [vmem:[%s8671_s7 + $0xbbc] ss:$48 sps:$4 sm:$0xff]  }
 0x143   : > { %3243 = vmatpush1.bf16.msra.mxu1 %v6214_v62  ;;  %3162 = vmatprep.subr.bf16.mxu0 %v6219_v63  ;;  %v6295_v62 = vld [vmem:[%s8671_s7 + $0xbb0] ss:$48 sps:$4 sm:$0xff]   ;;  %v6298_v63 = vld [vmem:[%s8671_s7 + $0xbb8] ss:$48 sps:$4 sm:$0xff]  }
 0x144   : > { %3244 = vmatprep.subr.bf16.mxu1 %v6222_v0  ;;  %v6303_v0 = vld [vmem:[%s8671_s7 + $0x24] ss:$48 sps:$4 sm:$0xff]  }
 0x146   : > { %3163 = vmatpush1.bf16.msra.mxu0 %v6217_v1  ;;  %v6306_v1 = vld [vmem:[%s8671_s7 + $0x2c] ss:$48 sps:$4 sm:$0xff]  }
 0x147   : > { %3245 = vmatpush1.bf16.msra.mxu1 %v6220_v2  ;;  %3164 = vmatprep.subr.bf16.mxu0 %v6225_v3  ;;  %v6301_v2 = vld [vmem:[%s8671_s7 + $0x20] ss:$48 sps:$4 sm:$0xff]   ;;  %v6304_v3 = vld [vmem:[%s8671_s7 + $0x28] ss:$48 sps:$4 sm:$0xff]  }
 0x148   : > { %3246 = vmatprep.subr.bf16.mxu1 %v6228_v4  ;;  %v6309_v4 = vld [vmem:[%s8671_s7 + $0x84] ss:$48 sps:$4 sm:$0xff]  }
 0x14a   : > { %3165 = vmatpush1.bf16.msra.mxu0 %v6223_v5  ;;  %v6312_v5 = vld [vmem:[%s8671_s7 + $0x8c] ss:$48 sps:$4 sm:$0xff]  }
 0x14b   : > { %3247 = vmatpush1.bf16.msra.mxu1 %v6226_v6  ;;  %3166 = vmatprep.subr.bf16.mxu0 %v6231_v7  ;;  %v6307_v6 = vld [vmem:[%s8671_s7 + $0x80] ss:$48 sps:$4 sm:$0xff]   ;;  %v6310_v7 = vld [vmem:[%s8671_s7 + $0x88] ss:$48 sps:$4 sm:$0xff]  }
 0x14c   : > { %3248 = vmatprep.subr.bf16.mxu1 %v6234_v12  ;;  %v6315_v12 = vld [vmem:[%s8671_s7 + $0xe4] ss:$48 sps:$4 sm:$0xff]  }
 0x14e   : > { %3167 = vmatpush1.bf16.msra.mxu0 %v6229_v13  ;;  %v6318_v13 = vld [vmem:[%s8671_s7 + $0xec] ss:$48 sps:$4 sm:$0xff]  }
 0x14f   : > { %3249 = vmatpush1.bf16.msra.mxu1 %v6232_v14  ;;  %3168 = vmatprep.subr.bf16.mxu0 %v6237_v15  ;;  %v6313_v14 = vld [vmem:[%s8671_s7 + $0xe0] ss:$48 sps:$4 sm:$0xff]   ;;  %v6316_v15 = vld [vmem:[%s8671_s7 + $0xe8] ss:$48 sps:$4 sm:$0xff]  }
 0x150   : > { %3250 = vmatprep.subr.bf16.mxu1 %v6240_v16  ;;  %v6324_v16 = vld [vmem:[%s8671_s7 + $0x14c] ss:$48 sps:$4 sm:$0xff]  }
 0x152   : > { %3169 = vmatpush1.bf16.msra.mxu0 %v6235_v17  ;;  %v6319_v17 = vld [vmem:[%s8671_s7 + $0x140] ss:$48 sps:$4 sm:$0xff]  }
 0x153   : > { %3251 = vmatpush1.bf16.msra.mxu1 %v6238_v18  ;;  %3170 = vmatprep.subr.bf16.mxu0 %v6243_v19  ;;  %v6322_v18 = vld [vmem:[%s8671_s7 + $0x148] ss:$48 sps:$4 sm:$0xff]   ;;  %v6327_v19 = vld [vmem:[%s8671_s7 + $0x1a4] ss:$48 sps:$4 sm:$0xff]  }
 0x154   : > { %3252 = vmatprep.subr.bf16.mxu1 %v6246_v20  ;;  %v6330_v20 = vld [vmem:[%s8671_s7 + $0x1ac] ss:$48 sps:$4 sm:$0xff]  }
 0x156   : > { %3171 = vmatpush1.bf16.msra.mxu0 %v6241_v23  ;;  %v6325_v23 = vld [vmem:[%s8671_s7 + $0x1a0] ss:$48 sps:$4 sm:$0xff]  }
 0x157   : > { %3253 = vmatpush1.bf16.msra.mxu1 %v6244_v27  ;;  %3172 = vmatprep.subr.bf16.mxu0 %v6249_v28  ;;  %v6328_v27 = vld [vmem:[%s8671_s7 + $0x1a8] ss:$48 sps:$4 sm:$0xff]   ;;  %v6333_v28 = vld [vmem:[%s8671_s7 + $0x204] ss:$48 sps:$4 sm:$0xff]  }
 0x158   : > { %3254 = vmatprep.subr.bf16.mxu1 %v6252_v29  ;;  %v6336_v29 = vld [vmem:[%s8671_s7 + $0x20c] ss:$48 sps:$4 sm:$0xff]  }
 0x15a   : > { %3173 = vmatpush1.bf16.msra.mxu0 %v6247_v30  ;;  %v6331_v30 = vld [vmem:[%s8671_s7 + $0x200] ss:$48 sps:$4 sm:$0xff]  }
 0x15b   : > { %3255 = vmatpush1.bf16.msra.mxu1 %v6250_v31  ;;  %3174 = vmatprep.subr.bf16.mxu0 %v6255_v32  ;;  %v6334_v31 = vld [vmem:[%s8671_s7 + $0x208] ss:$48 sps:$4 sm:$0xff]   ;;  %v6339_v32 = vld [vmem:[%s8671_s7 + $0x264] ss:$48 sps:$4 sm:$0xff]  }
 0x15c   : > { %3256 = vmatprep.subr.bf16.mxu1 %v6258_v33  ;;  %v6342_v33 = vld [vmem:[%s8671_s7 + $0x26c] ss:$48 sps:$4 sm:$0xff]  }
 0x15e   : > { %3175 = vmatpush1.bf16.msra.mxu0 %v6253_v34  ;;  %v6337_v34 = vld [vmem:[%s8671_s7 + $0x260] ss:$48 sps:$4 sm:$0xff]  }
 0x15f   : > { %3257 = vmatpush1.bf16.msra.mxu1 %v6256_v35  ;;  %3176 = vmatprep.subr.bf16.mxu0 %v6261_v36  ;;  %v6340_v35 = vld [vmem:[%s8671_s7 + $0x268] ss:$48 sps:$4 sm:$0xff]   ;;  %v6345_v36 = vld [vmem:[%s8671_s7 + $0x2c4] ss:$48 sps:$4 sm:$0xff]  }
 0x160   : > { %3258 = vmatprep.subr.bf16.mxu1 %v6264_v37  ;;  %v6348_v37 = vld [vmem:[%s8671_s7 + $0x2cc] ss:$48 sps:$4 sm:$0xff]  }
 0x162   : > { %3177 = vmatpush1.bf16.msra.mxu0 %v6259_v38  ;;  %v6343_v38 = vld [vmem:[%s8671_s7 + $0x2c0] ss:$48 sps:$4 sm:$0xff]  }
 0x163   : > { %3259 = vmatpush1.bf16.msra.mxu1 %v6262_v39  ;;  %3178 = vmatprep.subr.bf16.mxu0 %v6267_v41  ;;  %v6346_v39 = vld [vmem:[%s8671_s7 + $0x2c8] ss:$48 sps:$4 sm:$0xff]   ;;  %v6351_v41 = vld [vmem:[%s8671_s7 + $0x324] ss:$48 sps:$4 sm:$0xff]  }
 0x164   : > { %3260 = vmatprep.subr.bf16.mxu1 %v6270_v10  ;;  %v6354_v10 = vld [vmem:[%s8671_s7 + $0x32c] ss:$48 sps:$4 sm:$0xff]  }
 0x166   : > { %3179 = vmatpush1.bf16.msra.mxu0 %v6265_v11  ;;  %v6349_v11 = vld [vmem:[%s8671_s7 + $0x320] ss:$48 sps:$4 sm:$0xff]  }
 0x167   : > { %3261 = vmatpush1.bf16.msra.mxu1 %v6268_v42  ;;  %3180 = vmatprep.subr.bf16.mxu0 %v6273_v43  ;;  %v6352_v42 = vld [vmem:[%s8671_s7 + $0x328] ss:$48 sps:$4 sm:$0xff]   ;;  %v6357_v43 = vld [vmem:[%s8671_s7 + $0x384] ss:$48 sps:$4 sm:$0xff]  }
 0x168   : > { %3262 = vmatprep.subr.bf16.mxu1 %v6276_v45  ;;  %v6360_v45 = vld [vmem:[%s8671_s7 + $0x38c] ss:$48 sps:$4 sm:$0xff]  }
 0x16a   : > { %3181 = vmatpush1.bf16.msra.mxu0 %v6271_v46  ;;  %v6355_v46 = vld [vmem:[%s8671_s7 + $0x380] ss:$48 sps:$4 sm:$0xff]  }
 0x16b   : > { %3263 = vmatpush1.bf16.msra.mxu1 %v6274_v47  ;;  %3182 = vmatprep.subr.bf16.mxu0 %v6279_v48  ;;  %v6358_v47 = vld [vmem:[%s8671_s7 + $0x388] ss:$48 sps:$4 sm:$0xff]   ;;  %v6363_v48 = vld [vmem:[%s8671_s7 + $0x3e4] ss:$48 sps:$4 sm:$0xff]  }
 0x16c   : > { %3264 = vmatprep.subr.bf16.mxu1 %v6282_v49  ;;  %v6366_v49 = vld [vmem:[%s8671_s7 + $0x3ec] ss:$48 sps:$4 sm:$0xff]  }
 0x16e   : > { %3183 = vmatpush1.bf16.msra.mxu0 %v6277_v50  ;;  %v6361_v50 = vld [vmem:[%s8671_s7 + $0x3e0] ss:$48 sps:$4 sm:$0xff]  }
 0x16f   : > { %3265 = vmatpush1.bf16.msra.mxu1 %v6280_v51  ;;  %3184 = vmatprep.subr.bf16.mxu0 %v6285_v53  ;;  %v6364_v51 = vld [vmem:[%s8671_s7 + $0x3e8] ss:$48 sps:$4 sm:$0xff]   ;;  %v6369_v53 = vld [vmem:[%s8671_s7 + $0x444] ss:$48 sps:$4 sm:$0xff]  }
 0x170   : > { %3266 = vmatprep.subr.bf16.mxu1 %v6288_v54  ;;  %v6372_v54 = vld [vmem:[%s8671_s7 + $0x44c] ss:$48 sps:$4 sm:$0xff]  }
 0x172   : > { %3185 = vmatpush1.bf16.msra.mxu0 %v6283_v40  ;;  %v6367_v40 = vld [vmem:[%s8671_s7 + $0x440] ss:$48 sps:$4 sm:$0xff]  }
 0x173   : > { %3267 = vmatpush1.bf16.msra.mxu1 %v6286_v55  ;;  %3186 = vmatprep.subr.bf16.mxu0 %v6291_v56  ;;  %v6370_v55 = vld [vmem:[%s8671_s7 + $0x448] ss:$48 sps:$4 sm:$0xff]   ;;  %v6375_v56 = vld [vmem:[%s8671_s7 + $0x4a4] ss:$48 sps:$4 sm:$0xff]  }
 0x174   : > { %3268 = vmatprep.subr.bf16.mxu1 %v6294_v57  ;;  %v6378_v57 = vld [vmem:[%s8671_s7 + $0x4ac] ss:$48 sps:$4 sm:$0xff]  }
 0x176   : > { %3187 = vmatpush1.bf16.msra.mxu0 %v6289_v58  ;;  %v6373_v58 = vld [vmem:[%s8671_s7 + $0x4a0] ss:$48 sps:$4 sm:$0xff]  }
 0x177   : > { %3269 = vmatpush1.bf16.msra.mxu1 %v6292_v59  ;;  %3188 = vmatprep.subr.bf16.mxu0 %v6297_v60  ;;  %v6376_v59 = vld [vmem:[%s8671_s7 + $0x4a8] ss:$48 sps:$4 sm:$0xff]   ;;  %v6381_v60 = vld [vmem:[%s8671_s7 + $0x504] ss:$48 sps:$4 sm:$0xff]  }
 0x178   : > { %3270 = vmatprep.subr.bf16.mxu1 %v6300_v61  ;;  %v6384_v61 = vld [vmem:[%s8671_s7 + $0x50c] ss:$48 sps:$4 sm:$0xff]  }
 0x17a   : > { %3189 = vmatpush1.bf16.msra.mxu0 %v6295_v62  ;;  %v6379_v62 = vld [vmem:[%s8671_s7 + $0x500] ss:$48 sps:$4 sm:$0xff]  }
 0x17b   : > { %3271 = vmatpush1.bf16.msra.mxu1 %v6298_v63  ;;  %3281 = vmatprep.subr.bf16.mxu0 %v6303_v0  ;;  %v6382_v63 = vld [vmem:[%s8671_s7 + $0x508] ss:$48 sps:$4 sm:$0xff]   ;;  %v6387_v0 = vld [vmem:[%s8671_s7 + $0x564] ss:$48 sps:$4 sm:$0xff]  }
 0x17c   : > { %3363 = vmatprep.subr.bf16.mxu1 %v6306_v1  ;;  %v6390_v1 = vld [vmem:[%s8671_s7 + $0x56c] ss:$48 sps:$4 sm:$0xff]  }
 0x17d   : > { %3191 = vmatmul.mubr.bf16.vlgmr.msra.gmra.mrb[4].mxu0 %v7283_v52 }
 0x17e   : > { %3273 = vmatmul.mubr.bf16.vlgmr.msra.gmra.mrb[4].mxu1 %v7283_v52  ;;  %3282 = vmatpush1.bf16.msra.mxu0 %v6301_v2  ;;  %v6385_v2 = vld [vmem:[%s8671_s7 + $0x560] ss:$48 sps:$4 sm:$0xff]  }
 0x17f   : > { %3313 = vmatprep.mubr.bf16.mxu0 %v7071_v9  ;;  %3364 = vmatpush1.bf16.msra.mxu1 %v6304_v3  ;;  %v6388_v3 = vld [vmem:[%s8671_s7 + $0x568] ss:$48 sps:$4 sm:$0xff]  }
 0x180   : > { %3395 = vmatprep.mubr.bf16.mxu1 %v7071_v9  ;;  %3283 = vmatprep.subr.bf16.mxu0 %v6309_v4  ;;  %v6321_v9 = vld [vmem:[%s8671_s7 + $0x144] ss:$48 sps:$4 sm:$0xff]  }
 0x181   : > { %3365 = vmatprep.subr.bf16.mxu1 %v6312_v5  ;;  %v6393_v4 = vld [vmem:[%s8671_s7 + $0x5c4] ss:$48 sps:$4 sm:$0xff]   ;;  %v6396_v5 = vld [vmem:[%s8671_s7 + $0x5cc] ss:$48 sps:$4 sm:$0xff]  }
 0x182   : > { %3284 = vmatpush1.bf16.msra.mxu0 %v6307_v6  ;;  %v6391_v6 = vld [vmem:[%s8671_s7 + $0x5c0] ss:$48 sps:$4 sm:$0xff]  }
 0x183   : > { %3366 = vmatpush1.bf16.msra.mxu1 %v6310_v7  ;;  %3285 = vmatprep.subr.bf16.mxu0 %v6315_v12  ;;  %v6394_v7 = vld [vmem:[%s8671_s7 + $0x5c8] ss:$48 sps:$4 sm:$0xff]   ;;  %v6399_v12 = vld [vmem:[%s8671_s7 + $0x624] ss:$48 sps:$4 sm:$0xff]  }
 0x184   : > { %3367 = vmatprep.subr.bf16.mxu1 %v6318_v13  ;;  %v6402_v13 = vld [vmem:[%s8671_s7 + $0x62c] ss:$48 sps:$4 sm:$0xff]  }
 0x186   : > { %3286 = vmatpush1.bf16.msra.mxu0 %v6313_v14  ;;  %v6397_v14 = vld [vmem:[%s8671_s7 + $0x620] ss:$48 sps:$4 sm:$0xff]  }
 0x187   : > { %3368 = vmatpush1.bf16.msra.mxu1 %v6316_v15  ;;  %3287 = vmatprep.subr.bf16.mxu0 %v6321_v9  ;;  %v6400_v15 = vld [vmem:[%s8671_s7 + $0x628] ss:$48 sps:$4 sm:$0xff]   ;;  %v6405_v9 = vld [vmem:[%s8671_s7 + $0x684] ss:$48 sps:$4 sm:$0xff]  }
 0x188   : > { %3369 = vmatprep.subr.bf16.mxu1 %v6324_v16  ;;  %v6408_v16 = vld [vmem:[%s8671_s7 + $0x68c] ss:$48 sps:$4 sm:$0xff]  }
 0x18a   : > { %3288 = vmatpush1.bf16.msra.mxu0 %v6319_v17  ;;  %v6403_v17 = vld [vmem:[%s8671_s7 + $0x680] ss:$48 sps:$4 sm:$0xff]  }
 0x18b   : > { %3370 = vmatpush1.bf16.msra.mxu1 %v6322_v18  ;;  %3289 = vmatprep.subr.bf16.mxu0 %v6327_v19  ;;  %v6406_v18 = vld [vmem:[%s8671_s7 + $0x688] ss:$48 sps:$4 sm:$0xff]   ;;  %v6411_v19 = vld [vmem:[%s8671_s7 + $0x6e4] ss:$48 sps:$4 sm:$0xff]  }
 0x18c   : > { %3371 = vmatprep.subr.bf16.mxu1 %v6330_v20  ;;  %v6409_v20 = vld [vmem:[%s8671_s7 + $0x6e0] ss:$48 sps:$4 sm:$0xff]  }
 0x18e   : > { %3290 = vmatpush1.bf16.msra.mxu0 %v6325_v23  ;;  %v6412_v23 = vld [vmem:[%s8671_s7 + $0x6e8] ss:$48 sps:$4 sm:$0xff]  }
 0x18f   : > { %3372 = vmatpush1.bf16.msra.mxu1 %v6328_v27  ;;  %3291 = vmatprep.subr.bf16.mxu0 %v6333_v28  ;;  %v6420_v27 = vld [vmem:[%s8671_s7 + $0x74c] ss:$48 sps:$4 sm:$0xff]   ;;  %v6415_v28 = vld [vmem:[%s8671_s7 + $0x740] ss:$48 sps:$4 sm:$0xff]  }
 0x190   : > { %3373 = vmatprep.subr.bf16.mxu1 %v6336_v29  ;;  %v6418_v29 = vld [vmem:[%s8671_s7 + $0x748] ss:$48 sps:$4 sm:$0xff]  }
 0x192   : > { %3292 = vmatpush1.bf16.msra.mxu0 %v6331_v30  ;;  %v6423_v30 = vld [vmem:[%s8671_s7 + $0x7a4] ss:$48 sps:$4 sm:$0xff]  }
 0x193   : > { %3374 = vmatpush1.bf16.msra.mxu1 %v6334_v31  ;;  %3293 = vmatprep.subr.bf16.mxu0 %v6339_v32  ;;  %v6426_v31 = vld [vmem:[%s8671_s7 + $0x7ac] ss:$48 sps:$4 sm:$0xff]   ;;  %v6421_v32 = vld [vmem:[%s8671_s7 + $0x7a0] ss:$48 sps:$4 sm:$0xff]  }
 0x194   : > { %3375 = vmatprep.subr.bf16.mxu1 %v6342_v33  ;;  %v7919_v33 = vld [vmem:[%s8672_s8] sm:$0xff] }
 0x196   : > { %3294 = vmatpush1.bf16.msra.mxu0 %v6337_v34  ;;  %v6424_v34 = vld [vmem:[%s8671_s7 + $0x7a8] ss:$48 sps:$4 sm:$0xff]  }
 0x197   : > { %3376 = vmatpush1.bf16.msra.mxu1 %v6340_v35  ;;  %3295 = vmatprep.subr.bf16.mxu0 %v6345_v36  ;;  %v6429_v35 = vld [vmem:[%s8671_s7 + $0x804] ss:$48 sps:$4 sm:$0xff]   ;;  %v6432_v36 = vld [vmem:[%s8671_s7 + $0x80c] ss:$48 sps:$4 sm:$0xff]  }
 0x198   : > { %3377 = vmatprep.subr.bf16.mxu1 %v6348_v37  ;;  %v976_v37 = vrot.slane %v7919_v33, %v7047_v24 }
 0x19a   : > { %3296 = vmatpush1.bf16.msra.mxu0 %v6343_v38  ;;  %v6427_v38 = vld [vmem:[%s8671_s7 + $0x800] ss:$48 sps:$4 sm:$0xff]  }
 0x19b   : > { %3378 = vmatpush1.bf16.msra.mxu1 %v6346_v39  ;;  %3297 = vmatprep.subr.bf16.mxu0 %v6351_v41  ;;  %v6430_v39 = vld [vmem:[%s8671_s7 + $0x808] ss:$48 sps:$4 sm:$0xff]  }
 0x19c   : > { %3379 = vmatprep.subr.bf16.mxu1 %v6354_v10 }
 0x19e   : > { %3298 = vmatpush1.bf16.msra.mxu0 %v6349_v11  ;;  %v6435_v11 = vld [vmem:[%s8671_s7 + $0x864] ss:$48 sps:$4 sm:$0xff]  }
 0x19f   : > { %3380 = vmatpush1.bf16.msra.mxu1 %v6352_v42  ;;  %3299 = vmatprep.subr.bf16.mxu0 %v6357_v43  ;;  %v6438_v42 = vld [vmem:[%s8671_s7 + $0x86c] ss:$48 sps:$4 sm:$0xff]  }
 0x1a0   : > { %3381 = vmatprep.subr.bf16.mxu1 %v6360_v45 }
 0x1a2   : > { %3300 = vmatpush1.bf16.msra.mxu0 %v6355_v46 }
 0x1a3   : > { %3382 = vmatpush1.bf16.msra.mxu1 %v6358_v47  ;;  %3301 = vmatprep.subr.bf16.mxu0 %v6363_v48 }
 0x1a4   : > { %3383 = vmatprep.subr.bf16.mxu1 %v6366_v49  ;;  %v6433_v49 = vld [vmem:[%s8671_s7 + $0x860] ss:$48 sps:$4 sm:$0xff]  }
 0x1a6   : > { %3302 = vmatpush1.bf16.msra.mxu0 %v6361_v50 }
 0x1a7   : > { %3384 = vmatpush1.bf16.msra.mxu1 %v6364_v51  ;;  %3303 = vmatprep.subr.bf16.mxu0 %v6369_v53  ;;  %v6436_v53 = vld [vmem:[%s8671_s7 + $0x868] ss:$48 sps:$4 sm:$0xff]  }
 0x1a8   : > { %3385 = vmatprep.subr.bf16.mxu1 %v6372_v54  ;;  %v6441_v54 = vld [vmem:[%s8671_s7 + $0x8c4] ss:$48 sps:$4 sm:$0xff]  }
 0x1aa   : > { %3304 = vmatpush1.bf16.msra.mxu0 %v6367_v40  ;;  %v6444_v40 = vld [vmem:[%s8671_s7 + $0x8cc] ss:$48 sps:$4 sm:$0xff]  }
 0x1ab   : > { %3386 = vmatpush1.bf16.msra.mxu1 %v6370_v55  ;;  %3305 = vmatprep.subr.bf16.mxu0 %v6375_v56  ;;  %v6439_v55 = vld [vmem:[%s8671_s7 + $0x8c0] ss:$48 sps:$4 sm:$0xff]   ;;  %v6442_v56 = vld [vmem:[%s8671_s7 + $0x8c8] ss:$48 sps:$4 sm:$0xff]  }
 0x1ac   : > { %3387 = vmatprep.subr.bf16.mxu1 %v6378_v57  ;;  %v6447_v57 = vld [vmem:[%s8671_s7 + $0x924] ss:$48 sps:$4 sm:$0xff]  }
 0x1ae   : > { %3306 = vmatpush1.bf16.msra.mxu0 %v6373_v58  ;;  %v6450_v58 = vld [vmem:[%s8671_s7 + $0x92c] ss:$48 sps:$4 sm:$0xff]  }
 0x1af   : > { %3388 = vmatpush1.bf16.msra.mxu1 %v6376_v59  ;;  %3307 = vmatprep.subr.bf16.mxu0 %v6381_v60  ;;  %v6445_v59 = vld [vmem:[%s8671_s7 + $0x920] ss:$48 sps:$4 sm:$0xff]   ;;  %v6448_v60 = vld [vmem:[%s8671_s7 + $0x928] ss:$48 sps:$4 sm:$0xff]  }
 0x1b0   : > { %3389 = vmatprep.subr.bf16.mxu1 %v6384_v61  ;;  %v6453_v61 = vld [vmem:[%s8671_s7 + $0x984] ss:$48 sps:$4 sm:$0xff]  }
 0x1b2   : > { %3308 = vmatpush1.bf16.msra.mxu0 %v6379_v62  ;;  %v6456_v62 = vld [vmem:[%s8671_s7 + $0x98c] ss:$48 sps:$4 sm:$0xff]  }
 0x1b3   : > { %3390 = vmatpush1.bf16.msra.mxu1 %v6382_v63  ;;  %3309 = vmatprep.subr.bf16.mxu0 %v6387_v0  ;;  %v6451_v63 = vld [vmem:[%s8671_s7 + $0x980] ss:$48 sps:$4 sm:$0xff]   ;;  %v6454_v0 = vld [vmem:[%s8671_s7 + $0x988] ss:$48 sps:$4 sm:$0xff]  }
 0x1b4   : > { %3391 = vmatprep.subr.bf16.mxu1 %v6390_v1  ;;  %v6459_v1 = vld [vmem:[%s8671_s7 + $0x9e4] ss:$48 sps:$4 sm:$0xff]  }
 0x1b6   : > { %3310 = vmatpush1.bf16.msra.mxu0 %v6385_v2  ;;  %v6462_v2 = vld [vmem:[%s8671_s7 + $0x9ec] ss:$48 sps:$4 sm:$0xff]  }
 0x1b7   : > { %3392 = vmatpush1.bf16.msra.mxu1 %v6388_v3  ;;  %3311 = vmatprep.subr.bf16.mxu0 %v6393_v4  ;;  %v6457_v3 = vld [vmem:[%s8671_s7 + $0x9e0] ss:$48 sps:$4 sm:$0xff]   ;;  %v6460_v4 = vld [vmem:[%s8671_s7 + $0x9e8] ss:$48 sps:$4 sm:$0xff]  }
 0x1b8   : > { %3393 = vmatprep.subr.bf16.mxu1 %v6396_v5  ;;  %v6465_v5 = vld [vmem:[%s8671_s7 + $0xa44] ss:$48 sps:$4 sm:$0xff]  }
 0x1ba   : > { %3312 = vmatpush1.bf16.msra.mxu0 %v6391_v6  ;;  %v6468_v6 = vld [vmem:[%s8671_s7 + $0xa4c] ss:$48 sps:$4 sm:$0xff]  }
 0x1bb   : > { %3394 = vmatpush1.bf16.msra.mxu1 %v6394_v7  ;;  %3322 = vmatprep.subr.bf16.mxu0 %v6399_v12  ;;  %v6463_v7 = vld [vmem:[%s8671_s7 + $0xa40] ss:$48 sps:$4 sm:$0xff]   ;;  %v6466_v12 = vld [vmem:[%s8671_s7 + $0xa48] ss:$48 sps:$4 sm:$0xff]  }
 0x1bc   : > { %3404 = vmatprep.subr.bf16.mxu1 %v6402_v13  ;;  %v6471_v13 = vld [vmem:[%s8671_s7 + $0xaa4] ss:$48 sps:$4 sm:$0xff]  }
 0x1bd   : > { %3314 = vmatmul.mubr.bf16.vlgmr.msra.gmra.mrb[8].mxu0 %v7073_v8 }
 0x1be   : > { %3396 = vmatmul.mubr.bf16.vlgmr.msra.gmra.mrb[8].mxu1 %v7073_v8  ;;  %3323 = vmatpush1.bf16.msra.mxu0 %v6397_v14  ;;  %v6414_v8 = vld [vmem:[%s8671_s7 + $0x6ec] ss:$48 sps:$4 sm:$0xff]  }
 0x1bf   : > { %3354 = vmatprep.mubr.bf16.mxu0 %v7091_v44  ;;  %3405 = vmatpush1.bf16.msra.mxu1 %v6400_v15  ;;  %v6474_v14 = vld [vmem:[%s8671_s7 + $0xaac] ss:$48 sps:$4 sm:$0xff]   ;;  %v6469_v15 = vld [vmem:[%s8671_s7 + $0xaa0] ss:$48 sps:$4 sm:$0xff]  }
 0x1c0   : > { %3436 = vmatprep.mubr.bf16.mxu1 %v7091_v44  ;;  %3324 = vmatprep.subr.bf16.mxu0 %v6405_v9  ;;  %v6417_v44 = vld [vmem:[%s8671_s7 + $0x744] ss:$48 sps:$4 sm:$0xff]   ;;  %v6472_v9 = vld [vmem:[%s8671_s7 + $0xaa8] ss:$48 sps:$4 sm:$0xff]  }
 0x1c1   : > { %3406 = vmatprep.subr.bf16.mxu1 %v6408_v16  ;;  %v6477_v16 = vld [vmem:[%s8671_s7 + $0xb04] ss:$48 sps:$4 sm:$0xff]  }
 0x1c2   : > { %3325 = vmatpush1.bf16.msra.mxu0 %v6403_v17  ;;  %v6480_v17 = vld [vmem:[%s8671_s7 + $0xb0c] ss:$48 sps:$4 sm:$0xff]  }
 0x1c3   : > { %3407 = vmatpush1.bf16.msra.mxu1 %v6406_v18  ;;  %3326 = vmatprep.subr.bf16.mxu0 %v6411_v19  ;;  %v6475_v18 = vld [vmem:[%s8671_s7 + $0xb00] ss:$48 sps:$4 sm:$0xff]   ;;  %v6478_v19 = vld [vmem:[%s8671_s7 + $0xb08] ss:$48 sps:$4 sm:$0xff]  }
 0x1c4   : > { %3408 = vmatprep.subr.bf16.mxu1 %v6414_v8  ;;  %v6483_v8 = vld [vmem:[%s8671_s7 + $0xb64] ss:$48 sps:$4 sm:$0xff]  }
 0x1c6   : > { %3327 = vmatpush1.bf16.msra.mxu0 %v6409_v20  ;;  %v6486_v20 = vld [vmem:[%s8671_s7 + $0xb6c] ss:$48 sps:$4 sm:$0xff]  }
 0x1c7   : > { %3409 = vmatpush1.bf16.msra.mxu1 %v6412_v23  ;;  %3328 = vmatprep.subr.bf16.mxu0 %v6417_v44  ;;  %v6481_v23 = vld [vmem:[%s8671_s7 + $0xb60] ss:$48 sps:$4 sm:$0xff]   ;;  %v6484_v44 = vld [vmem:[%s8671_s7 + $0xb68] ss:$48 sps:$4 sm:$0xff]  }
 0x1c8   : > { %3410 = vmatprep.subr.bf16.mxu1 %v6420_v27  ;;  %v6489_v27 = vld [vmem:[%s8671_s7 + $0xbc4] ss:$48 sps:$4 sm:$0xff]  }
 0x1ca   : > { %3329 = vmatpush1.bf16.msra.mxu0 %v6415_v28  ;;  %v6492_v28 = vld [vmem:[%s8671_s7 + $0xbcc] ss:$48 sps:$4 sm:$0xff]  }
 0x1cb   : > { %3411 = vmatpush1.bf16.msra.mxu1 %v6418_v29  ;;  %3330 = vmatprep.subr.bf16.mxu0 %v6423_v30  ;;  %v6487_v29 = vld [vmem:[%s8671_s7 + $0xbc0] ss:$48 sps:$4 sm:$0xff]   ;;  %v6490_v30 = vld [vmem:[%s8671_s7 + $0xbc8] ss:$48 sps:$4 sm:$0xff]  }
 0x1cc   : > { %3412 = vmatprep.subr.bf16.mxu1 %v6426_v31  ;;  %v3458_v31 = vld [vmem:[%s8074_s18] sm:$0xff]  }
 0x1cd   : > { %3460 = vst [vmem:[#allocation3] sm:$0xff] %v3458_v31  }
 0x1ce   : > { %3331 = vmatpush1.bf16.msra.mxu0 %v6421_v32  ;;  %v991_v32 = vsub.s32 4, %v7038_v21 }
 0x1cf   : > { %3413 = vmatpush1.bf16.msra.mxu1 %v6424_v34  ;;  %3332 = vmatprep.subr.bf16.mxu0 %v6429_v35  ;;  %v995_v35 = vsub.s32 5, %v7038_v21 }
 0x1d0   : > { %v3028_v41 = vpop.f32.mrb[0].mxu0  ;;  %v7938_v10 = vpop.f32.mrb[0].mxu1  ;;  %3414 = vmatprep.subr.bf16.mxu1 %v6432_v36  ;;  %v992_v34 = vrot.slane %v7919_v33, %v991_v32 }
 0x1d1   : > { %v7946_v43 = vadd.f32 %v3028_v41, %v976_v37  ;;  %v7948_v45 = vpop.f32.mrb[1].mxu0  ;;  %v7950_v46 = vpop.f32.mrb[1].mxu1  ;;  %v6734_v37 = vmov 0.0   ;;  %v996_v41 = vrot.slane %v7919_v33, %v995_v35 }
 0x1d2   : > { %v3032_v47 = vpop.f32.mrb[2].mxu0  ;;  %v3114_v48 = vpop.f32.mrb[2].mxu1  ;;  %3333 = vmatpush1.bf16.msra.mxu0 %v6427_v38 }
 0x1d3   : > { %3415 = vmatpush1.bf16.msra.mxu1 %v6430_v39  ;;  %v3033_v50 = vpop.f32.mrb[3].mxu0  ;;  %v3115_v51 = vpop.f32.mrb[3].mxu1  ;;  %3446 = vrot.lane.b32.xlu1 %v7946_v43, %s6733_s20 }
 0x1d4   : > { %3334 = vmatprep.subr.bf16.mxu0 %v6435_v11  ;;  %3416 = vmatprep.subr.bf16.mxu1 %v6438_v42  ;;  %v6493_v36 = vld [vmem:[#allocation3] sm:$0xff]   ;;  %v3464_v50 = vld [vmem:[%s8086_s25] sm:$0xff]  }
 0x1d5   : > { %3466 = vst [vmem:[#allocation4] sm:$0xff] %v3464_v50  }
 0x1d6   : > { %3335 = vmatpush1.bf16.msra.mxu0 %v6433_v49 }
 0x1d7   : > { %3417 = vmatpush1.bf16.msra.mxu1 %v6436_v53  ;;  %3336 = vmatprep.subr.bf16.mxu0 %v6441_v54  ;;  %v5611_v53 = vld [vmem:[%s8074_s18 + $0x8] sm:$0xff]   ;;  %v980_v54 = vrot.slane %v7919_v33, %v7041_v22 }
 0x1d8   : > { %3418 = vmatprep.subr.bf16.mxu1 %v6444_v40  ;;  %3616 = vst [vmem:[#allocation3] sm:$0xff] %v5611_v53  }
 0x1da   : > { %3337 = vmatpush1.bf16.msra.mxu0 %v6439_v55  ;;  %v8101_v55 = vadd.f32 %v7948_v45, %v980_v54 }
 0x1db   : > { %3419 = vmatpush1.bf16.msra.mxu1 %v6442_v56  ;;  %3338 = vmatprep.subr.bf16.mxu0 %v6447_v57  ;;  %v5613_v57 = vld [vmem:[%s8086_s25 + $0x8] sm:$0xff]  }
 0x1dc   : > { %3420 = vmatprep.subr.bf16.mxu1 %v6450_v58  ;;  %v6494_v56 = vld [vmem:[#allocation4] sm:$0xff]   ;;  %v5624_v58 = vld [vmem:[%s8086_s25 + $0x10] sm:$0xff]  }
 0x1dd   : > { %3623 = vst [vmem:[#allocation4] sm:$0xff] %v5613_v57  }
 0x1de   : > { %3339 = vmatpush1.bf16.msra.mxu0 %v6445_v59  ;;  %v8123_v59 = vld [vmem:[%s496_s29] sm:$0xff]  ;;  %s529_s29 = scalar_lea.vmem %s8676_s12, %s6827_s15 }
 0x1df   : > { %3421 = vmatpush1.bf16.msra.mxu1 %v6448_v60  ;;  %3340 = vmatprep.subr.bf16.mxu0 %v6453_v61  ;;  %v8125_v60 = vld [vmem:[%s500_s14] sm:$0xff]  ;;  %s504_s14 = scalar_lea.vmem %s8667_s3, %s8113_s26  ;;  %s519_s26 = scalar_lea.vmem %s8674_s10, %s6827_s15 }
 0x1e0   : > { %3422 = vmatprep.subr.bf16.mxu1 %v6456_v62  ;;  %v8166_v54 = vld [vmem:[%s504_s14] sm:$0xff] }
 0x1e2   : > { %3341 = vmatpush1.bf16.msra.mxu0 %v6451_v63 }
 0x1e3   : > { %3423 = vmatpush1.bf16.msra.mxu1 %v6454_v0  ;;  %3342 = vmatprep.subr.bf16.mxu0 %v6459_v1 }
 0x1e4   : > { %3424 = vmatprep.subr.bf16.mxu1 %v6462_v2  ;;  %v6495_v45 = vld [vmem:[#allocation4] sm:$0xff]  }
 0x1e5   : > { %3778 = vst [vmem:[#allocation4] sm:$0xff] %v5624_v58  }
 0x1e6   : > { %3343 = vmatpush1.bf16.msra.mxu0 %v6457_v3 }
 0x1e7   : > { %3425 = vmatpush1.bf16.msra.mxu1 %v6460_v4  ;;  %3344 = vmatprep.subr.bf16.mxu0 %v6465_v5  ;;  %v970_v5 = vld [vmem:[%s8672_s8 + $0x8] sm:$0xf] }
 0x1e8   : > { %3426 = vmatprep.subr.bf16.mxu1 %v6468_v6 }
 0x1ea   : > { %3345 = vmatpush1.bf16.msra.mxu0 %v6463_v7 }
 0x1eb   : > { %3427 = vmatpush1.bf16.msra.mxu1 %v6466_v12  ;;  %3346 = vmatprep.subr.bf16.mxu0 %v6471_v13  ;;  %v1008_v12 = vrot.slane %v970_v5, %v7047_v24  ;;  %v1016_v13 = vrot.slane %v970_v5, %v7050_v25 }
 0x1ec   : > { %3428 = vmatprep.subr.bf16.mxu1 %v6474_v14  ;;  %v1012_v14 = vrot.slane %v970_v5, %v7041_v22 }
 0x1ee   : > { %3347 = vmatpush1.bf16.msra.mxu0 %v6469_v15 }
 0x1ef   : > { %3429 = vmatpush1.bf16.msra.mxu1 %v6472_v9  ;;  %3348 = vmatprep.subr.bf16.mxu0 %v6477_v16  ;;  %v1020_v9 = vrot.slane %v970_v5, %v7053_v26  ;;  %v6499_v5 = vld [vmem:[#allocation4] sm:$0xff]  }
 0x1f0   : > { %3430 = vmatprep.subr.bf16.mxu1 %v6480_v17  ;;  %v3445_v17 = vmul.f32 %v7946_v43, %v8123_v59 }
 0x1f2   : > { %3349 = vmatpush1.bf16.msra.mxu0 %v6475_v18 }
 0x1f3   : > { %3431 = vmatpush1.bf16.msra.mxu1 %v6478_v19  ;;  %3350 = vmatprep.subr.bf16.mxu0 %v6483_v8 }
 0x1f4   : > { %3432 = vmatprep.subr.bf16.mxu1 %v6486_v20 }
 0x1f6   : > { %3351 = vmatpush1.bf16.msra.mxu0 %v6481_v23 }
 0x1f7   : > { %3433 = vmatpush1.bf16.msra.mxu1 %v6484_v44  ;;  %3352 = vmatprep.subr.bf16.mxu0 %v6489_v27 }
 0x1f8   : > { %3434 = vmatprep.subr.bf16.mxu1 %v6492_v28 }
 0x1fa   : > { %3353 = vmatpush1.bf16.msra.mxu0 %v6487_v29 }
 0x1fb   : > { %3435 = vmatpush1.bf16.msra.mxu1 %v6490_v30  ;;  %5806 = vmatprep.subr.bf16.mxu0 %v6734_v37 }
 0x1fc   : > { %5814 = vmatprep.subr.bf16.mxu1 %v6734_v37 }
 0x1fd   : > { %3355 = vmatmul.mubr.bf16.vlgmr.msra.gmra.mrb[8].mxu0 %v7283_v52 }
 0x1fe   : > { %3437 = vmatmul.mubr.bf16.vlgmr.msra.gmra.mrb[8].mxu1 %v7283_v52  ;;  %5810 = vmatprep.mubr.msk.bf16.mxu0 %vm6735_vm0, %v6734_v37 }
 0x1ff   : > { %5815 = vmatpush3.bf16.msra.mxu1 %v6494_v56  ;;  %5818 = vmatprep.mubr.msk.bf16.mxu1 %vm6735_vm0, %v6734_v37 }
 0x200   : > { %5816 = vmatprep.subr.bf16.mxu1 %v6734_v37 }
 0x203   : > { %5807 = vmatpush3.bf16.xpose.msra.mxu0 %v6493_v36 }
 0x204   : > { %5808 = vmatprep.subr.bf16.mxu0 %v6734_v37 }
 0x245   : > { %v3447_v6 = vpop.permute.xlu1 %3446 }
 0x246   : > { %v3448_v15 = vmul.f32 %v3447_v6, %v8125_v60  ;;  %v5635_v6 = vld [vmem:[%s8086_s25 + $0x18] sm:$0xff]  }
 0x247   : > { %3933 = vst [vmem:[#allocation4] sm:$0xff] %v5635_v6  }
 0x248   : > { %v3449_v27 = vadd.f32 %v3448_v15, %v3445_v17 }
 0x24a   : > { %v3450_v35 = vmul.f32 0.088388346, %v3449_v27 }
 0x24c   : > { %v3470_v36 = vpack.c.bf16 %v3450_v35, %v3450_v35 }
 0x250   : > { %v3192_v52 = vpop.f32.mrb[4].mxu0 }
 0x251   : > { %v5874_v38 = vadd.f32 %v3192_v52, %v992_v34  ;;  %v8088_v39 = vpop.f32.mrb[4].mxu1  ;;  %v3194_v11 = vpop.f32.mrb[5].mxu0 }
 0x252   : > { %v8092_v42 = vpop.f32.mrb[5].mxu1  ;;  %v3196_v47 = vpop.f32.mrb[6].mxu0  ;;  %v5875_v40 = vadd.f32 %v3194_v11, %v996_v41 }
 0x253   : > { %v3278_v48 = vpop.f32.mrb[6].mxu1  ;;  %v3197_v49 = vpop.f32.mrb[7].mxu0  ;;  %3452 = vrot.lane.b32.xlu0 %v5874_v38, %s6733_s20  ;;  %v3451_v62 = vmul.f32 %v5874_v38, %v8123_v59 }
 0x254   : > { %v3279_v51 = vpop.f32.mrb[7].mxu1  ;;  %v3604_v2 = vmul.f32 %v5875_v40, %v8123_v59 }
 0x257   : > { %3605 = vrot.lane.b32.xlu0 %v5875_v40, %s6733_s20 }
 0x25b   : > { %3599 = vrot.lane.b32.xlu0 %v8101_v55, %s6733_s20 }
 0x2c5   : > { %v3453_v61 = vpop.permute.xlu0 %3452 }
 0x2c6   : > { %v3454_v63 = vmul.f32 %v3453_v61, %v8125_v60 }
 0x2c8   : > { %v3455_v0 = vadd.f32 %v3454_v63, %v3451_v62  ;;  %v999_v62 = vsub.s32 6, %v7038_v21 }
 0x2c9   : > { %v3606_v1 = vpop.permute.xlu0 %3605 }
 0x2ca   : > { %3456 = vst [vmem:[%s8133_s17] sm:$0xff] %v3455_v0  ;;  %v3462_v3 = vpack.c.bf16 %v3455_v0, %v3455_v0  ;;  %v3607_v4 = vmul.f32 %v3606_v1, %v8125_v60  ;;  %v1000_v63 = vrot.slane %v7919_v33, %v999_v62  ;;  %v984_v0 = vrot.slane %v7919_v33, %v7050_v25 }
 0x2cc   : > { %3463 = vst [vmem:[#allocation3 + $0x8] sm:$0xf] %v3462_v3  ;;  %v3608_v7 = vadd.f32 %v3607_v4, %v3604_v2  ;;  %v5876_v1 = vadd.f32 %v8088_v39, %v1000_v63  ;;  %v8177_v2 = vadd.f32 %v7938_v10, %v984_v0  ;;  %v6497_v3 = vld [vmem:[#allocation3] sm:$0xff]  }
 0x2cd   : > { %v5622_v4 = vld [vmem:[%s8074_s18 + $0x10] sm:$0xff]  }
 0x2ce   : > { %5609 = vst [vmem:[%s8133_s17 + $0x8] sm:$0xff] %v3608_v7  ;;  %v3618_v8 = vpack.c.bf16 %v3608_v7, %v3608_v7  ;;  %3771 = vst [vmem:[#allocation3] sm:$0xff] %v5622_v4   ;;  %v3759_v39 = vmul.f32 %v5876_v1, %v8123_v59 }
 0x2d0   : > { %v3356_v16 = vpop.f32.mrb[8].mxu0 }
 0x2d1   : > { %v5878_v18 = vadd.f32 %v3356_v16, %v1008_v12  ;;  %v3438_v19 = vpop.f32.mrb[8].mxu1  ;;  %v3358_v24 = vpop.f32.mrb[9].mxu0 }
 0x2d2   : > { %v5880_v20 = vadd.f32 %v3438_v19, %v1016_v13  ;;  %v5879_v23 = vadd.f32 %v3358_v24, %v1012_v14  ;;  %v3440_v44 = vpop.f32.mrb[9].mxu1  ;;  %v3360_v22 = vpop.f32.mrb[10].mxu0  ;;  %v3598_v24 = vmul.f32 %v8101_v55, %v8123_v59 }
 0x2d3   : > { %v3473_v28 = vld [vmem:[#allocation3 + $0x8] sm:$0xf]  ;;  %3457 = vst [vmem:[%s529_s29] sm:$0xff] %v5878_v18  ;;  %v3468_v29 = vpack.c.bf16 %v5878_v18, %v5878_v18  ;;  %v5881_v30 = vadd.f32 %v3440_v44, %v1020_v9  ;;  %v3442_v31 = vpop.f32.mrb[10].mxu1  ;;  %v3361_v32 = vpop.f32.mrb[11].mxu0 }
 0x2d4   : > { %3619 = vst [vmem:[#allocation3 + $0x8] sm:$0xf] %v3618_v8  ;;  %5621 = vst [vmem:[%s529_s29 + $0x10] sm:$0xff] %v5880_v20  ;;  %v3443_v34 = vpop.f32.mrb[11].mxu1  ;;  %v5605_v43 = vcombine.low %v3473_v28, %v3473_v28  ;;  %v3625_v52 = vpack.c.bf16 %v5879_v23, %v5879_v23  ;;  %v3780_v47 = vpack.c.bf16 %v5880_v20, %v5880_v20  ;;  %v3600_v18 = vpop.permute.xlu0 %3599 }
 0x2d5   : > { %5610 = vst [vmem:[%s529_s29 + $0x8] sm:$0xff] %v5879_v23  ;;  %3469 = vst [vmem:[#allocation4 + $0x8] sm:$0xf] %v3468_v29  ;;  %v3935_v50 = vpack.c.bf16 %v5881_v30, %v5881_v30  ;;  %v3601_v19 = vmul.f32 %v3600_v18, %v8125_v60 }
 0x2d6   : > { %5632 = vst [vmem:[%s529_s29 + $0x18] sm:$0xff] %v5881_v30  ;;  %5809 = vmatpush3.bf16.xpose.msra.mxu0 %v5605_v43  ;;  %v1003_v43 = vsub.s32 7, %v7038_v21 }
 0x2d7   : > { %5830 = vmatprep.subr.bf16.mxu0 %v6734_v37  ;;  %v3602_v8 = vadd.f32 %v3601_v19, %v3598_v24 }
 0x2d8   : > { %v1004_v35 = vrot.slane %v7919_v33, %v1003_v43 }
 0x2d9   : > { %v3603_v20 = vmul.f32 0.088388346, %v3602_v8 }
 0x2db   : > { %v6498_v9 = vld [vmem:[#allocation3 + $0x8] ss:$0 sps:$4 sm:$0xff]   ;;  %v3627_v23 = vpack.c.bf16 %v3603_v20, %v3603_v20 }
 0x2dc   : > { %v3538_v38 = vld [vmem:[#allocation4 + $0x8] sm:$0xf] }
 0x2dd   : > { %3626 = vst [vmem:[#allocation4 + $0x8] sm:$0xf] %v3625_v52  ;;  %5811 = vmatmul.mubr.bf16.vlgmr.msra.gmra.mrb[12].mxu0 %v3470_v36  ;;  %v5607_v41 = vcombine.low %v3538_v38, %v3538_v38  ;;  %v988_v36 = vrot.slane %v7919_v33, %v7053_v26  ;;  %v5877_v52 = vadd.f32 %v8092_v42, %v1004_v35 }
 0x2de   : > { %5831 = vmatpush3.bf16.msra.mxu0 %v6495_v45  ;;  %5834 = vmatprep.mubr.msk.bf16.mxu0 %vm6735_vm0, %v6734_v37 }
 0x2df   : > { %v3553_v11 = vsel %vm3551_vm1, %v5607_v41, 0  ;;  %5832 = vmatprep.subr.bf16.mxu0 %v6734_v37  ;;  %v8213_v38 = vadd.f32 %v7950_v46, %v988_v36  ;;  %v6501_v41 = vld [vmem:[#allocation3] sm:$0xff]   ;;  %v3914_v26 = vmul.f32 %v5877_v52, %v8123_v59 }
 0x2e0   : > { %5817 = vmatpush3.bf16.msra.mxu1 %v3553_v11  ;;  %v5633_v11 = vld [vmem:[%s8074_s18 + $0x18] sm:$0xff]  }
 0x2e1   : > { %5822 = vmatprep.subr.bf16.mxu1 %v6734_v37  ;;  %3926 = vst [vmem:[#allocation3] sm:$0xff] %v5633_v11  }
 0x2e4   : > { %v6496_v48 = vld [vmem:[#allocation4 + $0x8] ss:$0 sps:$4 sm:$0xff]  }
 0x2e5   : > { %3781 = vst [vmem:[#allocation4 + $0x8] sm:$0xf] %v3780_v47  ;;  %v3708_v49 = vsel %vm3551_vm1, %v6496_v48, 0 }
 0x2e6   : > { %5833 = vmatpush3.bf16.msra.mxu0 %v3708_v49 }
 0x2e7   : > { %5838 = vmatprep.subr.bf16.mxu0 %v6734_v37 }
 0x2e8   : > { %v6505_v24 = vld [vmem:[#allocation3] sm:$0xff]  }
 0x2ec   : > { %v6500_v51 = vld [vmem:[#allocation4 + $0x8] ss:$0 sps:$4 sm:$0xff]  }
 0x2ed   : > { %3936 = vst [vmem:[#allocation4 + $0x8] sm:$0xf] %v3935_v50  ;;  %v3863_v53 = vsel %vm3551_vm1, %v6500_v51, 0 }
 0x2f4   : > { %v6504_v63 = vld [vmem:[#allocation4 + $0x8] ss:$0 sps:$4 sm:$0xff]  }
 0x2f5   : > { %v4018_v0 = vsel %vm3551_vm1, %v6504_v63, 0  ;;  %v6520_v63 = vld [vmem:[%s8673_s9 + $0x64] ss:$16 sps:$4 sm:$0xff]  }
 0x3b0   : > { %v3518_v40 = vpop.f32.mrb[12].mxu0 }
 0x3b1   : > { %v3519_v56 = vadd.f32 %v3518_v40, %v8166_v54  ;;  %v5812_v57 = vpop.f32.mrb[13].mxu0 }
 0x3b2   : > { %v3521_v58 = vpop.f32.mrb[14].mxu0  ;;  %v3753_v57 = vmul.f32 %v8177_v2, %v8123_v59 }
 0x3b3   : > { %v5813_v45 = vpop.f32.mrb[15].mxu0  ;;  %v3525_v61 = vsel %vm3524_vm2, %v3519_v56, -inf }
 0x3b4   : > { %3526 = vmax.xlane.f32.xlu1 %v3525_v61  ;;  %v6503_v61 = vld [vmem:[#allocation4] sm:$0xff]  }
 0x3c5   : > { %3760 = vrot.lane.b32.xlu1 %v5876_v1, %s6733_s20 }
 0x3c9   : > { %3754 = vrot.lane.b32.xlu1 %v8177_v2, %s6733_s20 }
 0x441   : > { %v3527_v7 = vpop.xlane.xlu1 %3526 }
 0x442   : > { %v3528_v12 = vsub.f32 %v3519_v56, %v3527_v7 }
 0x444   : > { %v3529_v25 = vmul.f32 1.442695, %v3528_v12 }
 0x445   : > { %v3761_v13 = vpop.permute.xlu1 %3760 }
 0x446   : > { %6705 = vpow2.f32 %v3529_v25  ;;  %v3762_v10 = vmul.f32 %v3761_v13, %v8125_v60 }
 0x448   : > { %v3763_v14 = vadd.f32 %v3762_v10, %v3759_v39 }
 0x449   : > { %v3755_v40 = vpop.permute.xlu1 %3754 }
 0x44a   : > { %5620 = vst [vmem:[%s8133_s17 + $0x10] sm:$0xff] %v3763_v14  ;;  %v3773_v15 = vpack.c.bf16 %v3763_v14, %v3763_v14  ;;  %v3756_v56 = vmul.f32 %v3755_v40, %v8125_v60 }
 0x44c   : > { %3774 = vst [vmem:[#allocation3 + $0x8] sm:$0xf] %v3773_v15  ;;  %v3757_v58 = vadd.f32 %v3756_v56, %v3753_v57  ;;  %v6514_v57 = vld [vmem:[%s8673_s9 + $0x24] ss:$16 sps:$4 sm:$0xff]  }
 0x44e   : > { %v3758_v45 = vmul.f32 0.088388346, %v3757_v58 }
 0x450   : > { %v8186_v16 = vpop.eup %6705  ;;  %v3782_v62 = vpack.c.bf16 %v3758_v45, %v3758_v45  ;;  %v6512_v45 = vld [vmem:[%s8673_s9 + $0x20] ss:$16 sps:$4 sm:$0xff]  }
 0x451   : > { %v3535_v17 = vpack.c.bf16 %v8186_v16, %v8186_v16  ;;  %v3531_v39 = vsel %vm3524_vm2, %v8186_v16, 0.0 }
 0x453   : > { %5819 = vmatmul.mubr.msk.bf16.vlgmr.msra.gmra.mrb[12].mxu1 %vm3524_vm2, %v3535_v17  ;;  %v6502_v46 = vld [vmem:[#allocation3 + $0x8] ss:$0 sps:$4 sm:$0xff]  }
 0x454   : > { %5823 = vmatpush3.bf16.xpose.msra.mxu1 %v6497_v3  ;;  %5826 = vmatprep.mubr.msk.bf16.mxu1 %vm6735_vm0, %v6734_v37 }
 0x455   : > { %5824 = vmatprep.subr.bf16.mxu1 %v6734_v37 }
 0x45c   : > { %5825 = vmatpush3.bf16.xpose.msra.mxu1 %v6498_v9 }
 0x45d   : > { %5846 = vmatprep.subr.bf16.mxu1 %v6734_v37 }
 0x463   : > { %5827 = vmatmul.mubr.bf16.vlgmr.msra.gmra.mrb[16].mxu1 %v3627_v23 }
 0x464   : > { %5847 = vmatpush3.bf16.msra.mxu1 %v6499_v5  ;;  %5850 = vmatprep.mubr.msk.bf16.mxu1 %vm6735_vm0, %v6734_v37 }
 0x465   : > { %5848 = vmatprep.subr.bf16.mxu1 %v6734_v37 }
 0x468   : > { %5849 = vmatpush3.bf16.msra.mxu1 %v3863_v53 }
 0x469   : > { %5854 = vmatprep.subr.bf16.mxu1 %v6734_v37 }
 0x526   : > { %v8202_v44 = vpop.f32.mrb[12].mxu1 }
 0x527   : > { %v5820_v22 = vpop.f32.mrb[13].mxu1 }
 0x528   : > { %v3592_v55 = vpop.f32.mrb[14].mxu1 }
 0x529   : > { %v5821_v27 = vpop.f32.mrb[15].mxu1 }
 0x536   : > { %v3675_v28 = vpop.f32.mrb[16].mxu1 }
 0x537   : > { %v3676_v29 = vadd.f32 %v3675_v28, %v8166_v54  ;;  %v5828_v30 = vpop.f32.mrb[17].mxu1 }
 0x538   : > { %v3678_v31 = vpop.f32.mrb[18].mxu1  ;;  %v3908_v30 = vmul.f32 %v8213_v38, %v8123_v59 }
 0x539   : > { %v5829_v32 = vpop.f32.mrb[19].mxu1  ;;  %v3681_v34 = vsel %vm3524_vm2, %v3676_v29, -inf }
 0x53a   : > { %3682 = vmax.xlane.f32.xlu0 %v3681_v34 }
 0x550   : > { %3915 = vrot.lane.b32.xlu0 %v5877_v52, %s6733_s20 }
 0x554   : > { %3909 = vrot.lane.b32.xlu0 %v8213_v38, %s6733_s20 }
 0x5c7   : > { %v3683_v21 = vpop.xlane.xlu0 %3682 }
 0x5c8   : > { %v3684_v47 = vsub.f32 %v3676_v29, %v3683_v21 }
 0x5ca   : > { %v3685_v48 = vmul.f32 1.442695, %v3684_v47 }
 0x5cb   : > { %v3916_v49 = vpop.permute.xlu0 %3915 }
 0x5cc   : > { %6707 = vpow2.f32 %v3685_v48  ;;  %v3917_v33 = vmul.f32 %v3916_v49, %v8125_v60 }
 0x5ce   : > { %v3918_v42 = vadd.f32 %v3917_v33, %v3914_v26  ;;  %v6509_v33 = vld [vmem:[%s8673_s9 + $0x4] ss:$16 sps:$4 sm:$0xff]  }
 0x5cf   : > { %v3910_v22 = vpop.permute.xlu0 %3909 }
 0x5d0   : > { %5631 = vst [vmem:[%s8133_s17 + $0x18] sm:$0xff] %v3918_v42  ;;  %v3928_v50 = vpack.c.bf16 %v3918_v42, %v3918_v42  ;;  %v3911_v28 = vmul.f32 %v3910_v22, %v8125_v60  ;;  %v6620_v22 = vld [vmem:[%s8673_s9 + $0x2a0] ss:$16 sps:$4 sm:$0xff]  }
 0x5d2   : > { %3929 = vst [vmem:[#allocation3 + $0x8] sm:$0xf] %v3928_v50 }
 0x5d6   : > { %v6708_v51 = vpop.eup %6707 }
 0x5d7   : > { %v3691_v53 = vpack.c.bf16 %v6708_v51, %v6708_v51  ;;  %v3687_v10 = vsel %vm3524_vm2, %v6708_v51, 0.0 }
 0x5d9   : > { %5835 = vmatmul.mubr.msk.bf16.vlgmr.msra.gmra.mrb[16].mxu0 %vm3524_vm2, %v3691_v53  ;;  %v6506_v32 = vld [vmem:[#allocation3 + $0x8] ss:$0 sps:$4 sm:$0xff]  }
 0x5da   : > { %5839 = vmatpush3.bf16.xpose.msra.mxu0 %v6501_v41  ;;  %5842 = vmatprep.mubr.msk.bf16.mxu0 %vm6735_vm0, %v6734_v37 }
 0x5db   : > { %5840 = vmatprep.subr.bf16.mxu0 %v6734_v37 }
 0x5e2   : > { %5841 = vmatpush3.bf16.xpose.msra.mxu0 %v6502_v46 }
 0x5e3   : > { %5862 = vmatprep.subr.bf16.mxu0 %v6734_v37 }
 0x5e9   : > { %5843 = vmatmul.mubr.bf16.vlgmr.msra.gmra.mrb[20].mxu0 %v3782_v62  ;;  %v6515_v62 = vld [vmem:[%s8673_s9 + $0x40] ss:$16 sps:$4 sm:$0xff]  }
 0x5ea   : > { %5863 = vmatpush3.bf16.msra.mxu0 %v6503_v61  ;;  %5866 = vmatprep.mubr.msk.bf16.mxu0 %vm6735_vm0, %v6734_v37  ;;  %v6517_v61 = vld [vmem:[%s8673_s9 + $0x44] ss:$16 sps:$4 sm:$0xff]  }
 0x5eb   : > { %5864 = vmatprep.subr.bf16.mxu0 %v6734_v37 }
 0x5ee   : > { %5865 = vmatpush3.bf16.msra.mxu0 %v4018_v0  ;;  %v6518_v0 = vld [vmem:[%s8673_s9 + $0x60] ss:$16 sps:$4 sm:$0xff]  }
 0x5ef   : > { %4847 = vmatprep.subr.bf16.mxu0 %v6509_v33  ;;  %v6643_v33 = vld [vmem:[%s8673_s9 + $0x384] ss:$16 sps:$4 sm:$0xff]  }
 0x6ac   : > { %v3744_v1 = vpop.f32.mrb[16].mxu0 }
 0x6ad   : > { %v5836_v2 = vpop.f32.mrb[17].mxu0 }
 0x6ae   : > { %v3747_v3 = vpop.f32.mrb[18].mxu0  ;;  %v6521_v2 = vld [vmem:[%s8673_s9 + $0x80] ss:$16 sps:$4 sm:$0xff]  }
 0x6af   : > { %v5837_v4 = vpop.f32.mrb[19].mxu0  ;;  %v6605_v3 = vld [vmem:[%s8673_s9 + $0x200] ss:$16 sps:$4 sm:$0xff]  }
 0x6b0   : > { %v6607_v4 = vld [vmem:[%s8673_s9 + $0x204] ss:$16 sps:$4 sm:$0xff]  }
 0x6bc   : > { %v3830_v5 = vpop.f32.mrb[20].mxu0 }
 0x6bd   : > { %v3831_v6 = vadd.f32 %v3830_v5, %v8166_v54  ;;  %v5844_v7 = vpop.f32.mrb[21].mxu0  ;;  %v6526_v5 = vld [vmem:[%s8673_s9 + $0xa4] ss:$16 sps:$4 sm:$0xff]  }
 0x6be   : > { %v3833_v12 = vpop.f32.mrb[22].mxu0  ;;  %v6608_v7 = vld [vmem:[%s8673_s9 + $0x220] ss:$16 sps:$4 sm:$0xff]  }
 0x6bf   : > { %v5845_v25 = vpop.f32.mrb[23].mxu0  ;;  %v3836_v13 = vsel %vm3524_vm2, %v3831_v6, -inf  ;;  %v6524_v12 = vld [vmem:[%s8673_s9 + $0xa0] ss:$16 sps:$4 sm:$0xff]  }
 0x6c0   : > { %3837 = vmax.xlane.f32.xlu1 %v3836_v13  ;;  %v6613_v25 = vld [vmem:[%s8673_s9 + $0x244] ss:$16 sps:$4 sm:$0xff]  }
 0x6c1   : > { %v6529_v13 = vld [vmem:[%s8673_s9 + $0xc4] ss:$16 sps:$4 sm:$0xff]  }
 0x6c4   : > { %3532 = vadd.xlane.f32.xlu1 %v3531_v39  ;;  %v6611_v39 = vld [vmem:[%s8673_s9 + $0x240] ss:$16 sps:$4 sm:$0xff]  }
 0x6c8   : > { %3688 = vadd.xlane.f32.xlu1 %v3687_v10  ;;  %v6527_v10 = vld [vmem:[%s8673_s9 + $0xc0] ss:$16 sps:$4 sm:$0xff]  }
 0x74d   : > { %v3838_v14 = vpop.xlane.xlu1 %3837 }
 0x74e   : > { %v3839_v15 = vsub.f32 %v3831_v6, %v3838_v14  ;;  %v6610_v6 = vld [vmem:[%s8673_s9 + $0x224] ss:$16 sps:$4 sm:$0xff]  }
 0x74f   : > { %v6616_v14 = vld [vmem:[%s8673_s9 + $0x264] ss:$16 sps:$4 sm:$0xff]  }
 0x750   : > { %v3840_v9 = vmul.f32 1.442695, %v3839_v15  ;;  %v6532_v15 = vld [vmem:[%s8673_s9 + $0xe4] ss:$16 sps:$4 sm:$0xff]  }
 0x751   : > { %v3533_v17 = vpop.xlane.xlu1 %3532 }
 0x752   : > { %6709 = vpow2.f32 %v3840_v9  ;;  %v6614_v9 = vld [vmem:[%s8673_s9 + $0x260] ss:$16 sps:$4 sm:$0xff]  }
 0x753   : > { %6711 = vrcp.f32 %v3533_v17  ;;  %v6530_v17 = vld [vmem:[%s8673_s9 + $0xe0] ss:$16 sps:$4 sm:$0xff]  }
 0x755   : > { %v3689_v18 = vpop.xlane.xlu1 %3688 }
 0x756   : > { %6713 = vrcp.f32 %v3689_v18  ;;  %v6619_v18 = vld [vmem:[%s8673_s9 + $0x284] ss:$16 sps:$4 sm:$0xff]  }
 0x75c   : > { %v6710_v19 = vpop.eup %6709 }
 0x75d   : > { %v6712_v8 = vpop.eup %6711  ;;  %v3842_v20 = vsel %vm3524_vm2, %v6710_v19, 0.0  ;;  %v3846_v23 = vpack.c.bf16 %v6710_v19, %v6710_v19  ;;  %v6535_v19 = vld [vmem:[%s8673_s9 + $0x104] ss:$16 sps:$4 sm:$0xff]  }
 0x75e   : > { %v3595_v16 = vmul.f32 %v6712_v8, %v8202_v44  ;;  %3843 = vadd.xlane.f32.xlu1 %v3842_v20  ;;  %v3912_v44 = vadd.f32 %v3911_v28, %v3908_v30  ;;  %v6533_v8 = vld [vmem:[%s8673_s9 + $0x100] ss:$16 sps:$4 sm:$0xff]   ;;  %v6622_v20 = vld [vmem:[%s8673_s9 + $0x2a4] ss:$16 sps:$4 sm:$0xff]  }
 0x75f   : > { %5851 = vmatmul.mubr.msk.bf16.vlgmr.msra.gmra.mrb[20].mxu1 %vm3524_vm2, %v3846_v23  ;;  %v6538_v23 = vld [vmem:[%s8673_s9 + $0x124] ss:$16 sps:$4 sm:$0xff]   ;;  %v6623_v28 = vld [vmem:[%s8673_s9 + $0x2c0] ss:$16 sps:$4 sm:$0xff]  }
 0x760   : > { %v6714_v55 = vpop.eup %6713  ;;  %v3596_v27 = vpack.c.bf16 %v3595_v16, %v3595_v16  ;;  %5855 = vmatpush3.bf16.xpose.msra.mxu1 %v6505_v24  ;;  %5858 = vmatprep.mubr.msk.bf16.mxu1 %vm6735_vm0, %v6734_v37  ;;  %v3913_v34 = vmul.f32 0.088388346, %v3912_v44  ;;  %v6617_v24 = vld [vmem:[%s8673_s9 + $0x280] ss:$16 sps:$4 sm:$0xff]   ;;  %v6628_v30 = vld [vmem:[%s8673_s9 + $0x2e4] ss:$16 sps:$4 sm:$0xff]  }
 0x761   : > { %v3750_v29 = vmul.f32 %v6714_v55, %v3744_v1  ;;  %5856 = vmatprep.subr.bf16.mxu1 %v6734_v37  ;;  %v6523_v1 = vld [vmem:[%s8673_s9 + $0x84] ss:$16 sps:$4 sm:$0xff]   ;;  %v6536_v16 = vld [vmem:[%s8673_s9 + $0x120] ss:$16 sps:$4 sm:$0xff]  }
 0x762   : > { %3597 = vst [vmem:[#allocation2] sm:$0xf] %v3596_v27  ;;  %v3937_v43 = vpack.c.bf16 %v3913_v34, %v3913_v34  ;;  %v6625_v55 = vld [vmem:[%s8673_s9 + $0x2c4] ss:$16 sps:$4 sm:$0xff]   ;;  %v6626_v44 = vld [vmem:[%s8673_s9 + $0x2e0] ss:$16 sps:$4 sm:$0xff]  }
 0x763   : > { %v3751_v31 = vpack.c.bf16 %v3750_v29, %v3750_v29  ;;  %v6541_v27 = vld [vmem:[%s8673_s9 + $0x144] ss:$16 sps:$4 sm:$0xff]   ;;  %v6539_v29 = vld [vmem:[%s8673_s9 + $0x140] ss:$16 sps:$4 sm:$0xff]  }
 0x764   : > { %v6631_v34 = vld [vmem:[%s8673_s9 + $0x304] ss:$16 sps:$4 sm:$0xff]  }
 0x765   : > { %3752 = vst [vmem:[#allocation2 + $0x4] sm:$0xf] %v3751_v31  ;;  %v6544_v31 = vld [vmem:[%s8673_s9 + $0x164] ss:$16 sps:$4 sm:$0xff]  }
 0x768   : > { %5857 = vmatpush3.bf16.xpose.msra.mxu1 %v6506_v32  ;;  %v6542_v32 = vld [vmem:[%s8673_s9 + $0x160] ss:$16 sps:$4 sm:$0xff]  }
 0x769   : > { %4888 = vmatprep.subr.bf16.mxu1 %v6607_v4  ;;  %v6644_v4 = vld [vmem:[%s8673_s9 + $0x3a0] ss:$16 sps:$4 sm:$0xff]  }
 0x76c   : > { %v8252_v51 = vld [vmem:[#allocation2] sm:$0xff] }
 0x76d   : > { %v8263_v58 = vcombine.high %v8252_v51, %v8252_v51 }
 0x76f   : > { %5859 = vmatmul.mubr.bf16.vlgmr.msra.gmra.mrb[24].mxu1 %v3937_v43  ;;  %v6547_v43 = vld [vmem:[%s8673_s9 + $0x184] ss:$16 sps:$4 sm:$0xff]  }
 0x770   : > { %4889 = vmatpush1.bf16.msra.mxu1 %v6605_v3  ;;  %v6580_v3 = vld [vmem:[%s8673_s9 + $0xec] ss:$16 sps:$4 sm:$0xff]  }
 0x771   : > { %4890 = vmatprep.subr.bf16.mxu1 %v6610_v6  ;;  %v6649_v6 = vld [vmem:[%s8673_s9 + $0x3c4] ss:$16 sps:$4 sm:$0xff]  }
 0x774   : > { %4891 = vmatpush1.bf16.msra.mxu1 %v6608_v7  ;;  %v6578_v7 = vld [vmem:[%s8673_s9 + $0xe8] ss:$16 sps:$4 sm:$0xff]  }
 0x775   : > { %4892 = vmatprep.subr.bf16.mxu1 %v6613_v25  ;;  %v6583_v25 = vld [vmem:[%s8673_s9 + $0x10c] ss:$16 sps:$4 sm:$0xff]  }
 0x778   : > { %4893 = vmatpush1.bf16.msra.mxu1 %v6611_v39  ;;  %v6581_v39 = vld [vmem:[%s8673_s9 + $0x108] ss:$16 sps:$4 sm:$0xff]  }
 0x779   : > { %4894 = vmatprep.subr.bf16.mxu1 %v6616_v14  ;;  %v6584_v14 = vld [vmem:[%s8673_s9 + $0x128] ss:$16 sps:$4 sm:$0xff]  }
 0x77c   : > { %4895 = vmatpush1.bf16.msra.mxu1 %v6614_v9  ;;  %v6589_v9 = vld [vmem:[%s8673_s9 + $0x14c] ss:$16 sps:$4 sm:$0xff]  }
 0x77d   : > { %4896 = vmatprep.subr.bf16.mxu1 %v6619_v18  ;;  %v6592_v18 = vld [vmem:[%s8673_s9 + $0x16c] ss:$16 sps:$4 sm:$0xff]  }
 0x780   : > { %4897 = vmatpush1.bf16.msra.mxu1 %v6617_v24  ;;  %v6595_v24 = vld [vmem:[%s8673_s9 + $0x18c] ss:$16 sps:$4 sm:$0xff]  }
 0x781   : > { %4898 = vmatprep.subr.bf16.mxu1 %v6622_v20  ;;  %v6598_v20 = vld [vmem:[%s8673_s9 + $0x1ac] ss:$16 sps:$4 sm:$0xff]  }
 0x784   : > { %4899 = vmatpush1.bf16.msra.mxu1 %v6620_v22  ;;  %v6601_v22 = vld [vmem:[%s8673_s9 + $0x1cc] ss:$16 sps:$4 sm:$0xff]  }
 0x785   : > { %4900 = vmatprep.subr.bf16.mxu1 %v6625_v55  ;;  %v6604_v55 = vld [vmem:[%s8673_s9 + $0x1ec] ss:$16 sps:$4 sm:$0xff]  }
 0x788   : > { %4901 = vmatpush1.bf16.msra.mxu1 %v6623_v28 }
 0x789   : > { %4902 = vmatprep.subr.bf16.mxu1 %v6628_v30 }
 0x78c   : > { %4903 = vmatpush1.bf16.msra.mxu1 %v6626_v44 }
 0x78d   : > { %4904 = vmatprep.subr.bf16.mxu1 %v6631_v34 }
 0x7eb   : > { %v3844_v35 = vpop.xlane.xlu1 %3843 }
 0x7ec   : > { %6715 = vrcp.f32 %v3844_v35  ;;  %v6629_v35 = vld [vmem:[%s8673_s9 + $0x300] ss:$16 sps:$4 sm:$0xff]  }
 0x7ed   : > { %4905 = vmatpush1.bf16.msra.mxu1 %v6629_v35 }
 0x7f6   : > { %v6716_v36 = vpop.eup %6715 }
 0x832   : > { %v3899_v52 = vpop.f32.mrb[20].mxu1 }
 0x833   : > { %v3905_v60 = vmul.f32 %v6716_v36, %v3899_v52  ;;  %v5852_v41 = vpop.f32.mrb[21].mxu1  ;;  %v6545_v36 = vld [vmem:[%s8673_s9 + $0x180] ss:$16 sps:$4 sm:$0xff]   ;;  %v6634_v52 = vld [vmem:[%s8673_s9 + $0x324] ss:$16 sps:$4 sm:$0xff]  }
 0x834   : > { %v3902_v11 = vpop.f32.mrb[22].mxu1  ;;  %v6632_v41 = vld [vmem:[%s8673_s9 + $0x320] ss:$16 sps:$4 sm:$0xff]   ;;  %4906 = vmatprep.subr.bf16.mxu1 %v6634_v52 }
 0x835   : > { %v3906_v37 = vpack.c.bf16 %v3905_v60, %v3905_v60  ;;  %v5853_v21 = vpop.f32.mrb[23].mxu1  ;;  %v6550_v60 = vld [vmem:[%s8673_s9 + $0x1a4] ss:$16 sps:$4 sm:$0xff]   ;;  %v6548_v11 = vld [vmem:[%s8673_s9 + $0x1a0] ss:$16 sps:$4 sm:$0xff]   ;;  %4907 = vmatpush1.bf16.msra.mxu1 %v6632_v41 }
 0x836   : > { %v6553_v21 = vld [vmem:[%s8673_s9 + $0x1c4] ss:$16 sps:$4 sm:$0xff]   ;;  %v6660_v41 = vld [vmem:[%s8673_s9 + $0x22c] ss:$16 sps:$4 sm:$0xff]  }
 0x837   : > { %3907 = vst [vmem:[#allocation2 + $0x8] sm:$0xf] %v3906_v37  ;;  %v6637_v37 = vld [vmem:[%s8673_s9 + $0x344] ss:$16 sps:$4 sm:$0xff]  }
 0x838   : > { %4908 = vmatprep.subr.bf16.mxu1 %v6637_v37  ;;  %v6663_v37 = vld [vmem:[%s8673_s9 + $0x24c] ss:$16 sps:$4 sm:$0xff]  }
 0x842   : > { %v3985_v47 = vpop.f32.mrb[24].mxu1 }
 0x843   : > { %v3986_v59 = vadd.f32 %v3985_v47, %v8166_v54  ;;  %v5860_v38 = vpop.f32.mrb[25].mxu1  ;;  %v6507_v54 = vld [vmem:[%s8673_s9] ss:$16 sps:$4 sm:$0xff]  }
 0x844   : > { %v3988_v48 = vpop.f32.mrb[26].mxu1  ;;  %v6635_v47 = vld [vmem:[%s8673_s9 + $0x340] ss:$16 sps:$4 sm:$0xff]   ;;  %v6640_v38 = vld [vmem:[%s8673_s9 + $0x364] ss:$16 sps:$4 sm:$0xff]  }
 0x845   : > { %v5861_v49 = vpop.f32.mrb[27].mxu1  ;;  %v3991_v26 = vsel %vm3524_vm2, %v3986_v59, -inf  ;;  %v6556_v48 = vld [vmem:[%s8673_s9 + $0x1e4] ss:$16 sps:$4 sm:$0xff]   ;;  %4909 = vmatpush1.bf16.msra.mxu1 %v6635_v47  ;;  %v6666_v47 = vld [vmem:[%s8673_s9 + $0x26c] ss:$16 sps:$4 sm:$0xff]  }
 0x846   : > { %3992 = vmax.xlane.f32.xlu0 %v3991_v26  ;;  %v6638_v49 = vld [vmem:[%s8673_s9 + $0x360] ss:$16 sps:$4 sm:$0xff]   ;;  %4910 = vmatprep.subr.bf16.mxu1 %v6640_v38  ;;  %v6669_v38 = vld [vmem:[%s8673_s9 + $0x28c] ss:$16 sps:$4 sm:$0xff]  }
 0x847   : > { %v6554_v26 = vld [vmem:[%s8673_s9 + $0x1e0] ss:$16 sps:$4 sm:$0xff]  }
 0x849   : > { %4911 = vmatpush1.bf16.msra.mxu1 %v6638_v49  ;;  %v6672_v49 = vld [vmem:[%s8673_s9 + $0x2ac] ss:$16 sps:$4 sm:$0xff]  }
 0x84a   : > { %4912 = vmatprep.subr.bf16.mxu1 %v6643_v33  ;;  %v6675_v33 = vld [vmem:[%s8673_s9 + $0x2cc] ss:$16 sps:$4 sm:$0xff]  }
 0x8d3   : > { %v3993_v42 = vpop.xlane.xlu0 %3992 }
 0x8d4   : > { %v3994_v50 = vsub.f32 %v3986_v59, %v3993_v42  ;;  %v6551_v59 = vld [vmem:[%s8673_s9 + $0x1c0] ss:$16 sps:$4 sm:$0xff]   ;;  %v6559_v42 = vld [vmem:[%s8673_s9 + $0xc] ss:$16 sps:$4 sm:$0xff]  }
 0x8d6   : > { %v3995_v46 = vmul.f32 1.442695, %v3994_v50  ;;  %v6641_v50 = vld [vmem:[%s8673_s9 + $0x380] ss:$16 sps:$4 sm:$0xff]  }
 0x8d7   : > { %4913 = vmatpush1.bf16.msra.mxu1 %v6641_v50  ;;  %v6678_v50 = vld [vmem:[%s8673_s9 + $0x2ec] ss:$16 sps:$4 sm:$0xff]  }
 0x8d8   : > { %6717 = vpow2.f32 %v3995_v46  ;;  %v6557_v46 = vld [vmem:[%s8673_s9 + $0x8] ss:$16 sps:$4 sm:$0xff]  }
 0x8e2   : > { %v6718_v53 = vpop.eup %6717 }
 0x8e3   : > { %v3997_v40 = vsel %vm3524_vm2, %v6718_v53, 0.0  ;;  %v4001_v56 = vpack.c.bf16 %v6718_v53, %v6718_v53  ;;  %v8440_v53 = vcombine.low %v8252_v51, %v8252_v51  ;;  %v6565_v51 = vld [vmem:[%s8673_s9 + $0x4c] ss:$16 sps:$4 sm:$0xff]  }
 0x8e4   : > { %3998 = vadd.xlane.f32.xlu1 %v3997_v40  ;;  %v6560_v40 = vld [vmem:[%s8673_s9 + $0x28] ss:$16 sps:$4 sm:$0xff]  }
 0x8e5   : > { %5867 = vmatmul.mubr.msk.bf16.vlgmr.msra.gmra.mrb[24].mxu0 %vm3524_vm2, %v4001_v56  ;;  %v6563_v56 = vld [vmem:[%s8673_s9 + $0x48] ss:$16 sps:$4 sm:$0xff]  }
 0x8e6   : > { %4848 = vmatpush1.bf16.msra.mxu0 %v6507_v54  ;;  %4879 = vmatprep.mubr.bf16.mxu0 %v8263_v58  ;;  %v6562_v54 = vld [vmem:[%s8673_s9 + $0x2c] ss:$16 sps:$4 sm:$0xff]  }
 0x8e7   : > { %4849 = vmatprep.subr.bf16.mxu0 %v6514_v57  ;;  %v6568_v57 = vld [vmem:[%s8673_s9 + $0x6c] ss:$16 sps:$4 sm:$0xff]  }
 0x8ea   : > { %4850 = vmatpush1.bf16.msra.mxu0 %v6512_v45  ;;  %v6571_v45 = vld [vmem:[%s8673_s9 + $0x8c] ss:$16 sps:$4 sm:$0xff]  }
 0x8eb   : > { %4851 = vmatprep.subr.bf16.mxu0 %v6517_v61  ;;  %v6569_v61 = vld [vmem:[%s8673_s9 + $0x88] ss:$16 sps:$4 sm:$0xff]  }
 0x8ee   : > { %4852 = vmatpush1.bf16.msra.mxu0 %v6515_v62  ;;  %v6574_v62 = vld [vmem:[%s8673_s9 + $0xac] ss:$16 sps:$4 sm:$0xff]  }
 0x8ef   : > { %4853 = vmatprep.subr.bf16.mxu0 %v6520_v63  ;;  %v6572_v63 = vld [vmem:[%s8673_s9 + $0xa8] ss:$16 sps:$4 sm:$0xff]  }
 0x8f2   : > { %4854 = vmatpush1.bf16.msra.mxu0 %v6518_v0  ;;  %v6577_v0 = vld [vmem:[%s8673_s9 + $0xcc] ss:$16 sps:$4 sm:$0xff]  }
 0x8f3   : > { %4855 = vmatprep.subr.bf16.mxu0 %v6523_v1  ;;  %v6575_v1 = vld [vmem:[%s8673_s9 + $0xc8] ss:$16 sps:$4 sm:$0xff]  }
 0x8f6   : > { %4856 = vmatpush1.bf16.msra.mxu0 %v6521_v2  ;;  %v6646_v2 = vld [vmem:[%s8673_s9 + $0x3a4] ss:$16 sps:$4 sm:$0xff]  }
 0x8f7   : > { %4857 = vmatprep.subr.bf16.mxu0 %v6526_v5  ;;  %4914 = vmatprep.subr.bf16.mxu1 %v6646_v2  ;;  %v6647_v5 = vld [vmem:[%s8673_s9 + $0x3c0] ss:$16 sps:$4 sm:$0xff]   ;;  %v6694_v2 = vld [vmem:[%s8673_s9 + $0x3a8] ss:$16 sps:$4 sm:$0xff]  }
 0x8f8   : > { %4915 = vmatpush1.bf16.msra.mxu1 %v6644_v4  ;;  %v6699_v4 = vld [vmem:[%s8673_s9 + $0x3cc] ss:$16 sps:$4 sm:$0xff]  }
 0x8f9   : > { %4916 = vmatprep.subr.bf16.mxu1 %v6649_v6  ;;  %v6697_v6 = vld [vmem:[%s8673_s9 + $0x3c8] ss:$16 sps:$4 sm:$0xff]  }
 0x8fa   : > { %4858 = vmatpush1.bf16.msra.mxu0 %v6524_v12  ;;  %v6652_v12 = vld [vmem:[%s8673_s9 + $0x3e4] ss:$16 sps:$4 sm:$0xff]  }
 0x8fb   : > { %4859 = vmatprep.subr.bf16.mxu0 %v6529_v13  ;;  %v6650_v13 = vld [vmem:[%s8673_s9 + $0x3e0] ss:$16 sps:$4 sm:$0xff]  }
 0x8fc   : > { %4917 = vmatpush1.bf16.msra.mxu1 %v6647_v5 }
 0x8fd   : > { %4918 = vmatprep.subr.bf16.mxu1 %v6652_v12  ;;  %v6700_v12 = vld [vmem:[%s8673_s9 + $0x3e8] ss:$16 sps:$4 sm:$0xff]  }
 0x8fe   : > { %4860 = vmatpush1.bf16.msra.mxu0 %v6527_v10  ;;  %v6586_v10 = vld [vmem:[%s8673_s9 + $0x12c] ss:$16 sps:$4 sm:$0xff]  }
 0x8ff   : > { %4861 = vmatprep.subr.bf16.mxu0 %v6532_v15  ;;  %v6657_v15 = vld [vmem:[%s8673_s9 + $0x20c] ss:$16 sps:$4 sm:$0xff]  }
 0x900   : > { %4919 = vmatpush1.bf16.msra.mxu1 %v6650_v13 }
 0x901   : > { %4970 = vmatprep.subr.bf16.mxu1 %v6657_v15 }
 0x902   : > { %4862 = vmatpush1.bf16.msra.mxu0 %v6530_v17  ;;  %v6587_v17 = vld [vmem:[%s8673_s9 + $0x148] ss:$16 sps:$4 sm:$0xff]  }
 0x903   : > { %4863 = vmatprep.subr.bf16.mxu0 %v6535_v19  ;;  %v6590_v19 = vld [vmem:[%s8673_s9 + $0x168] ss:$16 sps:$4 sm:$0xff]  }
 0x906   : > { %4864 = vmatpush1.bf16.msra.mxu0 %v6533_v8  ;;  %v6593_v8 = vld [vmem:[%s8673_s9 + $0x188] ss:$16 sps:$4 sm:$0xff]  }
 0x907   : > { %4865 = vmatprep.subr.bf16.mxu0 %v6538_v23  ;;  %v6596_v23 = vld [vmem:[%s8673_s9 + $0x1a8] ss:$16 sps:$4 sm:$0xff]  }
 0x90a   : > { %4866 = vmatpush1.bf16.msra.mxu0 %v6536_v16  ;;  %v6599_v16 = vld [vmem:[%s8673_s9 + $0x1c8] ss:$16 sps:$4 sm:$0xff]  }
 0x90b   : > { %4867 = vmatprep.subr.bf16.mxu0 %v6541_v27  ;;  %v6602_v27 = vld [vmem:[%s8673_s9 + $0x1e8] ss:$16 sps:$4 sm:$0xff]  }
 0x90e   : > { %4868 = vmatpush1.bf16.msra.mxu0 %v6539_v29 }
 0x90f   : > { %4869 = vmatprep.subr.bf16.mxu0 %v6544_v31 }
 0x912   : > { %4870 = vmatpush1.bf16.msra.mxu0 %v6542_v32 }
 0x913   : > { %4871 = vmatprep.subr.bf16.mxu0 %v6547_v43 }
 0x916   : > { %4872 = vmatpush1.bf16.msra.mxu0 %v6545_v36 }
 0x917   : > { %4873 = vmatprep.subr.bf16.mxu0 %v6550_v60  ;;  %v6655_v60 = vld [vmem:[%s8673_s9 + $0x208] ss:$16 sps:$4 sm:$0xff]  }
 0x91a   : > { %4874 = vmatpush1.bf16.msra.mxu0 %v6548_v11  ;;  %v6658_v11 = vld [vmem:[%s8673_s9 + $0x228] ss:$16 sps:$4 sm:$0xff]  }
 0x91b   : > { %4875 = vmatprep.subr.bf16.mxu0 %v6553_v21  ;;  %v6661_v21 = vld [vmem:[%s8673_s9 + $0x248] ss:$16 sps:$4 sm:$0xff]  }
 0x91e   : > { %4876 = vmatpush1.bf16.msra.mxu0 %v6551_v59  ;;  %v6664_v59 = vld [vmem:[%s8673_s9 + $0x268] ss:$16 sps:$4 sm:$0xff]  }
 0x91f   : > { %4877 = vmatprep.subr.bf16.mxu0 %v6556_v48  ;;  %v6667_v48 = vld [vmem:[%s8673_s9 + $0x288] ss:$16 sps:$4 sm:$0xff]  }
 0x922   : > { %4878 = vmatpush1.bf16.msra.mxu0 %v6554_v26  ;;  %v6670_v26 = vld [vmem:[%s8673_s9 + $0x2a8] ss:$16 sps:$4 sm:$0xff]  }
 0x923   : > { %4929 = vmatprep.subr.bf16.mxu0 %v6559_v42  ;;  %v6673_v42 = vld [vmem:[%s8673_s9 + $0x2c8] ss:$16 sps:$4 sm:$0xff]  }
 0x925   : > { %4880 = vmatmul.mubr.bf16.vlgmr.msra.gmra.mrb[28].mxu0 %v8440_v53 }
 0x926   : > { %4930 = vmatpush1.bf16.msra.mxu0 %v6557_v46  ;;  %4961 = vmatprep.mubr.bf16.mxu0 %v8263_v58  ;;  %v6566_v58 = vld [vmem:[%s8673_s9 + $0x68] ss:$16 sps:$4 sm:$0xff]  }
 0x927   : > { %4931 = vmatprep.subr.bf16.mxu0 %v6562_v54  ;;  %v6676_v46 = vld [vmem:[%s8673_s9 + $0x2e8] ss:$16 sps:$4 sm:$0xff]  }
 0x928   : > { %v6679_v54 = vld [vmem:[%s8673_s9 + $0x308] ss:$16 sps:$4 sm:$0xff]  }
 0x92a   : > { %4932 = vmatpush1.bf16.msra.mxu0 %v6560_v40  ;;  %v6684_v40 = vld [vmem:[%s8673_s9 + $0x32c] ss:$16 sps:$4 sm:$0xff]  }
 0x92b   : > { %4933 = vmatprep.subr.bf16.mxu0 %v6565_v51  ;;  %v6682_v51 = vld [vmem:[%s8673_s9 + $0x328] ss:$16 sps:$4 sm:$0xff]  }
 0x92e   : > { %4934 = vmatpush1.bf16.msra.mxu0 %v6563_v56  ;;  %v6687_v56 = vld [vmem:[%s8673_s9 + $0x34c] ss:$16 sps:$4 sm:$0xff]  }
 0x92f   : > { %4935 = vmatprep.subr.bf16.mxu0 %v6568_v57  ;;  %v6685_v57 = vld [vmem:[%s8673_s9 + $0x348] ss:$16 sps:$4 sm:$0xff]  }
 0x932   : > { %4936 = vmatpush1.bf16.msra.mxu0 %v6566_v58  ;;  %v6690_v58 = vld [vmem:[%s8673_s9 + $0x36c] ss:$16 sps:$4 sm:$0xff]  }
 0x933   : > { %4937 = vmatprep.subr.bf16.mxu0 %v6571_v45  ;;  %v6688_v45 = vld [vmem:[%s8673_s9 + $0x368] ss:$16 sps:$4 sm:$0xff]  }
 0x936   : > { %4938 = vmatpush1.bf16.msra.mxu0 %v6569_v61  ;;  %v6693_v61 = vld [vmem:[%s8673_s9 + $0x38c] ss:$16 sps:$4 sm:$0xff]  }
 0x937   : > { %4939 = vmatprep.subr.bf16.mxu0 %v6574_v62  ;;  %v6691_v62 = vld [vmem:[%s8673_s9 + $0x388] ss:$16 sps:$4 sm:$0xff]  }
 0x93a   : > { %4940 = vmatpush1.bf16.msra.mxu0 %v6572_v63  ;;  %v6696_v63 = vld [vmem:[%s8673_s9 + $0x3ac] ss:$16 sps:$4 sm:$0xff]  }
 0x93b   : > { %4941 = vmatprep.subr.bf16.mxu0 %v6577_v0 }
 0x93e   : > { %4942 = vmatpush1.bf16.msra.mxu0 %v6575_v1 }
 0x93f   : > { %4943 = vmatprep.subr.bf16.mxu0 %v6580_v3 }
 0x942   : > { %4944 = vmatpush1.bf16.msra.mxu0 %v6578_v7  ;;  %v6702_v7 = vld [vmem:[%s8673_s9 + $0x3ec] ss:$16 sps:$4 sm:$0xff]  }
 0x943   : > { %4945 = vmatprep.subr.bf16.mxu0 %v6583_v25 }
 0x946   : > { %4946 = vmatpush1.bf16.msra.mxu0 %v6581_v39 }
 0x947   : > { %4947 = vmatprep.subr.bf16.mxu0 %v6586_v10 }
 0x94a   : > { %4948 = vmatpush1.bf16.msra.mxu0 %v6584_v14 }
 0x94b   : > { %4949 = vmatprep.subr.bf16.mxu0 %v6589_v9 }
 0x94e   : > { %4950 = vmatpush1.bf16.msra.mxu0 %v6587_v17 }
 0x94f   : > { %4951 = vmatprep.subr.bf16.mxu0 %v6592_v18 }
 0x952   : > { %4952 = vmatpush1.bf16.msra.mxu0 %v6590_v19  ;;  %v6721_v19 = vld [vmem:[%s6839_s24] sm:$0xff] }
 0x953   : > { %4953 = vmatprep.subr.bf16.mxu0 %v6595_v24 }
 0x956   : > { %4954 = vmatpush1.bf16.msra.mxu0 %v6593_v8 }
 0x957   : > { %4955 = vmatprep.subr.bf16.mxu0 %v6598_v20  ;;  %v6722_v20 = vld [vmem:[%s6839_s24 + $0x8] sm:$0xff] }
 0x95a   : > { %4956 = vmatpush1.bf16.msra.mxu0 %v6596_v23 }
 0x95b   : > { %4957 = vmatprep.subr.bf16.mxu0 %v6601_v22 }
 0x95e   : > { %4958 = vmatpush1.bf16.msra.mxu0 %v6599_v16 }
 0x95f   : > { %4959 = vmatprep.subr.bf16.mxu0 %v6604_v55 }
 0x962   : > { %4960 = vmatpush1.bf16.msra.mxu0 %v6602_v27 }
 0x965   : > { %4962 = vmatmul.mubr.bf16.vlgmr.msra.gmra.mrb[32].mxu0 %v8440_v53  ;;  %v6681_v53 = vld [vmem:[%s8673_s9 + $0x30c] ss:$16 sps:$4 sm:$0xff]  }
 0x971   : > { %v3999_v28 = vpop.xlane.xlu1 %3998 }
 0x972   : > { %6719 = vrcp.f32 %v3999_v28 }
 0x97c   : > { %v6720_v29 = vpop.eup %6719 }
 0x9b8   : > { %v4054_v30 = vpop.f32.mrb[24].mxu0 }
 0x9b9   : > { %v4060_v31 = vmul.f32 %v6720_v29, %v4054_v30  ;;  %v5868_v44 = vpop.f32.mrb[25].mxu0  ;;  %v6723_v29 = vld [vmem:[%s6839_s24 + $0x10] sm:$0xff] }
 0x9ba   : > { %v4057_v32 = vpop.f32.mrb[26].mxu0  ;;  %v6724_v44 = vld [vmem:[%s6839_s24 + $0x18] sm:$0xff] }
 0x9bb   : > { %v4061_v34 = vpack.c.bf16 %v4060_v31, %v4060_v31  ;;  %v5869_v43 = vpop.f32.mrb[27].mxu0 }
 0x9bd   : > { %4062 = vst [vmem:[#allocation2 + $0xc] sm:$0xf] %v4061_v34 }
 0x9c4   : > { %v4064_v35 = vld [vmem:[#allocation2 + $0x8] sm:$0xff] }
 0x9c5   : > { %v8556_v36 = vcombine.low %v4064_v35, %v4064_v35  ;;  %v5645_v52 = vcombine.high %v4064_v35, %v4064_v35 }
 0x9c7   : > { %4920 = vmatprep.mubr.bf16.mxu1 %v5645_v52 }
 0x9c8   : > { %4921 = vmatmul.mubr.bf16.vlgmr.msra.gmra.mrb[28].mxu1 %v8556_v36 }
 0x9c9   : > { %4971 = vmatpush1.bf16.msra.mxu1 %v6655_v60  ;;  %5002 = vmatprep.mubr.bf16.mxu1 %v5645_v52 }
 0x9ca   : > { %4972 = vmatprep.subr.bf16.mxu1 %v6660_v41 }
 0x9cd   : > { %4973 = vmatpush1.bf16.msra.mxu1 %v6658_v11 }
 0x9ce   : > { %4974 = vmatprep.subr.bf16.mxu1 %v6663_v37 }
 0x9d1   : > { %4975 = vmatpush1.bf16.msra.mxu1 %v6661_v21 }
 0x9d2   : > { %4976 = vmatprep.subr.bf16.mxu1 %v6666_v47 }
 0x9d5   : > { %4977 = vmatpush1.bf16.msra.mxu1 %v6664_v59 }
 0x9d6   : > { %4978 = vmatprep.subr.bf16.mxu1 %v6669_v38 }
 0x9d9   : > { %4979 = vmatpush1.bf16.msra.mxu1 %v6667_v48 }
 0x9da   : > { %4980 = vmatprep.subr.bf16.mxu1 %v6672_v49 }
 0x9dd   : > { %4981 = vmatpush1.bf16.msra.mxu1 %v6670_v26 }
 0x9de   : > { %4982 = vmatprep.subr.bf16.mxu1 %v6675_v33 }
 0x9e1   : > { %4983 = vmatpush1.bf16.msra.mxu1 %v6673_v42 }
 0x9e2   : > { %4984 = vmatprep.subr.bf16.mxu1 %v6678_v50 }
 0x9e5   : > { %4985 = vmatpush1.bf16.msra.mxu1 %v6676_v46 }
 0x9e6   : > { %4986 = vmatprep.subr.bf16.mxu1 %v6681_v53 }
 0x9e9   : > { %4987 = vmatpush1.bf16.msra.mxu1 %v6679_v54 }
 0x9ea   : > { %4988 = vmatprep.subr.bf16.mxu1 %v6684_v40 }
 0x9ed   : > { %4989 = vmatpush1.bf16.msra.mxu1 %v6682_v51 }
 0x9ee   : > { %4990 = vmatprep.subr.bf16.mxu1 %v6687_v56 }
 0x9f1   : > { %4991 = vmatpush1.bf16.msra.mxu1 %v6685_v57 }
 0x9f2   : > { %4992 = vmatprep.subr.bf16.mxu1 %v6690_v58 }
 0x9f5   : > { %4993 = vmatpush1.bf16.msra.mxu1 %v6688_v45 }
 0x9f6   : > { %4994 = vmatprep.subr.bf16.mxu1 %v6693_v61 }
 0x9f8   : > { %v4881_v0 = vpop.f32.mrb[28].mxu0 }
 0x9f9   : > { %v4883_v1 = vpop.f32.mrb[29].mxu0  ;;  %4995 = vmatpush1.bf16.msra.mxu1 %v6691_v62 }
 0x9fa   : > { %v4885_v3 = vpop.f32.mrb[30].mxu0  ;;  %4996 = vmatprep.subr.bf16.mxu1 %v6696_v63 }
 0x9fb   : > { %v4886_v5 = vpop.f32.mrb[31].mxu0 }
 0x9fd   : > { %4997 = vmatpush1.bf16.msra.mxu1 %v6694_v2 }
 0x9fe   : > { %4998 = vmatprep.subr.bf16.mxu1 %v6699_v4 }
 0xa01   : > { %4999 = vmatpush1.bf16.msra.mxu1 %v6697_v6 }
 0xa02   : > { %5000 = vmatprep.subr.bf16.mxu1 %v6702_v7 }
 0xa05   : > { %5001 = vmatpush1.bf16.msra.mxu1 %v6700_v12 }
 0xa08   : > { %5003 = vmatmul.mubr.bf16.vlgmr.msra.gmra.mrb[32].mxu1 %v8556_v36 }
 0xa38   : > { %v4963_v25 = vpop.f32.mrb[32].mxu0 }
 0xa39   : > { %v4965_v13 = vpop.f32.mrb[33].mxu0 }
 0xa3a   : > { %v4967_v39 = vpop.f32.mrb[34].mxu0 }
 0xa3b   : > { %v4968_v10 = vpop.f32.mrb[35].mxu0 }
 0xa9b   : > { %v4922_v14 = vpop.f32.mrb[28].mxu1 }
 0xa9c   : > { %v4923_v15 = vadd.f32 %v4922_v14, %v4881_v0  ;;  %v4924_v9 = vpop.f32.mrb[29].mxu1 }
 0xa9d   : > { %v4925_v17 = vadd.f32 %v4924_v9, %v4883_v1  ;;  %v4926_v18 = vpop.f32.mrb[30].mxu1 }
 0xa9e   : > { %v5011_v24 = vadd.f32 %v6721_v19, %v4923_v15  ;;  %v4927_v8 = vpop.f32.mrb[31].mxu1 }
 0xa9f   : > { %v5012_v23 = vadd.f32 %v6722_v20, %v4925_v17 }
 0xaa0   : > { %5015 = vst [vmem:[%s519_s26] sm:$0xff] %v5011_v24 }
 0xaa1   : > { %5016 = vst [vmem:[%s519_s26 + $0x8] sm:$0xff] %v5012_v23 }
 0xadb   : > { %v5004_v22 = vpop.f32.mrb[32].mxu1 }
 0xadc   : > { %v5005_v16 = vadd.f32 %v5004_v22, %v4963_v25  ;;  %v5006_v55 = vpop.f32.mrb[33].mxu1 }
 0xadd   : > { %v5007_v27 = vadd.f32 %v5006_v55, %v4965_v13  ;;  %v5008_v28 = vpop.f32.mrb[34].mxu1 }
 0xade   : > { %v5013_v30 = vadd.f32 %v6723_v29, %v5005_v16  ;;  %v5009_v31 = vpop.f32.mrb[35].mxu1 }
 0xadf   : > { %v5014_v32 = vadd.f32 %v6724_v44, %v5007_v27 }
 0xae0   : > { %5017 = vst [vmem:[%s519_s26 + $0x10] sm:$0xff] %v5013_v30 }
 0xae1   : > { %5018 = vst [vmem:[%s519_s26 + $0x18] sm:$0xff] %v5014_v32 }
 0xae2 PF: > { %s23_s21 = sadd.s32 1, %s6731_s21  }
 0xae3   : > { %p20_p4 = scmp.ge.s32.totalorder %s23_s21, 4  }
 0xae5   :  { %22 = sbr.rel (!%p20_p4) target bundleno = 1 (0x1), region = 141 }

// kernel: qwen_block_cache.3
= control target key start
LH: loop header
LB: loop body
LE: loop exit
PB: predicated region body
PF: predicated region fallthrough
CT: control target
= control target key end

     0   :  { %s6358_s0 = inlined_call_operand.vmem [shape: f32[2,8,512], index: 0, kind: input, shape index: {}]   ;;  %s6359_s1 = inlined_call_operand.vmem [shape: f32[1,512], index: 1, kind: input, shape index: {}]   ;;  %s6360_s2 = inlined_call_operand.vmem [shape: bf16[512,1024], index: 2, kind: input, shape index: {}]   ;;  %s6361_s3 = inlined_call_operand.vmem [shape: bf16[512,1024], index: 3, kind: input, shape index: {}]   ;;  %s6362_s4 = inlined_call_operand.vmem [shape: bf16[1024,512], index: 4, kind: input, shape index: {}]   ;;  %s6363_s5 = inlined_call_operand.hbm [shape: f32[2,8,512], index: 5, kind: output, shape index: {}]  }
   0x1   :  { %6368 = sst [smem:[#allocation12_spill]] %s6360_s2 }
   0x2   :  { %6369 = sst [smem:[#allocation13_spill]] %s6361_s3 }
   0x3   :  { %10 = vsyncpa [#allocation7], 0 }
   0x4   :  { %12 = vsyncpa [#allocation7 + $0x1], 0  ;;  %s5209_s18 = smov 0   ;;  %s5211_s19 = smov 0  }
   0x5   :  { %s5213_s20 = smov 0   ;;  %s5215_s21 = smov 0  }
   0x6   :  { %s5217_s22 = smov 0   ;;  %s5219_s23 = smov 0  }
   0x7   :  { %s5221_s24 = smov 0   ;;  %s5223_s25 = smov 0  }
   0x8   :  { %s5225_s26 = smov 0   ;;  %s5227_s27 = smov 0  }
   0x9 LB: > { %6370 = sst [smem:[#allocation9_spill]] %s5171_s26  ;;  %s3936_s28 = sadd.s32 4294967295, %s5175_s27   ;;  %s5175_s27 = sphi %s5227_s27, %s18_s27   ;;  %s5171_s26 = sphi %s5225_s26, %s6381_s26   ;;  %s5167_s25 = sphi %s5223_s25, %s6388_s25   ;;  %s5163_s24 = sphi %s5221_s24, %s6379_s24   ;;  %s5159_s23 = sphi %s5219_s23, %s6387_s23   ;;  %s5155_s22 = sphi %s5217_s22, %s6386_s22   ;;  %s5151_s21 = sphi %s5215_s21, %s6385_s21   ;;  %s5147_s20 = sphi %s5213_s20, %s6384_s20   ;;  %s5143_s19 = sphi %s5211_s19, %s6383_s19   ;;  %s5139_s18 = sphi %s5209_s18, %s6382_s18  }
   0xa   : > { %s3937_s29 = sadd.s32 4294967294, %s5175_s27   ;;  %s27_s30 = sadd.s32 1, %s5167_s25 }
   0xb   : > { %s30_s6 = sadd.s32 1, %s5171_s26  ;;  %p28_p0 = scmp.ge.s32.totalorder %s27_s30, 2 }
   0xc   : > { %s84_s7 = sadd.s32 1, %s5155_s22  ;;  %p91_p1 = scmp.ne.s32.totalorder %s5155_s22, %s5151_s21 }
   0xd   : > { %p92_p2 = scmp.eq.s32.totalorder %s5175_s27, 0  ;;  %s6390_s30 = smov (%p28_p0, %s27_s30), 0 }
   0xe   : > { %6371 = sst [smem:[#allocation10_spill]] %s6390_s30  ;;  %s6392_s6 = smov (!%p28_p0, %s30_s6), %s5171_s26 }
   0xf   : > { %s81_s8 = ssub.s32 %s5167_s25, %s6390_s30  ;;  %p5272_p3 = por %p92_p2, %p91_p1 }
  0x10   : > { %p32_p4 = scmp.ge.s32.totalorder %s6392_s6, 2  ;;  %p82_p5 = scmp.eq.s32.totalorder %s81_s8, 0 }
  0x11   : > { %s162_s10 = sadd.s32 1, %s5147_s20  ;;  %p172_p6 = scmp.ne.s32.totalorder %s5147_s20, %s5143_s19 }
  0x12   : > { %s6394_s6 = smov (%p32_p4, %s6392_s6), 0  ;;  %p173_p7 = scmp.eq.s32.totalorder %s3936_s28, 3 }
  0x13   : > { %6373 = sst [smem:[#allocation11_spill]] %s6394_s6  ;;  %s159_s12 = ssub.s32 %s5171_s26, %s6394_s6 }
  0x14   : > { %s5282_s11 = scalar_select %p82_p5, %s5155_s22, %s84_s7  }
  0x15   : > { %p160_p8 = scmp.eq.s32.totalorder %s159_s12, 0  ;;  %p178_p9 = scmp.ne.s32.totalorder %s5143_s19, %s5139_s18 }
  0x16   : > { %p5288_p10 = por %p173_p7, %p172_p6  ;;  %p179_p11 = scmp.eq.s32.totalorder %s3937_s29, 3 }
  0x17   : > { %s5293_s14 = scalar_select %p160_p8, %s5147_s20, %s162_s10  }
  0x18   : > { %p5295_p12 = por %p179_p11, %p178_p9  ;;  %p3939_p13 = scmp.ge.s32.totalorder %s5175_s27, 4 }
  0x1a   : > { %198 = sbr.rel (%p3939_p13) target bundleno = 181 (0xb5), region = 20 }
  0x21   : > { %209 = sbr.rel (!%p5272_p3) target bundleno = 107 (0x6b), region = 28  ;;  %s211_s16 = sand.u32 (%p5272_p3), 1, %s5155_s22  }
  0x22   : > { %s4356_s17 = sshll.u32 (%p5272_p3), %s5167_s25, 4  ;;  %s3940_s28 = sshll.u32 (%p5272_p3), %s211_s16, 10 }
  0x23   : > { %s6376_s2 = sld [smem:[#allocation12_spill]] (%p5272_p3)  ;;  %s5312_s10 = scalar_lea.vmem (%p5272_p3), [#allocation4], %s3940_s28 }
  0x29   : > { %s5307_s29 = scalar_lea.vmem %s6376_s2, %s4356_s17 }
  0x2a   : > { %v229_v0 = vld [vmem:[%s5307_s29] sm:$0xff]  ;;  %v231_v1 = vld [vmem:[%s5307_s29 + $0x8] sm:$0xff] }
  0x2b   : > { %v233_v2 = vld [vmem:[%s5307_s29 + $0x20] sm:$0xff]  ;;  %230 = vst [vmem:[%s5312_s10] sm:$0xff] %v229_v0  ;;  %232 = vst [vmem:[%s5312_s10 + $0x8] sm:$0xff] %v231_v1  ;;  %v235_v3 = vld [vmem:[%s5307_s29 + $0x28] sm:$0xff] }
  0x2c   : > { %234 = vst [vmem:[%s5312_s10 + $0x10] sm:$0xff] %v233_v2  ;;  %v237_v4 = vld [vmem:[%s5307_s29 + $0x40] sm:$0xff]  ;;  %v239_v5 = vld [vmem:[%s5307_s29 + $0x48] sm:$0xff]  ;;  %236 = vst [vmem:[%s5312_s10 + $0x18] sm:$0xff] %v235_v3 }
  0x2d   : > { %238 = vst [vmem:[%s5312_s10 + $0x20] sm:$0xff] %v237_v4  ;;  %240 = vst [vmem:[%s5312_s10 + $0x28] sm:$0xff] %v239_v5  ;;  %v241_v6 = vld [vmem:[%s5307_s29 + $0x60] sm:$0xff]  ;;  %v243_v7 = vld [vmem:[%s5307_s29 + $0x68] sm:$0xff] }
  0x2e   : > { %v245_v8 = vld [vmem:[%s5307_s29 + $0x80] sm:$0xff]  ;;  %242 = vst [vmem:[%s5312_s10 + $0x30] sm:$0xff] %v241_v6  ;;  %244 = vst [vmem:[%s5312_s10 + $0x38] sm:$0xff] %v243_v7  ;;  %v247_v9 = vld [vmem:[%s5307_s29 + $0x88] sm:$0xff] }
  0x2f   : > { %246 = vst [vmem:[%s5312_s10 + $0x40] sm:$0xff] %v245_v8  ;;  %v249_v10 = vld [vmem:[%s5307_s29 + $0xa0] sm:$0xff]  ;;  %v251_v11 = vld [vmem:[%s5307_s29 + $0xa8] sm:$0xff]  ;;  %248 = vst [vmem:[%s5312_s10 + $0x48] sm:$0xff] %v247_v9 }
  0x30   : > { %250 = vst [vmem:[%s5312_s10 + $0x50] sm:$0xff] %v249_v10  ;;  %252 = vst [vmem:[%s5312_s10 + $0x58] sm:$0xff] %v251_v11  ;;  %v253_v12 = vld [vmem:[%s5307_s29 + $0xc0] sm:$0xff]  ;;  %v255_v13 = vld [vmem:[%s5307_s29 + $0xc8] sm:$0xff] }
  0x31   : > { %v257_v14 = vld [vmem:[%s5307_s29 + $0xe0] sm:$0xff]  ;;  %254 = vst [vmem:[%s5312_s10 + $0x60] sm:$0xff] %v253_v12  ;;  %256 = vst [vmem:[%s5312_s10 + $0x68] sm:$0xff] %v255_v13  ;;  %v259_v15 = vld [vmem:[%s5307_s29 + $0xe8] sm:$0xff] }
  0x32   : > { %258 = vst [vmem:[%s5312_s10 + $0x70] sm:$0xff] %v257_v14  ;;  %v261_v16 = vld [vmem:[%s5307_s29 + $0x100] sm:$0xff]  ;;  %v263_v17 = vld [vmem:[%s5307_s29 + $0x108] sm:$0xff]  ;;  %260 = vst [vmem:[%s5312_s10 + $0x78] sm:$0xff] %v259_v15 }
  0x33   : > { %262 = vst [vmem:[%s5312_s10 + $0x80] sm:$0xff] %v261_v16  ;;  %264 = vst [vmem:[%s5312_s10 + $0x88] sm:$0xff] %v263_v17  ;;  %v265_v18 = vld [vmem:[%s5307_s29 + $0x120] sm:$0xff]  ;;  %v267_v19 = vld [vmem:[%s5307_s29 + $0x128] sm:$0xff] }
  0x34   : > { %v269_v20 = vld [vmem:[%s5307_s29 + $0x140] sm:$0xff]  ;;  %266 = vst [vmem:[%s5312_s10 + $0x90] sm:$0xff] %v265_v18  ;;  %268 = vst [vmem:[%s5312_s10 + $0x98] sm:$0xff] %v267_v19  ;;  %v271_v21 = vld [vmem:[%s5307_s29 + $0x148] sm:$0xff] }
  0x35   : > { %270 = vst [vmem:[%s5312_s10 + $0xa0] sm:$0xff] %v269_v20  ;;  %v273_v22 = vld [vmem:[%s5307_s29 + $0x160] sm:$0xff]  ;;  %v275_v23 = vld [vmem:[%s5307_s29 + $0x168] sm:$0xff]  ;;  %272 = vst [vmem:[%s5312_s10 + $0xa8] sm:$0xff] %v271_v21 }
  0x36   : > { %274 = vst [vmem:[%s5312_s10 + $0xb0] sm:$0xff] %v273_v22  ;;  %276 = vst [vmem:[%s5312_s10 + $0xb8] sm:$0xff] %v275_v23  ;;  %v277_v24 = vld [vmem:[%s5307_s29 + $0x180] sm:$0xff]  ;;  %v279_v25 = vld [vmem:[%s5307_s29 + $0x188] sm:$0xff] }
  0x37   : > { %v281_v26 = vld [vmem:[%s5307_s29 + $0x1a0] sm:$0xff]  ;;  %278 = vst [vmem:[%s5312_s10 + $0xc0] sm:$0xff] %v277_v24  ;;  %280 = vst [vmem:[%s5312_s10 + $0xc8] sm:$0xff] %v279_v25  ;;  %v283_v27 = vld [vmem:[%s5307_s29 + $0x1a8] sm:$0xff] }
  0x38   : > { %282 = vst [vmem:[%s5312_s10 + $0xd0] sm:$0xff] %v281_v26  ;;  %v285_v28 = vld [vmem:[%s5307_s29 + $0x1c0] sm:$0xff]  ;;  %v287_v29 = vld [vmem:[%s5307_s29 + $0x1c8] sm:$0xff]  ;;  %284 = vst [vmem:[%s5312_s10 + $0xd8] sm:$0xff] %v283_v27 }
  0x39   : > { %286 = vst [vmem:[%s5312_s10 + $0xe0] sm:$0xff] %v285_v28  ;;  %288 = vst [vmem:[%s5312_s10 + $0xe8] sm:$0xff] %v287_v29  ;;  %v289_v30 = vld [vmem:[%s5307_s29 + $0x1e0] sm:$0xff]  ;;  %v291_v31 = vld [vmem:[%s5307_s29 + $0x1e8] sm:$0xff] }
  0x3a   : > { %v293_v32 = vld [vmem:[%s5307_s29 + $0x200] sm:$0xff]  ;;  %290 = vst [vmem:[%s5312_s10 + $0xf0] sm:$0xff] %v289_v30  ;;  %292 = vst [vmem:[%s5312_s10 + $0xf8] sm:$0xff] %v291_v31  ;;  %v295_v33 = vld [vmem:[%s5307_s29 + $0x208] sm:$0xff] }
  0x3b   : > { %294 = vst [vmem:[%s5312_s10 + $0x100] sm:$0xff] %v293_v32  ;;  %v297_v34 = vld [vmem:[%s5307_s29 + $0x220] sm:$0xff]  ;;  %v299_v35 = vld [vmem:[%s5307_s29 + $0x228] sm:$0xff]  ;;  %296 = vst [vmem:[%s5312_s10 + $0x108] sm:$0xff] %v295_v33 }
  0x3c   : > { %298 = vst [vmem:[%s5312_s10 + $0x110] sm:$0xff] %v297_v34  ;;  %300 = vst [vmem:[%s5312_s10 + $0x118] sm:$0xff] %v299_v35  ;;  %v301_v36 = vld [vmem:[%s5307_s29 + $0x240] sm:$0xff]  ;;  %v303_v37 = vld [vmem:[%s5307_s29 + $0x248] sm:$0xff] }
  0x3d   : > { %v305_v38 = vld [vmem:[%s5307_s29 + $0x260] sm:$0xff]  ;;  %302 = vst [vmem:[%s5312_s10 + $0x120] sm:$0xff] %v301_v36  ;;  %304 = vst [vmem:[%s5312_s10 + $0x128] sm:$0xff] %v303_v37  ;;  %v307_v39 = vld [vmem:[%s5307_s29 + $0x268] sm:$0xff] }
  0x3e   : > { %306 = vst [vmem:[%s5312_s10 + $0x130] sm:$0xff] %v305_v38  ;;  %v309_v40 = vld [vmem:[%s5307_s29 + $0x280] sm:$0xff]  ;;  %v311_v41 = vld [vmem:[%s5307_s29 + $0x288] sm:$0xff]  ;;  %308 = vst [vmem:[%s5312_s10 + $0x138] sm:$0xff] %v307_v39 }
  0x3f   : > { %310 = vst [vmem:[%s5312_s10 + $0x140] sm:$0xff] %v309_v40  ;;  %312 = vst [vmem:[%s5312_s10 + $0x148] sm:$0xff] %v311_v41  ;;  %v313_v42 = vld [vmem:[%s5307_s29 + $0x2a0] sm:$0xff]  ;;  %v315_v43 = vld [vmem:[%s5307_s29 + $0x2a8] sm:$0xff] }
  0x40   : > { %v317_v44 = vld [vmem:[%s5307_s29 + $0x2c0] sm:$0xff]  ;;  %314 = vst [vmem:[%s5312_s10 + $0x150] sm:$0xff] %v313_v42  ;;  %316 = vst [vmem:[%s5312_s10 + $0x158] sm:$0xff] %v315_v43  ;;  %v319_v45 = vld [vmem:[%s5307_s29 + $0x2c8] sm:$0xff] }
  0x41   : > { %318 = vst [vmem:[%s5312_s10 + $0x160] sm:$0xff] %v317_v44  ;;  %v321_v46 = vld [vmem:[%s5307_s29 + $0x2e0] sm:$0xff]  ;;  %v323_v47 = vld [vmem:[%s5307_s29 + $0x2e8] sm:$0xff]  ;;  %320 = vst [vmem:[%s5312_s10 + $0x168] sm:$0xff] %v319_v45 }
  0x42   : > { %322 = vst [vmem:[%s5312_s10 + $0x170] sm:$0xff] %v321_v46  ;;  %324 = vst [vmem:[%s5312_s10 + $0x178] sm:$0xff] %v323_v47  ;;  %v325_v48 = vld [vmem:[%s5307_s29 + $0x300] sm:$0xff]  ;;  %v327_v49 = vld [vmem:[%s5307_s29 + $0x308] sm:$0xff] }
  0x43   : > { %v329_v50 = vld [vmem:[%s5307_s29 + $0x320] sm:$0xff]  ;;  %326 = vst [vmem:[%s5312_s10 + $0x180] sm:$0xff] %v325_v48  ;;  %328 = vst [vmem:[%s5312_s10 + $0x188] sm:$0xff] %v327_v49  ;;  %v331_v51 = vld [vmem:[%s5307_s29 + $0x328] sm:$0xff] }
  0x44   : > { %330 = vst [vmem:[%s5312_s10 + $0x190] sm:$0xff] %v329_v50  ;;  %v333_v52 = vld [vmem:[%s5307_s29 + $0x340] sm:$0xff]  ;;  %v335_v53 = vld [vmem:[%s5307_s29 + $0x348] sm:$0xff]  ;;  %332 = vst [vmem:[%s5312_s10 + $0x198] sm:$0xff] %v331_v51 }
  0x45   : > { %334 = vst [vmem:[%s5312_s10 + $0x1a0] sm:$0xff] %v333_v52  ;;  %336 = vst [vmem:[%s5312_s10 + $0x1a8] sm:$0xff] %v335_v53  ;;  %v337_v54 = vld [vmem:[%s5307_s29 + $0x360] sm:$0xff]  ;;  %v339_v55 = vld [vmem:[%s5307_s29 + $0x368] sm:$0xff] }
  0x46   : > { %v341_v56 = vld [vmem:[%s5307_s29 + $0x380] sm:$0xff]  ;;  %338 = vst [vmem:[%s5312_s10 + $0x1b0] sm:$0xff] %v337_v54  ;;  %340 = vst [vmem:[%s5312_s10 + $0x1b8] sm:$0xff] %v339_v55  ;;  %v343_v57 = vld [vmem:[%s5307_s29 + $0x388] sm:$0xff] }
  0x47   : > { %342 = vst [vmem:[%s5312_s10 + $0x1c0] sm:$0xff] %v341_v56  ;;  %v345_v58 = vld [vmem:[%s5307_s29 + $0x3a0] sm:$0xff]  ;;  %v347_v59 = vld [vmem:[%s5307_s29 + $0x3a8] sm:$0xff]  ;;  %344 = vst [vmem:[%s5312_s10 + $0x1c8] sm:$0xff] %v343_v57 }
  0x48   : > { %346 = vst [vmem:[%s5312_s10 + $0x1d0] sm:$0xff] %v345_v58  ;;  %348 = vst [vmem:[%s5312_s10 + $0x1d8] sm:$0xff] %v347_v59  ;;  %v349_v60 = vld [vmem:[%s5307_s29 + $0x3c0] sm:$0xff]  ;;  %v351_v61 = vld [vmem:[%s5307_s29 + $0x3c8] sm:$0xff] }
  0x49   : > { %v353_v62 = vld [vmem:[%s5307_s29 + $0x3e0] sm:$0xff]  ;;  %350 = vst [vmem:[%s5312_s10 + $0x1e0] sm:$0xff] %v349_v60  ;;  %352 = vst [vmem:[%s5312_s10 + $0x1e8] sm:$0xff] %v351_v61  ;;  %v355_v63 = vld [vmem:[%s5307_s29 + $0x3e8] sm:$0xff] }
  0x4a   : > { %354 = vst [vmem:[%s5312_s10 + $0x1f0] sm:$0xff] %v353_v62  ;;  %v357_v0 = vld [vmem:[%s5307_s29 + $0x400] sm:$0xff]  ;;  %v359_v1 = vld [vmem:[%s5307_s29 + $0x408] sm:$0xff]  ;;  %356 = vst [vmem:[%s5312_s10 + $0x1f8] sm:$0xff] %v355_v63 }
  0x4b   : > { %358 = vst [vmem:[%s5312_s10 + $0x200] sm:$0xff] %v357_v0  ;;  %360 = vst [vmem:[%s5312_s10 + $0x208] sm:$0xff] %v359_v1  ;;  %v361_v2 = vld [vmem:[%s5307_s29 + $0x420] sm:$0xff]  ;;  %v363_v3 = vld [vmem:[%s5307_s29 + $0x428] sm:$0xff] }
  0x4c   : > { %v365_v4 = vld [vmem:[%s5307_s29 + $0x440] sm:$0xff]  ;;  %362 = vst [vmem:[%s5312_s10 + $0x210] sm:$0xff] %v361_v2  ;;  %364 = vst [vmem:[%s5312_s10 + $0x218] sm:$0xff] %v363_v3  ;;  %v367_v5 = vld [vmem:[%s5307_s29 + $0x448] sm:$0xff] }
  0x4d   : > { %366 = vst [vmem:[%s5312_s10 + $0x220] sm:$0xff] %v365_v4  ;;  %v369_v6 = vld [vmem:[%s5307_s29 + $0x460] sm:$0xff]  ;;  %v371_v7 = vld [vmem:[%s5307_s29 + $0x468] sm:$0xff]  ;;  %368 = vst [vmem:[%s5312_s10 + $0x228] sm:$0xff] %v367_v5 }
  0x4e   : > { %370 = vst [vmem:[%s5312_s10 + $0x230] sm:$0xff] %v369_v6  ;;  %372 = vst [vmem:[%s5312_s10 + $0x238] sm:$0xff] %v371_v7  ;;  %v373_v8 = vld [vmem:[%s5307_s29 + $0x480] sm:$0xff]  ;;  %v375_v9 = vld [vmem:[%s5307_s29 + $0x488] sm:$0xff] }
  0x4f   : > { %v377_v10 = vld [vmem:[%s5307_s29 + $0x4a0] sm:$0xff]  ;;  %374 = vst [vmem:[%s5312_s10 + $0x240] sm:$0xff] %v373_v8  ;;  %376 = vst [vmem:[%s5312_s10 + $0x248] sm:$0xff] %v375_v9  ;;  %v379_v11 = vld [vmem:[%s5307_s29 + $0x4a8] sm:$0xff] }
  0x50   : > { %378 = vst [vmem:[%s5312_s10 + $0x250] sm:$0xff] %v377_v10  ;;  %v381_v12 = vld [vmem:[%s5307_s29 + $0x4c0] sm:$0xff]  ;;  %v383_v13 = vld [vmem:[%s5307_s29 + $0x4c8] sm:$0xff]  ;;  %380 = vst [vmem:[%s5312_s10 + $0x258] sm:$0xff] %v379_v11 }
  0x51   : > { %382 = vst [vmem:[%s5312_s10 + $0x260] sm:$0xff] %v381_v12  ;;  %384 = vst [vmem:[%s5312_s10 + $0x268] sm:$0xff] %v383_v13  ;;  %v385_v14 = vld [vmem:[%s5307_s29 + $0x4e0] sm:$0xff]  ;;  %v387_v15 = vld [vmem:[%s5307_s29 + $0x4e8] sm:$0xff] }
  0x52   : > { %v389_v16 = vld [vmem:[%s5307_s29 + $0x500] sm:$0xff]  ;;  %386 = vst [vmem:[%s5312_s10 + $0x270] sm:$0xff] %v385_v14  ;;  %388 = vst [vmem:[%s5312_s10 + $0x278] sm:$0xff] %v387_v15  ;;  %v391_v17 = vld [vmem:[%s5307_s29 + $0x508] sm:$0xff] }
  0x53   : > { %390 = vst [vmem:[%s5312_s10 + $0x280] sm:$0xff] %v389_v16  ;;  %v393_v18 = vld [vmem:[%s5307_s29 + $0x520] sm:$0xff]  ;;  %v395_v19 = vld [vmem:[%s5307_s29 + $0x528] sm:$0xff]  ;;  %392 = vst [vmem:[%s5312_s10 + $0x288] sm:$0xff] %v391_v17 }
  0x54   : > { %394 = vst [vmem:[%s5312_s10 + $0x290] sm:$0xff] %v393_v18  ;;  %396 = vst [vmem:[%s5312_s10 + $0x298] sm:$0xff] %v395_v19  ;;  %v397_v20 = vld [vmem:[%s5307_s29 + $0x540] sm:$0xff]  ;;  %v399_v21 = vld [vmem:[%s5307_s29 + $0x548] sm:$0xff] }
  0x55   : > { %v401_v22 = vld [vmem:[%s5307_s29 + $0x560] sm:$0xff]  ;;  %398 = vst [vmem:[%s5312_s10 + $0x2a0] sm:$0xff] %v397_v20  ;;  %400 = vst [vmem:[%s5312_s10 + $0x2a8] sm:$0xff] %v399_v21  ;;  %v403_v23 = vld [vmem:[%s5307_s29 + $0x568] sm:$0xff] }
  0x56   : > { %402 = vst [vmem:[%s5312_s10 + $0x2b0] sm:$0xff] %v401_v22  ;;  %v405_v24 = vld [vmem:[%s5307_s29 + $0x580] sm:$0xff]  ;;  %v407_v25 = vld [vmem:[%s5307_s29 + $0x588] sm:$0xff]  ;;  %404 = vst [vmem:[%s5312_s10 + $0x2b8] sm:$0xff] %v403_v23 }
  0x57   : > { %406 = vst [vmem:[%s5312_s10 + $0x2c0] sm:$0xff] %v405_v24  ;;  %408 = vst [vmem:[%s5312_s10 + $0x2c8] sm:$0xff] %v407_v25  ;;  %v409_v26 = vld [vmem:[%s5307_s29 + $0x5a0] sm:$0xff]  ;;  %v411_v27 = vld [vmem:[%s5307_s29 + $0x5a8] sm:$0xff] }
  0x58   : > { %v413_v28 = vld [vmem:[%s5307_s29 + $0x5c0] sm:$0xff]  ;;  %410 = vst [vmem:[%s5312_s10 + $0x2d0] sm:$0xff] %v409_v26  ;;  %412 = vst [vmem:[%s5312_s10 + $0x2d8] sm:$0xff] %v411_v27  ;;  %v415_v29 = vld [vmem:[%s5307_s29 + $0x5c8] sm:$0xff] }
  0x59   : > { %414 = vst [vmem:[%s5312_s10 + $0x2e0] sm:$0xff] %v413_v28  ;;  %v417_v30 = vld [vmem:[%s5307_s29 + $0x5e0] sm:$0xff]  ;;  %v419_v31 = vld [vmem:[%s5307_s29 + $0x5e8] sm:$0xff]  ;;  %416 = vst [vmem:[%s5312_s10 + $0x2e8] sm:$0xff] %v415_v29 }
  0x5a   : > { %418 = vst [vmem:[%s5312_s10 + $0x2f0] sm:$0xff] %v417_v30  ;;  %420 = vst [vmem:[%s5312_s10 + $0x2f8] sm:$0xff] %v419_v31  ;;  %v421_v32 = vld [vmem:[%s5307_s29 + $0x600] sm:$0xff]  ;;  %v423_v33 = vld [vmem:[%s5307_s29 + $0x608] sm:$0xff] }
  0x5b   : > { %v425_v34 = vld [vmem:[%s5307_s29 + $0x620] sm:$0xff]  ;;  %422 = vst [vmem:[%s5312_s10 + $0x300] sm:$0xff] %v421_v32  ;;  %424 = vst [vmem:[%s5312_s10 + $0x308] sm:$0xff] %v423_v33  ;;  %v427_v35 = vld [vmem:[%s5307_s29 + $0x628] sm:$0xff] }
  0x5c   : > { %426 = vst [vmem:[%s5312_s10 + $0x310] sm:$0xff] %v425_v34  ;;  %v429_v36 = vld [vmem:[%s5307_s29 + $0x640] sm:$0xff]  ;;  %v431_v37 = vld [vmem:[%s5307_s29 + $0x648] sm:$0xff]  ;;  %428 = vst [vmem:[%s5312_s10 + $0x318] sm:$0xff] %v427_v35 }
  0x5d   : > { %430 = vst [vmem:[%s5312_s10 + $0x320] sm:$0xff] %v429_v36  ;;  %432 = vst [vmem:[%s5312_s10 + $0x328] sm:$0xff] %v431_v37  ;;  %v433_v38 = vld [vmem:[%s5307_s29 + $0x660] sm:$0xff]  ;;  %v435_v39 = vld [vmem:[%s5307_s29 + $0x668] sm:$0xff] }
  0x5e   : > { %v437_v40 = vld [vmem:[%s5307_s29 + $0x680] sm:$0xff]  ;;  %434 = vst [vmem:[%s5312_s10 + $0x330] sm:$0xff] %v433_v38  ;;  %436 = vst [vmem:[%s5312_s10 + $0x338] sm:$0xff] %v435_v39  ;;  %v439_v41 = vld [vmem:[%s5307_s29 + $0x688] sm:$0xff] }
  0x5f   : > { %438 = vst [vmem:[%s5312_s10 + $0x340] sm:$0xff] %v437_v40  ;;  %v441_v42 = vld [vmem:[%s5307_s29 + $0x6a0] sm:$0xff]  ;;  %v443_v43 = vld [vmem:[%s5307_s29 + $0x6a8] sm:$0xff]  ;;  %440 = vst [vmem:[%s5312_s10 + $0x348] sm:$0xff] %v439_v41 }
  0x60   : > { %442 = vst [vmem:[%s5312_s10 + $0x350] sm:$0xff] %v441_v42  ;;  %444 = vst [vmem:[%s5312_s10 + $0x358] sm:$0xff] %v443_v43  ;;  %v445_v44 = vld [vmem:[%s5307_s29 + $0x6c0] sm:$0xff]  ;;  %v447_v45 = vld [vmem:[%s5307_s29 + $0x6c8] sm:$0xff] }
  0x61   : > { %v449_v46 = vld [vmem:[%s5307_s29 + $0x6e0] sm:$0xff]  ;;  %446 = vst [vmem:[%s5312_s10 + $0x360] sm:$0xff] %v445_v44  ;;  %448 = vst [vmem:[%s5312_s10 + $0x368] sm:$0xff] %v447_v45  ;;  %v451_v47 = vld [vmem:[%s5307_s29 + $0x6e8] sm:$0xff] }
  0x62   : > { %450 = vst [vmem:[%s5312_s10 + $0x370] sm:$0xff] %v449_v46  ;;  %v453_v48 = vld [vmem:[%s5307_s29 + $0x700] sm:$0xff]  ;;  %v455_v49 = vld [vmem:[%s5307_s29 + $0x708] sm:$0xff]  ;;  %452 = vst [vmem:[%s5312_s10 + $0x378] sm:$0xff] %v451_v47 }
  0x63   : > { %454 = vst [vmem:[%s5312_s10 + $0x380] sm:$0xff] %v453_v48  ;;  %456 = vst [vmem:[%s5312_s10 + $0x388] sm:$0xff] %v455_v49  ;;  %v457_v50 = vld [vmem:[%s5307_s29 + $0x720] sm:$0xff]  ;;  %v459_v51 = vld [vmem:[%s5307_s29 + $0x728] sm:$0xff] }
  0x64   : > { %v461_v52 = vld [vmem:[%s5307_s29 + $0x740] sm:$0xff]  ;;  %458 = vst [vmem:[%s5312_s10 + $0x390] sm:$0xff] %v457_v50  ;;  %460 = vst [vmem:[%s5312_s10 + $0x398] sm:$0xff] %v459_v51  ;;  %v463_v53 = vld [vmem:[%s5307_s29 + $0x748] sm:$0xff] }
  0x65   : > { %462 = vst [vmem:[%s5312_s10 + $0x3a0] sm:$0xff] %v461_v52  ;;  %v465_v54 = vld [vmem:[%s5307_s29 + $0x760] sm:$0xff]  ;;  %v467_v55 = vld [vmem:[%s5307_s29 + $0x768] sm:$0xff]  ;;  %464 = vst [vmem:[%s5312_s10 + $0x3a8] sm:$0xff] %v463_v53 }
  0x66   : > { %466 = vst [vmem:[%s5312_s10 + $0x3b0] sm:$0xff] %v465_v54  ;;  %468 = vst [vmem:[%s5312_s10 + $0x3b8] sm:$0xff] %v467_v55  ;;  %v469_v56 = vld [vmem:[%s5307_s29 + $0x780] sm:$0xff]  ;;  %v471_v57 = vld [vmem:[%s5307_s29 + $0x788] sm:$0xff] }
  0x67   : > { %v473_v58 = vld [vmem:[%s5307_s29 + $0x7a0] sm:$0xff]  ;;  %470 = vst [vmem:[%s5312_s10 + $0x3c0] sm:$0xff] %v469_v56  ;;  %472 = vst [vmem:[%s5312_s10 + $0x3c8] sm:$0xff] %v471_v57  ;;  %v475_v59 = vld [vmem:[%s5307_s29 + $0x7a8] sm:$0xff] }
  0x68   : > { %474 = vst [vmem:[%s5312_s10 + $0x3d0] sm:$0xff] %v473_v58  ;;  %v477_v60 = vld [vmem:[%s5307_s29 + $0x7c0] sm:$0xff]  ;;  %v479_v61 = vld [vmem:[%s5307_s29 + $0x7c8] sm:$0xff]  ;;  %476 = vst [vmem:[%s5312_s10 + $0x3d8] sm:$0xff] %v475_v59 }
  0x69   : > { %478 = vst [vmem:[%s5312_s10 + $0x3e0] sm:$0xff] %v477_v60  ;;  %480 = vst [vmem:[%s5312_s10 + $0x3e8] sm:$0xff] %v479_v61  ;;  %v481_v62 = vld [vmem:[%s5307_s29 + $0x7e0] sm:$0xff]  ;;  %v483_v63 = vld [vmem:[%s5307_s29 + $0x7e8] sm:$0xff] }
  0x6a   : > { %482 = vst [vmem:[%s5312_s10 + $0x3f0] sm:$0xff] %v481_v62  ;;  %484 = vst [vmem:[%s5312_s10 + $0x3f8] sm:$0xff] %v483_v63 }
  0x6b PF: > { %490 = sbr.rel (!%p5272_p3) target bundleno = 181 (0xb5), region = 51  ;;  %s492_s12 = sand.u32 (%p5272_p3), 1, %s5155_s22  }
  0x6c   : > { %s4357_s16 = sshll.u32 (%p5272_p3), %s5167_s25, 4  ;;  %s3943_s17 = sshll.u32 (%p5272_p3), %s492_s12, 10 }
  0x6d   : > { %s6377_s3 = sld [smem:[#allocation13_spill]] (%p5272_p3)  ;;  %s5579_s9 = scalar_lea.vmem (%p5272_p3), [#allocation5], %s3943_s17 }
  0x73   : > { %s5574_s8 = scalar_lea.vmem %s6377_s3, %s4357_s16 }
  0x74   : > { %v510_v0 = vld [vmem:[%s5574_s8] sm:$0xff]  ;;  %v512_v1 = vld [vmem:[%s5574_s8 + $0x8] sm:$0xff] }
  0x75   : > { %v514_v2 = vld [vmem:[%s5574_s8 + $0x20] sm:$0xff]  ;;  %511 = vst [vmem:[%s5579_s9] sm:$0xff] %v510_v0  ;;  %513 = vst [vmem:[%s5579_s9 + $0x8] sm:$0xff] %v512_v1  ;;  %v516_v3 = vld [vmem:[%s5574_s8 + $0x28] sm:$0xff] }
  0x76   : > { %515 = vst [vmem:[%s5579_s9 + $0x10] sm:$0xff] %v514_v2  ;;  %v518_v4 = vld [vmem:[%s5574_s8 + $0x40] sm:$0xff]  ;;  %v520_v5 = vld [vmem:[%s5574_s8 + $0x48] sm:$0xff]  ;;  %517 = vst [vmem:[%s5579_s9 + $0x18] sm:$0xff] %v516_v3 }
  0x77   : > { %519 = vst [vmem:[%s5579_s9 + $0x20] sm:$0xff] %v518_v4  ;;  %521 = vst [vmem:[%s5579_s9 + $0x28] sm:$0xff] %v520_v5  ;;  %v522_v6 = vld [vmem:[%s5574_s8 + $0x60] sm:$0xff]  ;;  %v524_v7 = vld [vmem:[%s5574_s8 + $0x68] sm:$0xff] }
  0x78   : > { %v526_v8 = vld [vmem:[%s5574_s8 + $0x80] sm:$0xff]  ;;  %523 = vst [vmem:[%s5579_s9 + $0x30] sm:$0xff] %v522_v6  ;;  %525 = vst [vmem:[%s5579_s9 + $0x38] sm:$0xff] %v524_v7  ;;  %v528_v9 = vld [vmem:[%s5574_s8 + $0x88] sm:$0xff] }
  0x79   : > { %527 = vst [vmem:[%s5579_s9 + $0x40] sm:$0xff] %v526_v8  ;;  %v530_v10 = vld [vmem:[%s5574_s8 + $0xa0] sm:$0xff]  ;;  %v532_v11 = vld [vmem:[%s5574_s8 + $0xa8] sm:$0xff]  ;;  %529 = vst [vmem:[%s5579_s9 + $0x48] sm:$0xff] %v528_v9 }
  0x7a   : > { %531 = vst [vmem:[%s5579_s9 + $0x50] sm:$0xff] %v530_v10  ;;  %533 = vst [vmem:[%s5579_s9 + $0x58] sm:$0xff] %v532_v11  ;;  %v534_v12 = vld [vmem:[%s5574_s8 + $0xc0] sm:$0xff]  ;;  %v536_v13 = vld [vmem:[%s5574_s8 + $0xc8] sm:$0xff] }
  0x7b   : > { %v538_v14 = vld [vmem:[%s5574_s8 + $0xe0] sm:$0xff]  ;;  %535 = vst [vmem:[%s5579_s9 + $0x60] sm:$0xff] %v534_v12  ;;  %537 = vst [vmem:[%s5579_s9 + $0x68] sm:$0xff] %v536_v13  ;;  %v540_v15 = vld [vmem:[%s5574_s8 + $0xe8] sm:$0xff] }
  0x7c   : > { %539 = vst [vmem:[%s5579_s9 + $0x70] sm:$0xff] %v538_v14  ;;  %v542_v16 = vld [vmem:[%s5574_s8 + $0x100] sm:$0xff]  ;;  %v544_v17 = vld [vmem:[%s5574_s8 + $0x108] sm:$0xff]  ;;  %541 = vst [vmem:[%s5579_s9 + $0x78] sm:$0xff] %v540_v15 }
  0x7d   : > { %543 = vst [vmem:[%s5579_s9 + $0x80] sm:$0xff] %v542_v16  ;;  %545 = vst [vmem:[%s5579_s9 + $0x88] sm:$0xff] %v544_v17  ;;  %v546_v18 = vld [vmem:[%s5574_s8 + $0x120] sm:$0xff]  ;;  %v548_v19 = vld [vmem:[%s5574_s8 + $0x128] sm:$0xff] }
  0x7e   : > { %v550_v20 = vld [vmem:[%s5574_s8 + $0x140] sm:$0xff]  ;;  %547 = vst [vmem:[%s5579_s9 + $0x90] sm:$0xff] %v546_v18  ;;  %549 = vst [vmem:[%s5579_s9 + $0x98] sm:$0xff] %v548_v19  ;;  %v552_v21 = vld [vmem:[%s5574_s8 + $0x148] sm:$0xff] }
  0x7f   : > { %551 = vst [vmem:[%s5579_s9 + $0xa0] sm:$0xff] %v550_v20  ;;  %v554_v22 = vld [vmem:[%s5574_s8 + $0x160] sm:$0xff]  ;;  %v556_v23 = vld [vmem:[%s5574_s8 + $0x168] sm:$0xff]  ;;  %553 = vst [vmem:[%s5579_s9 + $0xa8] sm:$0xff] %v552_v21 }
  0x80   : > { %555 = vst [vmem:[%s5579_s9 + $0xb0] sm:$0xff] %v554_v22  ;;  %557 = vst [vmem:[%s5579_s9 + $0xb8] sm:$0xff] %v556_v23  ;;  %v558_v24 = vld [vmem:[%s5574_s8 + $0x180] sm:$0xff]  ;;  %v560_v25 = vld [vmem:[%s5574_s8 + $0x188] sm:$0xff] }
  0x81   : > { %v562_v26 = vld [vmem:[%s5574_s8 + $0x1a0] sm:$0xff]  ;;  %559 = vst [vmem:[%s5579_s9 + $0xc0] sm:$0xff] %v558_v24  ;;  %561 = vst [vmem:[%s5579_s9 + $0xc8] sm:$0xff] %v560_v25  ;;  %v564_v27 = vld [vmem:[%s5574_s8 + $0x1a8] sm:$0xff] }
  0x82   : > { %563 = vst [vmem:[%s5579_s9 + $0xd0] sm:$0xff] %v562_v26  ;;  %v566_v28 = vld [vmem:[%s5574_s8 + $0x1c0] sm:$0xff]  ;;  %v568_v29 = vld [vmem:[%s5574_s8 + $0x1c8] sm:$0xff]  ;;  %565 = vst [vmem:[%s5579_s9 + $0xd8] sm:$0xff] %v564_v27 }
  0x83   : > { %567 = vst [vmem:[%s5579_s9 + $0xe0] sm:$0xff] %v566_v28  ;;  %569 = vst [vmem:[%s5579_s9 + $0xe8] sm:$0xff] %v568_v29  ;;  %v570_v30 = vld [vmem:[%s5574_s8 + $0x1e0] sm:$0xff]  ;;  %v572_v31 = vld [vmem:[%s5574_s8 + $0x1e8] sm:$0xff] }
  0x84   : > { %v574_v32 = vld [vmem:[%s5574_s8 + $0x200] sm:$0xff]  ;;  %571 = vst [vmem:[%s5579_s9 + $0xf0] sm:$0xff] %v570_v30  ;;  %573 = vst [vmem:[%s5579_s9 + $0xf8] sm:$0xff] %v572_v31  ;;  %v576_v33 = vld [vmem:[%s5574_s8 + $0x208] sm:$0xff] }
  0x85   : > { %575 = vst [vmem:[%s5579_s9 + $0x100] sm:$0xff] %v574_v32  ;;  %v578_v34 = vld [vmem:[%s5574_s8 + $0x220] sm:$0xff]  ;;  %v580_v35 = vld [vmem:[%s5574_s8 + $0x228] sm:$0xff]  ;;  %577 = vst [vmem:[%s5579_s9 + $0x108] sm:$0xff] %v576_v33 }
  0x86   : > { %579 = vst [vmem:[%s5579_s9 + $0x110] sm:$0xff] %v578_v34  ;;  %581 = vst [vmem:[%s5579_s9 + $0x118] sm:$0xff] %v580_v35  ;;  %v582_v36 = vld [vmem:[%s5574_s8 + $0x240] sm:$0xff]  ;;  %v584_v37 = vld [vmem:[%s5574_s8 + $0x248] sm:$0xff] }
  0x87   : > { %v586_v38 = vld [vmem:[%s5574_s8 + $0x260] sm:$0xff]  ;;  %583 = vst [vmem:[%s5579_s9 + $0x120] sm:$0xff] %v582_v36  ;;  %585 = vst [vmem:[%s5579_s9 + $0x128] sm:$0xff] %v584_v37  ;;  %v588_v39 = vld [vmem:[%s5574_s8 + $0x268] sm:$0xff] }
  0x88   : > { %587 = vst [vmem:[%s5579_s9 + $0x130] sm:$0xff] %v586_v38  ;;  %v590_v40 = vld [vmem:[%s5574_s8 + $0x280] sm:$0xff]  ;;  %v592_v41 = vld [vmem:[%s5574_s8 + $0x288] sm:$0xff]  ;;  %589 = vst [vmem:[%s5579_s9 + $0x138] sm:$0xff] %v588_v39 }
  0x89   : > { %591 = vst [vmem:[%s5579_s9 + $0x140] sm:$0xff] %v590_v40  ;;  %593 = vst [vmem:[%s5579_s9 + $0x148] sm:$0xff] %v592_v41  ;;  %v594_v42 = vld [vmem:[%s5574_s8 + $0x2a0] sm:$0xff]  ;;  %v596_v43 = vld [vmem:[%s5574_s8 + $0x2a8] sm:$0xff] }
  0x8a   : > { %v598_v44 = vld [vmem:[%s5574_s8 + $0x2c0] sm:$0xff]  ;;  %595 = vst [vmem:[%s5579_s9 + $0x150] sm:$0xff] %v594_v42  ;;  %597 = vst [vmem:[%s5579_s9 + $0x158] sm:$0xff] %v596_v43  ;;  %v600_v45 = vld [vmem:[%s5574_s8 + $0x2c8] sm:$0xff] }
  0x8b   : > { %599 = vst [vmem:[%s5579_s9 + $0x160] sm:$0xff] %v598_v44  ;;  %v602_v46 = vld [vmem:[%s5574_s8 + $0x2e0] sm:$0xff]  ;;  %v604_v47 = vld [vmem:[%s5574_s8 + $0x2e8] sm:$0xff]  ;;  %601 = vst [vmem:[%s5579_s9 + $0x168] sm:$0xff] %v600_v45 }
  0x8c   : > { %603 = vst [vmem:[%s5579_s9 + $0x170] sm:$0xff] %v602_v46  ;;  %605 = vst [vmem:[%s5579_s9 + $0x178] sm:$0xff] %v604_v47  ;;  %v606_v48 = vld [vmem:[%s5574_s8 + $0x300] sm:$0xff]  ;;  %v608_v49 = vld [vmem:[%s5574_s8 + $0x308] sm:$0xff] }
  0x8d   : > { %v610_v50 = vld [vmem:[%s5574_s8 + $0x320] sm:$0xff]  ;;  %607 = vst [vmem:[%s5579_s9 + $0x180] sm:$0xff] %v606_v48  ;;  %609 = vst [vmem:[%s5579_s9 + $0x188] sm:$0xff] %v608_v49  ;;  %v612_v51 = vld [vmem:[%s5574_s8 + $0x328] sm:$0xff] }
  0x8e   : > { %611 = vst [vmem:[%s5579_s9 + $0x190] sm:$0xff] %v610_v50  ;;  %v614_v52 = vld [vmem:[%s5574_s8 + $0x340] sm:$0xff]  ;;  %v616_v53 = vld [vmem:[%s5574_s8 + $0x348] sm:$0xff]  ;;  %613 = vst [vmem:[%s5579_s9 + $0x198] sm:$0xff] %v612_v51 }
  0x8f   : > { %615 = vst [vmem:[%s5579_s9 + $0x1a0] sm:$0xff] %v614_v52  ;;  %617 = vst [vmem:[%s5579_s9 + $0x1a8] sm:$0xff] %v616_v53  ;;  %v618_v54 = vld [vmem:[%s5574_s8 + $0x360] sm:$0xff]  ;;  %v620_v55 = vld [vmem:[%s5574_s8 + $0x368] sm:$0xff] }
  0x90   : > { %v622_v56 = vld [vmem:[%s5574_s8 + $0x380] sm:$0xff]  ;;  %619 = vst [vmem:[%s5579_s9 + $0x1b0] sm:$0xff] %v618_v54  ;;  %621 = vst [vmem:[%s5579_s9 + $0x1b8] sm:$0xff] %v620_v55  ;;  %v624_v57 = vld [vmem:[%s5574_s8 + $0x388] sm:$0xff] }
  0x91   : > { %623 = vst [vmem:[%s5579_s9 + $0x1c0] sm:$0xff] %v622_v56  ;;  %v626_v58 = vld [vmem:[%s5574_s8 + $0x3a0] sm:$0xff]  ;;  %v628_v59 = vld [vmem:[%s5574_s8 + $0x3a8] sm:$0xff]  ;;  %625 = vst [vmem:[%s5579_s9 + $0x1c8] sm:$0xff] %v624_v57 }
  0x92   : > { %627 = vst [vmem:[%s5579_s9 + $0x1d0] sm:$0xff] %v626_v58  ;;  %629 = vst [vmem:[%s5579_s9 + $0x1d8] sm:$0xff] %v628_v59  ;;  %v630_v60 = vld [vmem:[%s5574_s8 + $0x3c0] sm:$0xff]  ;;  %v632_v61 = vld [vmem:[%s5574_s8 + $0x3c8] sm:$0xff] }
  0x93   : > { %v634_v62 = vld [vmem:[%s5574_s8 + $0x3e0] sm:$0xff]  ;;  %631 = vst [vmem:[%s5579_s9 + $0x1e0] sm:$0xff] %v630_v60  ;;  %633 = vst [vmem:[%s5579_s9 + $0x1e8] sm:$0xff] %v632_v61  ;;  %v636_v63 = vld [vmem:[%s5574_s8 + $0x3e8] sm:$0xff] }
  0x94   : > { %635 = vst [vmem:[%s5579_s9 + $0x1f0] sm:$0xff] %v634_v62  ;;  %v638_v0 = vld [vmem:[%s5574_s8 + $0x400] sm:$0xff]  ;;  %v640_v1 = vld [vmem:[%s5574_s8 + $0x408] sm:$0xff]  ;;  %637 = vst [vmem:[%s5579_s9 + $0x1f8] sm:$0xff] %v636_v63 }
  0x95   : > { %639 = vst [vmem:[%s5579_s9 + $0x200] sm:$0xff] %v638_v0  ;;  %641 = vst [vmem:[%s5579_s9 + $0x208] sm:$0xff] %v640_v1  ;;  %v642_v2 = vld [vmem:[%s5574_s8 + $0x420] sm:$0xff]  ;;  %v644_v3 = vld [vmem:[%s5574_s8 + $0x428] sm:$0xff] }
  0x96   : > { %v646_v4 = vld [vmem:[%s5574_s8 + $0x440] sm:$0xff]  ;;  %643 = vst [vmem:[%s5579_s9 + $0x210] sm:$0xff] %v642_v2  ;;  %645 = vst [vmem:[%s5579_s9 + $0x218] sm:$0xff] %v644_v3  ;;  %v648_v5 = vld [vmem:[%s5574_s8 + $0x448] sm:$0xff] }
  0x97   : > { %647 = vst [vmem:[%s5579_s9 + $0x220] sm:$0xff] %v646_v4  ;;  %v650_v6 = vld [vmem:[%s5574_s8 + $0x460] sm:$0xff]  ;;  %v652_v7 = vld [vmem:[%s5574_s8 + $0x468] sm:$0xff]  ;;  %649 = vst [vmem:[%s5579_s9 + $0x228] sm:$0xff] %v648_v5 }
  0x98   : > { %651 = vst [vmem:[%s5579_s9 + $0x230] sm:$0xff] %v650_v6  ;;  %653 = vst [vmem:[%s5579_s9 + $0x238] sm:$0xff] %v652_v7  ;;  %v654_v8 = vld [vmem:[%s5574_s8 + $0x480] sm:$0xff]  ;;  %v656_v9 = vld [vmem:[%s5574_s8 + $0x488] sm:$0xff] }
  0x99   : > { %v658_v10 = vld [vmem:[%s5574_s8 + $0x4a0] sm:$0xff]  ;;  %655 = vst [vmem:[%s5579_s9 + $0x240] sm:$0xff] %v654_v8  ;;  %657 = vst [vmem:[%s5579_s9 + $0x248] sm:$0xff] %v656_v9  ;;  %v660_v11 = vld [vmem:[%s5574_s8 + $0x4a8] sm:$0xff] }
  0x9a   : > { %659 = vst [vmem:[%s5579_s9 + $0x250] sm:$0xff] %v658_v10  ;;  %v662_v12 = vld [vmem:[%s5574_s8 + $0x4c0] sm:$0xff]  ;;  %v664_v13 = vld [vmem:[%s5574_s8 + $0x4c8] sm:$0xff]  ;;  %661 = vst [vmem:[%s5579_s9 + $0x258] sm:$0xff] %v660_v11 }
  0x9b   : > { %663 = vst [vmem:[%s5579_s9 + $0x260] sm:$0xff] %v662_v12  ;;  %665 = vst [vmem:[%s5579_s9 + $0x268] sm:$0xff] %v664_v13  ;;  %v666_v14 = vld [vmem:[%s5574_s8 + $0x4e0] sm:$0xff]  ;;  %v668_v15 = vld [vmem:[%s5574_s8 + $0x4e8] sm:$0xff] }
  0x9c   : > { %v670_v16 = vld [vmem:[%s5574_s8 + $0x500] sm:$0xff]  ;;  %667 = vst [vmem:[%s5579_s9 + $0x270] sm:$0xff] %v666_v14  ;;  %669 = vst [vmem:[%s5579_s9 + $0x278] sm:$0xff] %v668_v15  ;;  %v672_v17 = vld [vmem:[%s5574_s8 + $0x508] sm:$0xff] }
  0x9d   : > { %671 = vst [vmem:[%s5579_s9 + $0x280] sm:$0xff] %v670_v16  ;;  %v674_v18 = vld [vmem:[%s5574_s8 + $0x520] sm:$0xff]  ;;  %v676_v19 = vld [vmem:[%s5574_s8 + $0x528] sm:$0xff]  ;;  %673 = vst [vmem:[%s5579_s9 + $0x288] sm:$0xff] %v672_v17 }
  0x9e   : > { %675 = vst [vmem:[%s5579_s9 + $0x290] sm:$0xff] %v674_v18  ;;  %677 = vst [vmem:[%s5579_s9 + $0x298] sm:$0xff] %v676_v19  ;;  %v678_v20 = vld [vmem:[%s5574_s8 + $0x540] sm:$0xff]  ;;  %v680_v21 = vld [vmem:[%s5574_s8 + $0x548] sm:$0xff] }
  0x9f   : > { %v682_v22 = vld [vmem:[%s5574_s8 + $0x560] sm:$0xff]  ;;  %679 = vst [vmem:[%s5579_s9 + $0x2a0] sm:$0xff] %v678_v20  ;;  %681 = vst [vmem:[%s5579_s9 + $0x2a8] sm:$0xff] %v680_v21  ;;  %v684_v23 = vld [vmem:[%s5574_s8 + $0x568] sm:$0xff] }
  0xa0   : > { %683 = vst [vmem:[%s5579_s9 + $0x2b0] sm:$0xff] %v682_v22  ;;  %v686_v24 = vld [vmem:[%s5574_s8 + $0x580] sm:$0xff]  ;;  %v688_v25 = vld [vmem:[%s5574_s8 + $0x588] sm:$0xff]  ;;  %685 = vst [vmem:[%s5579_s9 + $0x2b8] sm:$0xff] %v684_v23 }
  0xa1   : > { %687 = vst [vmem:[%s5579_s9 + $0x2c0] sm:$0xff] %v686_v24  ;;  %689 = vst [vmem:[%s5579_s9 + $0x2c8] sm:$0xff] %v688_v25  ;;  %v690_v26 = vld [vmem:[%s5574_s8 + $0x5a0] sm:$0xff]  ;;  %v692_v27 = vld [vmem:[%s5574_s8 + $0x5a8] sm:$0xff] }
  0xa2   : > { %v694_v28 = vld [vmem:[%s5574_s8 + $0x5c0] sm:$0xff]  ;;  %691 = vst [vmem:[%s5579_s9 + $0x2d0] sm:$0xff] %v690_v26  ;;  %693 = vst [vmem:[%s5579_s9 + $0x2d8] sm:$0xff] %v692_v27  ;;  %v696_v29 = vld [vmem:[%s5574_s8 + $0x5c8] sm:$0xff] }
  0xa3   : > { %695 = vst [vmem:[%s5579_s9 + $0x2e0] sm:$0xff] %v694_v28  ;;  %v698_v30 = vld [vmem:[%s5574_s8 + $0x5e0] sm:$0xff]  ;;  %v700_v31 = vld [vmem:[%s5574_s8 + $0x5e8] sm:$0xff]  ;;  %697 = vst [vmem:[%s5579_s9 + $0x2e8] sm:$0xff] %v696_v29 }
  0xa4   : > { %699 = vst [vmem:[%s5579_s9 + $0x2f0] sm:$0xff] %v698_v30  ;;  %701 = vst [vmem:[%s5579_s9 + $0x2f8] sm:$0xff] %v700_v31  ;;  %v702_v32 = vld [vmem:[%s5574_s8 + $0x600] sm:$0xff]  ;;  %v704_v33 = vld [vmem:[%s5574_s8 + $0x608] sm:$0xff] }
  0xa5   : > { %v706_v34 = vld [vmem:[%s5574_s8 + $0x620] sm:$0xff]  ;;  %703 = vst [vmem:[%s5579_s9 + $0x300] sm:$0xff] %v702_v32  ;;  %705 = vst [vmem:[%s5579_s9 + $0x308] sm:$0xff] %v704_v33  ;;  %v708_v35 = vld [vmem:[%s5574_s8 + $0x628] sm:$0xff] }
  0xa6   : > { %707 = vst [vmem:[%s5579_s9 + $0x310] sm:$0xff] %v706_v34  ;;  %v710_v36 = vld [vmem:[%s5574_s8 + $0x640] sm:$0xff]  ;;  %v712_v37 = vld [vmem:[%s5574_s8 + $0x648] sm:$0xff]  ;;  %709 = vst [vmem:[%s5579_s9 + $0x318] sm:$0xff] %v708_v35 }
  0xa7   : > { %711 = vst [vmem:[%s5579_s9 + $0x320] sm:$0xff] %v710_v36  ;;  %713 = vst [vmem:[%s5579_s9 + $0x328] sm:$0xff] %v712_v37  ;;  %v714_v38 = vld [vmem:[%s5574_s8 + $0x660] sm:$0xff]  ;;  %v716_v39 = vld [vmem:[%s5574_s8 + $0x668] sm:$0xff] }
  0xa8   : > { %v718_v40 = vld [vmem:[%s5574_s8 + $0x680] sm:$0xff]  ;;  %715 = vst [vmem:[%s5579_s9 + $0x330] sm:$0xff] %v714_v38  ;;  %717 = vst [vmem:[%s5579_s9 + $0x338] sm:$0xff] %v716_v39  ;;  %v720_v41 = vld [vmem:[%s5574_s8 + $0x688] sm:$0xff] }
  0xa9   : > { %719 = vst [vmem:[%s5579_s9 + $0x340] sm:$0xff] %v718_v40  ;;  %v722_v42 = vld [vmem:[%s5574_s8 + $0x6a0] sm:$0xff]  ;;  %v724_v43 = vld [vmem:[%s5574_s8 + $0x6a8] sm:$0xff]  ;;  %721 = vst [vmem:[%s5579_s9 + $0x348] sm:$0xff] %v720_v41 }
  0xaa   : > { %723 = vst [vmem:[%s5579_s9 + $0x350] sm:$0xff] %v722_v42  ;;  %725 = vst [vmem:[%s5579_s9 + $0x358] sm:$0xff] %v724_v43  ;;  %v726_v44 = vld [vmem:[%s5574_s8 + $0x6c0] sm:$0xff]  ;;  %v728_v45 = vld [vmem:[%s5574_s8 + $0x6c8] sm:$0xff] }
  0xab   : > { %v730_v46 = vld [vmem:[%s5574_s8 + $0x6e0] sm:$0xff]  ;;  %727 = vst [vmem:[%s5579_s9 + $0x360] sm:$0xff] %v726_v44  ;;  %729 = vst [vmem:[%s5579_s9 + $0x368] sm:$0xff] %v728_v45  ;;  %v732_v47 = vld [vmem:[%s5574_s8 + $0x6e8] sm:$0xff] }
  0xac   : > { %731 = vst [vmem:[%s5579_s9 + $0x370] sm:$0xff] %v730_v46  ;;  %v734_v48 = vld [vmem:[%s5574_s8 + $0x700] sm:$0xff]  ;;  %v736_v49 = vld [vmem:[%s5574_s8 + $0x708] sm:$0xff]  ;;  %733 = vst [vmem:[%s5579_s9 + $0x378] sm:$0xff] %v732_v47 }
  0xad   : > { %735 = vst [vmem:[%s5579_s9 + $0x380] sm:$0xff] %v734_v48  ;;  %737 = vst [vmem:[%s5579_s9 + $0x388] sm:$0xff] %v736_v49  ;;  %v738_v50 = vld [vmem:[%s5574_s8 + $0x720] sm:$0xff]  ;;  %v740_v51 = vld [vmem:[%s5574_s8 + $0x728] sm:$0xff] }
  0xae   : > { %v742_v52 = vld [vmem:[%s5574_s8 + $0x740] sm:$0xff]  ;;  %739 = vst [vmem:[%s5579_s9 + $0x390] sm:$0xff] %v738_v50  ;;  %741 = vst [vmem:[%s5579_s9 + $0x398] sm:$0xff] %v740_v51  ;;  %v744_v53 = vld [vmem:[%s5574_s8 + $0x748] sm:$0xff] }
  0xaf   : > { %743 = vst [vmem:[%s5579_s9 + $0x3a0] sm:$0xff] %v742_v52  ;;  %v746_v54 = vld [vmem:[%s5574_s8 + $0x760] sm:$0xff]  ;;  %v748_v55 = vld [vmem:[%s5574_s8 + $0x768] sm:$0xff]  ;;  %745 = vst [vmem:[%s5579_s9 + $0x3a8] sm:$0xff] %v744_v53 }
  0xb0   : > { %747 = vst [vmem:[%s5579_s9 + $0x3b0] sm:$0xff] %v746_v54  ;;  %749 = vst [vmem:[%s5579_s9 + $0x3b8] sm:$0xff] %v748_v55  ;;  %v750_v56 = vld [vmem:[%s5574_s8 + $0x780] sm:$0xff]  ;;  %v752_v57 = vld [vmem:[%s5574_s8 + $0x788] sm:$0xff] }
  0xb1   : > { %v754_v58 = vld [vmem:[%s5574_s8 + $0x7a0] sm:$0xff]  ;;  %751 = vst [vmem:[%s5579_s9 + $0x3c0] sm:$0xff] %v750_v56  ;;  %753 = vst [vmem:[%s5579_s9 + $0x3c8] sm:$0xff] %v752_v57  ;;  %v756_v59 = vld [vmem:[%s5574_s8 + $0x7a8] sm:$0xff] }
  0xb2   : > { %755 = vst [vmem:[%s5579_s9 + $0x3d0] sm:$0xff] %v754_v58  ;;  %v758_v60 = vld [vmem:[%s5574_s8 + $0x7c0] sm:$0xff]  ;;  %v760_v61 = vld [vmem:[%s5574_s8 + $0x7c8] sm:$0xff]  ;;  %757 = vst [vmem:[%s5579_s9 + $0x3d8] sm:$0xff] %v756_v59 }
  0xb3   : > { %759 = vst [vmem:[%s5579_s9 + $0x3e0] sm:$0xff] %v758_v60  ;;  %761 = vst [vmem:[%s5579_s9 + $0x3e8] sm:$0xff] %v760_v61  ;;  %v762_v62 = vld [vmem:[%s5574_s8 + $0x7e0] sm:$0xff]  ;;  %v764_v63 = vld [vmem:[%s5574_s8 + $0x7e8] sm:$0xff] }
  0xb4   : > { %763 = vst [vmem:[%s5579_s9 + $0x3f0] sm:$0xff] %v762_v62  ;;  %765 = vst [vmem:[%s5579_s9 + $0x3f8] sm:$0xff] %v764_v63 }
  0xb5 PF: > { %p3946_p0 = scmp.ge.s32.totalorder %s5175_s27, 1  ;;  %p780_p1 = scmp.lt.s32.totalorder %s5175_s27, 5 }
  0xb7   : > { %p781_p2 = pnand %p3946_p0, %p780_p1 }
  0xb8   : > { %s787_s29 = sand.u32 (!%p781_p2), 1, %s5151_s21   ;;  %s6366_s10 = sand.u32 (!%p781_p2), 1, %s5143_s19  }
  0xb9   : > { %784 = sbr.rel (%p781_p2) target bundleno = 1161 (0x489), region = 78  ;;  %s3947_s12 = sshll.u32 (!%p781_p2), %s787_s29, 10 }
  0xba   : > { %s3949_s16 = sshll.u32 (!%p781_p2), %s6366_s10, 5  ;;  %p836_p3 = scmp.lt.s32.totalorder (!%p781_p2), %s5163_s24, 1 }
  0xbb   : > { %s3952_s17 = sshll.u32 (!%p781_p2), %s5159_s23, 6  ;;  %s5853_s29 = scalar_lea.vmem (!%p781_p2), [#allocation4], %s3947_s12 }
  0xbc   : > { %p844_p4 = scmp.lt.s32.totalorder (!%p781_p2), %s3952_s17, 127  ;;  %s5855_s10 = scalar_lea.vmem (!%p781_p2), [#allocation5], %s3947_s12 }
  0xbd   : > { %s5857_s26 = scalar_lea.vmem (!%p781_p2), [#allocation6], %s3949_s16  ;;  %p3955_p5 = scmp.ne.s32.totalorder (!%p781_p2), %s5159_s23, 0 }
  0xc0   : > { %s837_s28 = scalar_select %p836_p3, %s5163_s24, 1 }
  0xc1   : > { %s6396_s17 = smov (!%p844_p4, %s3952_s17), 127  ;;  %853 = sbr.rel (%p3955_p5) target bundleno = 369 (0x171), region = 90 }
  0xc2   : > { %s4358_s7 = sshll.u32 %s837_s28, 5  ;;  %s4359_s3 = sshll.u32 %s6396_s17, 4  ;;  %v5177_v11 = vmov (!%p3955_p5), 0.0   ;;  %v877_v14 = vlaneseq (!%p3955_p5)  ;;  %v875_v21 = vld [vmem:[%s6359_s1] sm:$0xf] (!%p3955_p5) }
  0xc3   : > { %s5846_s2 = scalar_lea.vmem %s6358_s0, %s4358_s7  ;;  %s5851_s21 = scalar_lea.vmem %s6362_s4, %s4359_s3  ;;  %919 = vst [vmem:[#allocation3] sm:$0xff] (!%p3955_p5), %v5177_v11  ;;  %920 = vst [vmem:[#allocation3 + $0x8] sm:$0xff] (!%p3955_p5), %v5177_v11 }
  0xc4   : > { %v854_v0 = vld [vmem:[%s5846_s2] sm:$0xff] (!%p3955_p5)  ;;  %v855_v1 = vld [vmem:[%s5846_s2 + $0x8] sm:$0xff] (!%p3955_p5)  ;;  %v856_v2 = vld [vmem:[%s5846_s2 + $0x10] sm:$0xff] (!%p3955_p5)  ;;  %921 = vst [vmem:[#allocation3 + $0x10] sm:$0xff] (!%p3955_p5), %v5177_v11  ;;  %v878_v16 = vshrl.u32 (!%p3955_p5), %v877_v14, 7 }
  0xc5   : > { %v857_v3 = vld [vmem:[%s5846_s2 + $0x18] sm:$0xff] (!%p3955_p5)  ;;  %v858_v4 = vmul.f32 (!%p3955_p5), %v854_v0, %v854_v0  ;;  %v859_v5 = vmul.f32 (!%p3955_p5), %v855_v1, %v855_v1  ;;  %v860_v6 = vmul.f32 (!%p3955_p5), %v856_v2, %v856_v2  ;;  %922 = vst [vmem:[#allocation3 + $0x18] sm:$0xff] (!%p3955_p5), %v5177_v11 }
  0xc6   : > { %v861_v7 = vmul.f32 (!%p3955_p5), %v857_v3, %v857_v3  ;;  %v879_v17 = vsub.s32 (!%p3955_p5), 0, %v878_v16  ;;  %v883_v18 = vsub.s32 (!%p3955_p5), 1, %v878_v16  ;;  %v887_v19 = vsub.s32 (!%p3955_p5), 2, %v878_v16 }
  0xc7   : > { %v862_v8 = vadd.f32 (!%p3955_p5), %v859_v5, %v858_v4  ;;  %v891_v20 = vsub.s32 (!%p3955_p5), 3, %v878_v16 }
  0xc8   : > { %v880_v22 = vrot.slane %v875_v21, %v879_v17  ;;  %v884_v23 = vrot.slane %v875_v21, %v883_v18  ;;  %v888_v24 = vrot.slane %v875_v21, %v887_v19 }
  0xc9   : > { %v863_v9 = vadd.f32 %v862_v8, %v860_v6  ;;  %v892_v25 = vrot.slane %v875_v21, %v891_v20 }
  0xcb   : > { %v864_v10 = vadd.f32 %v863_v9, %v861_v7 }
  0xcd   : > { %865 = vadd.xlane.f32.xlu0 %v864_v10 }
 0x15a   : > { %v866_v12 = vpop.xlane.xlu0 %865 }
 0x15b   : > { %v868_v13 = vmul.f32 0.001953125, %v866_v12 }
 0x15d   : > { %v869_v15 = vadd.f32 1e-06, %v868_v13 }
 0x15f   : > { %4467 = vrsqrt.f32 %v869_v15 }
 0x169   : > { %v4468_v26 = vpop.eup %4467 }
 0x16a   : > { %v871_v27 = vmul.f32 %v4468_v26, %v854_v0  ;;  %v872_v28 = vmul.f32 %v4468_v26, %v855_v1  ;;  %v873_v29 = vmul.f32 %v4468_v26, %v856_v2  ;;  %v874_v30 = vmul.f32 %v4468_v26, %v857_v3 }
 0x16c   : > { %v897_v31 = vmul.f32 %v880_v22, %v871_v27  ;;  %v898_v32 = vmul.f32 %v884_v23, %v872_v28  ;;  %v899_v33 = vmul.f32 %v888_v24, %v873_v29  ;;  %v900_v34 = vmul.f32 %v892_v25, %v874_v30 }
 0x16e   : > { %v4360_v35 = vpack.c.bf16 %v898_v32, %v897_v31  ;;  %v4361_v36 = vpack.c.bf16 %v900_v34, %v899_v33 }
 0x170   : > { %917 = vst [vmem:[#allocation2] sm:$0xff] %v4360_v35  ;;  %918 = vst [vmem:[#allocation2 + $0x8] sm:$0xff] %v4361_v36 }
 0x171 PF: > { %v4469_v37 = vld [vmem:[%s5853_s29 + $0x4] ss:$16 sps:$4 sm:$0xff]   ;;  %v4471_v38 = vld [vmem:[%s5853_s29 + $0xc] ss:$16 sps:$4 sm:$0xff]   ;;  %v4473_v39 = vld [vmem:[%s5853_s29] ss:$16 sps:$4 sm:$0xff]  }
 0x172   : > { %1707 = vmatprep.subr.bf16.mxu0 %v4469_v37  ;;  %v4474_v40 = vld [vmem:[%s5853_s29 + $0x8] ss:$16 sps:$4 sm:$0xff]   ;;  %1789 = vmatprep.subr.bf16.mxu1 %v4471_v38  ;;  %v4475_v41 = vld [vmem:[%s5853_s29 + $0x24] ss:$16 sps:$4 sm:$0xff]   ;;  %v4477_v42 = vld [vmem:[%s5853_s29 + $0x2c] ss:$16 sps:$4 sm:$0xff]  }
 0x173   : > { %1708 = vmatpush1.bf16.msra.mxu0 %v4473_v39  ;;  %1790 = vmatpush1.bf16.msra.mxu1 %v4474_v40  ;;  %v4479_v43 = vld [vmem:[%s5853_s29 + $0x20] ss:$16 sps:$4 sm:$0xff]   ;;  %v4480_v44 = vld [vmem:[%s5853_s29 + $0x28] ss:$16 sps:$4 sm:$0xff]   ;;  %v4481_v45 = vld [vmem:[%s5853_s29 + $0x44] ss:$16 sps:$4 sm:$0xff]  }
 0x174   : > { %1709 = vmatprep.subr.bf16.mxu0 %v4475_v41  ;;  %1791 = vmatprep.subr.bf16.mxu1 %v4477_v42  ;;  %v4483_v46 = vld [vmem:[%s5853_s29 + $0x4c] ss:$16 sps:$4 sm:$0xff]   ;;  %v4485_v47 = vld [vmem:[%s5853_s29 + $0x40] ss:$16 sps:$4 sm:$0xff]   ;;  %v4486_v48 = vld [vmem:[%s5853_s29 + $0x48] ss:$16 sps:$4 sm:$0xff]  }
 0x175   : > { %v4487_v49 = vld [vmem:[%s5853_s29 + $0x64] ss:$16 sps:$4 sm:$0xff]   ;;  %v4489_v50 = vld [vmem:[%s5853_s29 + $0x6c] ss:$16 sps:$4 sm:$0xff]   ;;  %v4491_v51 = vld [vmem:[%s5853_s29 + $0x60] ss:$16 sps:$4 sm:$0xff]  }
 0x176   : > { %v4492_v52 = vld [vmem:[%s5853_s29 + $0x68] ss:$16 sps:$4 sm:$0xff]   ;;  %v4493_v53 = vld [vmem:[%s5853_s29 + $0x84] ss:$16 sps:$4 sm:$0xff]   ;;  %v4495_v54 = vld [vmem:[%s5853_s29 + $0x8c] ss:$16 sps:$4 sm:$0xff]  }
 0x177   : > { %1710 = vmatpush1.bf16.msra.mxu0 %v4479_v43  ;;  %1792 = vmatpush1.bf16.msra.mxu1 %v4480_v44  ;;  %v4497_v55 = vld [vmem:[%s5853_s29 + $0x80] ss:$16 sps:$4 sm:$0xff]   ;;  %v4498_v56 = vld [vmem:[%s5853_s29 + $0x88] ss:$16 sps:$4 sm:$0xff]   ;;  %v4499_v57 = vld [vmem:[%s5853_s29 + $0xa4] ss:$16 sps:$4 sm:$0xff]  }
 0x178   : > { %1711 = vmatprep.subr.bf16.mxu0 %v4481_v45  ;;  %1793 = vmatprep.subr.bf16.mxu1 %v4483_v46  ;;  %v4501_v58 = vld [vmem:[%s5853_s29 + $0xac] ss:$16 sps:$4 sm:$0xff]   ;;  %v4503_v59 = vld [vmem:[%s5853_s29 + $0xa0] ss:$16 sps:$4 sm:$0xff]   ;;  %v4504_v60 = vld [vmem:[%s5853_s29 + $0xa8] ss:$16 sps:$4 sm:$0xff]  }
 0x179   : > { %v4505_v61 = vld [vmem:[%s5853_s29 + $0xc4] ss:$16 sps:$4 sm:$0xff]   ;;  %v4507_v62 = vld [vmem:[%s5853_s29 + $0xcc] ss:$16 sps:$4 sm:$0xff]   ;;  %v4509_v63 = vld [vmem:[%s5853_s29 + $0xc0] ss:$16 sps:$4 sm:$0xff]  }
 0x17a   : > { %v4510_v0 = vld [vmem:[%s5853_s29 + $0xc8] ss:$16 sps:$4 sm:$0xff]   ;;  %v4511_v1 = vld [vmem:[%s5853_s29 + $0xe4] ss:$16 sps:$4 sm:$0xff]   ;;  %v4513_v2 = vld [vmem:[%s5853_s29 + $0xec] ss:$16 sps:$4 sm:$0xff]  }
 0x17b   : > { %1712 = vmatpush1.bf16.msra.mxu0 %v4485_v47  ;;  %1794 = vmatpush1.bf16.msra.mxu1 %v4486_v48  ;;  %v4515_v3 = vld [vmem:[%s5853_s29 + $0xe0] ss:$16 sps:$4 sm:$0xff]   ;;  %v4516_v4 = vld [vmem:[%s5853_s29 + $0xe8] ss:$16 sps:$4 sm:$0xff]   ;;  %v4517_v5 = vld [vmem:[%s5853_s29 + $0x104] ss:$16 sps:$4 sm:$0xff]  }
 0x17c   : > { %1713 = vmatprep.subr.bf16.mxu0 %v4487_v49  ;;  %1795 = vmatprep.subr.bf16.mxu1 %v4489_v50  ;;  %v4519_v6 = vld [vmem:[%s5853_s29 + $0x10c] ss:$16 sps:$4 sm:$0xff]   ;;  %v4521_v7 = vld [vmem:[%s5853_s29 + $0x100] ss:$16 sps:$4 sm:$0xff]   ;;  %v4522_v8 = vld [vmem:[%s5853_s29 + $0x108] ss:$16 sps:$4 sm:$0xff]  }
 0x17d   : > { %v4523_v9 = vld [vmem:[%s5853_s29 + $0x124] ss:$16 sps:$4 sm:$0xff]   ;;  %v4525_v10 = vld [vmem:[%s5853_s29 + $0x12c] ss:$16 sps:$4 sm:$0xff]   ;;  %v4527_v11 = vld [vmem:[%s5853_s29 + $0x120] ss:$16 sps:$4 sm:$0xff]  }
 0x17e   : > { %v4528_v12 = vld [vmem:[%s5853_s29 + $0x128] ss:$16 sps:$4 sm:$0xff]   ;;  %v4529_v13 = vld [vmem:[%s5853_s29 + $0x144] ss:$16 sps:$4 sm:$0xff]   ;;  %v4531_v14 = vld [vmem:[%s5853_s29 + $0x14c] ss:$16 sps:$4 sm:$0xff]  }
 0x17f   : > { %1714 = vmatpush1.bf16.msra.mxu0 %v4491_v51  ;;  %1796 = vmatpush1.bf16.msra.mxu1 %v4492_v52  ;;  %v4533_v15 = vld [vmem:[%s5853_s29 + $0x140] ss:$16 sps:$4 sm:$0xff]   ;;  %v4534_v16 = vld [vmem:[%s5853_s29 + $0x148] ss:$16 sps:$4 sm:$0xff]   ;;  %v4535_v17 = vld [vmem:[%s5853_s29 + $0x164] ss:$16 sps:$4 sm:$0xff]  }
 0x180   : > { %1715 = vmatprep.subr.bf16.mxu0 %v4493_v53  ;;  %1797 = vmatprep.subr.bf16.mxu1 %v4495_v54  ;;  %v4537_v18 = vld [vmem:[%s5853_s29 + $0x16c] ss:$16 sps:$4 sm:$0xff]   ;;  %v923_v19 = vld [vmem:[#allocation2] sm:$0xff]  ;;  %v4540_v22 = vld [vmem:[%s5853_s29 + $0x168] ss:$16 sps:$4 sm:$0xff]   ;;  %p4350_p6 = scmp.ne.s32.totalorder %s5159_s23, 1 }
 0x181   : > { %v4539_v20 = vld [vmem:[%s5853_s29 + $0x160] ss:$16 sps:$4 sm:$0xff]   ;;  %v5914_v21 = vcombine.high %v923_v19, %v923_v19  ;;  %v4541_v23 = vld [vmem:[%s5853_s29 + $0x184] ss:$16 sps:$4 sm:$0xff]   ;;  %v4543_v24 = vld [vmem:[%s5853_s29 + $0x18c] ss:$16 sps:$4 sm:$0xff]   ;;  %v5938_v42 = vcombine.low %v923_v19, %v923_v19 }
 0x182   : > { %v4545_v25 = vld [vmem:[%s5853_s29 + $0x180] ss:$16 sps:$4 sm:$0xff]   ;;  %v4546_v26 = vld [vmem:[%s5853_s29 + $0x188] ss:$16 sps:$4 sm:$0xff]   ;;  %v4547_v27 = vld [vmem:[%s5853_s29 + $0x1a4] ss:$16 sps:$4 sm:$0xff]  }
 0x183   : > { %1716 = vmatpush1.bf16.msra.mxu0 %v4497_v55  ;;  %1798 = vmatpush1.bf16.msra.mxu1 %v4498_v56  ;;  %v4549_v28 = vld [vmem:[%s5853_s29 + $0x1ac] ss:$16 sps:$4 sm:$0xff]   ;;  %v4551_v29 = vld [vmem:[%s5853_s29 + $0x1a0] ss:$16 sps:$4 sm:$0xff]   ;;  %v4552_v30 = vld [vmem:[%s5853_s29 + $0x1a8] ss:$16 sps:$4 sm:$0xff]  }
 0x184   : > { %1717 = vmatprep.subr.bf16.mxu0 %v4499_v57  ;;  %1799 = vmatprep.subr.bf16.mxu1 %v4501_v58  ;;  %v4553_v31 = vld [vmem:[%s5853_s29 + $0x1c4] ss:$16 sps:$4 sm:$0xff]   ;;  %v4555_v32 = vld [vmem:[%s5853_s29 + $0x1cc] ss:$16 sps:$4 sm:$0xff]   ;;  %v4557_v33 = vld [vmem:[%s5853_s29 + $0x1c0] ss:$16 sps:$4 sm:$0xff]  }
 0x185   : > { %1739 = vmatprep.mubr.bf16.mxu0 %v5914_v21  ;;  %1821 = vmatprep.mubr.bf16.mxu1 %v5914_v21  ;;  %v4558_v34 = vld [vmem:[%s5853_s29 + $0x1c8] ss:$16 sps:$4 sm:$0xff]   ;;  %v4559_v35 = vld [vmem:[%s5853_s29 + $0x1e4] ss:$16 sps:$4 sm:$0xff]   ;;  %v4561_v36 = vld [vmem:[%s5853_s29 + $0x1ec] ss:$16 sps:$4 sm:$0xff]  }
 0x186   : > { %v4563_v37 = vld [vmem:[%s5853_s29 + $0x1e0] ss:$16 sps:$4 sm:$0xff]   ;;  %v4564_v38 = vld [vmem:[%s5853_s29 + $0x1e8] ss:$16 sps:$4 sm:$0xff]   ;;  %v4568_v39 = vld [vmem:[%s5853_s29 + $0x204] ss:$16 sps:$4 sm:$0xff]  }
 0x187   : > { %1718 = vmatpush1.bf16.msra.mxu0 %v4503_v59  ;;  %1800 = vmatpush1.bf16.msra.mxu1 %v4504_v60  ;;  %v4571_v40 = vld [vmem:[%s5853_s29 + $0x20c] ss:$16 sps:$4 sm:$0xff]   ;;  %v4566_v41 = vld [vmem:[%s5853_s29 + $0x200] ss:$16 sps:$4 sm:$0xff]   ;;  %v4569_v43 = vld [vmem:[%s5853_s29 + $0x208] ss:$16 sps:$4 sm:$0xff]  }
 0x188   : > { %1719 = vmatprep.subr.bf16.mxu0 %v4505_v61  ;;  %1801 = vmatprep.subr.bf16.mxu1 %v4507_v62  ;;  %v4575_v44 = vld [vmem:[%s5853_s29 + $0x224] ss:$16 sps:$4 sm:$0xff]   ;;  %v4578_v45 = vld [vmem:[%s5853_s29 + $0x22c] ss:$16 sps:$4 sm:$0xff]   ;;  %v4573_v46 = vld [vmem:[%s5853_s29 + $0x220] ss:$16 sps:$4 sm:$0xff]  }
 0x189   : > { %v4576_v47 = vld [vmem:[%s5853_s29 + $0x228] ss:$16 sps:$4 sm:$0xff]   ;;  %v4581_v48 = vld [vmem:[%s5853_s29 + $0x244] ss:$16 sps:$4 sm:$0xff]   ;;  %v4584_v49 = vld [vmem:[%s5853_s29 + $0x24c] ss:$16 sps:$4 sm:$0xff]  }
 0x18a   : > { %v4579_v50 = vld [vmem:[%s5853_s29 + $0x240] ss:$16 sps:$4 sm:$0xff]   ;;  %v4582_v51 = vld [vmem:[%s5853_s29 + $0x248] ss:$16 sps:$4 sm:$0xff]   ;;  %v4587_v52 = vld [vmem:[%s5853_s29 + $0x264] ss:$16 sps:$4 sm:$0xff]  }
 0x18b   : > { %1720 = vmatpush1.bf16.msra.mxu0 %v4509_v63  ;;  %1802 = vmatpush1.bf16.msra.mxu1 %v4510_v0  ;;  %v4590_v53 = vld [vmem:[%s5853_s29 + $0x26c] ss:$16 sps:$4 sm:$0xff]   ;;  %v4585_v54 = vld [vmem:[%s5853_s29 + $0x260] ss:$16 sps:$4 sm:$0xff]   ;;  %v4588_v55 = vld [vmem:[%s5853_s29 + $0x268] ss:$16 sps:$4 sm:$0xff]  }
 0x18c   : > { %1721 = vmatprep.subr.bf16.mxu0 %v4511_v1  ;;  %1803 = vmatprep.subr.bf16.mxu1 %v4513_v2  ;;  %v4593_v56 = vld [vmem:[%s5853_s29 + $0x284] ss:$16 sps:$4 sm:$0xff]   ;;  %v4596_v57 = vld [vmem:[%s5853_s29 + $0x28c] ss:$16 sps:$4 sm:$0xff]   ;;  %v4591_v58 = vld [vmem:[%s5853_s29 + $0x280] ss:$16 sps:$4 sm:$0xff]  }
 0x18d   : > { %v4594_v59 = vld [vmem:[%s5853_s29 + $0x288] ss:$16 sps:$4 sm:$0xff]   ;;  %v4599_v60 = vld [vmem:[%s5853_s29 + $0x2a4] ss:$16 sps:$4 sm:$0xff]   ;;  %v4602_v61 = vld [vmem:[%s5853_s29 + $0x2ac] ss:$16 sps:$4 sm:$0xff]  }
 0x18e   : > { %v4597_v62 = vld [vmem:[%s5853_s29 + $0x2a0] ss:$16 sps:$4 sm:$0xff]   ;;  %v4600_v63 = vld [vmem:[%s5853_s29 + $0x2a8] ss:$16 sps:$4 sm:$0xff]   ;;  %v4605_v0 = vld [vmem:[%s5853_s29 + $0x2c4] ss:$16 sps:$4 sm:$0xff]  }
 0x18f   : > { %1722 = vmatpush1.bf16.msra.mxu0 %v4515_v3  ;;  %1804 = vmatpush1.bf16.msra.mxu1 %v4516_v4  ;;  %v4608_v1 = vld [vmem:[%s5853_s29 + $0x2cc] ss:$16 sps:$4 sm:$0xff]   ;;  %v4603_v4 = vld [vmem:[%s5853_s29 + $0x2c0] ss:$16 sps:$4 sm:$0xff]  }
 0x190   : > { %1723 = vmatprep.subr.bf16.mxu0 %v4517_v5  ;;  %1805 = vmatprep.subr.bf16.mxu1 %v4519_v6  ;;  %v5965_v2 = vld [vmem:[#allocation2 + $0x8] sm:$0xff]  ;;  %v4611_v6 = vld [vmem:[%s5853_s29 + $0x2e4] ss:$16 sps:$4 sm:$0xff]  }
 0x191   : > { %v5969_v3 = vcombine.high %v5965_v2, %v5965_v2  ;;  %v4606_v5 = vld [vmem:[%s5853_s29 + $0x2c8] ss:$16 sps:$4 sm:$0xff]   ;;  %v4632_v19 = vld [vmem:[%s5853_s29 + $0x34c] ss:$16 sps:$4 sm:$0xff]  }
 0x193   : > { %1724 = vmatpush1.bf16.msra.mxu0 %v4521_v7  ;;  %1806 = vmatpush1.bf16.msra.mxu1 %v4522_v8  ;;  %v4614_v7 = vld [vmem:[%s5853_s29 + $0x2ec] ss:$16 sps:$4 sm:$0xff]   ;;  %v4609_v8 = vld [vmem:[%s5853_s29 + $0x2e0] ss:$16 sps:$4 sm:$0xff]  }
 0x194   : > { %1725 = vmatprep.subr.bf16.mxu0 %v4523_v9  ;;  %1807 = vmatprep.subr.bf16.mxu1 %v4525_v10  ;;  %v4612_v9 = vld [vmem:[%s5853_s29 + $0x2e8] ss:$16 sps:$4 sm:$0xff]   ;;  %v4617_v10 = vld [vmem:[%s5853_s29 + $0x304] ss:$16 sps:$4 sm:$0xff]  }
 0x197   : > { %1726 = vmatpush1.bf16.msra.mxu0 %v4527_v11  ;;  %1808 = vmatpush1.bf16.msra.mxu1 %v4528_v12  ;;  %v4620_v11 = vld [vmem:[%s5853_s29 + $0x30c] ss:$16 sps:$4 sm:$0xff]   ;;  %v4615_v12 = vld [vmem:[%s5853_s29 + $0x300] ss:$16 sps:$4 sm:$0xff]  }
 0x198   : > { %1727 = vmatprep.subr.bf16.mxu0 %v4529_v13  ;;  %1809 = vmatprep.subr.bf16.mxu1 %v4531_v14  ;;  %v4618_v13 = vld [vmem:[%s5853_s29 + $0x308] ss:$16 sps:$4 sm:$0xff]   ;;  %v4623_v14 = vld [vmem:[%s5853_s29 + $0x324] ss:$16 sps:$4 sm:$0xff]  }
 0x19b   : > { %1728 = vmatpush1.bf16.msra.mxu0 %v4533_v15  ;;  %1810 = vmatpush1.bf16.msra.mxu1 %v4534_v16  ;;  %v4626_v15 = vld [vmem:[%s5853_s29 + $0x32c] ss:$16 sps:$4 sm:$0xff]   ;;  %v4621_v16 = vld [vmem:[%s5853_s29 + $0x320] ss:$16 sps:$4 sm:$0xff]  }
 0x19c   : > { %1729 = vmatprep.subr.bf16.mxu0 %v4535_v17  ;;  %1811 = vmatprep.subr.bf16.mxu1 %v4537_v18  ;;  %v4624_v17 = vld [vmem:[%s5853_s29 + $0x328] ss:$16 sps:$4 sm:$0xff]   ;;  %v4629_v18 = vld [vmem:[%s5853_s29 + $0x344] ss:$16 sps:$4 sm:$0xff]  }
 0x19f   : > { %1730 = vmatpush1.bf16.msra.mxu0 %v4539_v20  ;;  %1812 = vmatpush1.bf16.msra.mxu1 %v4540_v22  ;;  %v4627_v20 = vld [vmem:[%s5853_s29 + $0x340] ss:$16 sps:$4 sm:$0xff]   ;;  %v4630_v22 = vld [vmem:[%s5853_s29 + $0x348] ss:$16 sps:$4 sm:$0xff]  }
 0x1a0   : > { %1731 = vmatprep.subr.bf16.mxu0 %v4541_v23  ;;  %1813 = vmatprep.subr.bf16.mxu1 %v4543_v24  ;;  %v4635_v23 = vld [vmem:[%s5853_s29 + $0x364] ss:$16 sps:$4 sm:$0xff]   ;;  %v4638_v24 = vld [vmem:[%s5853_s29 + $0x36c] ss:$16 sps:$4 sm:$0xff]  }
 0x1a3   : > { %1732 = vmatpush1.bf16.msra.mxu0 %v4545_v25  ;;  %1814 = vmatpush1.bf16.msra.mxu1 %v4546_v26  ;;  %v4633_v25 = vld [vmem:[%s5853_s29 + $0x360] ss:$16 sps:$4 sm:$0xff]   ;;  %v4636_v26 = vld [vmem:[%s5853_s29 + $0x368] ss:$16 sps:$4 sm:$0xff]  }
 0x1a4   : > { %1733 = vmatprep.subr.bf16.mxu0 %v4547_v27  ;;  %1815 = vmatprep.subr.bf16.mxu1 %v4549_v28  ;;  %v4641_v27 = vld [vmem:[%s5853_s29 + $0x384] ss:$16 sps:$4 sm:$0xff]   ;;  %v4644_v28 = vld [vmem:[%s5853_s29 + $0x38c] ss:$16 sps:$4 sm:$0xff]  }
 0x1a7   : > { %1734 = vmatpush1.bf16.msra.mxu0 %v4551_v29  ;;  %1816 = vmatpush1.bf16.msra.mxu1 %v4552_v30  ;;  %v4639_v29 = vld [vmem:[%s5853_s29 + $0x380] ss:$16 sps:$4 sm:$0xff]   ;;  %v4642_v30 = vld [vmem:[%s5853_s29 + $0x388] ss:$16 sps:$4 sm:$0xff]  }
 0x1a8   : > { %1735 = vmatprep.subr.bf16.mxu0 %v4553_v31  ;;  %1817 = vmatprep.subr.bf16.mxu1 %v4555_v32  ;;  %v4647_v31 = vld [vmem:[%s5853_s29 + $0x3a4] ss:$16 sps:$4 sm:$0xff]   ;;  %v4650_v32 = vld [vmem:[%s5853_s29 + $0x3ac] ss:$16 sps:$4 sm:$0xff]  }
 0x1ab   : > { %1736 = vmatpush1.bf16.msra.mxu0 %v4557_v33  ;;  %1818 = vmatpush1.bf16.msra.mxu1 %v4558_v34  ;;  %v4645_v33 = vld [vmem:[%s5853_s29 + $0x3a0] ss:$16 sps:$4 sm:$0xff]   ;;  %v4648_v34 = vld [vmem:[%s5853_s29 + $0x3a8] ss:$16 sps:$4 sm:$0xff]  }
 0x1ac   : > { %1737 = vmatprep.subr.bf16.mxu0 %v4559_v35  ;;  %1819 = vmatprep.subr.bf16.mxu1 %v4561_v36  ;;  %v4653_v35 = vld [vmem:[%s5853_s29 + $0x3c4] ss:$16 sps:$4 sm:$0xff]   ;;  %v4656_v36 = vld [vmem:[%s5853_s29 + $0x3cc] ss:$16 sps:$4 sm:$0xff]  }
 0x1af   : > { %1738 = vmatpush1.bf16.msra.mxu0 %v4563_v37  ;;  %1820 = vmatpush1.bf16.msra.mxu1 %v4564_v38  ;;  %v4651_v37 = vld [vmem:[%s5853_s29 + $0x3c0] ss:$16 sps:$4 sm:$0xff]   ;;  %v4654_v38 = vld [vmem:[%s5853_s29 + $0x3c8] ss:$16 sps:$4 sm:$0xff]  }
 0x1b0   : > { %1748 = vmatprep.subr.bf16.mxu0 %v4568_v39  ;;  %1830 = vmatprep.subr.bf16.mxu1 %v4571_v40  ;;  %v4659_v39 = vld [vmem:[%s5853_s29 + $0x3e4] ss:$16 sps:$4 sm:$0xff]   ;;  %v4662_v40 = vld [vmem:[%s5853_s29 + $0x3ec] ss:$16 sps:$4 sm:$0xff]  }
 0x1b2   : > { %1740 = vmatmul.mubr.bf16.vlgmr.msra.gmra.mrb[0].mxu0 %v5938_v42  ;;  %1822 = vmatmul.mubr.bf16.vlgmr.msra.gmra.mrb[0].mxu1 %v5938_v42 }
 0x1b3   : > { %1749 = vmatpush1.bf16.msra.mxu0 %v4566_v41  ;;  %1831 = vmatpush1.bf16.msra.mxu1 %v4569_v43  ;;  %v4657_v41 = vld [vmem:[%s5853_s29 + $0x3e0] ss:$16 sps:$4 sm:$0xff]   ;;  %v4660_v43 = vld [vmem:[%s5853_s29 + $0x3e8] ss:$16 sps:$4 sm:$0xff]  }
 0x1b4   : > { %1750 = vmatprep.subr.bf16.mxu0 %v4575_v44  ;;  %1832 = vmatprep.subr.bf16.mxu1 %v4578_v45  ;;  %v4667_v44 = vld [vmem:[%s5855_s10 + $0x4] ss:$16 sps:$4 sm:$0xff]   ;;  %v4670_v45 = vld [vmem:[%s5855_s10 + $0xc] ss:$16 sps:$4 sm:$0xff]  }
 0x1b5   : > { %1780 = vmatprep.mubr.bf16.mxu0 %v5969_v3  ;;  %1862 = vmatprep.mubr.bf16.mxu1 %v5969_v3 }
 0x1b7   : > { %1751 = vmatpush1.bf16.msra.mxu0 %v4573_v46  ;;  %1833 = vmatpush1.bf16.msra.mxu1 %v4576_v47  ;;  %v6015_v46 = vcombine.low %v5965_v2, %v5965_v2  ;;  %v4665_v47 = vld [vmem:[%s5855_s10] ss:$16 sps:$4 sm:$0xff]  }
 0x1b8   : > { %1752 = vmatprep.subr.bf16.mxu0 %v4581_v48  ;;  %1834 = vmatprep.subr.bf16.mxu1 %v4584_v49  ;;  %v4668_v48 = vld [vmem:[%s5855_s10 + $0x8] ss:$16 sps:$4 sm:$0xff]   ;;  %v4673_v49 = vld [vmem:[%s5855_s10 + $0x24] ss:$16 sps:$4 sm:$0xff]   ;;  %v4695_v2 = vld [vmem:[%s5855_s10 + $0xa0] ss:$16 sps:$4 sm:$0xff]  }
 0x1bb   : > { %1753 = vmatpush1.bf16.msra.mxu0 %v4579_v50  ;;  %1835 = vmatpush1.bf16.msra.mxu1 %v4582_v51  ;;  %v4676_v50 = vld [vmem:[%s5855_s10 + $0x2c] ss:$16 sps:$4 sm:$0xff]   ;;  %v4671_v51 = vld [vmem:[%s5855_s10 + $0x20] ss:$16 sps:$4 sm:$0xff]  }
 0x1bc   : > { %1754 = vmatprep.subr.bf16.mxu0 %v4587_v52  ;;  %1836 = vmatprep.subr.bf16.mxu1 %v4590_v53  ;;  %v4674_v52 = vld [vmem:[%s5855_s10 + $0x28] ss:$16 sps:$4 sm:$0xff]   ;;  %v4679_v53 = vld [vmem:[%s5855_s10 + $0x44] ss:$16 sps:$4 sm:$0xff]  }
 0x1bf   : > { %1755 = vmatpush1.bf16.msra.mxu0 %v4585_v54  ;;  %1837 = vmatpush1.bf16.msra.mxu1 %v4588_v55  ;;  %v4682_v54 = vld [vmem:[%s5855_s10 + $0x4c] ss:$16 sps:$4 sm:$0xff]   ;;  %v4677_v55 = vld [vmem:[%s5855_s10 + $0x40] ss:$16 sps:$4 sm:$0xff]  }
 0x1c0   : > { %1756 = vmatprep.subr.bf16.mxu0 %v4593_v56  ;;  %1838 = vmatprep.subr.bf16.mxu1 %v4596_v57  ;;  %v4680_v56 = vld [vmem:[%s5855_s10 + $0x48] ss:$16 sps:$4 sm:$0xff]   ;;  %v4685_v57 = vld [vmem:[%s5855_s10 + $0x64] ss:$16 sps:$4 sm:$0xff]  }
 0x1c3   : > { %1757 = vmatpush1.bf16.msra.mxu0 %v4591_v58  ;;  %1839 = vmatpush1.bf16.msra.mxu1 %v4594_v59  ;;  %v4688_v58 = vld [vmem:[%s5855_s10 + $0x6c] ss:$16 sps:$4 sm:$0xff]   ;;  %v4683_v59 = vld [vmem:[%s5855_s10 + $0x60] ss:$16 sps:$4 sm:$0xff]  }
 0x1c4   : > { %1758 = vmatprep.subr.bf16.mxu0 %v4599_v60  ;;  %1840 = vmatprep.subr.bf16.mxu1 %v4602_v61  ;;  %v4686_v60 = vld [vmem:[%s5855_s10 + $0x68] ss:$16 sps:$4 sm:$0xff]   ;;  %v4694_v61 = vld [vmem:[%s5855_s10 + $0x8c] ss:$16 sps:$4 sm:$0xff]  }
 0x1c7   : > { %1759 = vmatpush1.bf16.msra.mxu0 %v4597_v62  ;;  %1841 = vmatpush1.bf16.msra.mxu1 %v4600_v63  ;;  %v4689_v62 = vld [vmem:[%s5855_s10 + $0x80] ss:$16 sps:$4 sm:$0xff]   ;;  %v4692_v63 = vld [vmem:[%s5855_s10 + $0x88] ss:$16 sps:$4 sm:$0xff]  }
 0x1c8   : > { %1760 = vmatprep.subr.bf16.mxu0 %v4605_v0  ;;  %1842 = vmatprep.subr.bf16.mxu1 %v4608_v1  ;;  %v4697_v0 = vld [vmem:[%s5855_s10 + $0xa4] ss:$16 sps:$4 sm:$0xff]   ;;  %v4700_v1 = vld [vmem:[%s5855_s10 + $0xac] ss:$16 sps:$4 sm:$0xff]  }
 0x1cb   : > { %1761 = vmatpush1.bf16.msra.mxu0 %v4603_v4  ;;  %1843 = vmatpush1.bf16.msra.mxu1 %v4606_v5  ;;  %v4698_v4 = vld [vmem:[%s5855_s10 + $0xa8] ss:$16 sps:$4 sm:$0xff]   ;;  %v4703_v5 = vld [vmem:[%s5855_s10 + $0xc4] ss:$16 sps:$4 sm:$0xff]  }
 0x1cc   : > { %1762 = vmatprep.subr.bf16.mxu0 %v4611_v6  ;;  %1844 = vmatprep.subr.bf16.mxu1 %v4614_v7  ;;  %v4706_v6 = vld [vmem:[%s5855_s10 + $0xcc] ss:$16 sps:$4 sm:$0xff]   ;;  %v4701_v7 = vld [vmem:[%s5855_s10 + $0xc0] ss:$16 sps:$4 sm:$0xff]  }
 0x1cf   : > { %1763 = vmatpush1.bf16.msra.mxu0 %v4609_v8  ;;  %1845 = vmatpush1.bf16.msra.mxu1 %v4612_v9  ;;  %v4704_v8 = vld [vmem:[%s5855_s10 + $0xc8] ss:$16 sps:$4 sm:$0xff]   ;;  %v4709_v9 = vld [vmem:[%s5855_s10 + $0xe4] ss:$16 sps:$4 sm:$0xff]  }
 0x1d0   : > { %1764 = vmatprep.subr.bf16.mxu0 %v4617_v10  ;;  %1846 = vmatprep.subr.bf16.mxu1 %v4620_v11  ;;  %v4712_v10 = vld [vmem:[%s5855_s10 + $0xec] ss:$16 sps:$4 sm:$0xff]   ;;  %v4707_v11 = vld [vmem:[%s5855_s10 + $0xe0] ss:$16 sps:$4 sm:$0xff]  }
 0x1d3   : > { %1765 = vmatpush1.bf16.msra.mxu0 %v4615_v12  ;;  %1847 = vmatpush1.bf16.msra.mxu1 %v4618_v13  ;;  %v4710_v12 = vld [vmem:[%s5855_s10 + $0xe8] ss:$16 sps:$4 sm:$0xff]   ;;  %v4715_v13 = vld [vmem:[%s5855_s10 + $0x104] ss:$16 sps:$4 sm:$0xff]  }
 0x1d4   : > { %1766 = vmatprep.subr.bf16.mxu0 %v4623_v14  ;;  %1848 = vmatprep.subr.bf16.mxu1 %v4626_v15  ;;  %v4718_v14 = vld [vmem:[%s5855_s10 + $0x10c] ss:$16 sps:$4 sm:$0xff]   ;;  %v4713_v15 = vld [vmem:[%s5855_s10 + $0x100] ss:$16 sps:$4 sm:$0xff]  }
 0x1d7   : > { %1767 = vmatpush1.bf16.msra.mxu0 %v4621_v16  ;;  %1849 = vmatpush1.bf16.msra.mxu1 %v4624_v17  ;;  %v4716_v16 = vld [vmem:[%s5855_s10 + $0x108] ss:$16 sps:$4 sm:$0xff]   ;;  %v4721_v17 = vld [vmem:[%s5855_s10 + $0x124] ss:$16 sps:$4 sm:$0xff]  }
 0x1d8   : > { %1768 = vmatprep.subr.bf16.mxu0 %v4629_v18  ;;  %1850 = vmatprep.subr.bf16.mxu1 %v4632_v19  ;;  %v4724_v18 = vld [vmem:[%s5855_s10 + $0x12c] ss:$16 sps:$4 sm:$0xff]   ;;  %v4719_v19 = vld [vmem:[%s5855_s10 + $0x120] ss:$16 sps:$4 sm:$0xff]  }
 0x1db   : > { %1769 = vmatpush1.bf16.msra.mxu0 %v4627_v20  ;;  %1851 = vmatpush1.bf16.msra.mxu1 %v4630_v22  ;;  %v4722_v20 = vld [vmem:[%s5855_s10 + $0x128] ss:$16 sps:$4 sm:$0xff]   ;;  %v4727_v22 = vld [vmem:[%s5855_s10 + $0x144] ss:$16 sps:$4 sm:$0xff]  }
 0x1dc   : > { %1770 = vmatprep.subr.bf16.mxu0 %v4635_v23  ;;  %1852 = vmatprep.subr.bf16.mxu1 %v4638_v24  ;;  %v4730_v23 = vld [vmem:[%s5855_s10 + $0x14c] ss:$16 sps:$4 sm:$0xff]   ;;  %v4725_v24 = vld [vmem:[%s5855_s10 + $0x140] ss:$16 sps:$4 sm:$0xff]  }
 0x1df   : > { %1771 = vmatpush1.bf16.msra.mxu0 %v4633_v25  ;;  %1853 = vmatpush1.bf16.msra.mxu1 %v4636_v26  ;;  %v4728_v25 = vld [vmem:[%s5855_s10 + $0x148] ss:$16 sps:$4 sm:$0xff]   ;;  %v4733_v26 = vld [vmem:[%s5855_s10 + $0x164] ss:$16 sps:$4 sm:$0xff]  }
 0x1e0   : > { %1772 = vmatprep.subr.bf16.mxu0 %v4641_v27  ;;  %1854 = vmatprep.subr.bf16.mxu1 %v4644_v28  ;;  %v4736_v27 = vld [vmem:[%s5855_s10 + $0x16c] ss:$16 sps:$4 sm:$0xff]   ;;  %v4731_v28 = vld [vmem:[%s5855_s10 + $0x160] ss:$16 sps:$4 sm:$0xff]  }
 0x1e3   : > { %1773 = vmatpush1.bf16.msra.mxu0 %v4639_v29  ;;  %1855 = vmatpush1.bf16.msra.mxu1 %v4642_v30  ;;  %v4734_v29 = vld [vmem:[%s5855_s10 + $0x168] ss:$16 sps:$4 sm:$0xff]   ;;  %v4739_v30 = vld [vmem:[%s5855_s10 + $0x184] ss:$16 sps:$4 sm:$0xff]  }
 0x1e4   : > { %1774 = vmatprep.subr.bf16.mxu0 %v4647_v31  ;;  %1856 = vmatprep.subr.bf16.mxu1 %v4650_v32  ;;  %v4742_v31 = vld [vmem:[%s5855_s10 + $0x18c] ss:$16 sps:$4 sm:$0xff]   ;;  %v4737_v32 = vld [vmem:[%s5855_s10 + $0x180] ss:$16 sps:$4 sm:$0xff]  }
 0x1e7   : > { %1775 = vmatpush1.bf16.msra.mxu0 %v4645_v33  ;;  %1857 = vmatpush1.bf16.msra.mxu1 %v4648_v34  ;;  %v4740_v33 = vld [vmem:[%s5855_s10 + $0x188] ss:$16 sps:$4 sm:$0xff]   ;;  %v4745_v34 = vld [vmem:[%s5855_s10 + $0x1a4] ss:$16 sps:$4 sm:$0xff]  }
 0x1e8   : > { %1776 = vmatprep.subr.bf16.mxu0 %v4653_v35  ;;  %1858 = vmatprep.subr.bf16.mxu1 %v4656_v36  ;;  %v4748_v35 = vld [vmem:[%s5855_s10 + $0x1ac] ss:$16 sps:$4 sm:$0xff]   ;;  %v4743_v36 = vld [vmem:[%s5855_s10 + $0x1a0] ss:$16 sps:$4 sm:$0xff]  }
 0x1eb   : > { %1777 = vmatpush1.bf16.msra.mxu0 %v4651_v37  ;;  %1859 = vmatpush1.bf16.msra.mxu1 %v4654_v38  ;;  %v4746_v37 = vld [vmem:[%s5855_s10 + $0x1a8] ss:$16 sps:$4 sm:$0xff]   ;;  %v4751_v38 = vld [vmem:[%s5855_s10 + $0x1c4] ss:$16 sps:$4 sm:$0xff]  }
 0x1ec   : > { %1778 = vmatprep.subr.bf16.mxu0 %v4659_v39  ;;  %1860 = vmatprep.subr.bf16.mxu1 %v4662_v40  ;;  %v4754_v39 = vld [vmem:[%s5855_s10 + $0x1cc] ss:$16 sps:$4 sm:$0xff]   ;;  %v4749_v40 = vld [vmem:[%s5855_s10 + $0x1c0] ss:$16 sps:$4 sm:$0xff]  }
 0x1ef   : > { %1779 = vmatpush1.bf16.msra.mxu0 %v4657_v41  ;;  %1861 = vmatpush1.bf16.msra.mxu1 %v4660_v43  ;;  %v4752_v41 = vld [vmem:[%s5855_s10 + $0x1c8] ss:$16 sps:$4 sm:$0xff]   ;;  %v4757_v43 = vld [vmem:[%s5855_s10 + $0x1e4] ss:$16 sps:$4 sm:$0xff]  }
 0x1f0   : > { %2639 = vmatprep.subr.bf16.mxu0 %v4667_v44  ;;  %2721 = vmatprep.subr.bf16.mxu1 %v4670_v45  ;;  %v4760_v44 = vld [vmem:[%s5855_s10 + $0x1ec] ss:$16 sps:$4 sm:$0xff]   ;;  %v4755_v45 = vld [vmem:[%s5855_s10 + $0x1e0] ss:$16 sps:$4 sm:$0xff]  }
 0x1f2   : > { %1781 = vmatmul.mubr.bf16.vlgmr.msra.gmra.mrb[0].mxu0 %v6015_v46  ;;  %1863 = vmatmul.mubr.bf16.vlgmr.msra.gmra.mrb[0].mxu1 %v6015_v46 }
 0x1f3   : > { %2640 = vmatpush1.bf16.msra.mxu0 %v4665_v47  ;;  %2722 = vmatpush1.bf16.msra.mxu1 %v4668_v48  ;;  %v4758_v47 = vld [vmem:[%s5855_s10 + $0x1e8] ss:$16 sps:$4 sm:$0xff]   ;;  %v4763_v48 = vld [vmem:[%s5855_s10 + $0x204] ss:$16 sps:$4 sm:$0xff]  }
 0x1f4   : > { %2641 = vmatprep.subr.bf16.mxu0 %v4673_v49  ;;  %2723 = vmatprep.subr.bf16.mxu1 %v4676_v50  ;;  %v4766_v49 = vld [vmem:[%s5855_s10 + $0x20c] ss:$16 sps:$4 sm:$0xff]   ;;  %v4761_v50 = vld [vmem:[%s5855_s10 + $0x200] ss:$16 sps:$4 sm:$0xff]  }
 0x1f5   : > { %2671 = vmatprep.mubr.bf16.mxu0 %v5914_v21  ;;  %2753 = vmatprep.mubr.bf16.mxu1 %v5914_v21  ;;  %v4691_v21 = vld [vmem:[%s5855_s10 + $0x84] ss:$16 sps:$4 sm:$0xff]  }
 0x1f7   : > { %2642 = vmatpush1.bf16.msra.mxu0 %v4671_v51  ;;  %2724 = vmatpush1.bf16.msra.mxu1 %v4674_v52  ;;  %v4764_v51 = vld [vmem:[%s5855_s10 + $0x208] ss:$16 sps:$4 sm:$0xff]   ;;  %v4769_v52 = vld [vmem:[%s5855_s10 + $0x224] ss:$16 sps:$4 sm:$0xff]  }
 0x1f8   : > { %2643 = vmatprep.subr.bf16.mxu0 %v4679_v53  ;;  %2725 = vmatprep.subr.bf16.mxu1 %v4682_v54  ;;  %v4772_v53 = vld [vmem:[%s5855_s10 + $0x22c] ss:$16 sps:$4 sm:$0xff]   ;;  %v4767_v54 = vld [vmem:[%s5855_s10 + $0x220] ss:$16 sps:$4 sm:$0xff]  }
 0x1fb   : > { %2644 = vmatpush1.bf16.msra.mxu0 %v4677_v55  ;;  %2726 = vmatpush1.bf16.msra.mxu1 %v4680_v56  ;;  %v4770_v55 = vld [vmem:[%s5855_s10 + $0x228] ss:$16 sps:$4 sm:$0xff]   ;;  %v4775_v56 = vld [vmem:[%s5855_s10 + $0x244] ss:$16 sps:$4 sm:$0xff]  }
 0x1fc   : > { %2645 = vmatprep.subr.bf16.mxu0 %v4685_v57  ;;  %2727 = vmatprep.subr.bf16.mxu1 %v4688_v58  ;;  %v4778_v57 = vld [vmem:[%s5855_s10 + $0x24c] ss:$16 sps:$4 sm:$0xff]   ;;  %v4773_v58 = vld [vmem:[%s5855_s10 + $0x240] ss:$16 sps:$4 sm:$0xff]  }
 0x1ff   : > { %2646 = vmatpush1.bf16.msra.mxu0 %v4683_v59  ;;  %2728 = vmatpush1.bf16.msra.mxu1 %v4686_v60  ;;  %v4776_v59 = vld [vmem:[%s5855_s10 + $0x248] ss:$16 sps:$4 sm:$0xff]   ;;  %v4781_v60 = vld [vmem:[%s5855_s10 + $0x264] ss:$16 sps:$4 sm:$0xff]  }
 0x200   : > { %2647 = vmatprep.subr.bf16.mxu0 %v4691_v21  ;;  %2729 = vmatprep.subr.bf16.mxu1 %v4694_v61  ;;  %v4779_v21 = vld [vmem:[%s5855_s10 + $0x260] ss:$16 sps:$4 sm:$0xff]   ;;  %v4782_v61 = vld [vmem:[%s5855_s10 + $0x268] ss:$16 sps:$4 sm:$0xff]  }
 0x203   : > { %2648 = vmatpush1.bf16.msra.mxu0 %v4689_v62  ;;  %2730 = vmatpush1.bf16.msra.mxu1 %v4692_v63  ;;  %v4787_v62 = vld [vmem:[%s5855_s10 + $0x284] ss:$16 sps:$4 sm:$0xff]   ;;  %v4790_v63 = vld [vmem:[%s5855_s10 + $0x28c] ss:$16 sps:$4 sm:$0xff]  }
 0x204   : > { %2649 = vmatprep.subr.bf16.mxu0 %v4697_v0  ;;  %2731 = vmatprep.subr.bf16.mxu1 %v4700_v1  ;;  %v4788_v0 = vld [vmem:[%s5855_s10 + $0x288] ss:$16 sps:$4 sm:$0xff]   ;;  %v4793_v1 = vld [vmem:[%s5855_s10 + $0x2a4] ss:$16 sps:$4 sm:$0xff]  }
 0x207   : > { %2650 = vmatpush1.bf16.msra.mxu0 %v4695_v2  ;;  %2732 = vmatpush1.bf16.msra.mxu1 %v4698_v4  ;;  %v4796_v2 = vld [vmem:[%s5855_s10 + $0x2ac] ss:$16 sps:$4 sm:$0xff]   ;;  %v4791_v4 = vld [vmem:[%s5855_s10 + $0x2a0] ss:$16 sps:$4 sm:$0xff]  }
 0x208   : > { %2651 = vmatprep.subr.bf16.mxu0 %v4703_v5  ;;  %2733 = vmatprep.subr.bf16.mxu1 %v4706_v6  ;;  %v4794_v5 = vld [vmem:[%s5855_s10 + $0x2a8] ss:$16 sps:$4 sm:$0xff]   ;;  %v4799_v6 = vld [vmem:[%s5855_s10 + $0x2c4] ss:$16 sps:$4 sm:$0xff]  }
 0x20b   : > { %2652 = vmatpush1.bf16.msra.mxu0 %v4701_v7  ;;  %2734 = vmatpush1.bf16.msra.mxu1 %v4704_v8  ;;  %v4802_v7 = vld [vmem:[%s5855_s10 + $0x2cc] ss:$16 sps:$4 sm:$0xff]   ;;  %v4797_v8 = vld [vmem:[%s5855_s10 + $0x2c0] ss:$16 sps:$4 sm:$0xff]  }
 0x20c   : > { %2653 = vmatprep.subr.bf16.mxu0 %v4709_v9  ;;  %2735 = vmatprep.subr.bf16.mxu1 %v4712_v10  ;;  %v4800_v9 = vld [vmem:[%s5855_s10 + $0x2c8] ss:$16 sps:$4 sm:$0xff]   ;;  %v4805_v10 = vld [vmem:[%s5855_s10 + $0x2e4] ss:$16 sps:$4 sm:$0xff]  }
 0x20f   : > { %2654 = vmatpush1.bf16.msra.mxu0 %v4707_v11  ;;  %2736 = vmatpush1.bf16.msra.mxu1 %v4710_v12  ;;  %v4808_v11 = vld [vmem:[%s5855_s10 + $0x2ec] ss:$16 sps:$4 sm:$0xff]   ;;  %v4803_v12 = vld [vmem:[%s5855_s10 + $0x2e0] ss:$16 sps:$4 sm:$0xff]  }
 0x210   : > { %2655 = vmatprep.subr.bf16.mxu0 %v4715_v13  ;;  %2737 = vmatprep.subr.bf16.mxu1 %v4718_v14  ;;  %v4806_v13 = vld [vmem:[%s5855_s10 + $0x2e8] ss:$16 sps:$4 sm:$0xff]   ;;  %v4811_v14 = vld [vmem:[%s5855_s10 + $0x304] ss:$16 sps:$4 sm:$0xff]  }
 0x213   : > { %2656 = vmatpush1.bf16.msra.mxu0 %v4713_v15  ;;  %2738 = vmatpush1.bf16.msra.mxu1 %v4716_v16  ;;  %v4814_v15 = vld [vmem:[%s5855_s10 + $0x30c] ss:$16 sps:$4 sm:$0xff]   ;;  %v4809_v16 = vld [vmem:[%s5855_s10 + $0x300] ss:$16 sps:$4 sm:$0xff]  }
 0x214   : > { %2657 = vmatprep.subr.bf16.mxu0 %v4721_v17  ;;  %2739 = vmatprep.subr.bf16.mxu1 %v4724_v18  ;;  %v4812_v17 = vld [vmem:[%s5855_s10 + $0x308] ss:$16 sps:$4 sm:$0xff]   ;;  %v4817_v18 = vld [vmem:[%s5855_s10 + $0x324] ss:$16 sps:$4 sm:$0xff]  }
 0x217   : > { %2658 = vmatpush1.bf16.msra.mxu0 %v4719_v19  ;;  %2740 = vmatpush1.bf16.msra.mxu1 %v4722_v20  ;;  %v4820_v19 = vld [vmem:[%s5855_s10 + $0x32c] ss:$16 sps:$4 sm:$0xff]   ;;  %v4815_v20 = vld [vmem:[%s5855_s10 + $0x320] ss:$16 sps:$4 sm:$0xff]  }
 0x218   : > { %2659 = vmatprep.subr.bf16.mxu0 %v4727_v22  ;;  %2741 = vmatprep.subr.bf16.mxu1 %v4730_v23  ;;  %v4818_v22 = vld [vmem:[%s5855_s10 + $0x328] ss:$16 sps:$4 sm:$0xff]   ;;  %v4823_v23 = vld [vmem:[%s5855_s10 + $0x344] ss:$16 sps:$4 sm:$0xff]  }
 0x21b   : > { %2660 = vmatpush1.bf16.msra.mxu0 %v4725_v24  ;;  %2742 = vmatpush1.bf16.msra.mxu1 %v4728_v25  ;;  %v4826_v24 = vld [vmem:[%s5855_s10 + $0x34c] ss:$16 sps:$4 sm:$0xff]   ;;  %v4821_v25 = vld [vmem:[%s5855_s10 + $0x340] ss:$16 sps:$4 sm:$0xff]  }
 0x21c   : > { %2661 = vmatprep.subr.bf16.mxu0 %v4733_v26  ;;  %2743 = vmatprep.subr.bf16.mxu1 %v4736_v27  ;;  %v4824_v26 = vld [vmem:[%s5855_s10 + $0x348] ss:$16 sps:$4 sm:$0xff]   ;;  %v4829_v27 = vld [vmem:[%s5855_s10 + $0x364] ss:$16 sps:$4 sm:$0xff]  }
 0x21f   : > { %2662 = vmatpush1.bf16.msra.mxu0 %v4731_v28  ;;  %2744 = vmatpush1.bf16.msra.mxu1 %v4734_v29  ;;  %v4832_v28 = vld [vmem:[%s5855_s10 + $0x36c] ss:$16 sps:$4 sm:$0xff]   ;;  %v4827_v29 = vld [vmem:[%s5855_s10 + $0x360] ss:$16 sps:$4 sm:$0xff]  }
 0x220   : > { %2663 = vmatprep.subr.bf16.mxu0 %v4739_v30  ;;  %2745 = vmatprep.subr.bf16.mxu1 %v4742_v31  ;;  %v4830_v30 = vld [vmem:[%s5855_s10 + $0x368] ss:$16 sps:$4 sm:$0xff]   ;;  %v4835_v31 = vld [vmem:[%s5855_s10 + $0x384] ss:$16 sps:$4 sm:$0xff]  }
 0x223   : > { %2664 = vmatpush1.bf16.msra.mxu0 %v4737_v32  ;;  %2746 = vmatpush1.bf16.msra.mxu1 %v4740_v33  ;;  %v4838_v32 = vld [vmem:[%s5855_s10 + $0x38c] ss:$16 sps:$4 sm:$0xff]   ;;  %v4833_v33 = vld [vmem:[%s5855_s10 + $0x380] ss:$16 sps:$4 sm:$0xff]  }
 0x224   : > { %2665 = vmatprep.subr.bf16.mxu0 %v4745_v34  ;;  %2747 = vmatprep.subr.bf16.mxu1 %v4748_v35  ;;  %v4836_v34 = vld [vmem:[%s5855_s10 + $0x388] ss:$16 sps:$4 sm:$0xff]   ;;  %v4841_v35 = vld [vmem:[%s5855_s10 + $0x3a4] ss:$16 sps:$4 sm:$0xff]  }
 0x227   : > { %2666 = vmatpush1.bf16.msra.mxu0 %v4743_v36  ;;  %2748 = vmatpush1.bf16.msra.mxu1 %v4746_v37  ;;  %v4844_v36 = vld [vmem:[%s5855_s10 + $0x3ac] ss:$16 sps:$4 sm:$0xff]   ;;  %v4839_v37 = vld [vmem:[%s5855_s10 + $0x3a0] ss:$16 sps:$4 sm:$0xff]  }
 0x228   : > { %2667 = vmatprep.subr.bf16.mxu0 %v4751_v38  ;;  %2749 = vmatprep.subr.bf16.mxu1 %v4754_v39  ;;  %v4842_v38 = vld [vmem:[%s5855_s10 + $0x3a8] ss:$16 sps:$4 sm:$0xff]   ;;  %v4847_v39 = vld [vmem:[%s5855_s10 + $0x3c4] ss:$16 sps:$4 sm:$0xff]  }
 0x22b   : > { %2668 = vmatpush1.bf16.msra.mxu0 %v4749_v40  ;;  %2750 = vmatpush1.bf16.msra.mxu1 %v4752_v41  ;;  %v4850_v40 = vld [vmem:[%s5855_s10 + $0x3cc] ss:$16 sps:$4 sm:$0xff]   ;;  %v4845_v41 = vld [vmem:[%s5855_s10 + $0x3c0] ss:$16 sps:$4 sm:$0xff]  }
 0x22c   : > { %2669 = vmatprep.subr.bf16.mxu0 %v4757_v43  ;;  %2751 = vmatprep.subr.bf16.mxu1 %v4760_v44  ;;  %v4848_v43 = vld [vmem:[%s5855_s10 + $0x3c8] ss:$16 sps:$4 sm:$0xff]   ;;  %v4853_v44 = vld [vmem:[%s5855_s10 + $0x3e4] ss:$16 sps:$4 sm:$0xff]  }
 0x22f   : > { %2670 = vmatpush1.bf16.msra.mxu0 %v4755_v45  ;;  %2752 = vmatpush1.bf16.msra.mxu1 %v4758_v47  ;;  %v4856_v45 = vld [vmem:[%s5855_s10 + $0x3ec] ss:$16 sps:$4 sm:$0xff]   ;;  %v4851_v47 = vld [vmem:[%s5855_s10 + $0x3e0] ss:$16 sps:$4 sm:$0xff]  }
 0x230   : > { %2680 = vmatprep.subr.bf16.mxu0 %v4763_v48  ;;  %2762 = vmatprep.subr.bf16.mxu1 %v4766_v49  ;;  %v4854_v48 = vld [vmem:[%s5855_s10 + $0x3e8] ss:$16 sps:$4 sm:$0xff]   ;;  %v4859_v49 = vld [vmem:[%s5851_s21 + $0x4] ss:$16 sps:$4 sm:$0xff]  }
 0x232   : > { %2672 = vmatmul.mubr.bf16.vlgmr.msra.gmra.mrb[4].mxu0 %v5938_v42  ;;  %2754 = vmatmul.mubr.bf16.vlgmr.msra.gmra.mrb[4].mxu1 %v5938_v42  ;;  %v4784_v42 = vld [vmem:[%s5855_s10 + $0x26c] ss:$16 sps:$4 sm:$0xff]  }
 0x233   : > { %2681 = vmatpush1.bf16.msra.mxu0 %v4761_v50  ;;  %2763 = vmatpush1.bf16.msra.mxu1 %v4764_v51  ;;  %v4862_v50 = vld [vmem:[%s5851_s21 + $0x204] ss:$16 sps:$4 sm:$0xff]   ;;  %v4857_v51 = vld [vmem:[%s5851_s21] ss:$16 sps:$4 sm:$0xff]  }
 0x234   : > { %2682 = vmatprep.subr.bf16.mxu0 %v4769_v52  ;;  %2764 = vmatprep.subr.bf16.mxu1 %v4772_v53  ;;  %v4860_v52 = vld [vmem:[%s5851_s21 + $0x200] ss:$16 sps:$4 sm:$0xff]   ;;  %v4865_v53 = vld [vmem:[%s5851_s21 + $0x24] ss:$16 sps:$4 sm:$0xff]  }
 0x235   : > { %2712 = vmatprep.mubr.bf16.mxu0 %v5969_v3  ;;  %2794 = vmatprep.mubr.bf16.mxu1 %v5969_v3  ;;  %v4785_v3 = vld [vmem:[%s5855_s10 + $0x280] ss:$16 sps:$4 sm:$0xff]  }
 0x237   : > { %2683 = vmatpush1.bf16.msra.mxu0 %v4767_v54  ;;  %2765 = vmatpush1.bf16.msra.mxu1 %v4770_v55  ;;  %v4868_v54 = vld [vmem:[%s5851_s21 + $0x224] ss:$16 sps:$4 sm:$0xff]   ;;  %v4863_v55 = vld [vmem:[%s5851_s21 + $0x20] ss:$16 sps:$4 sm:$0xff]  }
 0x238   : > { %2684 = vmatprep.subr.bf16.mxu0 %v4775_v56  ;;  %2766 = vmatprep.subr.bf16.mxu1 %v4778_v57  ;;  %v4866_v56 = vld [vmem:[%s5851_s21 + $0x220] ss:$16 sps:$4 sm:$0xff]   ;;  %v4871_v57 = vld [vmem:[%s5851_s21 + $0x44] ss:$16 sps:$4 sm:$0xff]  }
 0x23b   : > { %2685 = vmatpush1.bf16.msra.mxu0 %v4773_v58  ;;  %2767 = vmatpush1.bf16.msra.mxu1 %v4776_v59  ;;  %v4874_v58 = vld [vmem:[%s5851_s21 + $0x244] ss:$16 sps:$4 sm:$0xff]   ;;  %v4869_v59 = vld [vmem:[%s5851_s21 + $0x40] ss:$16 sps:$4 sm:$0xff]  }
 0x23c   : > { %2686 = vmatprep.subr.bf16.mxu0 %v4781_v60  ;;  %2768 = vmatprep.subr.bf16.mxu1 %v4784_v42  ;;  %v4872_v60 = vld [vmem:[%s5851_s21 + $0x240] ss:$16 sps:$4 sm:$0xff]   ;;  %v4880_v42 = vld [vmem:[%s5851_s21 + $0x264] ss:$16 sps:$4 sm:$0xff]  }
 0x23f   : > { %2687 = vmatpush1.bf16.msra.mxu0 %v4779_v21  ;;  %2769 = vmatpush1.bf16.msra.mxu1 %v4782_v61  ;;  %v4875_v21 = vld [vmem:[%s5851_s21 + $0x60] ss:$16 sps:$4 sm:$0xff]  }
 0x240   : > { %2688 = vmatprep.subr.bf16.mxu0 %v4787_v62  ;;  %2770 = vmatprep.subr.bf16.mxu1 %v4790_v63  ;;  %v4878_v61 = vld [vmem:[%s5851_s21 + $0x260] ss:$16 sps:$4 sm:$0xff]   ;;  %v4883_v62 = vld [vmem:[%s5851_s21 + $0x84] ss:$16 sps:$4 sm:$0xff]  }
 0x241   : > { %v4886_v63 = vld [vmem:[%s5851_s21 + $0x284] ss:$16 sps:$4 sm:$0xff]  }
 0x243   : > { %2689 = vmatpush1.bf16.msra.mxu0 %v4785_v3  ;;  %2771 = vmatpush1.bf16.msra.mxu1 %v4788_v0  ;;  %v4881_v3 = vld [vmem:[%s5851_s21 + $0x80] ss:$16 sps:$4 sm:$0xff]  }
 0x244   : > { %2690 = vmatprep.subr.bf16.mxu0 %v4793_v1  ;;  %2772 = vmatprep.subr.bf16.mxu1 %v4796_v2  ;;  %v4884_v0 = vld [vmem:[%s5851_s21 + $0x280] ss:$16 sps:$4 sm:$0xff]   ;;  %v4889_v1 = vld [vmem:[%s5851_s21 + $0xa4] ss:$16 sps:$4 sm:$0xff]  }
 0x245   : > { %v4892_v2 = vld [vmem:[%s5851_s21 + $0x2a4] ss:$16 sps:$4 sm:$0xff]  }
 0x247   : > { %2691 = vmatpush1.bf16.msra.mxu0 %v4791_v4  ;;  %2773 = vmatpush1.bf16.msra.mxu1 %v4794_v5  ;;  %v4887_v4 = vld [vmem:[%s5851_s21 + $0xa0] ss:$16 sps:$4 sm:$0xff]  }
 0x248   : > { %2692 = vmatprep.subr.bf16.mxu0 %v4799_v6  ;;  %2774 = vmatprep.subr.bf16.mxu1 %v4802_v7  ;;  %v4890_v5 = vld [vmem:[%s5851_s21 + $0x2a0] ss:$16 sps:$4 sm:$0xff]   ;;  %v4895_v6 = vld [vmem:[%s5851_s21 + $0xc4] ss:$16 sps:$4 sm:$0xff]  }
 0x249   : > { %v4898_v7 = vld [vmem:[%s5851_s21 + $0x2c4] ss:$16 sps:$4 sm:$0xff]  }
 0x24b   : > { %2693 = vmatpush1.bf16.msra.mxu0 %v4797_v8  ;;  %2775 = vmatpush1.bf16.msra.mxu1 %v4800_v9  ;;  %v4893_v8 = vld [vmem:[%s5851_s21 + $0xc0] ss:$16 sps:$4 sm:$0xff]  }
 0x24c   : > { %2694 = vmatprep.subr.bf16.mxu0 %v4805_v10  ;;  %2776 = vmatprep.subr.bf16.mxu1 %v4808_v11  ;;  %v4896_v9 = vld [vmem:[%s5851_s21 + $0x2c0] ss:$16 sps:$4 sm:$0xff]   ;;  %v4901_v10 = vld [vmem:[%s5851_s21 + $0xe4] ss:$16 sps:$4 sm:$0xff]  }
 0x24d   : > { %v4904_v11 = vld [vmem:[%s5851_s21 + $0x2e4] ss:$16 sps:$4 sm:$0xff]  }
 0x24f   : > { %2695 = vmatpush1.bf16.msra.mxu0 %v4803_v12  ;;  %2777 = vmatpush1.bf16.msra.mxu1 %v4806_v13  ;;  %v4899_v12 = vld [vmem:[%s5851_s21 + $0xe0] ss:$16 sps:$4 sm:$0xff]  }
 0x250   : > { %2696 = vmatprep.subr.bf16.mxu0 %v4811_v14  ;;  %2778 = vmatprep.subr.bf16.mxu1 %v4814_v15  ;;  %v4902_v13 = vld [vmem:[%s5851_s21 + $0x2e0] ss:$16 sps:$4 sm:$0xff]   ;;  %v4907_v14 = vld [vmem:[%s5851_s21 + $0x104] ss:$16 sps:$4 sm:$0xff]  }
 0x251   : > { %v4910_v15 = vld [vmem:[%s5851_s21 + $0x304] ss:$16 sps:$4 sm:$0xff]  }
 0x253   : > { %2697 = vmatpush1.bf16.msra.mxu0 %v4809_v16  ;;  %2779 = vmatpush1.bf16.msra.mxu1 %v4812_v17  ;;  %v4905_v16 = vld [vmem:[%s5851_s21 + $0x100] ss:$16 sps:$4 sm:$0xff]  }
 0x254   : > { %2698 = vmatprep.subr.bf16.mxu0 %v4817_v18  ;;  %2780 = vmatprep.subr.bf16.mxu1 %v4820_v19  ;;  %v4908_v17 = vld [vmem:[%s5851_s21 + $0x300] ss:$16 sps:$4 sm:$0xff]   ;;  %v4913_v18 = vld [vmem:[%s5851_s21 + $0x124] ss:$16 sps:$4 sm:$0xff]  }
 0x255   : > { %v4916_v19 = vld [vmem:[%s5851_s21 + $0x324] ss:$16 sps:$4 sm:$0xff]  }
 0x257   : > { %2699 = vmatpush1.bf16.msra.mxu0 %v4815_v20  ;;  %2781 = vmatpush1.bf16.msra.mxu1 %v4818_v22  ;;  %v4911_v20 = vld [vmem:[%s5851_s21 + $0x120] ss:$16 sps:$4 sm:$0xff]  }
 0x258   : > { %2700 = vmatprep.subr.bf16.mxu0 %v4823_v23  ;;  %2782 = vmatprep.subr.bf16.mxu1 %v4826_v24  ;;  %v4914_v22 = vld [vmem:[%s5851_s21 + $0x320] ss:$16 sps:$4 sm:$0xff]   ;;  %v4919_v23 = vld [vmem:[%s5851_s21 + $0x144] ss:$16 sps:$4 sm:$0xff]  }
 0x259   : > { %v4922_v24 = vld [vmem:[%s5851_s21 + $0x344] ss:$16 sps:$4 sm:$0xff]  }
 0x25b   : > { %2701 = vmatpush1.bf16.msra.mxu0 %v4821_v25  ;;  %2783 = vmatpush1.bf16.msra.mxu1 %v4824_v26  ;;  %v4917_v25 = vld [vmem:[%s5851_s21 + $0x140] ss:$16 sps:$4 sm:$0xff]  }
 0x25c   : > { %2702 = vmatprep.subr.bf16.mxu0 %v4829_v27  ;;  %2784 = vmatprep.subr.bf16.mxu1 %v4832_v28  ;;  %v4920_v26 = vld [vmem:[%s5851_s21 + $0x340] ss:$16 sps:$4 sm:$0xff]   ;;  %v4925_v27 = vld [vmem:[%s5851_s21 + $0x164] ss:$16 sps:$4 sm:$0xff]  }
 0x25d   : > { %v4928_v28 = vld [vmem:[%s5851_s21 + $0x364] ss:$16 sps:$4 sm:$0xff]  }
 0x25f   : > { %2703 = vmatpush1.bf16.msra.mxu0 %v4827_v29  ;;  %2785 = vmatpush1.bf16.msra.mxu1 %v4830_v30  ;;  %v4923_v29 = vld [vmem:[%s5851_s21 + $0x160] ss:$16 sps:$4 sm:$0xff]  }
 0x260   : > { %2704 = vmatprep.subr.bf16.mxu0 %v4835_v31  ;;  %2786 = vmatprep.subr.bf16.mxu1 %v4838_v32  ;;  %v4926_v30 = vld [vmem:[%s5851_s21 + $0x360] ss:$16 sps:$4 sm:$0xff]   ;;  %v4931_v31 = vld [vmem:[%s5851_s21 + $0x184] ss:$16 sps:$4 sm:$0xff]  }
 0x261   : > { %v4934_v32 = vld [vmem:[%s5851_s21 + $0x384] ss:$16 sps:$4 sm:$0xff]  }
 0x263   : > { %2705 = vmatpush1.bf16.msra.mxu0 %v4833_v33  ;;  %2787 = vmatpush1.bf16.msra.mxu1 %v4836_v34  ;;  %v4929_v33 = vld [vmem:[%s5851_s21 + $0x180] ss:$16 sps:$4 sm:$0xff]  }
 0x264   : > { %2706 = vmatprep.subr.bf16.mxu0 %v4841_v35  ;;  %2788 = vmatprep.subr.bf16.mxu1 %v4844_v36  ;;  %v4932_v34 = vld [vmem:[%s5851_s21 + $0x380] ss:$16 sps:$4 sm:$0xff]   ;;  %v4937_v35 = vld [vmem:[%s5851_s21 + $0x1a4] ss:$16 sps:$4 sm:$0xff]  }
 0x265   : > { %v4940_v36 = vld [vmem:[%s5851_s21 + $0x3a4] ss:$16 sps:$4 sm:$0xff]  }
 0x267   : > { %2707 = vmatpush1.bf16.msra.mxu0 %v4839_v37  ;;  %2789 = vmatpush1.bf16.msra.mxu1 %v4842_v38  ;;  %v4935_v37 = vld [vmem:[%s5851_s21 + $0x1a0] ss:$16 sps:$4 sm:$0xff]  }
 0x268   : > { %2708 = vmatprep.subr.bf16.mxu0 %v4847_v39  ;;  %2790 = vmatprep.subr.bf16.mxu1 %v4850_v40  ;;  %v4938_v38 = vld [vmem:[%s5851_s21 + $0x3a0] ss:$16 sps:$4 sm:$0xff]   ;;  %v4943_v39 = vld [vmem:[%s5851_s21 + $0x1c4] ss:$16 sps:$4 sm:$0xff]  }
 0x269   : > { %v4946_v40 = vld [vmem:[%s5851_s21 + $0x3c4] ss:$16 sps:$4 sm:$0xff]  }
 0x26b   : > { %2709 = vmatpush1.bf16.msra.mxu0 %v4845_v41  ;;  %2791 = vmatpush1.bf16.msra.mxu1 %v4848_v43  ;;  %v4941_v41 = vld [vmem:[%s5851_s21 + $0x1c0] ss:$16 sps:$4 sm:$0xff]  }
 0x26c   : > { %2710 = vmatprep.subr.bf16.mxu0 %v4853_v44  ;;  %2792 = vmatprep.subr.bf16.mxu1 %v4856_v45  ;;  %v4944_v43 = vld [vmem:[%s5851_s21 + $0x3c0] ss:$16 sps:$4 sm:$0xff]  }
 0x26f   : > { %2711 = vmatpush1.bf16.msra.mxu0 %v4851_v47  ;;  %2793 = vmatpush1.bf16.msra.mxu1 %v4854_v48 }
 0x270   : > { %3611 = vmatprep.subr.bf16.mxu0 %v4859_v49  ;;  %3652 = vmatprep.subr.bf16.mxu1 %v4862_v50 }
 0x272   : > { %2713 = vmatmul.mubr.bf16.vlgmr.msra.gmra.mrb[4].mxu0 %v6015_v46  ;;  %2795 = vmatmul.mubr.bf16.vlgmr.msra.gmra.mrb[4].mxu1 %v6015_v46  ;;  %v4877_v46 = vld [vmem:[%s5851_s21 + $0x64] ss:$16 sps:$4 sm:$0xff]  }
 0x273   : > { %3612 = vmatpush1.bf16.msra.mxu0 %v4857_v51  ;;  %3653 = vmatpush1.bf16.msra.mxu1 %v4860_v52 }
 0x274   : > { %3613 = vmatprep.subr.bf16.mxu0 %v4865_v53  ;;  %3654 = vmatprep.subr.bf16.mxu1 %v4868_v54  ;;  %v4947_v53 = vld [vmem:[%s5851_s21 + $0x1e0] ss:$16 sps:$4 sm:$0xff]   ;;  %v4949_v54 = vld [vmem:[%s5851_s21 + $0x1e4] ss:$16 sps:$4 sm:$0xff]  }
 0x277   : > { %3614 = vmatpush1.bf16.msra.mxu0 %v4863_v55  ;;  %3655 = vmatpush1.bf16.msra.mxu1 %v4866_v56  ;;  %v4950_v55 = vld [vmem:[%s5851_s21 + $0x3e0] ss:$16 sps:$4 sm:$0xff]   ;;  %v4952_v56 = vld [vmem:[%s5851_s21 + $0x3e4] ss:$16 sps:$4 sm:$0xff]  }
 0x278   : > { %3615 = vmatprep.subr.bf16.mxu0 %v4871_v57  ;;  %3656 = vmatprep.subr.bf16.mxu1 %v4874_v58  ;;  %v4955_v57 = vld [vmem:[%s5851_s21 + $0xc] ss:$16 sps:$4 sm:$0xff]  }
 0x279   : > { %v4958_v58 = vld [vmem:[%s5851_s21 + $0x20c] ss:$16 sps:$4 sm:$0xff]  }
 0x27b   : > { %3616 = vmatpush1.bf16.msra.mxu0 %v4869_v59  ;;  %3657 = vmatpush1.bf16.msra.mxu1 %v4872_v60 }
 0x27c   : > { %3617 = vmatprep.subr.bf16.mxu0 %v4877_v46  ;;  %3658 = vmatprep.subr.bf16.mxu1 %v4880_v42 }
 0x27f   : > { %3618 = vmatpush1.bf16.msra.mxu0 %v4875_v21  ;;  %3659 = vmatpush1.bf16.msra.mxu1 %v4878_v61 }
 0x280   : > { %3619 = vmatprep.subr.bf16.mxu0 %v4883_v62  ;;  %3660 = vmatprep.subr.bf16.mxu1 %v4886_v63 }
 0x283   : > { %3620 = vmatpush1.bf16.msra.mxu0 %v4881_v3  ;;  %3661 = vmatpush1.bf16.msra.mxu1 %v4884_v0 }
 0x284   : > { %3621 = vmatprep.subr.bf16.mxu0 %v4889_v1  ;;  %3662 = vmatprep.subr.bf16.mxu1 %v4892_v2 }
 0x287   : > { %3622 = vmatpush1.bf16.msra.mxu0 %v4887_v4  ;;  %3663 = vmatpush1.bf16.msra.mxu1 %v4890_v5 }
 0x288   : > { %3623 = vmatprep.subr.bf16.mxu0 %v4895_v6  ;;  %3664 = vmatprep.subr.bf16.mxu1 %v4898_v7 }
 0x28b   : > { %3624 = vmatpush1.bf16.msra.mxu0 %v4893_v8  ;;  %3665 = vmatpush1.bf16.msra.mxu1 %v4896_v9 }
 0x28c   : > { %3625 = vmatprep.subr.bf16.mxu0 %v4901_v10  ;;  %3666 = vmatprep.subr.bf16.mxu1 %v4904_v11 }
 0x28f   : > { %3626 = vmatpush1.bf16.msra.mxu0 %v4899_v12  ;;  %3667 = vmatpush1.bf16.msra.mxu1 %v4902_v13 }
 0x290   : > { %3627 = vmatprep.subr.bf16.mxu0 %v4907_v14  ;;  %3668 = vmatprep.subr.bf16.mxu1 %v4910_v15 }
 0x293   : > { %3628 = vmatpush1.bf16.msra.mxu0 %v4905_v16  ;;  %3669 = vmatpush1.bf16.msra.mxu1 %v4908_v17 }
 0x294   : > { %3629 = vmatprep.subr.bf16.mxu0 %v4913_v18  ;;  %3670 = vmatprep.subr.bf16.mxu1 %v4916_v19 }
 0x297   : > { %3630 = vmatpush1.bf16.msra.mxu0 %v4911_v20  ;;  %3671 = vmatpush1.bf16.msra.mxu1 %v4914_v22 }
 0x298   : > { %3631 = vmatprep.subr.bf16.mxu0 %v4919_v23  ;;  %3672 = vmatprep.subr.bf16.mxu1 %v4922_v24 }
 0x29b   : > { %3632 = vmatpush1.bf16.msra.mxu0 %v4917_v25  ;;  %3673 = vmatpush1.bf16.msra.mxu1 %v4920_v26 }
 0x29c   : > { %3633 = vmatprep.subr.bf16.mxu0 %v4925_v27  ;;  %3674 = vmatprep.subr.bf16.mxu1 %v4928_v28  ;;  %v4953_v27 = vld [vmem:[%s5851_s21 + $0x8] ss:$16 sps:$4 sm:$0xff]  }
 0x29d   : > { %v4956_v28 = vld [vmem:[%s5851_s21 + $0x208] ss:$16 sps:$4 sm:$0xff]  }
 0x29f   : > { %3634 = vmatpush1.bf16.msra.mxu0 %v4923_v29  ;;  %3675 = vmatpush1.bf16.msra.mxu1 %v4926_v30 }
 0x2a0   : > { %3635 = vmatprep.subr.bf16.mxu0 %v4931_v31  ;;  %3676 = vmatprep.subr.bf16.mxu1 %v4934_v32  ;;  %v4961_v31 = vld [vmem:[%s5851_s21 + $0x2c] ss:$16 sps:$4 sm:$0xff]  }
 0x2a1   : > { %v4964_v32 = vld [vmem:[%s5851_s21 + $0x22c] ss:$16 sps:$4 sm:$0xff]  }
 0x2a3   : > { %3636 = vmatpush1.bf16.msra.mxu0 %v4929_v33  ;;  %3677 = vmatpush1.bf16.msra.mxu1 %v4932_v34  ;;  %v4959_v33 = vld [vmem:[%s5851_s21 + $0x28] ss:$16 sps:$4 sm:$0xff]  }
 0x2a4   : > { %3637 = vmatprep.subr.bf16.mxu0 %v4937_v35  ;;  %3678 = vmatprep.subr.bf16.mxu1 %v4940_v36  ;;  %v4962_v34 = vld [vmem:[%s5851_s21 + $0x228] ss:$16 sps:$4 sm:$0xff]   ;;  %v4967_v35 = vld [vmem:[%s5851_s21 + $0x4c] ss:$16 sps:$4 sm:$0xff]  }
 0x2a5   : > { %v4970_v36 = vld [vmem:[%s5851_s21 + $0x24c] ss:$16 sps:$4 sm:$0xff]  }
 0x2a7   : > { %3638 = vmatpush1.bf16.msra.mxu0 %v4935_v37  ;;  %3679 = vmatpush1.bf16.msra.mxu1 %v4938_v38  ;;  %v4965_v37 = vld [vmem:[%s5851_s21 + $0x48] ss:$16 sps:$4 sm:$0xff]  }
 0x2a8   : > { %3639 = vmatprep.subr.bf16.mxu0 %v4943_v39  ;;  %3680 = vmatprep.subr.bf16.mxu1 %v4946_v40  ;;  %v4968_v38 = vld [vmem:[%s5851_s21 + $0x248] ss:$16 sps:$4 sm:$0xff]   ;;  %v4973_v39 = vld [vmem:[%s5851_s21 + $0x6c] ss:$16 sps:$4 sm:$0xff]  }
 0x2a9   : > { %v4976_v40 = vld [vmem:[%s5851_s21 + $0x26c] ss:$16 sps:$4 sm:$0xff]  }
 0x2ab   : > { %3640 = vmatpush1.bf16.msra.mxu0 %v4941_v41  ;;  %3681 = vmatpush1.bf16.msra.mxu1 %v4944_v43  ;;  %v4971_v41 = vld [vmem:[%s5851_s21 + $0x68] ss:$16 sps:$4 sm:$0xff]  }
 0x2ac   : > { %3641 = vmatprep.subr.bf16.mxu0 %v4949_v54  ;;  %3682 = vmatprep.subr.bf16.mxu1 %v4952_v56  ;;  %v4974_v43 = vld [vmem:[%s5851_s21 + $0x268] ss:$16 sps:$4 sm:$0xff]   ;;  %v4994_v54 = vld [vmem:[%s5851_s21 + $0x2cc] ss:$16 sps:$4 sm:$0xff]  }
 0x2ad   : > { %v4992_v56 = vld [vmem:[%s5851_s21 + $0x2c8] ss:$16 sps:$4 sm:$0xff]  }
 0x2af   : > { %3642 = vmatpush1.bf16.msra.mxu0 %v4947_v53  ;;  %3683 = vmatpush1.bf16.msra.mxu1 %v4950_v55  ;;  %v4991_v53 = vld [vmem:[%s5851_s21 + $0xcc] ss:$16 sps:$4 sm:$0xff]   ;;  %v4989_v55 = vld [vmem:[%s5851_s21 + $0xc8] ss:$16 sps:$4 sm:$0xff]  }
 0x2b0   : > { %3693 = vmatprep.subr.bf16.mxu0 %v4955_v57  ;;  %3734 = vmatprep.subr.bf16.mxu1 %v4958_v58  ;;  %v4997_v57 = vld [vmem:[%s5851_s21 + $0xec] ss:$16 sps:$4 sm:$0xff]  }
 0x2b1   : > { %v5000_v58 = vld [vmem:[%s5851_s21 + $0x2ec] ss:$16 sps:$4 sm:$0xff]  }
 0x2c5   : > { %v1782_v44 = vpop.f32.mrb[0].mxu0  ;;  %v1864_v45 = vpop.f32.mrb[0].mxu1 }
 0x2c6   : > { %v1784_v47 = vpop.f32.mrb[1].mxu0  ;;  %v1866_v48 = vpop.f32.mrb[1].mxu1  ;;  %v4218_v59 = vmul.f32 -1.442695, %v1782_v44  ;;  %v4220_v60 = vmul.f32 -1.442695, %v1864_v45 }
 0x2c7   : > { %v1786_v49 = vpop.f32.mrb[2].mxu0  ;;  %v1868_v50 = vpop.f32.mrb[2].mxu1  ;;  %v4219_v46 = vmul.f32 -1.442695, %v1784_v47  ;;  %v4221_v42 = vmul.f32 -1.442695, %v1866_v48 }
 0x2c8   : > { %v1787_v51 = vpop.f32.mrb[3].mxu0  ;;  %v1869_v52 = vpop.f32.mrb[3].mxu1  ;;  %5049 = vpow2.f32 %v4218_v59  ;;  %v4985_v49 = vld [vmem:[%s5851_s21 + $0xac] ss:$16 sps:$4 sm:$0xff]   ;;  %v4995_v59 = vld [vmem:[%s5851_s21 + $0xe8] ss:$16 sps:$4 sm:$0xff]  }
 0x2c9   : > { %5051 = vpow2.f32 %v4220_v60  ;;  %v4988_v50 = vld [vmem:[%s5851_s21 + $0x2ac] ss:$16 sps:$4 sm:$0xff]   ;;  %v4983_v51 = vld [vmem:[%s5851_s21 + $0xa8] ss:$16 sps:$4 sm:$0xff]  }
 0x2ca   : > { %5053 = vpow2.f32 %v4219_v46  ;;  %v4986_v52 = vld [vmem:[%s5851_s21 + $0x2a8] ss:$16 sps:$4 sm:$0xff]   ;;  %v5003_v46 = vld [vmem:[%s5851_s21 + $0x10c] ss:$16 sps:$4 sm:$0xff]  }
 0x2cb   : > { %5055 = vpow2.f32 %v4221_v42  ;;  %v4998_v60 = vld [vmem:[%s5851_s21 + $0x2e8] ss:$16 sps:$4 sm:$0xff]   ;;  %v5006_v42 = vld [vmem:[%s5851_s21 + $0x30c] ss:$16 sps:$4 sm:$0xff]  }
 0x2d2   : > { %v5050_v21 = vpop.eup %5049 }
 0x2d3   : > { %v5052_v61 = vpop.eup %5051  ;;  %v2815_v3 = vadd.f32 1.0, %v5050_v21  ;;  %v5001_v21 = vld [vmem:[%s5851_s21 + $0x108] ss:$16 sps:$4 sm:$0xff]  }
 0x2d4   : > { %v5054_v62 = vpop.eup %5053  ;;  %v2817_v0 = vadd.f32 1.0, %v5052_v61  ;;  %v5004_v61 = vld [vmem:[%s5851_s21 + $0x308] ss:$16 sps:$4 sm:$0xff]  }
 0x2d5   : > { %v5056_v63 = vpop.eup %5055  ;;  %v2816_v1 = vadd.f32 1.0, %v5054_v62  ;;  %5057 = vrcp.f32 %v2815_v3  ;;  %v5009_v62 = vld [vmem:[%s5851_s21 + $0x12c] ss:$16 sps:$4 sm:$0xff]   ;;  %v5007_v3 = vld [vmem:[%s5851_s21 + $0x128] ss:$16 sps:$4 sm:$0xff]  }
 0x2d6   : > { %v2818_v2 = vadd.f32 1.0, %v5056_v63  ;;  %5059 = vrcp.f32 %v2817_v0  ;;  %v5012_v63 = vld [vmem:[%s5851_s21 + $0x32c] ss:$16 sps:$4 sm:$0xff]   ;;  %v5010_v0 = vld [vmem:[%s5851_s21 + $0x328] ss:$16 sps:$4 sm:$0xff]  }
 0x2d7   : > { %5061 = vrcp.f32 %v2816_v1  ;;  %v5015_v1 = vld [vmem:[%s5851_s21 + $0x14c] ss:$16 sps:$4 sm:$0xff]  }
 0x2d8   : > { %5063 = vrcp.f32 %v2818_v2  ;;  %v5018_v2 = vld [vmem:[%s5851_s21 + $0x34c] ss:$16 sps:$4 sm:$0xff]  }
 0x2df   : > { %v5058_v4 = vpop.eup %5057 }
 0x2e0   : > { %v5060_v5 = vpop.eup %5059  ;;  %v2827_v8 = vmul.f32 %v5058_v4, %v1782_v44  ;;  %v4979_v44 = vld [vmem:[%s5851_s21 + $0x8c] ss:$16 sps:$4 sm:$0xff]   ;;  %v5013_v4 = vld [vmem:[%s5851_s21 + $0x148] ss:$16 sps:$4 sm:$0xff]  }
 0x2e1   : > { %v5062_v6 = vpop.eup %5061  ;;  %v2829_v9 = vmul.f32 %v5060_v5, %v1864_v45  ;;  %v4982_v45 = vld [vmem:[%s5851_s21 + $0x28c] ss:$16 sps:$4 sm:$0xff]   ;;  %v5016_v5 = vld [vmem:[%s5851_s21 + $0x348] ss:$16 sps:$4 sm:$0xff]  }
 0x2e2   : > { %v5064_v7 = vpop.eup %5063  ;;  %v2828_v10 = vmul.f32 %v5062_v6, %v1784_v47  ;;  %v4977_v47 = vld [vmem:[%s5851_s21 + $0x88] ss:$16 sps:$4 sm:$0xff]   ;;  %v5021_v6 = vld [vmem:[%s5851_s21 + $0x16c] ss:$16 sps:$4 sm:$0xff]  }
 0x2e3   : > { %v2830_v11 = vmul.f32 %v5064_v7, %v1866_v48  ;;  %v4980_v48 = vld [vmem:[%s5851_s21 + $0x288] ss:$16 sps:$4 sm:$0xff]   ;;  %v5024_v7 = vld [vmem:[%s5851_s21 + $0x36c] ss:$16 sps:$4 sm:$0xff]  }
 0x345   : > { %v2714_v12 = vpop.f32.mrb[4].mxu0  ;;  %v2796_v13 = vpop.f32.mrb[4].mxu1 }
 0x346   : > { %v2831_v14 = vmul.f32 %v2827_v8, %v2714_v12  ;;  %v2833_v15 = vmul.f32 %v2829_v9, %v2796_v13  ;;  %v2716_v16 = vpop.f32.mrb[5].mxu0  ;;  %v2798_v17 = vpop.f32.mrb[5].mxu1  ;;  %v5019_v8 = vld [vmem:[%s5851_s21 + $0x168] ss:$16 sps:$4 sm:$0xff]  }
 0x347   : > { %v2832_v18 = vmul.f32 %v2828_v10, %v2716_v16  ;;  %v2834_v19 = vmul.f32 %v2830_v11, %v2798_v17  ;;  %v2718_v20 = vpop.f32.mrb[6].mxu0  ;;  %v2800_v22 = vpop.f32.mrb[6].mxu1  ;;  %v5022_v9 = vld [vmem:[%s5851_s21 + $0x368] ss:$16 sps:$4 sm:$0xff]   ;;  %v5027_v10 = vld [vmem:[%s5851_s21 + $0x18c] ss:$16 sps:$4 sm:$0xff]  }
 0x348   : > { %v2719_v23 = vpop.f32.mrb[7].mxu0  ;;  %v2801_v24 = vpop.f32.mrb[7].mxu1  ;;  %v6221_v29 = vpack.c.bf16 %v2831_v14, %v2831_v14  ;;  %v6223_v30 = vpack.c.bf16 %v2833_v15, %v2833_v15  ;;  %v5030_v11 = vld [vmem:[%s5851_s21 + $0x38c] ss:$16 sps:$4 sm:$0xff]   ;;  %v5025_v12 = vld [vmem:[%s5851_s21 + $0x188] ss:$16 sps:$4 sm:$0xff]  }
 0x349   : > { %v2836_v25 = vpack.c.bf16 %v2832_v18, %v2832_v18  ;;  %v2838_v26 = vpack.c.bf16 %v2834_v19, %v2834_v19  ;;  %v5028_v13 = vld [vmem:[%s5851_s21 + $0x388] ss:$16 sps:$4 sm:$0xff]   ;;  %v5033_v14 = vld [vmem:[%s5851_s21 + $0x1ac] ss:$16 sps:$4 sm:$0xff]  }
 0x34a   : > { %v5036_v15 = vld [vmem:[%s5851_s21 + $0x3ac] ss:$16 sps:$4 sm:$0xff]   ;;  %v5031_v16 = vld [vmem:[%s5851_s21 + $0x1a8] ss:$16 sps:$4 sm:$0xff]  }
 0x34b   : > { %3643 = vmatprep.mubr.bf16.mxu0 %v2836_v25  ;;  %3684 = vmatprep.mubr.bf16.mxu1 %v2838_v26  ;;  %v5034_v17 = vld [vmem:[%s5851_s21 + $0x3a8] ss:$16 sps:$4 sm:$0xff]   ;;  %v5039_v18 = vld [vmem:[%s5851_s21 + $0x1cc] ss:$16 sps:$4 sm:$0xff]  }
 0x34c   : > { %3644 = vmatmul.mubr.bf16.vlgmr.msra.gmra.mrb[8].mxu0 %v6221_v29  ;;  %3685 = vmatmul.mubr.bf16.vlgmr.msra.gmra.mrb[8].mxu1 %v6223_v30  ;;  %v5042_v19 = vld [vmem:[%s5851_s21 + $0x3cc] ss:$16 sps:$4 sm:$0xff]   ;;  %v5037_v20 = vld [vmem:[%s5851_s21 + $0x1c8] ss:$16 sps:$4 sm:$0xff]  }
 0x34d   : > { %3694 = vmatpush1.bf16.msra.mxu0 %v4953_v27  ;;  %3735 = vmatpush1.bf16.msra.mxu1 %v4956_v28  ;;  %v5040_v22 = vld [vmem:[%s5851_s21 + $0x3c8] ss:$16 sps:$4 sm:$0xff]   ;;  %v5045_v23 = vld [vmem:[%s5851_s21 + $0x1ec] ss:$16 sps:$4 sm:$0xff]   ;;  %v2839_v28 = vld [vmem:[#allocation3] sm:$0xff] }
 0x34e   : > { %3725 = vmatprep.mubr.bf16.mxu0 %v2836_v25  ;;  %3766 = vmatprep.mubr.bf16.mxu1 %v2838_v26  ;;  %v5048_v24 = vld [vmem:[%s5851_s21 + $0x3ec] ss:$16 sps:$4 sm:$0xff]   ;;  %v5043_v25 = vld [vmem:[%s5851_s21 + $0x1e8] ss:$16 sps:$4 sm:$0xff]  }
 0x34f   : > { %3695 = vmatprep.subr.bf16.mxu0 %v4961_v31  ;;  %3736 = vmatprep.subr.bf16.mxu1 %v4964_v32  ;;  %v5046_v26 = vld [vmem:[%s5851_s21 + $0x3e8] ss:$16 sps:$4 sm:$0xff]  }
 0x351   : > { %3696 = vmatpush1.bf16.msra.mxu0 %v4959_v33  ;;  %3737 = vmatpush1.bf16.msra.mxu1 %v4962_v34  ;;  %v2840_v34 = vld [vmem:[#allocation3 + $0x8] sm:$0xff] }
 0x352   : > { %3697 = vmatprep.subr.bf16.mxu0 %v4967_v35  ;;  %3738 = vmatprep.subr.bf16.mxu1 %v4970_v36 }
 0x355   : > { %3698 = vmatpush1.bf16.msra.mxu0 %v4965_v37  ;;  %3739 = vmatpush1.bf16.msra.mxu1 %v4968_v38 }
 0x356   : > { %3699 = vmatprep.subr.bf16.mxu0 %v4973_v39  ;;  %3740 = vmatprep.subr.bf16.mxu1 %v4976_v40 }
 0x359   : > { %3700 = vmatpush1.bf16.msra.mxu0 %v4971_v41  ;;  %3741 = vmatpush1.bf16.msra.mxu1 %v4974_v43 }
 0x35a   : > { %3701 = vmatprep.subr.bf16.mxu0 %v4979_v44  ;;  %3742 = vmatprep.subr.bf16.mxu1 %v4982_v45 }
 0x35d   : > { %3702 = vmatpush1.bf16.msra.mxu0 %v4977_v47  ;;  %3743 = vmatpush1.bf16.msra.mxu1 %v4980_v48  ;;  %v2842_v48 = vld [vmem:[#allocation3 + $0x18] sm:$0xff] }
 0x35e   : > { %3703 = vmatprep.subr.bf16.mxu0 %v4985_v49  ;;  %3744 = vmatprep.subr.bf16.mxu1 %v4988_v50 }
 0x361   : > { %3704 = vmatpush1.bf16.msra.mxu0 %v4983_v51  ;;  %3745 = vmatpush1.bf16.msra.mxu1 %v4986_v52 }
 0x362   : > { %3705 = vmatprep.subr.bf16.mxu0 %v4991_v53  ;;  %3746 = vmatprep.subr.bf16.mxu1 %v4994_v54 }
 0x365   : > { %3706 = vmatpush1.bf16.msra.mxu0 %v4989_v55  ;;  %3747 = vmatpush1.bf16.msra.mxu1 %v4992_v56 }
 0x366   : > { %3707 = vmatprep.subr.bf16.mxu0 %v4997_v57  ;;  %3748 = vmatprep.subr.bf16.mxu1 %v5000_v58  ;;  %v3787_v57 = vld [vmem:[%s5846_s2] sm:$0xff] (!%p4350_p6) }
 0x369   : > { %3708 = vmatpush1.bf16.msra.mxu0 %v4995_v59  ;;  %3749 = vmatpush1.bf16.msra.mxu1 %v4998_v60  ;;  %v3788_v59 = vld [vmem:[%s5846_s2 + $0x8] sm:$0xff] (!%p4350_p6) }
 0x36a   : > { %3709 = vmatprep.subr.bf16.mxu0 %v5003_v46  ;;  %3750 = vmatprep.subr.bf16.mxu1 %v5006_v42  ;;  %v3789_v42 = vld [vmem:[%s5846_s2 + $0x10] sm:$0xff] (!%p4350_p6) }
 0x36d   : > { %3710 = vmatpush1.bf16.msra.mxu0 %v5001_v21  ;;  %3751 = vmatpush1.bf16.msra.mxu1 %v5004_v61 }
 0x36e   : > { %3711 = vmatprep.subr.bf16.mxu0 %v5009_v62  ;;  %3752 = vmatprep.subr.bf16.mxu1 %v5012_v63  ;;  %v3790_v63 = vld [vmem:[%s5846_s2 + $0x18] sm:$0xff] (!%p4350_p6) }
 0x371   : > { %3712 = vmatpush1.bf16.msra.mxu0 %v5007_v3  ;;  %3753 = vmatpush1.bf16.msra.mxu1 %v5010_v0 }
 0x372   : > { %3713 = vmatprep.subr.bf16.mxu0 %v5015_v1  ;;  %3754 = vmatprep.subr.bf16.mxu1 %v5018_v2 }
 0x375   : > { %3714 = vmatpush1.bf16.msra.mxu0 %v5013_v4  ;;  %3755 = vmatpush1.bf16.msra.mxu1 %v5016_v5 }
 0x376   : > { %3715 = vmatprep.subr.bf16.mxu0 %v5021_v6  ;;  %3756 = vmatprep.subr.bf16.mxu1 %v5024_v7 }
 0x379   : > { %3716 = vmatpush1.bf16.msra.mxu0 %v5019_v8  ;;  %3757 = vmatpush1.bf16.msra.mxu1 %v5022_v9 }
 0x37a   : > { %3717 = vmatprep.subr.bf16.mxu0 %v5027_v10  ;;  %3758 = vmatprep.subr.bf16.mxu1 %v5030_v11 }
 0x37d   : > { %3718 = vmatpush1.bf16.msra.mxu0 %v5025_v12  ;;  %3759 = vmatpush1.bf16.msra.mxu1 %v5028_v13 }
 0x37e   : > { %3719 = vmatprep.subr.bf16.mxu0 %v5033_v14  ;;  %3760 = vmatprep.subr.bf16.mxu1 %v5036_v15 }
 0x381   : > { %3720 = vmatpush1.bf16.msra.mxu0 %v5031_v16  ;;  %3761 = vmatpush1.bf16.msra.mxu1 %v5034_v17 }
 0x382   : > { %3721 = vmatprep.subr.bf16.mxu0 %v5039_v18  ;;  %3762 = vmatprep.subr.bf16.mxu1 %v5042_v19 }
 0x385   : > { %3722 = vmatpush1.bf16.msra.mxu0 %v5037_v20  ;;  %3763 = vmatpush1.bf16.msra.mxu1 %v5040_v22 }
 0x386   : > { %3723 = vmatprep.subr.bf16.mxu0 %v5045_v23  ;;  %3764 = vmatprep.subr.bf16.mxu1 %v5048_v24 }
 0x389   : > { %3724 = vmatpush1.bf16.msra.mxu0 %v5043_v25  ;;  %3765 = vmatpush1.bf16.msra.mxu1 %v5046_v26 }
 0x38c   : > { %3726 = vmatmul.mubr.bf16.vlgmr.msra.gmra.mrb[12].mxu0 %v6221_v29  ;;  %3767 = vmatmul.mubr.bf16.vlgmr.msra.gmra.mrb[12].mxu1 %v6223_v30  ;;  %v2841_v29 = vld [vmem:[#allocation3 + $0x10] sm:$0xff] }
 0x41f   : > { %v3645_v27 = vpop.f32.mrb[8].mxu0  ;;  %v3686_v31 = vpop.f32.mrb[8].mxu1 }
 0x420   : > { %v3687_v32 = vadd.f32 %v3686_v31, %v3645_v27  ;;  %v3647_v33 = vpop.f32.mrb[9].mxu0  ;;  %v3688_v35 = vpop.f32.mrb[9].mxu1 }
 0x421   : > { %v3689_v36 = vadd.f32 %v3688_v35, %v3647_v33  ;;  %v3649_v37 = vpop.f32.mrb[10].mxu0  ;;  %v3690_v38 = vpop.f32.mrb[10].mxu1 }
 0x422   : > { %v3775_v39 = vadd.f32 %v3687_v32, %v2839_v28  ;;  %v3650_v40 = vpop.f32.mrb[11].mxu0  ;;  %v3691_v41 = vpop.f32.mrb[11].mxu1 }
 0x423   : > { %v3776_v43 = vadd.f32 %v3689_v36, %v2840_v34 }
 0x424   : > { %3779 = vst [vmem:[#allocation3] sm:$0xff] %v3775_v39 }
 0x425   : > { %3780 = vst [vmem:[#allocation3 + $0x8] sm:$0xff] %v3776_v43 }
 0x42b   : > { %v3791_v58 = vld [vmem:[#allocation3] sm:$0xff] (!%p4350_p6) }
 0x42c   : > { %v3795_v60 = vadd.f32 (!%p4350_p6), %v3791_v58, %v3787_v57  ;;  %v3792_v46 = vld [vmem:[#allocation3 + $0x8] sm:$0xff] (!%p4350_p6) }
 0x42d   : > { %v3796_v61 = vadd.f32 (!%p4350_p6), %v3792_v46, %v3788_v59 }
 0x42e   : > { %3799 = vst [vmem:[%s5857_s26] sm:$0xff] (!%p4350_p6), %v3795_v60 }
 0x42f   : > { %3800 = vst [vmem:[%s5857_s26 + $0x8] sm:$0xff] (!%p4350_p6), %v3796_v61 }
 0x45f   : > { %v3727_v44 = vpop.f32.mrb[12].mxu0  ;;  %v3768_v45 = vpop.f32.mrb[12].mxu1  ;;  %3786 = sbr.rel (%p4350_p6) target bundleno = 1136 (0x470), region = 94 }
 0x460   : > { %v3769_v30 = vadd.f32 %v3768_v45, %v3727_v44  ;;  %v3729_v47 = vpop.f32.mrb[13].mxu0  ;;  %v3770_v49 = vpop.f32.mrb[13].mxu1 }
 0x461   : > { %v3771_v50 = vadd.f32 %v3770_v49, %v3729_v47  ;;  %v3731_v51 = vpop.f32.mrb[14].mxu0  ;;  %v3772_v52 = vpop.f32.mrb[14].mxu1 }
 0x462   : > { %v3777_v53 = vadd.f32 %v3769_v30, %v2841_v29  ;;  %v3732_v54 = vpop.f32.mrb[15].mxu0  ;;  %v3773_v55 = vpop.f32.mrb[15].mxu1 }
 0x463   : > { %v3778_v56 = vadd.f32 %v3771_v50, %v2842_v48 }
 0x464   : > { %3781 = vst [vmem:[#allocation3 + $0x10] sm:$0xff] %v3777_v53 }
 0x465   : > { %3782 = vst [vmem:[#allocation3 + $0x18] sm:$0xff] %v3778_v56 }
 0x46b   : > { %v3793_v21 = vld [vmem:[#allocation3 + $0x10] sm:$0xff] }
 0x46c   : > { %v3797_v62 = vadd.f32 %v3793_v21, %v3789_v42  ;;  %v3794_v3 = vld [vmem:[#allocation3 + $0x18] sm:$0xff] }
 0x46d   : > { %v3798_v0 = vadd.f32 %v3794_v3, %v3790_v63 }
 0x46e   : > { %3801 = vst [vmem:[%s5857_s26 + $0x10] sm:$0xff] %v3797_v62 }
 0x46f   : > { %3802 = vst [vmem:[%s5857_s26 + $0x18] sm:$0xff] %v3798_v0 }
 0x470 PF: > { %s4362_s23 = sshll.u32 %s5163_s24, 9  ;;  %s3818_s16 = sshll.u32 %s5857_s26, 4  ;;  %s3819_s16 = int_to_ptr.vmem [resolvable:$true] %s3818_s16 }
 0x471   : > { %s6302_s12 = scalar_lea.hbm %s6363_s5, %s4362_s23  ;;  %s6378_s2 = sand.u32 1, %s5143_s19  }
 0x472   : > { %s3804_s17 = scalar_lea.sflag [#allocation7], %s6378_s2  ;;  %s5065_s28 = scalar_lea.vmem %s3819_s16, 512 }
 0x473   : > { %p5066_p7 = scmp.ne.s32.totalorder %s3819_s16, %s5065_s28  ;;  %s5178_s7 = smov [#allocation6]  }
 0x474   : > { %s5069_s8 = sshll.u32 %s5178_s7, 4  ;;  %s5070_s8 = int_to_ptr.vmem [resolvable:$false] %s5069_s8 }
 0x475   : > { %p5067_p8 = pnand %p5066_p7, %p5288_p10  ;;  %s5071_s9 = scalar_lea.vmem %s5070_s8, 1024 }
 0x476   : > { %p5072_p11 = scmp.lt.s32.totalorder %s3819_s16, %s5070_s8  ;;  %p5073_p13 = scmp.lt.s32.totalorder %s5071_s9, %s5065_s28 }
 0x477   : > { %p5068_p9 = pneg %p5067_p8 }
 0x478   : > { %p5074_p0 = por %p5073_p13, %p5072_p11 }
 0x47a   : > { %p5075_p1 = pnand %p5074_p0, %p5068_p9 }
 0x47c   : > { %5078 = shalt.err (!%p5075_p1)
}
 0x47d   : > { %s5079_s24 = scalar_lea.hbm %s6302_s12, 512  ;;  %s5083_s29 = scalar_lea.hbm %s6363_s5, 1024 }
 0x47e   : > { %p5080_p2 = scmp.ne.s32.totalorder %s6302_s12, %s5079_s24  ;;  %p5084_p5 = scmp.lt.u32.totalorder %s6302_s12, %s6363_s5 }
 0x47f   : > { %p5085_p6 = scmp.lt.u32.totalorder %s5083_s29, %s5079_s24  ;;  %p5087_p8 = scmp.lt.u32.totalorder %s5079_s24, %s6302_s12 }
 0x480   : > { %p5081_p3 = pnand %p5080_p2, %p5288_p10 }
 0x481   : > { %p5086_p7 = por %p5085_p6, %p5084_p5 }
 0x482   : > { %p5082_p4 = pneg %p5081_p3 }
 0x483   : > { %p5088_p9 = por %p5087_p8, %p5086_p7 }
 0x485   : > { %p5089_p11 = pnand %p5088_p9, %p5082_p4 }
 0x487   : > { %5092 = shalt.err (!%p5089_p11)
}
 0x488   : > { %4379 = dma.vmem_to_hbm [thread:$0]  (%p5288_p10), %s3819_s16, 512, %s6302_s12, %s3804_s17  }
 0x489 PF: > { %p4385_p13 = scmp.ge.s32.totalorder %s5175_s27, 2  ;;  %s3830_s23 = sand.u32 1, %s5139_s18  }
 0x48a   : > { %s3831_s6 = scalar_lea.sflag [#allocation7], %s3830_s23 }
 0x48b   : > { %p4382_p0 = pnand %p4385_p13, %p5295_p12 }
 0x48d   : > { %5134 = dma.done.wait (!%p4382_p0), %s3831_s6, 512  }
 0x48e   : > { %5136 = vsyncadd (!%p4382_p0), %s3831_s6, 4294966784  ;;  %s18_s27 = sadd.s32 1, %s5175_s27   ;;  %s6379_s24 = sld [smem:[#allocation9_spill]] }
 0x48f   : > { %p15_p1 = scmp.ge.s32.totalorder %s18_s27, 6   ;;  %s6380_s13 = sld [smem:[#allocation10_spill]] }
 0x490   : > { %s6381_s26 = sld [smem:[#allocation11_spill]]  ;;  %s6382_s18 = smov %s5143_s19 }
 0x491   : > { %s6383_s19 = smov %s5147_s20  ;;  %s6384_s20 = smov %s5293_s14 }
 0x492   : > { %s6385_s21 = smov %s5155_s22  ;;  %s6386_s22 = smov %s5282_s11 }
 0x493   : > { %s6387_s23 = smov %s5167_s25  ;;  %17 = sbr.rel (!%p15_p1) target bundleno = 9 (0x9), region = 148 }
 0x495   : > { %s6388_s25 = smov %s6380_s13 }
 0x49a   :  { %3836 = vsyncpa [#allocation7], 1 }
 0x49b   :  { %3838 = vsyncpa [#allocation7 + $0x1], 1 }

</bundles_post_ra>
